<compile_context>
chip_gen: v5e
topology: v5e:2x2
jax: 0.10.0
libtpu: 0.0.40
codegen_flags: <defaults>
</compile_context>

<pallas_src>
import functools

import jax
import jax.numpy as jnp
from jax.experimental import pallas as pl
from jax.experimental.pallas import tpu as pltpu

STEM_CH = 32               # EfficientNet-B0 conv_stem out channels
HEAD_CH = 1280             # EfficientNet-B0 conv_head out channels
FC_HIDDEN = 512            # nodes_fc_layers[1]
NUM_CLASSES = 4
FEATURE_DIM = 2 * HEAD_CH  # rgb + depth branches


# ----------------------------------------------------------------------------
# Fused Pallas kernel: whole model, one call
# ----------------------------------------------------------------------------
def _fused_fsgnet_kernel(
    inv_hw,                                            # python float (1/HW), via partial
    rgb_ref, dep_ref,                                  # (1, hw_tile, Kr/Kd) bf16 patches
    rgb_sw_ref, rgb_sb_ref, rgb_hw_ref, rgb_hb_ref,    # stem/head weights+biases (rgb)
    dep_sw_ref, dep_sb_ref, dep_hw_ref, dep_hb_ref,    # stem/head weights+biases (depth)
    fc2_w_ref, fc2_b_ref, fc3_w_ref, fc3_b_ref,        # FSAG-folded fc layers
    out_ref,                                           # (1, 1, NUM_CLASSES)
    acc_ref,                                           # VMEM scratch (1, FEATURE_DIM) f32
):
    t = pl.program_id(1)

    @pl.when(t == 0)
    def _():
        acc_ref[...] = jnp.zeros_like(acc_ref)

    def branch(patches, sw_ref, sb_ref, hw_ref, hb_ref, col0):
        # stem conv-as-matmul (BN scale pre-folded into sw) + SiLU, stays in VMEM.
        s = jnp.dot(patches, sw_ref[...], preferred_element_type=jnp.float32)
        s = s + sb_ref[...]
        s = s * jax.nn.sigmoid(s)                                        # SiLU
        # 1x1 conv_head (BN folded) + SiLU.
        h = jnp.dot(s.astype(hw_ref.dtype), hw_ref[...],
                    preferred_element_type=jnp.float32)
        h = h + hb_ref[...]
        h = h * jax.nn.sigmoid(h)                                        # SiLU
        # partial global-average-pool (sum) into the f32 accumulator.
        acc_ref[:, col0:col0 + HEAD_CH] = (
            acc_ref[:, col0:col0 + HEAD_CH] + jnp.sum(h, axis=0, keepdims=True))

    branch(rgb_ref[0], rgb_sw_ref, rgb_sb_ref, rgb_hw_ref, rgb_hb_ref, 0)
    branch(dep_ref[0], dep_sw_ref, dep_sb_ref, dep_hw_ref, dep_hb_ref, HEAD_CH)

    @pl.when(t == pl.num_programs(1) - 1)
    def _():
        emb = acc_ref[...] * inv_hw                       # pooled (1, FEATURE_DIM)
        # fc2 (sigmoid(fsag_L1) folded into rows) -> relu
        h = jnp.dot(emb.astype(fc2_w_ref.dtype), fc2_w_ref[...],
                    preferred_element_type=jnp.float32) + fc2_b_ref[...]
        h = jnp.maximum(h, 0.0)
        # fc3 (sigmoid(fsag_L2) folded into rows)
        y = jnp.dot(h.astype(fc3_w_ref.dtype), fc3_w_ref[...],
                    preferred_element_type=jnp.float32) + fc3_b_ref[...]
        out_ref[...] = y.reshape(out_ref.shape).astype(out_ref.dtype)


def _pick_hw_tile(hw, max_tile=1024):
    """Largest multiple-of-8 tile <= max_tile that divides HW (full HW if small)."""
    if hw <= max_tile:
        return hw
    for cand in range(max_tile, 7, -8):
        if hw % cand == 0:
            return cand
    return hw  # fallback: single tile


def fsgnet_forward(rgb, depth, params):
    """Full FSGNetEffNet forward (rgb + depth branches) via one fused pallas_call."""
    kr = params["rgb"]["stem_w"].shape[0]
    kd = params["depth"]["stem_w"].shape[0]
    rgb_p, (B, Ho, Wo) = im2col_nchw(rgb, pad_k_to=kr)
    dep_p, _ = im2col_nchw(depth, pad_k_to=kd)
    HW = Ho * Wo
    hw_tile = _pick_hw_tile(HW)
    assert HW % hw_tile == 0
    nt = HW // hw_tile

    rgb_p = rgb_p.astype(jnp.bfloat16)
    dep_p = dep_p.astype(jnp.bfloat16)
    pr, pd = params["rgb"], params["depth"]

    args = (rgb_p, dep_p,
            pr["stem_w"], pr["stem_b"], pr["head_w"], pr["head_b"],
            pd["stem_w"], pd["stem_b"], pd["head_w"], pd["head_b"],
            params["fc2_w"], params["fc2_b"], params["fc3_w"], params["fc3_b"])

    flops = (2 * B * HW * ((kr + kd) * STEM_CH + 2 * STEM_CH * HEAD_CH)
             + 2 * B * (FEATURE_DIM * FC_HIDDEN + FC_HIDDEN * NUM_CLASSES))
    transcendentals = 2 * B * HW * (STEM_CH + HEAD_CH)
    bytes_accessed = int(sum(int(a.size) * a.dtype.itemsize for a in args)
                         + B * NUM_CLASSES * 4)

    grid_spec = pltpu.PrefetchScalarGridSpec(
        num_scalar_prefetch=0,
        grid=(B, nt),                                    # reduction (HW) axis last
        in_specs=[
            pl.BlockSpec((1, hw_tile, kr), lambda b, t: (b, t, 0)),
            pl.BlockSpec((1, hw_tile, kd), lambda b, t: (b, t, 0)),
            pl.BlockSpec((kr, STEM_CH), lambda b, t: (0, 0)),
            pl.BlockSpec((1, STEM_CH), lambda b, t: (0, 0)),
            pl.BlockSpec((STEM_CH, HEAD_CH), lambda b, t: (0, 0)),
            pl.BlockSpec((1, HEAD_CH), lambda b, t: (0, 0)),
            pl.BlockSpec((kd, STEM_CH), lambda b, t: (0, 0)),
            pl.BlockSpec((1, STEM_CH), lambda b, t: (0, 0)),
            pl.BlockSpec((STEM_CH, HEAD_CH), lambda b, t: (0, 0)),
            pl.BlockSpec((1, HEAD_CH), lambda b, t: (0, 0)),
            pl.BlockSpec((FEATURE_DIM, FC_HIDDEN), lambda b, t: (0, 0)),
            pl.BlockSpec((1, FC_HIDDEN), lambda b, t: (0, 0)),
            pl.BlockSpec((FC_HIDDEN, NUM_CLASSES), lambda b, t: (0, 0)),
            pl.BlockSpec((1, NUM_CLASSES), lambda b, t: (0, 0)),
        ],
        out_specs=pl.BlockSpec((1, 1, NUM_CLASSES), lambda b, t: (b, 0, 0)),
        scratch_shapes=[pltpu.VMEM((1, FEATURE_DIM), jnp.float32)],
    )

    out = pl.pallas_call(
        functools.partial(_fused_fsgnet_kernel, 1.0 / float(HW)),
        out_shape=jax.ShapeDtypeStruct((B, 1, NUM_CLASSES), jnp.float32),
        grid_spec=grid_spec,
        # batch axis parallel (v7x megacore), HW pool-reduction axis arbitrary.
        compiler_params=pltpu.CompilerParams(
            dimension_semantics=("parallel", "arbitrary")),
        cost_estimate=pl.CostEstimate(flops=flops,
                                      transcendentals=transcendentals,
                                      bytes_accessed=bytes_accessed),
    )(*args)
    return out[:, 0, :]


# ----------------------------------------------------------------------------
# Glue (plain JAX): im2col + offline parameter folding
# ----------------------------------------------------------------------------
def im2col_nchw(x_nchw, k=3, stride=2, pad=1, pad_k_to=None):
    """NCHW -> (B, Ho*Wo, k*k*C [zero-padded to pad_k_to]); feature order (kh,kw,Cin)."""
    x = jnp.transpose(x_nchw, (0, 2, 3, 1))  # NHWC
    B, H, W, C = x.shape
    xp = jnp.pad(x, ((0, 0), (pad, pad), (pad, pad), (0, 0)))
    Ho = (H + 2 * pad - k) // stride + 1
    Wo = (W + 2 * pad - k) // stride + 1
    cols = []
    for di in range(k):
        for dj in range(k):
            cols.append(xp[:, di:di + stride * Ho:stride, dj:dj + stride * Wo:stride, :])
    patches = jnp.stack(cols, axis=3).reshape(B, Ho, Wo, k * k * C)
    K = k * k * C
    if pad_k_to is not None and pad_k_to > K:
        patches = jnp.pad(patches, ((0, 0), (0, 0), (0, 0), (0, pad_k_to - K)))
    return patches.reshape(B, Ho * Wo, -1), (B, Ho, Wo)


def torch_conv_weight_to_matmul(w_oihw):
    """(Cout, Cin, kh, kw) torch layout -> (kh*kw*Cin, Cout) matmul layout."""
    Cout, Cin, kh, kw = w_oihw.shape
    return jnp.transpose(w_oihw, (2, 3, 1, 0)).reshape(kh * kw * Cin, Cout)


def fold_bn(gamma, beta, mean, var, eps=1e-5):
    scale = gamma / jnp.sqrt(var + eps)
    bias = beta - mean * scale
    return scale, bias


def _round_up(x, m):
    return ((x + m - 1) // m) * m


def make_branch_params(key, in_ch):
    ks = jax.random.split(key, 10)
    k_raw = 9 * in_ch
    k_pad = _round_up(k_raw, 16)  # bf16-friendly K

    stem_w_oihw = 0.2 * jax.random.normal(ks[0], (STEM_CH, in_ch, 3, 3), jnp.float32)
    s1, b1 = fold_bn(
        1.0 + 0.1 * jax.random.normal(ks[1], (STEM_CH,), jnp.float32),
        0.1 * jax.random.normal(ks[2], (STEM_CH,), jnp.float32),
        0.1 * jax.random.normal(ks[3], (STEM_CH,), jnp.float32),
        0.5 + jnp.abs(jax.random.normal(ks[4], (STEM_CH,), jnp.float32)))

    head_w_oihw = 0.2 * jax.random.normal(ks[5], (HEAD_CH, STEM_CH, 1, 1), jnp.float32)
    s2, b2 = fold_bn(
        1.0 + 0.1 * jax.random.normal(ks[6], (HEAD_CH,), jnp.float32),
        0.1 * jax.random.normal(ks[7], (HEAD_CH,), jnp.float32),
        0.1 * jax.random.normal(ks[8], (HEAD_CH,), jnp.float32),
        0.5 + jnp.abs(jax.random.normal(ks[9], (HEAD_CH,), jnp.float32)))

    # Fold BN scales into the conv weights offline; keep only bias adds in-kernel.
    stem_w = torch_conv_weight_to_matmul(stem_w_oihw) * s1[None, :]
    stem_w = jnp.pad(stem_w, ((0, k_pad - k_raw), (0, 0)))        # zero-pad K rows
    head_w = head_w_oihw[:, :, 0, 0].T * s2[None, :]              # (32, 1280)

    return {
        "stem_w": stem_w.astype(jnp.bfloat16),
        "stem_b": b1[None, :].astype(jnp.float32),
        "head_w": head_w.astype(jnp.bfloat16),
        "head_b": b2[None, :].astype(jnp.float32),
    }


def make_head_params(key):
    ks = jax.random.split(key, 6)
    # fsag params initialized so sigmoid() ~ 0.5 (xavier-ish, as in the module)
    fsag_L1 = jax.random.normal(ks[0], (FEATURE_DIM,), jnp.float32) * (2.0 / (1 + FEATURE_DIM)) ** 0.5
    fsag_L2 = jax.random.normal(ks[1], (FC_HIDDEN,), jnp.float32) * (2.0 / (1 + FC_HIDDEN)) ** 0.5
    fc2_w = 0.05 * jax.random.normal(ks[2], (FEATURE_DIM, FC_HIDDEN), jnp.float32)
    fc2_b = 0.1 * jax.random.normal(ks[3], (FC_HIDDEN,), jnp.float32)
    fc3_w = 0.1 * jax.random.normal(ks[4], (FC_HIDDEN, NUM_CLASSES), jnp.float32)
    fc3_b = 0.1 * jax.random.normal(ks[5], (NUM_CLASSES,), jnp.float32)
    # Fold FSAG sigmoid gates into the fc weight rows: (emb*g) @ W == emb @ (g[:,None]*W)
    return {
        "fc2_w": (jax.nn.sigmoid(fsag_L1)[:, None] * fc2_w).astype(jnp.bfloat16),
        "fc2_b": fc2_b[None, :].astype(jnp.float32),
        "fc3_w": (jax.nn.sigmoid(fsag_L2)[:, None] * fc3_w).astype(jnp.bfloat16),
        "fc3_b": fc3_b[None, :].astype(jnp.float32),
    }


# Pure-JAX reference (same folded params, same bf16/f32 mixed precision).
def reference_forward(rgb, depth, params):
    def ref_branch(x, p):
        k_pad = p["stem_w"].shape[0]
        patches, (B, Ho, Wo) = im2col_nchw(x, pad_k_to=k_pad)
        pb = patches.reshape(B * Ho * Wo, k_pad).astype(jnp.bfloat16)
        s = jnp.dot(pb, p["stem_w"], preferred_element_type=jnp.float32) + p["stem_b"]
        s = s * jax.nn.sigmoid(s)
        h = jnp.dot(s.astype(jnp.bfloat16), p["head_w"],
                    preferred_element_type=jnp.float32) + p["head_b"]
        h = h * jax.nn.sigmoid(h)
        return h.reshape(B, Ho * Wo, HEAD_CH).mean(axis=1)

    emb = jnp.concatenate([ref_branch(rgb, params["rgb"]),
                           ref_branch(depth, params["depth"])], axis=1)
    h = jnp.dot(emb.astype(jnp.bfloat16), params["fc2_w"],
                preferred_element_type=jnp.float32) + params["fc2_b"]
    h = jnp.maximum(h, 0.0)
    y = jnp.dot(h.astype(jnp.bfloat16), params["fc3_w"],
                preferred_element_type=jnp.float32) + params["fc3_b"]
    return y


if __name__ == "__main__":
    key = jax.random.PRNGKey(0)
    k_rgb, k_depth, k_head, k_in = jax.random.split(key, 4)

    # config equivalent: use_rgb=True, use_mask=False, use_depth=True,
    # nodes_fc_layers=[512, 512], num_classes=4 (eval mode: dropout is a no-op)
    params = {
        "rgb": make_branch_params(k_rgb, 3),
        "depth": make_branch_params(k_depth, 1),
        **make_head_params(k_head),
    }

    ki1, ki2 = jax.random.split(k_in)
    rgb = jax.random.normal(ki1, (2, 3, 16, 16), jnp.float32)    # NCHW
    depth = jax.random.normal(ki2, (2, 1, 16, 16), jnp.float32)  # NCHW

    fwd = jax.jit(fsgnet_forward)
    out = jax.block_until_ready(fwd(rgb, depth, params))
    ref = jax.block_until_ready(reference_forward(rgb, depth, params))

    assert out.shape == (2, NUM_CLASSES), out.shape
    assert bool(jnp.allclose(out, ref, atol=5e-3, rtol=5e-3)), (out, ref)
    print("KERNEL_OK")
</pallas_src>

<mosaic_0001>
module attributes {stable_mosaic.version = 11 : i64} {
  func.func @_fused_fsgnet_kernel(%arg0: i32, %arg1: i32, %arg2: memref<1x64x32xbf16, #tpu.memory_space<vmem>>, %arg3: memref<1x64x16xbf16, #tpu.memory_space<vmem>>, %arg4: memref<32x32xbf16, #tpu.memory_space<vmem>>, %arg5: memref<1x32xf32, #tpu.memory_space<vmem>>, %arg6: memref<32x1280xbf16, #tpu.memory_space<vmem>>, %arg7: memref<1x1280xf32, #tpu.memory_space<vmem>>, %arg8: memref<16x32xbf16, #tpu.memory_space<vmem>>, %arg9: memref<1x32xf32, #tpu.memory_space<vmem>>, %arg10: memref<32x1280xbf16, #tpu.memory_space<vmem>>, %arg11: memref<1x1280xf32, #tpu.memory_space<vmem>>, %arg12: memref<2560x512xbf16, #tpu.memory_space<vmem>>, %arg13: memref<1x512xf32, #tpu.memory_space<vmem>>, %arg14: memref<512x4xbf16, #tpu.memory_space<vmem>>, %arg15: memref<1x4xf32, #tpu.memory_space<vmem>>, %arg16: memref<1x1x4xf32, #tpu.memory_space<vmem>>, %arg17: memref<1x2560xf32, #tpu.memory_space<vmem>>) attributes {dimension_semantics = [#tpu.dimension_semantics<parallel>, #tpu.dimension_semantics<arbitrary>], iteration_bounds = array<i64: 2, 1>, scalar_prefetch = 0 : i64, scratch_operands = 1 : i64, tpu.core_type = #tpu.core_type<tc>, window_params = [{transform_indices = @transform_0, window_bounds = array<i64: 1, 64, 32>}, {transform_indices = @transform_1, window_bounds = array<i64: 1, 64, 16>}, {pipeline_mode = #tpu.pipeline_mode<synchronous>, transform_indices = @transform_2, window_bounds = array<i64: 32, 32>}, {pipeline_mode = #tpu.pipeline_mode<synchronous>, transform_indices = @transform_3, window_bounds = array<i64: 1, 32>}, {pipeline_mode = #tpu.pipeline_mode<synchronous>, transform_indices = @transform_4, window_bounds = array<i64: 32, 1280>}, {pipeline_mode = #tpu.pipeline_mode<synchronous>, transform_indices = @transform_5, window_bounds = array<i64: 1, 1280>}, {pipeline_mode = #tpu.pipeline_mode<synchronous>, transform_indices = @transform_6, window_bounds = array<i64: 16, 32>}, {pipeline_mode = #tpu.pipeline_mode<synchronous>, transform_indices = @transform_7, window_bounds = array<i64: 1, 32>}, {pipeline_mode = #tpu.pipeline_mode<synchronous>, transform_indices = @transform_8, window_bounds = array<i64: 32, 1280>}, {pipeline_mode = #tpu.pipeline_mode<synchronous>, transform_indices = @transform_9, window_bounds = array<i64: 1, 1280>}, {pipeline_mode = #tpu.pipeline_mode<synchronous>, transform_indices = @transform_10, window_bounds = array<i64: 2560, 512>}, {pipeline_mode = #tpu.pipeline_mode<synchronous>, transform_indices = @transform_11, window_bounds = array<i64: 1, 512>}, {pipeline_mode = #tpu.pipeline_mode<synchronous>, transform_indices = @transform_12, window_bounds = array<i64: 512, 4>}, {pipeline_mode = #tpu.pipeline_mode<synchronous>, transform_indices = @transform_13, window_bounds = array<i64: 1, 4>}, {transform_indices = @transform_14, window_bounds = array<i64: 1, 1, 4>}]} {
    %c0_i32 = arith.constant 0 : i32
    %0 = arith.cmpi eq, %arg1, %c0_i32 : i32
    %1 = arith.extui %0 : i1 to i32
    %c0_i32_0 = arith.constant 0 : i32
    %2 = arith.cmpi ne, %1, %c0_i32_0 : i32
    scf.if %2 {
      %cst_40 = arith.constant 0.000000e+00 : f32
      %66 = vector.broadcast %cst_40 : f32 to vector<1x2560xf32>
      %c0_41 = arith.constant 0 : index
      %c0_42 = arith.constant 0 : index
      %67 = vector.load %arg17[%c0_41, %c0_42] : memref<1x2560xf32, #tpu.memory_space<vmem>>, vector<1x2560xf32>
      tpu.vector_store %arg17[%c0_41, %c0_42], %66 {strides = array<i32>} : memref<1x2560xf32, #tpu.memory_space<vmem>>, vector<1x2560xf32>,
    } else {
    }
    %c0 = arith.constant 0 : index
    %c0_1 = arith.constant 0 : index
    %c0_2 = arith.constant 0 : index
    %3 = vector.load %arg2[%c0, %c0_1, %c0_2] : memref<1x64x32xbf16, #tpu.memory_space<vmem>>, vector<1x64x32xbf16>
    %4 = vector.shape_cast %3 : vector<1x64x32xbf16> to vector<64x32xbf16>
    %c0_3 = arith.constant 0 : index
    %c0_4 = arith.constant 0 : index
    %5 = vector.load %arg4[%c0_3, %c0_4] : memref<32x32xbf16, #tpu.memory_space<vmem>>, vector<32x32xbf16>
    %cst = arith.constant dense<0.000000e+00> : vector<64x32xf32>
    %6 = tpu.matmul %4, %5, %cst {dimension_numbers = #tpu.dot_dimension_numbers<[1], [0], [0], [1], [0, 0, 1, 1], [], []>} : vector<64x32xbf16>, vector<32x32xbf16>, vector<64x32xf32> -> vector<64x32xf32>
    %c0_5 = arith.constant 0 : index
    %c0_6 = arith.constant 0 : index
    %7 = vector.load %arg5[%c0_5, %c0_6] : memref<1x32xf32, #tpu.memory_space<vmem>>, vector<1x32xf32>
    %8 = vector.broadcast %7 : vector<1x32xf32> to vector<64x32xf32>
    %9 = arith.addf %6, %8 : vector<64x32xf32>
    %10 = arith.negf %9 : vector<64x32xf32>
    %11 = math.exp %10 : vector<64x32xf32>
    %cst_7 = arith.constant 1.000000e+00 : f32
    %12 = vector.broadcast %cst_7 : f32 to vector<64x32xf32>
    %13 = arith.addf %12, %11 : vector<64x32xf32>
    %14 = arith.divf %12, %13 : vector<64x32xf32>
    %15 = arith.mulf %9, %14 : vector<64x32xf32>
    %16 = arith.truncf %15 : vector<64x32xf32> to vector<64x32xbf16>
    %c0_8 = arith.constant 0 : index
    %c0_9 = arith.constant 0 : index
    %17 = vector.load %arg6[%c0_8, %c0_9] : memref<32x1280xbf16, #tpu.memory_space<vmem>>, vector<32x1280xbf16>
    %cst_10 = arith.constant dense<0.000000e+00> : vector<64x1280xf32>
    %18 = tpu.matmul %16, %17, %cst_10 {dimension_numbers = #tpu.dot_dimension_numbers<[1], [0], [0], [1], [0, 0, 1, 1], [], []>} : vector<64x32xbf16>, vector<32x1280xbf16>, vector<64x1280xf32> -> vector<64x1280xf32>
    %c0_11 = arith.constant 0 : index
    %c0_12 = arith.constant 0 : index
    %19 = vector.load %arg7[%c0_11, %c0_12] : memref<1x1280xf32, #tpu.memory_space<vmem>>, vector<1x1280xf32>
    %20 = vector.broadcast %19 : vector<1x1280xf32> to vector<64x1280xf32>
    %21 = arith.addf %18, %20 : vector<64x1280xf32>
    %22 = arith.negf %21 : vector<64x1280xf32>
    %23 = math.exp %22 : vector<64x1280xf32>
    %cst_13 = arith.constant 1.000000e+00 : f32
    %24 = vector.broadcast %cst_13 : f32 to vector<64x1280xf32>
    %25 = arith.addf %24, %23 : vector<64x1280xf32>
    %26 = arith.divf %24, %25 : vector<64x1280xf32>
    %27 = arith.mulf %21, %26 : vector<64x1280xf32>
    %c0_14 = arith.constant 0 : index
    %c0_15 = arith.constant 0 : index
    %28 = vector.load %arg17[%c0_14, %c0_15] : memref<1x2560xf32, #tpu.memory_space<vmem>>, vector<1x1280xf32>
    %cst_16 = arith.constant dense<0.000000e+00> : vector<1280xf32>
    %29 = vector.multi_reduction <add>, %27, %cst_16 [0] : vector<64x1280xf32> to vector<1280xf32>
    %30 = vector.shape_cast %29 : vector<1280xf32> to vector<1x1280xf32>
    %31 = arith.addf %28, %30 : vector<1x1280xf32>
    %c0_17 = arith.constant 0 : index
    %c0_18 = arith.constant 0 : index
    %32 = vector.load %arg17[%c0_17, %c0_18] : memref<1x2560xf32, #tpu.memory_space<vmem>>, vector<1x1280xf32>
    tpu.vector_store %arg17[%c0_17, %c0_18], %31 {strides = array<i32>} : memref<1x2560xf32, #tpu.memory_space<vmem>>, vector<1x1280xf32>,
    %c0_19 = arith.constant 0 : index
    %c0_20 = arith.constant 0 : index
    %c0_21 = arith.constant 0 : index
    %33 = vector.load %arg3[%c0_19, %c0_20, %c0_21] : memref<1x64x16xbf16, #tpu.memory_space<vmem>>, vector<1x64x16xbf16>
    %34 = vector.shape_cast %33 : vector<1x64x16xbf16> to vector<64x16xbf16>
    %c0_22 = arith.constant 0 : index
    %c0_23 = arith.constant 0 : index
    %35 = vector.load %arg8[%c0_22, %c0_23] : memref<16x32xbf16, #tpu.memory_space<vmem>>, vector<16x32xbf16>
    %cst_24 = arith.constant dense<0.000000e+00> : vector<64x32xf32>
    %36 = tpu.matmul %34, %35, %cst_24 {dimension_numbers = #tpu.dot_dimension_numbers<[1], [0], [0], [1], [0, 0, 1, 1], [], []>} : vector<64x16xbf16>, vector<16x32xbf16>, vector<64x32xf32> -> vector<64x32xf32>
    %c0_25 = arith.constant 0 : index
    %c0_26 = arith.constant 0 : index
    %37 = vector.load %arg9[%c0_25, %c0_26] : memref<1x32xf32, #tpu.memory_space<vmem>>, vector<1x32xf32>
    %38 = vector.broadcast %37 : vector<1x32xf32> to vector<64x32xf32>
    %39 = arith.addf %36, %38 : vector<64x32xf32>
    %40 = arith.negf %39 : vector<64x32xf32>
    %41 = math.exp %40 : vector<64x32xf32>
    %cst_27 = arith.constant 1.000000e+00 : f32
    %42 = vector.broadcast %cst_27 : f32 to vector<64x32xf32>
    %43 = arith.addf %42, %41 : vector<64x32xf32>
    %44 = arith.divf %42, %43 : vector<64x32xf32>
    %45 = arith.mulf %39, %44 : vector<64x32xf32>
    %46 = arith.truncf %45 : vector<64x32xf32> to vector<64x32xbf16>
    %c0_28 = arith.constant 0 : index
    %c0_29 = arith.constant 0 : index
    %47 = vector.load %arg10[%c0_28, %c0_29] : memref<32x1280xbf16, #tpu.memory_space<vmem>>, vector<32x1280xbf16>
    %cst_30 = arith.constant dense<0.000000e+00> : vector<64x1280xf32>
    %48 = tpu.matmul %46, %47, %cst_30 {dimension_numbers = #tpu.dot_dimension_numbers<[1], [0], [0], [1], [0, 0, 1, 1], [], []>} : vector<64x32xbf16>, vector<32x1280xbf16>, vector<64x1280xf32> -> vector<64x1280xf32>
    %c0_31 = arith.constant 0 : index
    %c0_32 = arith.constant 0 : index
    %49 = vector.load %arg11[%c0_31, %c0_32] : memref<1x1280xf32, #tpu.memory_space<vmem>>, vector<1x1280xf32>
    %50 = vector.broadcast %49 : vector<1x1280xf32> to vector<64x1280xf32>
    %51 = arith.addf %48, %50 : vector<64x1280xf32>
    %52 = arith.negf %51 : vector<64x1280xf32>
    %53 = math.exp %52 : vector<64x1280xf32>
    %cst_33 = arith.constant 1.000000e+00 : f32
    %54 = vector.broadcast %cst_33 : f32 to vector<64x1280xf32>
    %55 = arith.addf %54, %53 : vector<64x1280xf32>
    %56 = arith.divf %54, %55 : vector<64x1280xf32>
    %57 = arith.mulf %51, %56 : vector<64x1280xf32>
    %c0_34 = arith.constant 0 : index
    %c1280 = arith.constant 1280 : index
    %58 = vector.load %arg17[%c0_34, %c1280] : memref<1x2560xf32, #tpu.memory_space<vmem>>, vector<1x1280xf32>
    %cst_35 = arith.constant dense<0.000000e+00> : vector<1280xf32>
    %59 = vector.multi_reduction <add>, %57, %cst_35 [0] : vector<64x1280xf32> to vector<1280xf32>
    %60 = vector.shape_cast %59 : vector<1280xf32> to vector<1x1280xf32>
    %61 = arith.addf %58, %60 : vector<1x1280xf32>
    %c0_36 = arith.constant 0 : index
    %c1280_37 = arith.constant 1280 : index
    %62 = vector.load %arg17[%c0_36, %c1280_37] : memref<1x2560xf32, #tpu.memory_space<vmem>>, vector<1x1280xf32>
    tpu.vector_store %arg17[%c0_36, %c1280_37], %61 {strides = array<i32>} : memref<1x2560xf32, #tpu.memory_space<vmem>>, vector<1x1280xf32>,
    %c0_i32_38 = arith.constant 0 : i32
    %63 = arith.cmpi eq, %arg1, %c0_i32_38 : i32
    %64 = arith.extui %63 : i1 to i32
    %c0_i32_39 = arith.constant 0 : i32
    %65 = arith.cmpi ne, %64, %c0_i32_39 : i32
    scf.if %65 {
      %c0_40 = arith.constant 0 : index
      %c0_41 = arith.constant 0 : index
      %66 = vector.load %arg17[%c0_40, %c0_41] : memref<1x2560xf32, #tpu.memory_space<vmem>>, vector<1x2560xf32>
      %cst_42 = arith.constant 1.562500e-02 : f32
      %67 = vector.broadcast %cst_42 : f32 to vector<1x2560xf32>
      %68 = arith.mulf %66, %67 : vector<1x2560xf32>
      %69 = arith.truncf %68 : vector<1x2560xf32> to vector<1x2560xbf16>
      %c0_43 = arith.constant 0 : index
      %c0_44 = arith.constant 0 : index
      %70 = vector.load %arg12[%c0_43, %c0_44] : memref<2560x512xbf16, #tpu.memory_space<vmem>>, vector<2560x512xbf16>
      %cst_45 = arith.constant dense<0.000000e+00> : vector<1x512xf32>
      %71 = tpu.matmul %69, %70, %cst_45 {dimension_numbers = #tpu.dot_dimension_numbers<[1], [0], [0], [1], [0, 0, 1, 1], [], []>} : vector<1x2560xbf16>, vector<2560x512xbf16>, vector<1x512xf32> -> vector<1x512xf32>
      %c0_46 = arith.constant 0 : index
      %c0_47 = arith.constant 0 : index
      %72 = vector.load %arg13[%c0_46, %c0_47] : memref<1x512xf32, #tpu.memory_space<vmem>>, vector<1x512xf32>
      %73 = arith.addf %71, %72 : vector<1x512xf32>
      %cst_48 = arith.constant 0.000000e+00 : f32
      %74 = vector.broadcast %cst_48 : f32 to vector<1x512xf32>
      %75 = arith.maximumf %73, %74 : vector<1x512xf32>
      %76 = arith.truncf %75 : vector<1x512xf32> to vector<1x512xbf16>
      %c0_49 = arith.constant 0 : index
      %c0_50 = arith.constant 0 : index
      %77 = vector.load %arg14[%c0_49, %c0_50] : memref<512x4xbf16, #tpu.memory_space<vmem>>, vector<512x4xbf16>
      %cst_51 = arith.constant dense<0.000000e+00> : vector<1x4xf32>
      %78 = tpu.matmul %76, %77, %cst_51 {dimension_numbers = #tpu.dot_dimension_numbers<[1], [0], [0], [1], [0, 0, 1, 1], [], []>} : vector<1x512xbf16>, vector<512x4xbf16>, vector<1x4xf32> -> vector<1x4xf32>
      %c0_52 = arith.constant 0 : index
      %c0_53 = arith.constant 0 : index
      %79 = vector.load %arg15[%c0_52, %c0_53] : memref<1x4xf32, #tpu.memory_space<vmem>>, vector<1x4xf32>
      %80 = arith.addf %78, %79 : vector<1x4xf32>
      %81 = vector.shape_cast %80 : vector<1x4xf32> to vector<1x1x4xf32>
      %c0_54 = arith.constant 0 : index
      %c0_55 = arith.constant 0 : index
      %c0_56 = arith.constant 0 : index
      %82 = vector.load %arg16[%c0_54, %c0_55, %c0_56] : memref<1x1x4xf32, #tpu.memory_space<vmem>>, vector<1x1x4xf32>
      tpu.vector_store %arg16[%c0_54, %c0_55, %c0_56], %81 {strides = array<i32>} : memref<1x1x4xf32, #tpu.memory_space<vmem>>, vector<1x1x4xf32>,
    } else {
    }
    return
  }
  func.func @transform_0(%arg0: i32, %arg1: i32) -> (i32, i32, i32) {
    %c0_i32 = arith.constant 0 : i32
    %c0_i32_0 = arith.constant 0 : i32
    return %arg0, %arg1, %c0_i32 : i32, i32, i32
  }
  func.func @transform_1(%arg0: i32, %arg1: i32) -> (i32, i32, i32) {
    %c0_i32 = arith.constant 0 : i32
    %c0_i32_0 = arith.constant 0 : i32
    return %arg0, %arg1, %c0_i32 : i32, i32, i32
  }
  func.func @transform_2(%arg0: i32, %arg1: i32) -> (i32, i32) {
    %c0_i32 = arith.constant 0 : i32
    %c0_i32_0 = arith.constant 0 : i32
    %c0_i32_1 = arith.constant 0 : i32
    return %c0_i32, %c0_i32_0 : i32, i32
  }
  func.func @transform_3(%arg0: i32, %arg1: i32) -> (i32, i32) {
    %c0_i32 = arith.constant 0 : i32
    %c0_i32_0 = arith.constant 0 : i32
    %c0_i32_1 = arith.constant 0 : i32
    return %c0_i32, %c0_i32_0 : i32, i32
  }
  func.func @transform_4(%arg0: i32, %arg1: i32) -> (i32, i32) {
    %c0_i32 = arith.constant 0 : i32
    %c0_i32_0 = arith.constant 0 : i32
    %c0_i32_1 = arith.constant 0 : i32
    return %c0_i32, %c0_i32_0 : i32, i32
  }
  func.func @transform_5(%arg0: i32, %arg1: i32) -> (i32, i32) {
    %c0_i32 = arith.constant 0 : i32
    %c0_i32_0 = arith.constant 0 : i32
    %c0_i32_1 = arith.constant 0 : i32
    return %c0_i32, %c0_i32_0 : i32, i32
  }
  func.func @transform_6(%arg0: i32, %arg1: i32) -> (i32, i32) {
    %c0_i32 = arith.constant 0 : i32
    %c0_i32_0 = arith.constant 0 : i32
    %c0_i32_1 = arith.constant 0 : i32
    return %c0_i32, %c0_i32_0 : i32, i32
  }
  func.func @transform_7(%arg0: i32, %arg1: i32) -> (i32, i32) {
    %c0_i32 = arith.constant 0 : i32
    %c0_i32_0 = arith.constant 0 : i32
    %c0_i32_1 = arith.constant 0 : i32
    return %c0_i32, %c0_i32_0 : i32, i32
  }
  func.func @transform_8(%arg0: i32, %arg1: i32) -> (i32, i32) {
    %c0_i32 = arith.constant 0 : i32
    %c0_i32_0 = arith.constant 0 : i32
    %c0_i32_1 = arith.constant 0 : i32
    return %c0_i32, %c0_i32_0 : i32, i32
  }
  func.func @transform_9(%arg0: i32, %arg1: i32) -> (i32, i32) {
    %c0_i32 = arith.constant 0 : i32
    %c0_i32_0 = arith.constant 0 : i32
    %c0_i32_1 = arith.constant 0 : i32
    return %c0_i32, %c0_i32_0 : i32, i32
  }
  func.func @transform_10(%arg0: i32, %arg1: i32) -> (i32, i32) {
    %c0_i32 = arith.constant 0 : i32
    %c0_i32_0 = arith.constant 0 : i32
    %c0_i32_1 = arith.constant 0 : i32
    return %c0_i32, %c0_i32_0 : i32, i32
  }
  func.func @transform_11(%arg0: i32, %arg1: i32) -> (i32, i32) {
    %c0_i32 = arith.constant 0 : i32
    %c0_i32_0 = arith.constant 0 : i32
    %c0_i32_1 = arith.constant 0 : i32
    return %c0_i32, %c0_i32_0 : i32, i32
  }
  func.func @transform_12(%arg0: i32, %arg1: i32) -> (i32, i32) {
    %c0_i32 = arith.constant 0 : i32
    %c0_i32_0 = arith.constant 0 : i32
    %c0_i32_1 = arith.constant 0 : i32
    return %c0_i32, %c0_i32_0 : i32, i32
  }
  func.func @transform_13(%arg0: i32, %arg1: i32) -> (i32, i32) {
    %c0_i32 = arith.constant 0 : i32
    %c0_i32_0 = arith.constant 0 : i32
    %c0_i32_1 = arith.constant 0 : i32
    return %c0_i32, %c0_i32_0 : i32, i32
  }
  func.func @transform_14(%arg0: i32, %arg1: i32) -> (i32, i32, i32) {
    %c0_i32 = arith.constant 0 : i32
    %c0_i32_0 = arith.constant 0 : i32
    %c0_i32_1 = arith.constant 0 : i32
    return %arg0, %c0_i32, %c0_i32_0 : i32, i32, i32
  }
}

</mosaic_0001>

<bundles_post_ra>
// kernel: fsgnet_forward.1
= control target key start
LH: loop header
LB: loop body
LE: loop exit
PB: predicated region body
PF: predicated region fallthrough
CT: control target
= control target key end

     0   :  { %s22649_s0 = inlined_call_operand.vmem [shape: bf16[2,64,32], index: 0, kind: input, shape index: {}]   ;;  %s22650_s1 = inlined_call_operand.vmem [shape: bf16[2,64,16], index: 1, kind: input, shape index: {}]   ;;  %s22651_s2 = inlined_call_operand.hbm [shape: bf16[32,32], index: 2, kind: input, shape index: {}]   ;;  %s22652_s3 = inlined_call_operand.hbm [shape: f32[1,32], index: 3, kind: input, shape index: {}]   ;;  %s22653_s4 = inlined_call_operand.hbm [shape: bf16[32,1280], index: 4, kind: input, shape index: {}]   ;;  %s22654_s5 = inlined_call_operand.hbm [shape: f32[1,1280], index: 5, kind: input, shape index: {}]   ;;  %s22655_s6 = inlined_call_operand.hbm [shape: bf16[16,32], index: 6, kind: input, shape index: {}]   ;;  %s22656_s7 = inlined_call_operand.hbm [shape: f32[1,32], index: 7, kind: input, shape index: {}]   ;;  %s22657_s8 = inlined_call_operand.hbm [shape: bf16[32,1280], index: 8, kind: input, shape index: {}]   ;;  %s22658_s9 = inlined_call_operand.hbm [shape: f32[1,1280], index: 9, kind: input, shape index: {}]   ;;  %s22659_s10 = inlined_call_operand.hbm [shape: bf16[2560,512], index: 10, kind: input, shape index: {}]   ;;  %s22660_s11 = inlined_call_operand.hbm [shape: f32[1,512], index: 11, kind: input, shape index: {}]   ;;  %s22661_s12 = inlined_call_operand.vmem [shape: bf16[512,4], index: 12, kind: input, shape index: {}]   ;;  %s22662_s13 = inlined_call_operand.hbm [shape: f32[1,4], index: 13, kind: input, shape index: {}]   ;;  %s22663_s14 = inlined_call_operand.hbm [shape: f32[2,1,4], index: 14, kind: output, shape index: {}]  }
   0x1   :  { %22698 = sst [smem:[#allocation49_spill]] %s22651_s2 }
   0x2   :  { %22699 = sst [smem:[#allocation50_spill]] %s22652_s3 }
   0x3   :  { %22700 = sst [smem:[#allocation51_spill]] %s22653_s4 }
   0x4   :  { %22701 = sst [smem:[#allocation52_spill]] %s22654_s5 }
   0x5   :  { %22702 = sst [smem:[#allocation53_spill]] %s22656_s7 }
   0x6   :  { %22703 = sst [smem:[#allocation54_spill]] %s22658_s9 }
   0x7   :  { %19 = vsyncpa [#allocation4], 0 }
   0x8   :  { %20 = vsyncpa [#allocation7], 0 }
   0x9   :  { %21 = vsyncpa [#allocation10], 0 }
   0xa   :  { %22 = vsyncpa [#allocation13], 0 }
   0xb   :  { %23 = vsyncpa [#allocation16], 0 }
   0xc   :  { %24 = vsyncpa [#allocation19], 0 }
   0xd   :  { %25 = vsyncpa [#allocation5], 0 }
   0xe   :  { %27 = vsyncpa [#allocation5 + $0x1], 0  ;;  %s16457_s29 = smov 0   ;;  %s16459_s30 = smov 0  }
   0xf   :  { %s16461_s15 = smov 0   ;;  %s16463_s16 = smov 0  }
  0x10   :  { %s16465_s17 = smov 0   ;;  %s16467_s18 = smov 0  }
  0x11 LB: > { %22704 = sst [smem:[#allocation29_spill]] %s16342_s29  ;;  %s11130_s19 = sadd.s32 4294967295, %s16362_s18   ;;  %s16362_s18 = sphi %s16467_s18, %s33_s18   ;;  %s16358_s17 = sphi %s16465_s17, %s23303_s17   ;;  %s16354_s16 = sphi %s16463_s16, %s23302_s16   ;;  %s16350_s15 = sphi %s16461_s15, %s23301_s15   ;;  %s16346_s30 = sphi %s16459_s30, %s23305_s30   ;;  %s16342_s29 = sphi %s16457_s29, %s23304_s29  }
  0x12   : > { %22705 = sst [smem:[#allocation30_spill]] %s16350_s15  ;;  %s11131_s20 = sadd.s32 4294967294, %s16362_s18  }
  0x13   : > { %22706 = sst [smem:[#allocation31_spill]] %s16358_s17  ;;  %s45_s21 = sadd.s32 1, %s16358_s17 }
  0x14   : > { %22707 = sst [smem:[#allocation32_spill]] %s16362_s18  ;;  %s360_s22 = sadd.s32 1, %s16350_s15 }
  0x15   : > { %p47_p0 = scmp.ge.s32.totalorder %s45_s21, 2  ;;  %p370_p1 = scmp.ne.s32.totalorder %s16350_s15, %s16346_s30 }
  0x16   : > { %p371_p2 = scmp.eq.s32.totalorder %s11130_s19, 1  ;;  %p376_p3 = scmp.ne.s32.totalorder %s16346_s30, %s16342_s29 }
  0x17   : > { %s23307_s21 = smov (%p47_p0, %s45_s21), 0  ;;  %p377_p5 = scmp.eq.s32.totalorder %s11131_s20, 1 }
  0x18   : > { %22708 = sst [smem:[#allocation33_spill]] %s23307_s21  ;;  %p16497_p4 = por %p371_p2, %p370_p1 }
  0x19   : > { %s357_s24 = ssub.s32 %s16358_s17, %s23307_s21  ;;  %p11132_p6 = scmp.ge.s32.totalorder %s16362_s18, 1 }
  0x1a   : > { %s22709_s23 = scalar_select %p16497_p4, 1, 0 }
  0x1b   : > { %p358_p7 = scmp.eq.s32.totalorder %s357_s24, 0  ;;  %p16504_p8 = por %p377_p5, %p376_p3 }
  0x1c   : > { %22710 = sst [smem:[#allocation34_spill]] %s22709_s23  ;;  %p384_p9 = scmp.lt.s32.totalorder %s16362_s18, 3 }
  0x1d   : > { %s22711_s25 = scalar_select %p16504_p8, 1, 0 }
  0x1e   : > { %s16510_s26 = scalar_select %p358_p7, %s16350_s15, %s360_s22  }
  0x1f   : > { %22712 = sst [smem:[#allocation35_spill]] %s22711_s25  ;;  %p16512_p10 = pnand %p11132_p6, %p384_p9 }
  0x20   : > { %22713 = sst [smem:[#allocation36_spill]] %s16510_s26  ;;  %p16516_p11 = scmp.eq.s32.totalorder %s11130_s19, 0 }
  0x21   : > { %s22716_s3 = sld [smem:[#allocation50_spill]]  ;;  %p15090_p12 = pneg %p16512_p10 }
  0x22   : > { %s16364_s17 = smov [#allocation6]   ;;  %s22717_s5 = sld [smem:[#allocation52_spill]] }
  0x23   : > { %s412_s22 = sshll.u32 %s16364_s17, 4  ;;  %p16530_p13 = pnand %p16516_p11, %p15090_p12  ;;  %s413_s22 = int_to_ptr.vmem [resolvable:$true] %s412_s22 }
  0x24   : > { %s16365_s21 = smov [#allocation9]   ;;  %s22719_s7 = sld [smem:[#allocation53_spill]] }
  0x25   : > { %s438_s20 = sshll.u32 %s16365_s21, 4  ;;  %s16366_s26 = smov [#allocation12]   ;;  %s439_s20 = int_to_ptr.vmem [resolvable:$true] %s438_s20 }
  0x26   : > { %s22720_s9 = sld [smem:[#allocation54_spill]]  ;;  %s514_s21 = sshll.u32 %s22660_s11, 4  ;;  %s515_s21 = int_to_ptr.hbm [resolvable:$true] %s514_s21 }
  0x27   : > { %s410_s24 = sshll.u32 %s22716_s3, 4  ;;  %s16367_s3 = smov [#allocation15]   ;;  %s411_s24 = int_to_ptr.hbm [resolvable:$true] %s410_s24 }
  0x28   : > { %s436_s25 = sshll.u32 %s22717_s5, 4  ;;  %s464_s5 = sshll.u32 %s16366_s26, 4  ;;  %s437_s25 = int_to_ptr.hbm [resolvable:$true] %s436_s25  ;;  %s465_s5 = int_to_ptr.vmem [resolvable:$true] %s464_s5 }
  0x29   : > { %15096 = dma.hbm_to_vmem [thread:$0]  (!%p16530_p13), %s411_s24, 16, %s413_s22, [#allocation7]  }
  0x2a   : > { %s462_s15 = sshll.u32 %s22719_s7, 4  ;;  %s490_s17 = sshll.u32 %s16367_s3, 4  ;;  %s463_s15 = int_to_ptr.hbm [resolvable:$true] %s462_s15  ;;  %s491_s17 = int_to_ptr.vmem [resolvable:$true] %s490_s17 }
  0x2b   : > { %15102 = dma.hbm_to_vmem [thread:$0]  (!%p16530_p13), %s437_s25, 160, %s439_s20, [#allocation10]  }
  0x2c   : > { %s488_s23 = sshll.u32 %s22720_s9, 4  ;;  %s16368_s25 = smov [#allocation18]   ;;  %s489_s23 = int_to_ptr.hbm [resolvable:$true] %s488_s23 }
  0x2d   : > { %15108 = dma.hbm_to_vmem [thread:$0]  (!%p16530_p13), %s463_s15, 16, %s465_s5, [#allocation13]  }
  0x2e   : > { %15114 = dma.hbm_to_vmem [thread:$0]  (!%p16530_p13), %s489_s23, 160, %s491_s17, [#allocation16]  }
  0x2f   : > { %s516_s20 = sshll.u32 %s16368_s25, 4  ;;  %s22721_s2 = sld [smem:[#allocation49_spill]]  ;;  %s517_s20 = int_to_ptr.vmem [resolvable:$true] %s516_s20 }
  0x30   : > { %15120 = dma.hbm_to_vmem [thread:$0]  (!%p16530_p13), %s515_s21, 64, %s517_s20, [#allocation19]  }
  0x31   : > { %s16369_s15 = smov [#allocation3]   ;;  %s22722_s4 = sld [smem:[#allocation51_spill]] }
  0x32   : > { %s397_s26 = sshll.u32 %s16369_s15, 4  ;;  %s16370_s7 = smov 64   ;;  %s398_s26 = int_to_ptr.vmem [resolvable:$true] %s397_s26 }
  0x33   : > { %s16371_s23 = smov 4   ;;  %s16372_s21 = smov [#allocation8]  }
  0x34   : > { %s423_s17 = sshll.u32 %s16372_s21, 4  ;;  %s16373_s25 = smov 640   ;;  %s424_s17 = int_to_ptr.vmem [resolvable:$true] %s423_s17 }
  0x35   : > { %s395_s5 = sshll.u32 %s22721_s2, 4  ;;  %s16374_s20 = smov 40   ;;  %s396_s5 = int_to_ptr.hbm [resolvable:$true] %s395_s5 }
  0x36   : > { %15093 = dma.hbm_to_vmem [thread:$0]  (!%p16530_p13), %s396_s5, 256, %s398_s26, [#allocation4], %s16370_s7, %s16370_s7, %s16371_s23  }
  0x37   : > { %s421_s3 = sshll.u32 %s22722_s4, 4  ;;  %s447_s15 = sshll.u32 %s22655_s6, 4  ;;  %s422_s3 = int_to_ptr.hbm [resolvable:$true] %s421_s3  ;;  %s448_s15 = int_to_ptr.hbm [resolvable:$true] %s447_s15 }
  0x38   : > { %15099 = dma.hbm_to_vmem [thread:$0]  (!%p16530_p13), %s422_s3, 2560, %s424_s17, [#allocation7], %s16373_s25, %s16373_s25, %s16374_s20  }
  0x39   : > { %s16375_s24 = smov [#allocation11]   ;;  %s473_s5 = sshll.u32 %s22657_s8, 4  ;;  %s474_s5 = int_to_ptr.hbm [resolvable:$true] %s473_s5 }
  0x3a   : > { %s449_s22 = sshll.u32 %s16375_s24, 4  ;;  %s16376_s26 = smov [#allocation14]   ;;  %s450_s22 = int_to_ptr.vmem [resolvable:$true] %s449_s22 }
  0x3b   : > { %15105 = dma.hbm_to_vmem [thread:$0]  (!%p16530_p13), %s448_s15, 128, %s450_s22, [#allocation10], %s16370_s7, %s16370_s7, %s16371_s23  }
  0x3c   : > { %s475_s21 = sshll.u32 %s16376_s26, 4  ;;  %s499_s17 = sshll.u32 %s22659_s10, 4  ;;  %s476_s21 = int_to_ptr.vmem [resolvable:$true] %s475_s21  ;;  %s500_s17 = int_to_ptr.hbm [resolvable:$true] %s499_s17 }
  0x3d   : > { %15111 = dma.hbm_to_vmem [thread:$0]  (!%p16530_p13), %s474_s5, 2560, %s476_s21, [#allocation13], %s16373_s25, %s16373_s25, %s16374_s20  }
  0x3e   : > { %s16377_s29 = smov [#allocation17]   ;;  %s529_s24 = sshll.u32 %s22662_s13, 4  ;;  %s530_s24 = int_to_ptr.hbm [resolvable:$true] %s529_s24 }
  0x3f   : > { %s501_s18 = sshll.u32 %s16377_s29, 4  ;;  %s16378_s7 = smov 256   ;;  %s502_s18 = int_to_ptr.vmem [resolvable:$true] %s501_s18 }
  0x40   : > { %s16379_s23 = smov 16   ;;  %s16380_s15 = smov [#allocation20]  }
  0x41   : > { %15117 = dma.hbm_to_vmem [thread:$0]  (!%p16530_p13), %s500_s17, 81920, %s502_s18, [#allocation16], %s16378_s7, %s16378_s7, %s16379_s23  }
  0x42   : > { %s531_s9 = sshll.u32 %s16380_s15, 4  ;;  %570 = sbr.rel (%p16512_p10) target bundleno = 2127 (0x84f), region = 76  ;;  %s532_s9 = int_to_ptr.vmem [resolvable:$true] %s531_s9 }
  0x43   : > { %15123 = dma.hbm_to_vmem [thread:$0]  (!%p16530_p13), %s530_s24, 16, %s532_s9, [#allocation19]  }
  0x47   : > { %16313 = dma.done.wait (%p16516_p11), [#allocation4], 256  }
  0x48   : > { %16315 = vsyncadd (%p16516_p11), [#allocation4], 4294967040 }
  0x49   : > { %16317 = dma.done.wait (%p16516_p11), [#allocation7], 2576  }
  0x4a   : > { %16319 = vsyncadd (%p16516_p11), [#allocation7], 4294964720 }
  0x4b   : > { %16321 = dma.done.wait (%p16516_p11), [#allocation10], 288  }
  0x4c   : > { %16323 = vsyncadd (%p16516_p11), [#allocation10], 4294967008 }
  0x4d   : > { %16325 = dma.done.wait (%p16516_p11), [#allocation13], 2576  }
  0x4e   : > { %16327 = vsyncadd (%p16516_p11), [#allocation13], 4294964720 }
  0x4f   : > { %16329 = dma.done.wait (%p16516_p11), [#allocation16], 82080  }
  0x50   : > { %16331 = vsyncadd (%p16516_p11), [#allocation16], 4294885216 }
  0x51   : > { %16333 = dma.done.wait (%p16516_p11), [#allocation19], 80  }
  0x52   : > { %16335 = vsyncadd (%p16516_p11), [#allocation19], 4294967216  ;;  %p680_p0 = scmp.lt.s32.totalorder %s16354_s16, 1  ;;  %v14326_v0 = vld [vmem:[#allocation3 + $0x8] sm:$0xff]  ;;  %v14325_v1 = vld [vmem:[#allocation3] sm:$0xff]  ;;  %vm22673_vm0 = vcmask 261120   ;;  %s10932_s7 = scalar_lea.hbm %s22663_s14, %s16354_s16 }
  0x53   : > { %778 = vmatpush.bf16.msra.mxu0 %v14326_v0  ;;  %v16623_v6 = vld [vmem:[#allocation6] ss:$0 sm:$0xff]  ;;  %v11239_v9 = vld [vmem:[#allocation8 + $0x50] sm:$0xf]  ;;  %v14342_v10 = vld [vmem:[#allocation8 + $0x74] sm:$0xf0] }
  0x54   : > { %s16611_s27 = scalar_select %p680_p0, %s16354_s16, 1  ;;  %v14337_v11 = vld [vmem:[#allocation8 + $0x54] sm:$0xf]  ;;  %v11240_v13 = vor.u32 %v14342_v10, %v11239_v9  ;;  %v11241_v14 = vld [vmem:[#allocation8 + $0x78] sm:$0xf0] }
  0x55   : > { %v11247_v15 = vld [vmem:[#allocation8 + $0x58] sm:$0xf]  ;;  %v11244_v16 = vor.u32 %v14337_v11, %v11241_v14  ;;  %v14343_v17 = vld [vmem:[#allocation8 + $0x7c] sm:$0xf0]  ;;  %v14338_v18 = vld [vmem:[#allocation8 + $0x5c] sm:$0xf] }
  0x56   : > { %s14319_s19 = sshll.u32 %s16611_s27, 5  ;;  %v11249_v19 = vld [vmem:[#allocation8 + $0x80] sm:$0xf0]  ;;  %1127 = vmatpush.bf16.msra.mxu1 %v11240_v13  ;;  %v11248_v20 = vor.u32 %v14343_v17, %v11247_v15  ;;  %v11199_v22 = vld [vmem:[#allocation8] sm:$0xf]  ;;  %s677_s18 = sand.u32 1, %s16346_s30  }
  0x57   : > { %s687_s22 = scalar_lea.vmem %s22649_s0, %s14319_s19  ;;  %779 = vmatpush.bf16.msra.mxu0 %v14325_v1  ;;  %v11252_v21 = vor.u32 %v14338_v18, %v11249_v19  ;;  %1156 = vmatpush.bf16.msra.mxu2 %v11244_v16  ;;  %v14332_v23 = vld [vmem:[#allocation8 + $0x24] sm:$0xf0]  ;;  %v14327_v24 = vld [vmem:[#allocation8 + $0x4] sm:$0xf]  ;;  %v11201_v26 = vld [vmem:[#allocation8 + $0x28] sm:$0xf0]  ;;  %s16804_s26 = scalar_lea.vmem %s22650_s1, %s14319_s19 }
  0x58   : > { %v14321_v2 = vld [vmem:[%s687_s22] sm:$0xff]  ;;  %v14322_v3 = vld [vmem:[%s687_s22 + $0x8] sm:$0xff]  ;;  %v14323_v4 = vld [vmem:[%s687_s22 + $0x10] sm:$0xff]  ;;  %1185 = vmatpush.bf16.msra.mxu3 %v11248_v20  ;;  %v11200_v25 = vor.u32 %v14332_v23, %v11199_v22  ;;  %v11204_v30 = vor.u32 %v14327_v24, %v11201_v26  ;;  %s678_s23 = scalar_lea.vmem [#allocation21], %s677_s18  ;;  %s10936_s9 = sshll.u32 %s10932_s7, 4  ;;  %s10937_s9 = int_to_ptr.hbm [resolvable:$true] %s10936_s9 }
  0x59   : > { %v14324_v5 = vld [vmem:[%s687_s22 + $0x18] sm:$0xff]  ;;  %v11207_v27 = vld [vmem:[#allocation8 + $0x8] sm:$0xf]  ;;  %v14328_v32 = vld [vmem:[#allocation8 + $0xc] sm:$0xf]  ;;  %s10934_s15 = sshll.u32 %s678_s23, 4  ;;  %s10935_s15 = int_to_ptr.vmem [resolvable:$true] %s10934_s15 }
  0x5a   : > { %11185 = vmatmul.msk.bf16.vlgmr.msra.gmra.mxu0 %vm22673_vm0, %v14321_v2  ;;  %v14333_v28 = vld [vmem:[#allocation8 + $0x2c] sm:$0xf0]  ;;  %v11209_v33 = vld [vmem:[#allocation8 + $0x30] sm:$0xf0]  ;;  %1128 = vmatpush.bf16.msra.mxu1 %v11200_v25  ;;  %s10924_s27 = scalar_lea.sflag [#allocation5], %s677_s18  ;;  %s16274_s19 = sshra.s32 %s10937_s9, 4  ;;  %s16275_s19 = int_to_ptr.hbm [resolvable:$true] %s16274_s19 }
  0x5b   : > { %1214 = vmatpush.bf16.msrb.mxu0 %v11252_v21  ;;  %v11208_v31 = vor.u32 %v14333_v28, %v11207_v27  ;;  %v11212_v35 = vor.u32 %v14328_v32, %v11209_v33  ;;  %1157 = vmatpush.bf16.msra.mxu2 %v11204_v30  ;;  %v14330_v30 = vld [vmem:[#allocation8 + $0x1c] sm:$0xf]  ;;  %s16276_s25 = scalar_lea.hbm %s16275_s19, 1  ;;  %s16280_s16 = scalar_lea.hbm %s22663_s14, 2 }
  0x5c   : > { %p16277_p1 = scmp.ne.s32.totalorder %s16275_s19, %s16276_s25  ;;  %p16281_p5 = scmp.lt.s32.totalorder %s16275_s19, %s22663_s14 }
  0x5d   : > { %1186 = vmatpush.bf16.msra.mxu3 %v11208_v31  ;;  %p16282_p6 = scmp.lt.s32.totalorder %s16280_s16, %s16276_s25 }
  0x5e   : > { %p16278_p2 = pnand %p16277_p1, %p16497_p4 }
  0x5f   : > { %1215 = vmatpush.bf16.msrb.mxu0 %v11212_v35  ;;  %p16283_p7 = por %p16282_p6, %p16281_p5 }
  0x60   : > { %p16279_p3 = pneg %p16278_p2 }
  0x62   : > { %p16284_p9 = pnand %p16283_p7, %p16279_p3 }
  0x6a   : > { %11186 = vmatmul.msk.bf16.gmra.mxu0 %vm22673_vm0, %v14322_v3 }
  0x7a   : > { %11187 = vmatmul.msk.bf16.gmra.mxu0 %vm22673_vm0, %v14323_v4 }
  0x8a   : > { %11188 = vmatmul.msk.bf16.gmra.mxu0 %vm22673_vm0, %v14324_v5 }
  0xd7   : > { %v781_v7 = vpop.f32.mrf.mxu0 }
  0xd8   : > { %v16626_v8 = vadd.f32 %v16623_v6, %v781_v7 }
  0xda   : > { %v11189_v12 = vmul.f32 -1.442695, %v16626_v8 }
  0xdc   : > { %15219 = vpow2.f32 %v11189_v12 }
  0xdf   : > { %v783_v29 = vpop.f32.mrf.mxu0 }
  0xe0   : > { %v16630_v34 = vadd.f32 %v16623_v6, %v783_v29 }
  0xe2   : > { %v15220_v36 = vpop.eup %15219  ;;  %v11190_v37 = vmul.f32 -1.442695, %v16630_v34 }
  0xe3   : > { %v825_v38 = vadd.f32 1.0, %v15220_v36 }
  0xe4   : > { %15221 = vpow2.f32 %v11190_v37 }
  0xe5   : > { %15223 = vrcp.f32 %v825_v38  ;;  %v844_v56 = vand.u32 2147483648, %v825_v38  ;;  %vm838_vm2 = vweird.f32 %v825_v38  ;;  %v842_v57 = vand.u32 2147483647, %v825_v38 }
  0xe7   : > { %v786_v39 = vpop.f32.mrf.mxu0  ;;  %v845_v2 = vor.u32 1.1754944e-38, %v844_v56  ;;  %vm843_vm5 = vcmp.eq.f32.partialorder %v842_v57, 8.507059e+37 }
  0xe8   : > { %v16634_v40 = vadd.f32 %v16623_v6, %v786_v39 }
  0xea   : > { %v15222_v41 = vpop.eup %15221  ;;  %v11191_v42 = vmul.f32 -1.442695, %v16634_v40 }
  0xeb   : > { %v15224_v43 = vpop.eup %15223  ;;  %v826_v44 = vadd.f32 1.0, %v15222_v41 }
  0xec   : > { %v834_v45 = vmul.f32 %v15224_v43, %v825_v38  ;;  %15225 = vpow2.f32 %v11191_v42  ;;  %vm839_vm1 = vweird.f32 %v15224_v43 }
  0xed   : > { %15227 = vrcp.f32 %v826_v44  ;;  %vm16644_vm3 = vmor %vm838_vm2, %vm839_vm1  ;;  %v857_v60 = vand.u32 2147483647, %v826_v44  ;;  %v859_v61 = vand.u32 2147483648, %v826_v44  ;;  %vm853_vm6 = vweird.f32 %v826_v44 }
  0xee   : > { %v835_v46 = vsub.f32 1.0, %v834_v45 }
  0xef   : > { %v788_v47 = vpop.f32.mrf.mxu0  ;;  %v860_v10 = vor.u32 1.1754944e-38, %v859_v61  ;;  %vm858_vm8 = vcmp.eq.f32.partialorder %v857_v60, 8.507059e+37 }
  0xf0   : > { %v836_v48 = vmul.f32 %v15224_v43, %v835_v46  ;;  %v16638_v49 = vadd.f32 %v16623_v6, %v788_v47 }
  0xf2   : > { %v15226_v50 = vpop.eup %15225  ;;  %v11192_v51 = vmul.f32 -1.442695, %v16638_v49  ;;  %v837_v54 = vadd.f32 %v15224_v43, %v836_v48 }
  0xf3   : > { %v15228_v52 = vpop.eup %15227  ;;  %v16641_v53 = vadd.f32 1.0, %v15226_v50 }
  0xf4   : > { %v849_v55 = vmul.f32 %v15228_v52, %v826_v44  ;;  %15229 = vpow2.f32 %v11192_v51  ;;  %v841_v63 = vsel %vm16644_vm3, %v15224_v43, %v837_v54  ;;  %vm854_vm4 = vweird.f32 %v15228_v52 }
  0xf5   : > { %15231 = vrcp.f32 %v16641_v53  ;;  %v846_v9 = vsel %vm843_vm5, %v845_v2, %v841_v63  ;;  %vm855_vm7 = vmor %vm853_vm6, %vm854_vm4  ;;  %v874_v27 = vand.u32 2147483648, %v16641_v53  ;;  %vm868_vm10 = vweird.f32 %v16641_v53  ;;  %v14339_v2 = vld [vmem:[#allocation8 + $0x64] sm:$0xf] }
  0xf6   : > { %v850_v58 = vsub.f32 1.0, %v849_v55  ;;  %v953_v15 = vmul.f32 %v846_v9, %v16626_v8  ;;  %v872_v28 = vand.u32 2147483647, %v16641_v53  ;;  %v14340_v9 = vld [vmem:[#allocation8 + $0x6c] sm:$0xf] }
  0xf7   : > { %v791_v62 = vpop.f32.mrf.mxu0  ;;  %v875_v37 = vor.u32 1.1754944e-38, %v874_v27  ;;  %v11223_v27 = vld [vmem:[#allocation8 + $0x18] sm:$0xf] }
  0xf8   : > { %v851_v0 = vmul.f32 %v15228_v52, %v850_v58  ;;  %v16651_v1 = vadd.f32 %v16623_v6, %v791_v62  ;;  %vm873_vm13 = vcmp.eq.f32.partialorder %v872_v28, 8.507059e+37  ;;  %v14344_v62 = vld [vmem:[#allocation8 + $0x84] sm:$0xf0] }
  0xfa   : > { %v15230_v3 = vpop.eup %15229  ;;  %v852_v4 = vadd.f32 %v15228_v52, %v851_v0  ;;  %v11193_v5 = vmul.f32 -1.442695, %v16651_v1 }
  0xfb   : > { %v15232_v7 = vpop.eup %15231  ;;  %v828_v11 = vadd.f32 1.0, %v15230_v3  ;;  %v11257_v3 = vld [vmem:[#allocation8 + $0x88] sm:$0xf0] }
  0xfc   : > { %v856_v12 = vsel %vm855_vm7, %v15228_v52, %v852_v4  ;;  %v864_v13 = vmul.f32 %v15232_v7, %v16641_v53  ;;  %15233 = vpow2.f32 %v11193_v5  ;;  %vm869_vm9 = vweird.f32 %v15232_v7  ;;  %v11263_v4 = vld [vmem:[#allocation8 + $0x68] sm:$0xf] }
  0xfd   : > { %v861_v14 = vsel %vm858_vm8, %v860_v10, %v856_v12  ;;  %15235 = vrcp.f32 %v828_v11  ;;  %vm16677_vm11 = vmor %vm868_vm10, %vm869_vm9  ;;  %v887_v31 = vand.u32 2147483647, %v828_v11  ;;  %v889_v32 = vand.u32 2147483648, %v828_v11 }
  0xfe   : > { %v954_v16 = vmul.f32 %v861_v14, %v16630_v34  ;;  %v865_v17 = vsub.f32 1.0, %v864_v13  ;;  %vm883_vm14 = vweird.f32 %v828_v11  ;;  %v11265_v13 = vld [vmem:[#allocation8 + $0x90] sm:$0xf0]  ;;  %v11215_v14 = vld [vmem:[#allocation8 + $0x10] sm:$0xf] }
  0xff   : > { %v793_v18 = vpop.f32.mrf.mxu0  ;;  %v890_v44 = vor.u32 1.1754944e-38, %v889_v32  ;;  %vm888_vm1 = vcmp.eq.f32.partialorder %v887_v31, 8.507059e+37  ;;  %v11225_v31 = vld [vmem:[#allocation8 + $0x40] sm:$0xf0] }
 0x100   : > { %v16657_v19 = vpack.c.bf16 %v954_v16, %v953_v15  ;;  %v866_v20 = vmul.f32 %v15232_v7, %v865_v17  ;;  %v16660_v21 = vadd.f32 %v16623_v6, %v793_v18  ;;  %v11260_v17 = vor.u32 %v14339_v2, %v11257_v3  ;;  %v14351_v15 = vld [vmem:[#allocation11] sm:$0xff] }
 0x102   : > { %v15234_v22 = vpop.eup %15233  ;;  %v11194_v23 = vmul.f32 -1.442695, %v16660_v21  ;;  %11277 = vmatmul.msk.bf16.vlgmr.msra.gmra.mxu1 %vm22673_vm0, %v16657_v19  ;;  %11281 = vmatmul.msk.bf16.vlgmr.msra.gmra.mxu2 %vm22673_vm0, %v16657_v19  ;;  %v867_v25 = vadd.f32 %v15232_v7, %v866_v20  ;;  %v11268_v20 = vor.u32 %v14340_v9, %v11265_v13 }
 0x103   : > { %v15236_v8 = vpop.eup %15235  ;;  %v16667_v24 = vadd.f32 1.0, %v15234_v22  ;;  %11285 = vmatmul.msk.bf16.vlgmr.msra.gmra.mxu3 %vm22673_vm0, %v16657_v19  ;;  %11289 = vmatmul.msk.bf16.vlgmr.msrb.gmra.mxu0 %vm22673_vm0, %v16657_v19  ;;  %v14334_v22 = vld [vmem:[#allocation8 + $0x34] sm:$0xf0] }
 0x104   : > { %v879_v26 = vmul.f32 %v15236_v8, %v828_v11  ;;  %15237 = vpow2.f32 %v11194_v23  ;;  %v871_v34 = vsel %vm16677_vm11, %v15232_v7, %v867_v25  ;;  %vm884_vm12 = vweird.f32 %v15236_v8  ;;  %v14345_v7 = vld [vmem:[#allocation8 + $0x8c] sm:$0xf0]  ;;  %v14329_v23 = vld [vmem:[#allocation8 + $0x14] sm:$0xf]  ;;  %1272 = vmatpush.bf16.msrb.mxu2 %v11260_v17  ;;  %1330 = vmatpush.bf16.msra.mxu0 %v11268_v20  ;;  %v985_v17 = vld [vmem:[#allocation9] sm:$0xff] }
 0x105   : > { %15239 = vrcp.f32 %v16667_v24  ;;  %v876_v43 = vsel %vm873_vm13, %v875_v37, %v871_v34  ;;  %vm885_vm15 = vmor %vm883_vm14, %vm884_vm12  ;;  %v902_v53 = vand.u32 2147483647, %v16667_v24  ;;  %v904_v59 = vand.u32 2147483648, %v16667_v24 }
 0x106   : > { %v880_v29 = vsub.f32 1.0, %v879_v26  ;;  %v955_v50 = vmul.f32 %v876_v43, %v16634_v40  ;;  %vm898_vm4 = vweird.f32 %v16667_v24  ;;  %v11264_v18 = vor.u32 %v14345_v7, %v11263_v4  ;;  %v11217_v26 = vld [vmem:[#allocation8 + $0x38] sm:$0xf0]  ;;  %v14341_v4 = vld [vmem:[#allocation8 + $0x74] sm:$0xf] }
 0x107   : > { %v796_v33 = vpop.f32.mrf.mxu0  ;;  %vm16709_vm2 = vcmp.eq.f32.partialorder %v902_v53, 8.507059e+37  ;;  %v905_v10 = vor.u32 1.1754944e-38, %v904_v59  ;;  %v11216_v25 = vor.u32 %v14334_v22, %v11215_v14  ;;  %v11220_v28 = vor.u32 %v14329_v23, %v11217_v26  ;;  %v11273_v7 = vld [vmem:[#allocation8 + $0x98] sm:$0xf0]  ;;  %v11233_v14 = vld [vmem:[#allocation8 + $0x48] sm:$0xf0] }
 0x108   : > { %v881_v35 = vmul.f32 %v15236_v8, %v880_v29  ;;  %v16684_v36 = vadd.f32 %v16623_v6, %v796_v33  ;;  %1301 = vmatpush.bf16.msrb.mxu3 %v11264_v18  ;;  %v14335_v29 = vld [vmem:[#allocation8 + $0x3c] sm:$0xf0]  ;;  %v11276_v9 = vor.u32 %v14341_v4, %v11273_v7  ;;  %v16806_v18 = vperm.slane %v985_v17, 0 }
 0x109   : > { %v11224_v34 = vor.u32 %v14335_v29, %v11223_v27  ;;  %1273 = vmatpush.bf16.msrb.mxu2 %v11220_v28  ;;  %v16808_v20 = vperm.slane %v985_v17, 3  ;;  %v14347_v23 = vld [vmem:[%s16804_s26] sm:$0xff]  ;;  %v16822_v27 = vperm.slane %v985_v17, 1  ;;  %v16826_v29 = vperm.slane %v985_v17, 2 }
 0x10a   : > { %v15238_v38 = vpop.eup %15237  ;;  %v882_v39 = vadd.f32 %v15236_v8, %v881_v35  ;;  %v11195_v41 = vmul.f32 -1.442695, %v16684_v36  ;;  %v11228_v35 = vor.u32 %v14330_v30, %v11225_v31 }
 0x10b   : > { %v16687_v42 = vpop.eup %15239  ;;  %v16689_v45 = vadd.f32 1.0, %v15238_v38 }
 0x10c   : > { %v886_v46 = vsel %vm885_vm15, %v15236_v8, %v882_v39  ;;  %v894_v47 = vmul.f32 %v16687_v42, %v16667_v24  ;;  %15241 = vpow2.f32 %v11195_v41  ;;  %vm899_vm3 = vweird.f32 %v16687_v42  ;;  %1302 = vmatpush.bf16.msrb.mxu3 %v11224_v34  ;;  %1331 = vmatpush.bf16.msra.mxu0 %v11228_v35 }
 0x10d   : > { %v891_v48 = vsel %vm888_vm1, %v890_v44, %v886_v46  ;;  %15243 = vrcp.f32 %v16689_v45  ;;  %v917_v5 = vand.u32 2147483647, %v16689_v45  ;;  %vm16727_vm5 = vmor %vm898_vm4, %vm899_vm3  ;;  %v919_v16 = vand.u32 2147483648, %v16689_v45  ;;  %1388 = vmatpush.bf16.msra.mxu2 %v11276_v9 }
 0x10e   : > { %v956_v51 = vmul.f32 %v891_v48, %v16638_v49  ;;  %v895_v52 = vsub.f32 1.0, %v894_v47  ;;  %vm913_vm7 = vweird.f32 %v16689_v45  ;;  %vm3226_vm3 = vcmask 130048  }
 0x10f   : > { %v798_v54 = vpop.f32.mrf.mxu0  ;;  %v920_v39 = vor.u32 1.1754944e-38, %v919_v16  ;;  %vm918_vm9 = vcmp.eq.f32.partialorder %v917_v5, 8.507059e+37 }
 0x110   : > { %v16697_v55 = vpack.c.bf16 %v956_v51, %v955_v50  ;;  %v896_v56 = vmul.f32 %v16687_v42, %v895_v52  ;;  %v16701_v57 = vadd.f32 %v16623_v6, %v798_v54  ;;  %v11255_v6 = vld [vmem:[#allocation8 + $0x60] sm:$0xf]  ;;  %3246 = vmatpush.bf16.msra.mxu3 %v14351_v15 }
 0x111   : > { %v11256_v12 = vor.u32 %v14344_v62, %v11255_v6 }
 0x112   : > { %v15242_v58 = vpop.eup %15241  ;;  %v11196_v60 = vmul.f32 -1.442695, %v16701_v57  ;;  %11278 = vmatmul.msk.bf16.gmra.mxu1 %vm22673_vm0, %v16697_v55  ;;  %11282 = vmatmul.msk.bf16.gmra.mxu2 %vm22673_vm0, %v16697_v55  ;;  %v897_v63 = vadd.f32 %v16687_v42, %v896_v56 }
 0x113   : > { %v15244_v40 = vpop.eup %15243  ;;  %v16713_v61 = vadd.f32 1.0, %v15242_v58  ;;  %11286 = vmatmul.msk.bf16.gmra.mxu3 %vm22673_vm0, %v16697_v55  ;;  %11290 = vmatmul.msk.bf16.gmra.mxu0 %vm22673_vm0, %v16697_v55 }
 0x114   : > { %v909_v0 = vmul.f32 %v15244_v40, %v16689_v45  ;;  %15245 = vpow2.f32 %v11196_v60  ;;  %v901_v8 = vsel %vm16727_vm5, %v16687_v42, %v897_v63  ;;  %vm914_vm6 = vweird.f32 %v15244_v40  ;;  %1243 = vmatpush.bf16.msrb.mxu1 %v11256_v12  ;;  %v14331_v12 = vld [vmem:[#allocation8 + $0x24] sm:$0xf] }
 0x115   : > { %15247 = vrcp.f32 %v16713_v61  ;;  %v906_v38 = vsel %vm16709_vm2, %v905_v10, %v901_v8  ;;  %vm915_vm8 = vmor %vm913_vm7, %vm914_vm6  ;;  %v934_v52 = vand.u32 2147483648, %v16713_v61  ;;  %vm928_vm11 = vweird.f32 %v16713_v61  ;;  %v11231_v10 = vld [vmem:[#allocation8 + $0x20] sm:$0xf] }
 0x116   : > { %v910_v11 = vsub.f32 1.0, %v909_v0  ;;  %v957_v45 = vmul.f32 %v906_v38, %v16651_v1  ;;  %v932_v53 = vand.u32 2147483647, %v16713_v61  ;;  %v11236_v16 = vor.u32 %v14331_v12, %v11233_v14 }
 0x118   : > { %v911_v24 = vmul.f32 %v15244_v40, %v910_v11  ;;  %1244 = vmatpush.bf16.msrb.mxu1 %v11216_v25  ;;  %vm933_vm14 = vcmp.eq.f32.partialorder %v932_v53, 8.507059e+37  ;;  %v14336_v11 = vld [vmem:[#allocation8 + $0x44] sm:$0xf0]  ;;  %1389 = vmatpush.bf16.msra.mxu2 %v11236_v16 }
 0x119   : > { %v11232_v13 = vor.u32 %v14336_v11, %v11231_v10 }
 0x11a   : > { %v15246_v32 = vpop.eup %15245  ;;  %v912_v33 = vadd.f32 %v15244_v40, %v911_v24 }
 0x11b   : > { %v15248_v37 = vpop.eup %15247  ;;  %v832_v41 = vadd.f32 1.0, %v15246_v32 }
 0x11c   : > { %v916_v42 = vsel %vm915_vm8, %v15244_v40, %v912_v33  ;;  %v924_v43 = vmul.f32 %v15248_v37, %v16713_v61  ;;  %vm929_vm10 = vweird.f32 %v15248_v37  ;;  %v935_v40 = vor.u32 1.1754944e-38, %v934_v52 }
 0x11d   : > { %v921_v44 = vsel %vm918_vm9, %v920_v39, %v916_v42  ;;  %15249 = vrcp.f32 %v832_v41  ;;  %vm930_vm12 = vmor %vm928_vm11, %vm929_vm10  ;;  %v949_v56 = vand.u32 2147483648, %v832_v41  ;;  %v947_v60 = vand.u32 2147483647, %v832_v41 }
 0x11e   : > { %v958_v46 = vmul.f32 %v921_v44, %v16660_v21  ;;  %v925_v47 = vsub.f32 1.0, %v924_v43  ;;  %vm943_vm15 = vweird.f32 %v832_v41 }
 0x11f   : > { %v950_v62 = vor.u32 1.1754944e-38, %v949_v56  ;;  %vm948_vm2 = vcmp.eq.f32.partialorder %v947_v60, 8.507059e+37 }
 0x120   : > { %v16742_v48 = vpack.c.bf16 %v958_v46, %v957_v45  ;;  %v926_v50 = vmul.f32 %v15248_v37, %v925_v47 }
 0x122   : > { %11279 = vmatmul.msk.bf16.gmra.mxu1 %vm22673_vm0, %v16742_v48  ;;  %11283 = vmatmul.msk.bf16.gmra.mxu2 %vm22673_vm0, %v16742_v48  ;;  %v927_v1 = vadd.f32 %v15248_v37, %v926_v50 }
 0x123   : > { %v15250_v51 = vpop.eup %15249  ;;  %11287 = vmatmul.msk.bf16.gmra.mxu3 %vm22673_vm0, %v16742_v48  ;;  %11291 = vmatmul.msk.bf16.gmra.mxu0 %vm22673_vm0, %v16742_v48 }
 0x124   : > { %v939_v21 = vmul.f32 %v15250_v51, %v832_v41  ;;  %v931_v58 = vsel %vm930_vm12, %v15248_v37, %v927_v1  ;;  %vm944_vm13 = vweird.f32 %v15250_v51 }
 0x125   : > { %v936_v6 = vsel %vm933_vm14, %v935_v40, %v931_v58  ;;  %vm945_vm1 = vmor %vm943_vm15, %vm944_vm13 }
 0x126   : > { %v940_v54 = vsub.f32 1.0, %v939_v21  ;;  %v959_v2 = vmul.f32 %v936_v6, %v16684_v36  ;;  %v11271_v36 = vld [vmem:[#allocation8 + $0x70] sm:$0xf] }
 0x128   : > { %v941_v59 = vmul.f32 %v15250_v51, %v940_v54 }
 0x12a   : > { %v942_v49 = vadd.f32 %v15250_v51, %v941_v59 }
 0x12c   : > { %v946_v63 = vsel %vm945_vm1, %v15250_v51, %v942_v49  ;;  %v14348_v51 = vld [vmem:[%s16804_s26 + $0x8] sm:$0xff] }
 0x12d   : > { %v951_v0 = vsel %vm948_vm2, %v950_v62, %v946_v63 }
 0x12e   : > { %v960_v61 = vmul.f32 %v951_v0, %v16701_v57  ;;  %v14346_v57 = vld [vmem:[#allocation8 + $0x94] sm:$0xf0] }
 0x12f   : > { %v11272_v5 = vor.u32 %v14346_v57, %v11271_v36 }
 0x130   : > { %v16757_v3 = vpack.c.bf16 %v960_v61, %v959_v2 }
 0x131   : > { %1359 = vmatpush.bf16.msra.mxu1 %v11272_v5 }
 0x132   : > { %11280 = vmatmul.msk.bf16.gmra.mxu1 %vm22673_vm0, %v16757_v3  ;;  %11284 = vmatmul.msk.bf16.gmra.mxu2 %vm22673_vm0, %v16757_v3 }
 0x133   : > { %11288 = vmatmul.msk.bf16.gmra.mxu3 %vm22673_vm0, %v16757_v3  ;;  %11292 = vmatmul.msk.bf16.gmra.mxu0 %vm22673_vm0, %v16757_v3 }
 0x135   : > { %1360 = vmatpush.bf16.msra.mxu1 %v11232_v13 }
 0x142   : > { %11293 = vmatmul.msk.bf16.vlgmr.msrb.gmra.mxu1 %vm22673_vm0, %v16657_v19  ;;  %11297 = vmatmul.msk.bf16.vlgmr.msrb.gmra.mxu2 %vm22673_vm0, %v16657_v19 }
 0x143   : > { %11301 = vmatmul.msk.bf16.vlgmr.msrb.gmra.mxu3 %vm22673_vm0, %v16657_v19  ;;  %11305 = vmatmul.msk.bf16.vlgmr.msra.gmra.mxu0 %vm22673_vm0, %v16657_v19 }
 0x152   : > { %11294 = vmatmul.msk.bf16.gmra.mxu1 %vm22673_vm0, %v16697_v55  ;;  %11298 = vmatmul.msk.bf16.gmra.mxu2 %vm22673_vm0, %v16697_v55 }
 0x153   : > { %11302 = vmatmul.msk.bf16.gmra.mxu3 %vm22673_vm0, %v16697_v55  ;;  %11306 = vmatmul.msk.bf16.gmra.mxu0 %vm22673_vm0, %v16697_v55 }
 0x162   : > { %11295 = vmatmul.msk.bf16.gmra.mxu1 %vm22673_vm0, %v16742_v48  ;;  %11299 = vmatmul.msk.bf16.gmra.mxu2 %vm22673_vm0, %v16742_v48 }
 0x163   : > { %11303 = vmatmul.msk.bf16.gmra.mxu3 %vm22673_vm0, %v16742_v48  ;;  %11307 = vmatmul.msk.bf16.gmra.mxu0 %vm22673_vm0, %v16742_v48 }
 0x172   : > { %11296 = vmatmul.msk.bf16.gmra.mxu1 %vm22673_vm0, %v16757_v3  ;;  %11300 = vmatmul.msk.bf16.gmra.mxu2 %vm22673_vm0, %v16757_v3 }
 0x173   : > { %11304 = vmatmul.msk.bf16.gmra.mxu3 %vm22673_vm0, %v16757_v3  ;;  %11308 = vmatmul.msk.bf16.gmra.mxu0 %vm22673_vm0, %v16757_v3 }
 0x17f   : > { %v1130_v22 = vpop.f32.mrf.mxu1 }
 0x180   : > { %v16812_v8 = vadd.f32 %v1130_v22, %v16806_v18  ;;  %v1217_v24 = vpop.f32.mrf.mxu0 }
 0x181   : > { %v16815_v25 = vadd.f32 %v1217_v24, %v16808_v20 }
 0x182   : > { %v11317_v26 = vmul.f32 -1.442695, %v16812_v8  ;;  %11309 = vmatmul.msk.bf16.vlgmr.msra.gmra.mxu1 %vm22673_vm0, %v16657_v19  ;;  %11313 = vmatmul.msk.bf16.vlgmr.msra.gmra.mxu2 %vm22673_vm0, %v16657_v19 }
 0x183   : > { %v11320_v28 = vmul.f32 -1.442695, %v16815_v25  ;;  %11417 = vmatmul.msk.bf16.vlgmr.msra.gmra.mxu3 %vm3226_vm3, %v14347_v23 }
 0x184   : > { %15251 = vpow2.f32 %v11317_v26 }
 0x185   : > { %15253 = vpow2.f32 %v11320_v28  ;;  %v1159_v30 = vpop.f32.mrf.mxu2 }
 0x186   : > { %v16829_v31 = vadd.f32 %v1159_v30, %v16822_v27  ;;  %v1188_v32 = vpop.f32.mrf.mxu3 }
 0x187   : > { %v16832_v33 = vadd.f32 %v1188_v32, %v16826_v29  ;;  %v1132_v34 = vpop.f32.mrf.mxu1 }
 0x188   : > { %v11318_v19 = vmul.f32 -1.442695, %v16829_v31  ;;  %v16836_v35 = vadd.f32 %v1132_v34, %v16806_v18  ;;  %v1219_v37 = vpop.f32.mrf.mxu0 }
 0x189   : > { %v11319_v38 = vmul.f32 -1.442695, %v16832_v33  ;;  %v16840_v39 = vadd.f32 %v1219_v37, %v16808_v20 }
 0x18a   : > { %v15252_v41 = vpop.eup %15251  ;;  %15255 = vpow2.f32 %v11318_v19  ;;  %v11327_v42 = vmul.f32 -1.442695, %v16836_v35 }
 0x18b   : > { %v15254_v43 = vpop.eup %15253  ;;  %v1651_v44 = vadd.f32 1.0, %v15252_v41  ;;  %15257 = vpow2.f32 %v11319_v38  ;;  %v11330_v45 = vmul.f32 -1.442695, %v16840_v39 }
 0x18c   : > { %v16844_v46 = vadd.f32 1.0, %v15254_v43  ;;  %15259 = vpow2.f32 %v11327_v42 }
 0x18d   : > { %15261 = vrcp.f32 %v1651_v44  ;;  %v1161_v47 = vpop.f32.mrf.mxu2  ;;  %v1742_v54 = vand.u32 2147483648, %v1651_v44  ;;  %v1740_v59 = vand.u32 2147483647, %v1651_v44  ;;  %vm1736_vm4 = vweird.f32 %v1651_v44 }
 0x18e   : > { %15263 = vrcp.f32 %v16844_v46  ;;  %v16848_v50 = vadd.f32 %v1161_v47, %v16822_v27  ;;  %v1190_v6 = vpop.f32.mrf.mxu3  ;;  %vm1781_vm5 = vweird.f32 %v16844_v46  ;;  %v1785_v63 = vand.u32 2147483647, %v16844_v46 }
 0x18f   : > { %15265 = vpow2.f32 %v11330_v45  ;;  %v1135_v0 = vpop.f32.mrf.mxu1  ;;  %v1743_v36 = vor.u32 1.1754944e-38, %v1742_v54  ;;  %v1787_v57 = vand.u32 2147483648, %v16844_v46  ;;  %vm16875_vm6 = vcmp.eq.f32.partialorder %v1740_v59, 8.507059e+37 }
 0x190   : > { %v15256_v1 = vpop.eup %15255  ;;  %v11328_v60 = vmul.f32 -1.442695, %v16848_v50  ;;  %v1222_v2 = vpop.f32.mrf.mxu0  ;;  %v16882_v10 = vadd.f32 %v1190_v6, %v16826_v29  ;;  %v16887_v12 = vadd.f32 %v1135_v0, %v16806_v18  ;;  %vm16906_vm9 = vcmp.eq.f32.partialorder %v1785_v63, 8.507059e+37  ;;  %v14349_v0 = vld [vmem:[%s16804_s26 + $0x10] sm:$0xff] }
 0x191   : > { %v15258_v21 = vpop.eup %15257  ;;  %v16851_v52 = vadd.f32 1.0, %v15256_v1  ;;  %v16890_v13 = vadd.f32 %v1222_v2, %v16808_v20  ;;  %v1788_v19 = vor.u32 1.1754944e-38, %v1787_v57 }
 0x192   : > { %v15260_v53 = vpop.eup %15259  ;;  %v16853_v56 = vadd.f32 1.0, %v15258_v21  ;;  %11310 = vmatmul.msk.bf16.gmra.mxu1 %vm22673_vm0, %v16697_v55  ;;  %11314 = vmatmul.msk.bf16.gmra.mxu2 %vm22673_vm0, %v16697_v55  ;;  %v11329_v32 = vmul.f32 -1.442695, %v16882_v10  ;;  %v11337_v41 = vmul.f32 -1.442695, %v16887_v12 }
 0x193   : > { %v16859_v58 = vpop.eup %15261  ;;  %15267 = vrcp.f32 %v16851_v52  ;;  %11418 = vmatmul.msk.bf16.gmra.mxu3 %vm3226_vm3, %v14348_v51  ;;  %v16873_v4 = vadd.f32 1.0, %v15260_v53  ;;  %v1757_v16 = vand.u32 2147483648, %v16851_v52  ;;  %v1755_v38 = vand.u32 2147483647, %v16851_v52 }
 0x194   : > { %v16864_v40 = vpop.eup %15263  ;;  %v1732_v49 = vmul.f32 %v16859_v58, %v1651_v44  ;;  %15269 = vrcp.f32 %v16853_v56  ;;  %vm1737_vm7 = vweird.f32 %v16859_v58  ;;  %v1772_v24 = vand.u32 2147483648, %v16853_v56 }
 0x195   : > { %v15266_v62 = vpop.eup %15265  ;;  %v1777_v55 = vmul.f32 %v16864_v40, %v16844_v46  ;;  %15271 = vpow2.f32 %v11328_v60  ;;  %vm1782_vm8 = vweird.f32 %v16864_v40  ;;  %vm16914_vm10 = vmor %vm1736_vm4, %vm1737_vm7  ;;  %vm1751_vm12 = vweird.f32 %v16851_v52 }
 0x196   : > { %v1733_v61 = vsub.f32 1.0, %v1732_v49  ;;  %v16879_v9 = vadd.f32 1.0, %v15266_v62  ;;  %15273 = vrcp.f32 %v16873_v4  ;;  %vm16927_vm11 = vmor %vm1781_vm5, %vm1782_vm8  ;;  %v16932_v45 = vor.u32 1.1754944e-38, %v1757_v16 }
 0x197   : > { %v1778_v7 = vsub.f32 1.0, %v1777_v55  ;;  %v1770_v51 = vand.u32 2147483647, %v16853_v56  ;;  %vm1766_vm13 = vweird.f32 %v16853_v56  ;;  %v16941_v46 = vor.u32 1.1754944e-38, %v1772_v24  ;;  %v1193_v24 = vpop.f32.mrf.mxu3 }
 0x198   : > { %v1734_v11 = vmul.f32 %v16859_v58, %v1733_v61  ;;  %15275 = vrcp.f32 %v16879_v9  ;;  %v1892_v53 = vand.u32 2147483648, %v16873_v4  ;;  %v11340_v54 = vmul.f32 -1.442695, %v16890_v13 }
 0x199   : > { %v16892_v14 = vpop.eup %15267  ;;  %v1779_v15 = vmul.f32 %v16864_v40, %v1778_v7  ;;  %vm1886_vm15 = vweird.f32 %v16873_v4  ;;  %v1890_v60 = vand.u32 2147483647, %v16873_v4  ;;  %v1935_v62 = vand.u32 2147483647, %v16879_v9 }
 0x19a   : > { %v16898_v17 = vpop.eup %15269  ;;  %v1735_v22 = vadd.f32 %v16859_v58, %v1734_v11  ;;  %v1747_v23 = vmul.f32 %v16892_v14, %v16851_v52  ;;  %vm1752_vm14 = vweird.f32 %v16892_v14  ;;  %vm16961_vm1 = vcmp.eq.f32.partialorder %v1755_v38, 8.507059e+37 }
 0x19b   : > { %v1780_v26 = vadd.f32 %v16864_v40, %v1779_v15  ;;  %v1762_v30 = vmul.f32 %v16898_v17, %v16853_v56  ;;  %v15272_v42 = vpop.eup %15271  ;;  %v1937_v57 = vand.u32 2147483648, %v16879_v9  ;;  %vm1767_vm2 = vweird.f32 %v16898_v17 }
 0x19c   : > { %v1748_v37 = vsub.f32 1.0, %v1747_v23  ;;  %v1739_v43 = vsel %vm16914_vm10, %v16859_v58, %v1735_v22  ;;  %v16935_v1 = vpop.eup %15273  ;;  %v16957_v55 = vadd.f32 1.0, %v15272_v42  ;;  %vm16969_vm4 = vcmp.eq.f32.partialorder %v1770_v51, 8.507059e+37  ;;  %v1164_v23 = vpop.f32.mrf.mxu2 }
 0x19d   : > { %v1763_v47 = vsub.f32 1.0, %v1762_v30  ;;  %v1784_v21 = vsel %vm16927_vm11, %v16864_v40, %v1780_v26  ;;  %v1882_v59 = vmul.f32 %v16935_v1, %v16873_v4  ;;  %v1744_v49 = vsel %vm16875_vm6, %v1743_v36, %v1739_v43  ;;  %vm17021_vm11 = vmor %vm1766_vm13, %vm1767_vm2 }
 0x19e   : > { %v1749_v58 = vmul.f32 %v16892_v14, %v1748_v37  ;;  %v16951_v40 = vpop.eup %15275  ;;  %v1789_v63 = vsel %vm16906_vm9, %v1788_v19, %v1784_v21  ;;  %v1893_v5 = vor.u32 1.1754944e-38, %v1892_v53  ;;  %vm1931_vm5 = vweird.f32 %v16879_v9  ;;  %v1224_v37 = vpop.f32.mrf.mxu0  ;;  %vm17003_vm9 = vmor %vm1751_vm12, %vm1752_vm14 }
 0x19f   : > { %v1764_v6 = vmul.f32 %v16898_v17, %v1763_v47  ;;  %v1883_v2 = vsub.f32 1.0, %v1882_v59  ;;  %v1927_v61 = vmul.f32 %v16951_v40, %v16879_v9  ;;  %15277 = vrcp.f32 %v16957_v55 }
 0x1a0   : > { %v16980_v7 = vmul.f32 %v1744_v49, %v16812_v8  ;;  %v1750_v11 = vadd.f32 %v16892_v14, %v1749_v58  ;;  %vm16984_vm6 = vcmp.eq.f32.partialorder %v1890_v60, 8.507059e+37  ;;  %v16989_v26 = vmul.f32 %v1789_v63, %v16815_v25  ;;  %v1137_v8 = vpop.f32.mrf.mxu1 }
 0x1a1   : > { %v1884_v15 = vmul.f32 %v16935_v1, %v1883_v2  ;;  %v1928_v22 = vsub.f32 1.0, %v1927_v61  ;;  %v1765_v28 = vadd.f32 %v16898_v17, %v1764_v6  ;;  %vm1887_vm7 = vweird.f32 %v16935_v1 }
 0x1a2   : > { %11311 = vmatmul.msk.bf16.gmra.mxu1 %vm22673_vm0, %v16742_v48  ;;  %11315 = vmatmul.msk.bf16.gmra.mxu2 %vm22673_vm0, %v16742_v48  ;;  %vm16993_vm8 = vcmp.eq.f32.partialorder %v1935_v62, 8.507059e+37  ;;  %v1938_v19 = vor.u32 1.1754944e-38, %v1937_v57  ;;  %15279 = vpow2.f32 %v11329_v32  ;;  %vm1932_vm10 = vweird.f32 %v16951_v40  ;;  %vm17036_vm12 = vmor %vm1886_vm15, %vm1887_vm7  ;;  %v1195_v48 = vpop.f32.mrf.mxu3 }
 0x1a3   : > { %v1885_v30 = vadd.f32 %v16935_v1, %v1884_v15  ;;  %v1929_v34 = vmul.f32 %v16951_v40, %v1928_v22  ;;  %15281 = vpow2.f32 %v11337_v41  ;;  %v17009_v38 = vadd.f32 %v1164_v23, %v16822_v27  ;;  %vm17052_vm13 = vmor %vm1931_vm5, %vm1932_vm10  ;;  %11419 = vmatmul.msk.bf16.gmra.mxu3 %vm3226_vm3, %v14349_v0 }
 0x1a4   : > { %v17012_v42 = vadd.f32 %v1193_v24, %v16826_v29  ;;  %v1754_v32 = vsel %vm17003_vm9, %v16892_v14, %v1750_v11  ;;  %15283 = vpow2.f32 %v11340_v54  ;;  %v17027_v43 = vadd.f32 %v1137_v8, %v16806_v18  ;;  %v1166_v36 = vpop.f32.mrf.mxu2 }
 0x1a5   : > { %v1930_v41 = vadd.f32 %v16951_v40, %v1929_v34  ;;  %v15278_v44 = vpop.eup %15277  ;;  %v1769_v47 = vsel %vm17021_vm11, %v16898_v17, %v1765_v28  ;;  %v11338_v14 = vmul.f32 -1.442695, %v17009_v38  ;;  %v17043_v21 = vadd.f32 %v1224_v37, %v16808_v20 }
 0x1a6   : > { %v11339_v51 = vmul.f32 -1.442695, %v17012_v42  ;;  %v1889_v53 = vsel %vm17036_vm12, %v16935_v1, %v1885_v30  ;;  %v1897_v17 = vmul.f32 %v15278_v44, %v16957_v55  ;;  %vm1901_vm14 = vweird.f32 %v16957_v55 }
 0x1a7   : > { %v1905_v54 = vand.u32 2147483647, %v16957_v55  ;;  %v1759_v58 = vsel %vm16961_vm1, %v16932_v45, %v1754_v32  ;;  %v1934_v1 = vsel %vm17052_vm13, %v16951_v40, %v1930_v41  ;;  %15285 = vpow2.f32 %v11338_v14 }
 0x1a8   : > { %v11347_v9 = vmul.f32 -1.442695, %v17027_v43  ;;  %v15280_v59 = vpop.eup %15279  ;;  %v1774_v60 = vsel %vm16969_vm4, %v16941_v46, %v1769_v47  ;;  %v1898_v49 = vsub.f32 1.0, %v1897_v17  ;;  %v1907_v6 = vand.u32 2147483648, %v16957_v55  ;;  %v1227_v17 = vpop.f32.mrf.mxu0 }
 0x1a9   : > { %15287 = vpow2.f32 %v11339_v51  ;;  %v15282_v62 = vpop.eup %15281  ;;  %v1894_v45 = vsel %vm16984_vm6, %v1893_v5, %v1889_v53  ;;  %vm1902_vm15 = vweird.f32 %v15278_v44  ;;  %v17072_v63 = vadd.f32 1.0, %v15280_v59 }
 0x1aa   : > { %v11350_v40 = vmul.f32 -1.442695, %v17043_v21  ;;  %v15284_v2 = vpop.eup %15283  ;;  %v1939_v61 = vsel %vm16993_vm8, %v1938_v19, %v1934_v1  ;;  %v1899_v57 = vmul.f32 %v15278_v44, %v1898_v49  ;;  %v17078_v46 = vadd.f32 1.0, %v15282_v62  ;;  %vm1903_vm2 = vmor %vm1901_vm14, %vm1902_vm15 }
 0x1ab   : > { %15289 = vpow2.f32 %v11347_v9  ;;  %v2932_v11 = vmul.f32 %v1759_v58, %v16829_v31  ;;  %v17082_v15 = vmul.f32 %v1774_v60, %v16832_v33  ;;  %vm17084_vm1 = vcmp.eq.f32.partialorder %v1905_v54, 8.507059e+37 }
 0x1ac   : > { %15291 = vrcp.f32 %v17072_v63  ;;  %v2941_v16 = vmul.f32 %v1894_v45, %v16836_v35  ;;  %v1900_v22 = vadd.f32 %v15278_v44, %v1899_v57  ;;  %v1908_v23 = vor.u32 1.1754944e-38, %v1907_v6 }
 0x1ad   : > { %15293 = vrcp.f32 %v17078_v46  ;;  %v15286_v24 = vpop.eup %15285  ;;  %v2944_v31 = vmul.f32 %v1939_v61, %v16840_v39  ;;  %v17096_v33 = vadd.f32 1.0, %v15284_v2  ;;  %v17099_v28 = vadd.f32 %v1166_v36, %v16822_v27 }
 0x1ae   : > { %15295 = vpow2.f32 %v11350_v40  ;;  %v1904_v35 = vsel %vm1903_vm2, %v15278_v44, %v1900_v22  ;;  %v1920_v30 = vand.u32 2147483647, %v17072_v63  ;;  %v1922_v34 = vand.u32 2147483648, %v17072_v63 }
 0x1af   : > { %v15288_v8 = vpop.eup %15287  ;;  %v17103_v19 = vadd.f32 1.0, %v15286_v24  ;;  %v1909_v39 = vsel %vm17084_vm1, %v1908_v23, %v1904_v35  ;;  %v2040_v55 = vand.u32 2147483647, %v17078_v46  ;;  %v2042_v37 = vand.u32 2147483648, %v17078_v46 }
 0x1b0   : > { %15297 = vrcp.f32 %v17096_v33  ;;  %v17115_v32 = vadd.f32 %v2941_v16, %v16980_v7  ;;  %v2942_v52 = vmul.f32 %v1909_v39, %v16848_v50  ;;  %v17120_v41 = vadd.f32 %v1195_v48, %v16826_v29 }
 0x1b1   : > { %v15290_v25 = vpop.eup %15289  ;;  %15299 = vrcp.f32 %v17103_v19  ;;  %v17123_v47 = vadd.f32 %v2944_v31, %v16989_v26  ;;  %vm1916_vm4 = vweird.f32 %v17072_v63  ;;  %vm2036_vm5 = vweird.f32 %v17078_v46 }
 0x1b2   : > { %11312 = vmatmul.msk.bf16.gmra.mxu1 %vm22673_vm0, %v16757_v3  ;;  %11316 = vmatmul.msk.bf16.gmra.mxu2 %vm22673_vm0, %v16757_v3  ;;  %v15292_v44 = vpop.eup %15291  ;;  %v17127_v3 = vadd.f32 1.0, %v15288_v8  ;;  %vm17130_vm6 = vcmp.eq.f32.partialorder %v1920_v30, 8.507059e+37  ;;  %v1923_v14 = vor.u32 1.1754944e-38, %v1922_v34  ;;  %v2085_v51 = vand.u32 2147483647, %v17096_v33 }
 0x1b3   : > { %v15294_v56 = vpop.eup %15293  ;;  %v1912_v7 = vmul.f32 %v15292_v44, %v17072_v63  ;;  %v2087_v53 = vand.u32 2147483648, %v17096_v33  ;;  %vm17137_vm7 = vcmp.eq.f32.partialorder %v2040_v55, 8.507059e+37  ;;  %v2043_v54 = vor.u32 1.1754944e-38, %v2042_v37 }
 0x1b4   : > { %v15296_v26 = vpop.eup %15295  ;;  %v2032_v4 = vmul.f32 %v15294_v56, %v17078_v46  ;;  %v2055_v58 = vand.u32 2147483647, %v17103_v19  ;;  %v17143_v1 = vmul.f32 -1.442695, %v17099_v28  ;;  %v17145_v9 = vadd.f32 %v2942_v52, %v2932_v11 }
 0x1b5   : > { %v1913_v59 = vsub.f32 1.0, %v1912_v7  ;;  %vm2081_vm8 = vweird.f32 %v17096_v33  ;;  %v2057_v60 = vand.u32 2147483648, %v17103_v19  ;;  %15301 = vrcp.f32 %v17127_v3 }
 0x1b6   : > { %v15298_v49 = vpop.eup %15297  ;;  %vm1917_vm9 = vweird.f32 %v15292_v44  ;;  %v2033_v6 = vsub.f32 1.0, %v2032_v4  ;;  %vm2037_vm10 = vweird.f32 %v15294_v56  ;;  %vm2051_vm11 = vweird.f32 %v17103_v19 }
 0x1b7   : > { %v17151_v62 = vadd.f32 1.0, %v15290_v25  ;;  %v15300_v45 = vpop.eup %15299  ;;  %v1914_v40 = vmul.f32 %v15292_v44, %v1913_v59  ;;  %v2077_v0 = vmul.f32 %v15298_v49, %v17096_v33  ;;  %vm17154_vm12 = vcmp.eq.f32.partialorder %v2085_v51, 8.507059e+37  ;;  %vm1918_vm14 = vmor %vm1916_vm4, %vm1917_vm9  ;;  %v1140_v51 = vpop.f32.mrf.mxu1 }
 0x1b8   : > { %v2088_v61 = vor.u32 1.1754944e-38, %v2087_v53  ;;  %v17158_v57 = vadd.f32 1.0, %v15296_v26  ;;  %v2034_v36 = vmul.f32 %v15294_v56, %v2033_v6  ;;  %v2047_v11 = vmul.f32 %v15300_v45, %v17103_v19  ;;  %vm2038_vm2 = vmor %vm2036_vm5, %vm2037_vm10  ;;  %v1229_v25 = vpop.f32.mrf.mxu0 }
 0x1b9   : > { %vm17161_vm13 = vcmp.eq.f32.partialorder %v2055_v58, 8.507059e+37  ;;  %v2070_v16 = vand.u32 2147483647, %v17127_v3  ;;  %v1915_v22 = vadd.f32 %v15292_v44, %v1914_v40  ;;  %v2078_v23 = vsub.f32 1.0, %v2077_v0 }
 0x1ba   : > { %v2058_v24 = vor.u32 1.1754944e-38, %v2057_v60  ;;  %15303 = vrcp.f32 %v17151_v62  ;;  %v2035_v31 = vadd.f32 %v15294_v56, %v2034_v36  ;;  %vm2082_vm15 = vweird.f32 %v15298_v49  ;;  %v1169_v36 = vpop.f32.mrf.mxu2 }
 0x1bb   : > { %v2048_v48 = vsub.f32 1.0, %v2047_v11  ;;  %vm2066_vm1 = vweird.f32 %v17127_v3  ;;  %v2072_v8 = vand.u32 2147483648, %v17127_v3  ;;  %v15302_v35 = vpop.eup %15301  ;;  %v1919_v30 = vsel %vm1918_vm14, %v15292_v44, %v1915_v22  ;;  %vm2083_vm5 = vmor %vm2081_vm8, %vm2082_vm15  ;;  %v1198_v11 = vpop.f32.mrf.mxu3 }
 0x1bc   : > { %v2079_v34 = vmul.f32 %v15298_v49, %v2078_v23  ;;  %vm2052_vm0 = vweird.f32 %v15300_v45  ;;  %15305 = vrcp.f32 %v17158_v57  ;;  %v1924_v63 = vsel %vm17130_vm6, %v1923_v14, %v1919_v30 }
 0x1bd   : > { %v2039_v39 = vsel %vm2038_vm2, %v15294_v56, %v2035_v31  ;;  %v2049_v55 = vmul.f32 %v15300_v45, %v2048_v48  ;;  %v2062_v37 = vmul.f32 %v15302_v35, %v17127_v3  ;;  %vm17179_vm4 = vcmp.eq.f32.partialorder %v2070_v16, 8.507059e+37  ;;  %vm2053_vm6 = vmor %vm2051_vm11, %vm2052_vm0 }
 0x1be   : > { %v2943_v52 = vmul.f32 %v1924_v63, %v16882_v10  ;;  %v2044_v46 = vsel %vm17137_vm7, %v2043_v54, %v2039_v39  ;;  %v2080_v44 = vadd.f32 %v15298_v49, %v2079_v34  ;;  %v2192_v7 = vand.u32 2147483648, %v17151_v62 }
 0x1bf   : > { %v2951_v50 = vmul.f32 %v2044_v46, %v16887_v12  ;;  %v2050_v56 = vadd.f32 %v15300_v45, %v2049_v55  ;;  %v2063_v14 = vsub.f32 1.0, %v2062_v37  ;;  %v2073_v53 = vor.u32 1.1754944e-38, %v2072_v8 }
 0x1c0   : > { %v15304_v26 = vpop.eup %15303  ;;  %v3039_v4 = vadd.f32 %v2943_v52, %v17082_v15  ;;  %v2084_v10 = vsel %vm2083_vm5, %v15298_v49, %v2080_v44  ;;  %vm2067_vm7 = vweird.f32 %v15302_v35  ;;  %vm2186_vm9 = vweird.f32 %v17151_v62 }
 0x1c1   : > { %v2190_v12 = vand.u32 2147483647, %v17151_v62  ;;  %v17198_v33 = vadd.f32 %v17115_v32, %v2951_v50  ;;  %v2089_v54 = vsel %vm17154_vm12, %v2088_v61, %v2084_v10  ;;  %v2054_v58 = vsel %vm2053_vm6, %v15300_v45, %v2050_v56  ;;  %vm2068_vm8 = vmor %vm2066_vm1, %vm2067_vm7 }
 0x1c2   : > { %v2064_v59 = vmul.f32 %v15302_v35, %v2063_v14  ;;  %v15306_v15 = vpop.eup %15305  ;;  %v2954_v60 = vmul.f32 %v2089_v54, %v16890_v13  ;;  %v2059_v19 = vsel %vm17161_vm13, %v2058_v24, %v2054_v58  ;;  %v2182_v49 = vmul.f32 %v15304_v26, %v17151_v62 }
 0x1c3   : > { %v2193_v6 = vor.u32 1.1754944e-38, %v2192_v7  ;;  %v2952_v40 = vmul.f32 %v2059_v19, %v17009_v38  ;;  %v2227_v32 = vmul.f32 %v15306_v15, %v17158_v57  ;;  %vm2231_vm0 = vweird.f32 %v17158_v57 }
 0x1c4   : > { %v2065_v0 = vadd.f32 %v15302_v35, %v2064_v59  ;;  %v17210_v2 = vadd.f32 %v17123_v47, %v2954_v60  ;;  %v2183_v13 = vsub.f32 1.0, %v2182_v49  ;;  %vm2187_vm10 = vweird.f32 %v15304_v26  ;;  %v1200_v59 = vpop.f32.mrf.mxu3 }
 0x1c5   : > { %vm2232_vm11 = vweird.f32 %v15306_v15  ;;  %v17216_v45 = vadd.f32 %v17145_v9, %v2952_v40  ;;  %v2228_v38 = vsub.f32 1.0, %v2227_v32  ;;  %15307 = vpow2.f32 %v17143_v1  ;;  %vm2188_vm12 = vmor %vm2186_vm9, %vm2187_vm10 }
 0x1c6   : > { %v2069_v61 = vsel %vm2068_vm8, %v15302_v35, %v2065_v0  ;;  %v2184_v5 = vmul.f32 %v15304_v26, %v2183_v13  ;;  %v2235_v16 = vand.u32 2147483647, %v17158_v57  ;;  %v2237_v3 = vand.u32 2147483648, %v17158_v57  ;;  %v1142_v35 = vpop.f32.mrf.mxu1  ;;  %vm17246_vm14 = vmor %vm2231_vm0, %vm2232_vm11 }
 0x1c7   : > { %v2074_v47 = vsel %vm17179_vm4, %v2073_v53, %v2069_v61  ;;  %v2229_v23 = vmul.f32 %v15306_v15, %v2228_v38  ;;  %v11349_v9 = vmul.f32 -1.442695, %v17120_v41  ;;  %v17226_v24 = vadd.f32 %v1140_v51, %v16806_v18  ;;  %v14350_v53 = vld [vmem:[%s16804_s26 + $0x18] sm:$0xff] }
 0x1c8   : > { %v2953_v22 = vmul.f32 %v2074_v47, %v17012_v42  ;;  %v2185_v31 = vadd.f32 %v15304_v26, %v2184_v5  ;;  %v17229_v1 = vadd.f32 %v1227_v17, %v16808_v20  ;;  %v17232_v48 = vadd.f32 %v1169_v36, %v16822_v27  ;;  %v1171_v17 = vpop.f32.mrf.mxu2  ;;  %11420 = vmatmul.msk.bf16.gmra.mxu3 %vm3226_vm3, %v14350_v53 }
 0x1c9   : > { %v17235_v8 = vadd.f32 %v1198_v11, %v16826_v29  ;;  %v2230_v42 = vadd.f32 %v15306_v15, %v2229_v23  ;;  %15309 = vpow2.f32 %v11349_v9  ;;  %v11357_v34 = vmul.f32 -1.442695, %v17226_v24 }
 0x1ca   : > { %v17237_v30 = vadd.f32 %v3039_v4, %v2953_v22  ;;  %v2189_v63 = vsel %vm2188_vm12, %v15304_v26, %v2185_v31  ;;  %vm2191_vm13 = vcmp.eq.f32.partialorder %v2190_v12, 8.507059e+37  ;;  %v11360_v55 = vmul.f32 -1.442695, %v17229_v1 }
 0x1cb   : > { %v11358_v37 = vmul.f32 -1.442695, %v17232_v48  ;;  %v15308_v62 = vpop.eup %15307  ;;  %v2194_v52 = vsel %vm2191_vm13, %v2193_v6, %v2189_v63  ;;  %v2234_v46 = vsel %vm17246_vm14, %v15306_v15, %v2230_v42  ;;  %15311 = vpow2.f32 %v11357_v34 }
 0x1cc   : > { %v17255_v44 = vadd.f32 %v1142_v35, %v16806_v18  ;;  %v2238_v57 = vor.u32 1.1754944e-38, %v2237_v3  ;;  %v17257_v7 = vadd.f32 1.0, %v15308_v62  ;;  %15313 = vpow2.f32 %v11360_v55 }
 0x1cd   : > { %vm2236_vm15 = vcmp.eq.f32.partialorder %v2235_v16, 8.507059e+37  ;;  %15315 = vpow2.f32 %v11358_v37  ;;  %v11359_v51 = vmul.f32 -1.442695, %v17235_v8  ;;  %v17261_v50 = vadd.f32 %v1229_v25, %v16808_v20 }
 0x1ce   : > { %v2961_v56 = vmul.f32 %v2194_v52, %v17027_v43  ;;  %v2239_v14 = vsel %vm2236_vm15, %v2238_v57, %v2234_v46  ;;  %15317 = vrcp.f32 %v17257_v7  ;;  %v11367_v4 = vmul.f32 -1.442695, %v17255_v44  ;;  %v1145_v0 = vpop.f32.mrf.mxu1 }
 0x1cf   : > { %v15310_v26 = vpop.eup %15309  ;;  %v11370_v12 = vmul.f32 -1.442695, %v17261_v50  ;;  %v2964_v58 = vmul.f32 %v2239_v14, %v17043_v21  ;;  %15319 = vpow2.f32 %v11359_v51  ;;  %v2205_v60 = vand.u32 2147483647, %v17257_v7 }
 0x1d0   : > { %v17267_v10 = vadd.f32 1.0, %v15310_v26  ;;  %v17273_v15 = vadd.f32 %v17198_v33, %v2961_v56  ;;  %v2207_v19 = vand.u32 2147483648, %v17257_v7  ;;  %v17283_v21 = vadd.f32 %v1171_v17, %v16822_v27 }
 0x1d1   : > { %v15312_v54 = vpop.eup %15311  ;;  %v17291_v61 = vadd.f32 %v1200_v59, %v16826_v29  ;;  %v17294_v38 = vadd.f32 %v17210_v2, %v2964_v58  ;;  %vm2201_vm3 = vweird.f32 %v17257_v7  ;;  %v17303_v5 = vadd.f32 %v1145_v0, %v16806_v18 }
 0x1d2   : > { %v15314_v43 = vpop.eup %15313  ;;  %15321 = vrcp.f32 %v17267_v10  ;;  %v17278_v6 = vadd.f32 1.0, %v15312_v54  ;;  %v2222_v33 = vand.u32 2147483648, %v17267_v10  ;;  %v2208_v11 = vor.u32 1.1754944e-38, %v2207_v19 }
 0x1d3   : > { %v15316_v49 = vpop.eup %15315  ;;  %v17280_v40 = vadd.f32 1.0, %v15314_v43  ;;  %15323 = vpow2.f32 %v11367_v4  ;;  %v2220_v47 = vand.u32 2147483647, %v17267_v10  ;;  %vm17305_vm1 = vcmp.eq.f32.partialorder %v2205_v60, 8.507059e+37  ;;  %v1232_v43 = vpop.f32.mrf.mxu0 }
 0x1d4   : > { %v17285_v32 = vpop.eup %15317  ;;  %v17288_v13 = vadd.f32 1.0, %v15316_v49  ;;  %15325 = vpow2.f32 %v11370_v12  ;;  %v2342_v22 = vand.u32 2147483648, %v17278_v6  ;;  %v17312_v23 = vmul.f32 -1.442695, %v17283_v21 }
 0x1d5   : > { %v2197_v36 = vmul.f32 %v17285_v32, %v17257_v7  ;;  %15327 = vrcp.f32 %v17278_v6  ;;  %v15320_v16 = vpop.eup %15319  ;;  %vm2216_vm2 = vweird.f32 %v17267_v10  ;;  %v2223_v31 = vor.u32 1.1754944e-38, %v2222_v33 }
 0x1d6   : > { %15329 = vrcp.f32 %v17280_v40  ;;  %v2340_v35 = vand.u32 2147483647, %v17278_v6  ;;  %v17317_v42 = vmul.f32 -1.442695, %v17291_v61  ;;  %vm2202_vm4 = vweird.f32 %v17285_v32 }
 0x1d7   : > { %v2198_v3 = vsub.f32 1.0, %v2197_v36  ;;  %15331 = vrcp.f32 %v17288_v13  ;;  %v2385_v55 = vand.u32 2147483647, %v17280_v40  ;;  %vm17323_vm5 = vcmp.eq.f32.partialorder %v2220_v47, 8.507059e+37  ;;  %vm17341_vm9 = vmor %vm2201_vm3, %vm2202_vm4 }
 0x1d8   : > { %v15322_v9 = vpop.eup %15321  ;;  %vm2336_vm6 = vweird.f32 %v17278_v6  ;;  %v2387_v62 = vand.u32 2147483648, %v17280_v40  ;;  %v17329_v52 = vadd.f32 1.0, %v15320_v16  ;;  %v17332_v46 = vmul.f32 -1.442695, %v17303_v5 }
 0x1d9   : > { %v15324_v34 = vpop.eup %15323  ;;  %v2199_v63 = vmul.f32 %v17285_v32, %v2198_v3  ;;  %v2212_v39 = vmul.f32 %v15322_v9, %v17267_v10  ;;  %v2343_v14 = vor.u32 1.1754944e-38, %v2342_v22  ;;  %vm2381_vm7 = vweird.f32 %v17280_v40 }
 0x1da   : > { %v15326_v37 = vpop.eup %15325  ;;  %v2355_v53 = vand.u32 2147483647, %v17288_v13  ;;  %vm2217_vm0 = vweird.f32 %v15322_v9  ;;  %vm17346_vm8 = vcmp.eq.f32.partialorder %v2340_v35, 8.507059e+37  ;;  %vm2351_vm10 = vweird.f32 %v17288_v13 }
 0x1db   : > { %v15328_v57 = vpop.eup %15327  ;;  %v2200_v51 = vadd.f32 %v17285_v32, %v2199_v63  ;;  %v2213_v56 = vsub.f32 1.0, %v2212_v39  ;;  %15333 = vrcp.f32 %v17329_v52  ;;  %vm17356_vm11 = vcmp.eq.f32.partialorder %v2385_v55, 8.507059e+37  ;;  %vm2218_vm13 = vmor %vm2216_vm2, %vm2217_vm0 }
 0x1dc   : > { %v15330_v26 = vpop.eup %15329  ;;  %v2332_v12 = vmul.f32 %v15328_v57, %v17278_v6  ;;  %v17360_v60 = vadd.f32 1.0, %v15324_v34  ;;  %v2388_v49 = vor.u32 1.1754944e-38, %v2387_v62  ;;  %v2357_v33 = vand.u32 2147483648, %v17288_v13 }
 0x1dd   : > { %v15332_v54 = vpop.eup %15331  ;;  %v2204_v7 = vsel %vm17341_vm9, %v17285_v32, %v2200_v51  ;;  %v2214_v58 = vmul.f32 %v15322_v9, %v2213_v56  ;;  %v2377_v59 = vmul.f32 %v15330_v26, %v17280_v40  ;;  %vm17364_vm12 = vcmp.eq.f32.partialorder %v2355_v53, 8.507059e+37 }
 0x1de   : > { %v2333_v19 = vsub.f32 1.0, %v2332_v12  ;;  %v2347_v0 = vmul.f32 %v15332_v54, %v17288_v13  ;;  %v17368_v32 = vadd.f32 1.0, %v15326_v37  ;;  %v2209_v3 = vsel %vm17305_vm1, %v2208_v11, %v2204_v7 }
 0x1df   : > { %v2215_v36 = vadd.f32 %v15322_v9, %v2214_v58  ;;  %v2378_v47 = vsub.f32 1.0, %v2377_v59  ;;  %vm2337_vm14 = vweird.f32 %v15328_v57  ;;  %vm2382_vm15 = vweird.f32 %v15330_v26 }
 0x1e0   : > { %v2334_v22 = vmul.f32 %v15328_v57, %v2333_v19  ;;  %v2348_v35 = vsub.f32 1.0, %v2347_v0  ;;  %15335 = vrcp.f32 %v17360_v60  ;;  %vm2352_vm3 = vweird.f32 %v15332_v54  ;;  %vm2338_vm1 = vmor %vm2336_vm6, %vm2337_vm14  ;;  %v1174_v19 = vpop.f32.mrf.mxu2 }
 0x1e1   : > { %v2219_v34 = vsel %vm2218_vm13, %v15322_v9, %v2215_v36  ;;  %v2379_v63 = vmul.f32 %v15330_v26, %v2378_v47  ;;  %v15334_v39 = vpop.eup %15333  ;;  %v2358_v37 = vor.u32 1.1754944e-38, %v2357_v33  ;;  %v2962_v2 = vmul.f32 %v2209_v3, %v17099_v28  ;;  %vm2383_vm2 = vmor %vm2381_vm7, %vm2382_vm15 }
 0x1e2   : > { %v2335_v55 = vadd.f32 %v15328_v57, %v2334_v22  ;;  %v2349_v62 = vmul.f32 %v15332_v54, %v2348_v35  ;;  %v2224_v11 = vsel %vm17323_vm5, %v2223_v31, %v2219_v34  ;;  %v2362_v9 = vmul.f32 %v15334_v39, %v17329_v52  ;;  %vm2353_vm5 = vmor %vm2351_vm10, %vm2352_vm3 }
 0x1e3   : > { %v2380_v10 = vadd.f32 %v15330_v26, %v2379_v63  ;;  %vm2366_vm4 = vweird.f32 %v17329_v52  ;;  %v2370_v53 = vand.u32 2147483647, %v17329_v52  ;;  %v2372_v31 = vand.u32 2147483648, %v17329_v52 }
 0x1e4   : > { %v2339_v51 = vsel %vm2338_vm1, %v15328_v57, %v2335_v55  ;;  %v2350_v56 = vadd.f32 %v15332_v54, %v2349_v62  ;;  %v2363_v6 = vsub.f32 1.0, %v2362_v9  ;;  %v2963_v57 = vmul.f32 %v2224_v11, %v17120_v41 }
 0x1e5   : > { %v2344_v28 = vsel %vm17346_vm8, %v2343_v14, %v2339_v51  ;;  %v2384_v25 = vsel %vm2383_vm2, %v15330_v26, %v2380_v10  ;;  %vm2367_vm6 = vweird.f32 %v15334_v39  ;;  %v3028_v13 = vadd.f32 %v17216_v45, %v2962_v2 }
 0x1e6   : > { %v2971_v40 = vmul.f32 %v2344_v28, %v17226_v24  ;;  %v2389_v4 = vsel %vm17356_vm11, %v2388_v49, %v2384_v25  ;;  %v2354_v12 = vsel %vm2353_vm5, %v15332_v54, %v2350_v56  ;;  %v15336_v7 = vpop.eup %15335  ;;  %v2364_v26 = vmul.f32 %v15334_v39, %v2363_v6  ;;  %vm2368_vm9 = vmor %vm2366_vm4, %vm2367_vm6  ;;  %v1234_v56 = vpop.f32.mrf.mxu0 }
 0x1e7   : > { %v2974_v58 = vmul.f32 %v2389_v4, %v17229_v1  ;;  %v2359_v14 = vsel %vm17364_vm12, %v2358_v37, %v2354_v12  ;;  %v2482_v24 = vmul.f32 %v15336_v7, %v17360_v60  ;;  %vm2371_vm7 = vcmp.eq.f32.partialorder %v2370_v53, 8.507059e+37 }
 0x1e8   : > { %v17400_v17 = vadd.f32 %v17273_v15, %v2971_v40  ;;  %v2972_v41 = vmul.f32 %v2359_v14, %v17232_v48  ;;  %v2365_v54 = vadd.f32 %v15334_v39, %v2364_v26  ;;  %v2373_v1 = vor.u32 1.1754944e-38, %v2372_v31  ;;  %v1176_v53 = vpop.f32.mrf.mxu2 }
 0x1e9   : > { %v17405_v59 = vadd.f32 %v17294_v38, %v2974_v58  ;;  %v2483_v45 = vsub.f32 1.0, %v2482_v24  ;;  %vm2486_vm0 = vweird.f32 %v17360_v60  ;;  %15337 = vrcp.f32 %v17368_v32  ;;  %v1203_v38 = vpop.f32.mrf.mxu3 }
 0x1ea   : > { %v17407_v49 = vadd.f32 %v3028_v13, %v2972_v41  ;;  %v3041_v48 = vadd.f32 %v17237_v30, %v2963_v57  ;;  %v2369_v15 = vsel %vm2368_vm9, %v15334_v39, %v2365_v54  ;;  %vm2487_vm8 = vweird.f32 %v15336_v7 }
 0x1eb   : > { %15339 = vpow2.f32 %v17312_v23  ;;  %v2374_v0 = vsel %vm2371_vm7, %v2373_v1, %v2369_v15  ;;  %v2484_v33 = vmul.f32 %v15336_v7, %v2483_v45  ;;  %v17417_v36 = vadd.f32 %v1232_v43, %v16808_v20  ;;  %vm17435_vm10 = vmor %vm2486_vm0, %vm2487_vm8 }
 0x1ec   : > { %15341 = vpow2.f32 %v17317_v42  ;;  %v2973_v52 = vmul.f32 %v2374_v0, %v17235_v8  ;;  %v2490_v47 = vand.u32 2147483647, %v17360_v60  ;;  %v2492_v16 = vand.u32 2147483648, %v17360_v60  ;;  %v1147_v60 = vpop.f32.mrf.mxu1 }
 0x1ed   : > { %15343 = vpow2.f32 %v17332_v46  ;;  %v2485_v30 = vadd.f32 %v15336_v7, %v2484_v33  ;;  %v11380_v3 = vmul.f32 -1.442695, %v17417_v36  ;;  %v17425_v23 = vadd.f32 %v1174_v19, %v16822_v27 }
 0x1ee   : > { %v17428_v22 = vadd.f32 %v1203_v38, %v16826_v29  ;;  %v17430_v42 = vadd.f32 %v3041_v48, %v2973_v52  ;;  %v2493_v55 = vor.u32 1.1754944e-38, %v2492_v16  ;;  %vm2491_vm11 = vcmp.eq.f32.partialorder %v2490_v47, 8.507059e+37 }
 0x1ef   : > { %v17439_v35 = vpop.eup %15337  ;;  %v2489_v46 = vsel %vm17435_vm10, %v15336_v7, %v2485_v30  ;;  %15345 = vpow2.f32 %v11380_v3  ;;  %v11378_v34 = vmul.f32 -1.442695, %v17425_v23  ;;  %v17453_v28 = vadd.f32 %v1147_v60, %v16806_v18 }
 0x1f0   : > { %v11379_v63 = vmul.f32 -1.442695, %v17428_v22  ;;  %v2527_v62 = vmul.f32 %v17439_v35, %v17368_v32  ;;  %v2494_v10 = vsel %vm2491_vm11, %v2493_v55, %v2489_v46  ;;  %v2535_v6 = vand.u32 2147483647, %v17368_v32 }
 0x1f1   : > { %v15340_v39 = vpop.eup %15339  ;;  %15347 = vpow2.f32 %v11378_v34  ;;  %v2537_v31 = vand.u32 2147483648, %v17368_v32  ;;  %v2981_v40 = vmul.f32 %v2494_v10, %v17255_v44  ;;  %v17463_v12 = vadd.f32 %v1234_v56, %v16808_v20 }
 0x1f2   : > { %v15342_v37 = vpop.eup %15341  ;;  %v17447_v2 = vadd.f32 1.0, %v15340_v39  ;;  %v2528_v9 = vsub.f32 1.0, %v2527_v62  ;;  %15349 = vpow2.f32 %v11379_v63  ;;  %v17466_v7 = vadd.f32 %v1176_v53, %v16822_v27 }
 0x1f3   : > { %v15344_v11 = vpop.eup %15343  ;;  %v17449_v51 = vadd.f32 1.0, %v15342_v37  ;;  %vm2532_vm12 = vweird.f32 %v17439_v35  ;;  %v11387_v44 = vmul.f32 -1.442695, %v17453_v28  ;;  %vm2531_vm13 = vweird.f32 %v17368_v32 }
 0x1f4   : > { %15351 = vrcp.f32 %v17447_v2  ;;  %v2529_v25 = vmul.f32 %v17439_v35, %v2528_v9  ;;  %v17460_v4 = vadd.f32 1.0, %v15344_v11  ;;  %v2507_v26 = vand.u32 2147483648, %v17447_v2  ;;  %vm17488_vm15 = vmor %vm2531_vm13, %vm2532_vm12 }
 0x1f5   : > { %15353 = vrcp.f32 %v17449_v51  ;;  %v15346_v57 = vpop.eup %15345  ;;  %v2522_v13 = vand.u32 2147483648, %v17449_v51  ;;  %vm17477_vm14 = vcmp.eq.f32.partialorder %v2535_v6, 8.507059e+37  ;;  %v2505_v41 = vand.u32 2147483647, %v17447_v2 }
 0x1f6   : > { %v2530_v18 = vadd.f32 %v17439_v35, %v2529_v25  ;;  %v17470_v58 = vadd.f32 1.0, %v15346_v57  ;;  %15355 = vrcp.f32 %v17460_v4  ;;  %v17486_v54 = vadd.f32 %v17400_v17, %v2981_v40 }
 0x1f7   : > { %v15348_v14 = vpop.eup %15347  ;;  %v2538_v43 = vor.u32 1.1754944e-38, %v2537_v31  ;;  %v11390_v32 = vmul.f32 -1.442695, %v17463_v12  ;;  %v17494_v19 = vmul.f32 -1.442695, %v17466_v7  ;;  %vm2501_vm3 = vweird.f32 %v17447_v2 }
 0x1f8   : > { %v15350_v20 = vpop.eup %15349  ;;  %15357 = vrcp.f32 %v17470_v58  ;;  %v2534_v48 = vsel %vm17488_vm15, %v17439_v35, %v2530_v18  ;;  %v2520_v15 = vand.u32 2147483647, %v17449_v51  ;;  %v2508_v38 = vor.u32 1.1754944e-38, %v2507_v26 }
 0x1f9   : > { %vm2516_vm1 = vweird.f32 %v17449_v51  ;;  %v17508_v33 = vor.u32 1.1754944e-38, %v2522_v13  ;;  %15359 = vpow2.f32 %v11387_v44  ;;  %vm17510_vm2 = vcmp.eq.f32.partialorder %v2505_v41, 8.507059e+37 }
 0x1fa   : > { %v17483_v24 = vpop.eup %15351  ;;  %vm2636_vm4 = vweird.f32 %v17460_v4  ;;  %v2640_v16 = vand.u32 2147483647, %v17460_v4  ;;  %v2642_v30 = vand.u32 2147483648, %v17460_v4  ;;  %v17517_v3 = vadd.f32 1.0, %v15348_v14 }
 0x1fb   : > { %v17496_v45 = vpop.eup %15353  ;;  %v2497_v17 = vmul.f32 %v17483_v24, %v17447_v2  ;;  %v2539_v35 = vsel %vm17477_vm14, %v2538_v43, %v2534_v48  ;;  %vm2681_vm5 = vweird.f32 %v17470_v58  ;;  %v17522_v34 = vadd.f32 1.0, %v15350_v20 }
 0x1fc   : > { %v2512_v0 = vmul.f32 %v17496_v45, %v17449_v51  ;;  %v15356_v8 = vpop.eup %15355  ;;  %vm2502_vm6 = vweird.f32 %v17483_v24  ;;  %15361 = vrcp.f32 %v17517_v3  ;;  %v2685_v37 = vand.u32 2147483647, %v17470_v58 }
 0x1fd   : > { %v2498_v52 = vsub.f32 1.0, %v2497_v17  ;;  %v2632_v55 = vmul.f32 %v15356_v8, %v17460_v4  ;;  %v2687_v11 = vand.u32 2147483648, %v17470_v58  ;;  %v2984_v10 = vmul.f32 %v2539_v35, %v17261_v50  ;;  %vm17536_vm7 = vmor %vm2501_vm3, %vm2502_vm6 }
 0x1fe   : > { %v2513_v46 = vsub.f32 1.0, %v2512_v0  ;;  %v15358_v63 = vpop.eup %15357  ;;  %15363 = vpow2.f32 %v11390_v32  ;;  %vm2517_vm9 = vweird.f32 %v17496_v45  ;;  %vm17541_vm0 = vcmp.eq.f32.partialorder %v2520_v15, 8.507059e+37 }
 0x1ff   : > { %v2499_v39 = vmul.f32 %v17483_v24, %v2498_v52  ;;  %v2677_v60 = vmul.f32 %v15358_v63, %v17470_v58  ;;  %v2633_v56 = vsub.f32 1.0, %v2632_v55  ;;  %v15360_v53 = vpop.eup %15359  ;;  %vm17545_vm8 = vcmp.eq.f32.partialorder %v2640_v16, 8.507059e+37  ;;  %vm17560_vm12 = vmor %vm2516_vm1, %vm2517_vm9 }
 0x200   : > { %v2514_v62 = vmul.f32 %v17496_v45, %v2513_v46  ;;  %15365 = vrcp.f32 %v17522_v34  ;;  %vm2637_vm10 = vweird.f32 %v15356_v8  ;;  %v2657_v40 = vand.u32 2147483648, %v17517_v3 }
 0x201   : > { %v2500_v9 = vadd.f32 %v17483_v24, %v2499_v39  ;;  %v2678_v50 = vsub.f32 1.0, %v2677_v60  ;;  %v2634_v57 = vmul.f32 %v15356_v8, %v2633_v56  ;;  %v2643_v14 = vor.u32 1.1754944e-38, %v2642_v30  ;;  %vm2638_vm14 = vmor %vm2636_vm4, %vm2637_vm10 }
 0x202   : > { %v2515_v18 = vadd.f32 %v17496_v45, %v2514_v62  ;;  %vm2682_vm11 = vweird.f32 %v15358_v63  ;;  %v15362_v13 = vpop.eup %15361  ;;  %v3056_v44 = vadd.f32 %v17405_v59, %v2984_v10  ;;  %vm17564_vm13 = vcmp.eq.f32.partialorder %v2685_v37, 8.507059e+37 }
 0x203   : > { %v2504_v2 = vsel %vm17536_vm7, %v17483_v24, %v2500_v9  ;;  %v2679_v26 = vmul.f32 %v15358_v63, %v2678_v50  ;;  %v2635_v27 = vadd.f32 %v15356_v8, %v2634_v57  ;;  %v2688_v24 = vor.u32 1.1754944e-38, %v2687_v11  ;;  %vm2683_vm15 = vmor %vm2681_vm5, %vm2682_vm11 }
 0x204   : > { %v2509_v1 = vsel %vm17510_vm2, %v2508_v38, %v2504_v2  ;;  %v2647_v43 = vmul.f32 %v15362_v13, %v17517_v3  ;;  %v17573_v51 = vadd.f32 1.0, %v15360_v53  ;;  %v15364_v32 = vpop.eup %15363  ;;  %vm2651_vm3 = vweird.f32 %v17517_v3 }
 0x205   : > { %v2680_v59 = vadd.f32 %v15358_v63, %v2679_v26  ;;  %v2639_v48 = vsel %vm2638_vm14, %v15356_v8, %v2635_v27  ;;  %v2655_v17 = vand.u32 2147483647, %v17517_v3  ;;  %v2658_v15 = vor.u32 1.1754944e-38, %v2657_v40 }
 0x206   : > { %v15366_v0 = vpop.eup %15365  ;;  %v2519_v4 = vsel %vm17560_vm12, %v17496_v45, %v2515_v18  ;;  %v2644_v38 = vsel %vm17545_vm8, %v2643_v14, %v2639_v48  ;;  %v2648_v47 = vsub.f32 1.0, %v2647_v43  ;;  %v2982_v16 = vmul.f32 %v2509_v1, %v17283_v21  ;;  %v1205_v45 = vpop.f32.mrf.mxu3 }
 0x207   : > { %v2684_v52 = vsel %vm2683_vm15, %v15358_v63, %v2680_v59  ;;  %v2991_v58 = vmul.f32 %v2644_v38, %v17303_v5  ;;  %v2662_v8 = vmul.f32 %v15366_v0, %v17522_v34  ;;  %vm2652_vm1 = vweird.f32 %v15362_v13  ;;  %v1246_v18 = vpop.f32.mrf.mxu1  ;;  %v1333_v1 = vpop.f32.mrf.mxu0 }
 0x208   : > { %v2689_v30 = vsel %vm17564_vm13, %v2688_v24, %v2684_v52  ;;  %v2649_v46 = vmul.f32 %v15362_v13, %v2648_v47  ;;  %15367 = vrcp.f32 %v17573_v51  ;;  %v2524_v63 = vsel %vm17541_vm0, %v17508_v33, %v2519_v4  ;;  %vm2653_vm2 = vmor %vm2651_vm3, %vm2652_vm1 }
 0x209   : > { %v2994_v35 = vmul.f32 %v2689_v30, %v17417_v36  ;;  %v17595_v21 = vadd.f32 %v17486_v54, %v2991_v58  ;;  %v2663_v5 = vsub.f32 1.0, %v2662_v8  ;;  %v2672_v39 = vand.u32 2147483648, %v17522_v34 }
 0x20a   : > { %v2650_v62 = vadd.f32 %v15362_v13, %v2649_v46  ;;  %v17600_v60 = vadd.f32 1.0, %v15364_v32  ;;  %15369 = vpow2.f32 %v17494_v19  ;;  %vm2667_vm4 = vweird.f32 %v15366_v0 }
 0x20b   : > { %v17598_v55 = vadd.f32 %v3056_v44, %v2994_v35  ;;  %v2664_v36 = vmul.f32 %v15366_v0, %v2663_v5  ;;  %v2670_v33 = vand.u32 2147483647, %v17522_v34  ;;  %v17607_v54 = vadd.f32 %v1205_v45, %v16826_v29  ;;  %v1275_v5 = vpop.f32.mrf.mxu2 }
 0x20c   : > { %v2983_v37 = vmul.f32 %v2524_v63, %v17291_v61  ;;  %v2654_v11 = vsel %vm2653_vm2, %v15362_v13, %v2650_v62  ;;  %vm2656_vm5 = vcmp.eq.f32.partialorder %v2655_v17, 8.507059e+37  ;;  %15371 = vrcp.f32 %v17600_v60 }
 0x20d   : > { %v2659_v10 = vsel %vm2656_vm5, %v2658_v15, %v2654_v11  ;;  %v2665_v9 = vadd.f32 %v15366_v0, %v2664_v36  ;;  %vm2666_vm6 = vweird.f32 %v17522_v34  ;;  %v11389_v19 = vmul.f32 -1.442695, %v17607_v54 }
 0x20e   : > { %v15368_v3 = vpop.eup %15367  ;;  %v3030_v56 = vadd.f32 %v17407_v49, %v2982_v16  ;;  %v2992_v53 = vmul.f32 %v2659_v10, %v17425_v23  ;;  %vm2668_vm7 = vmor %vm2666_vm6, %vm2667_vm4  ;;  %v2673_v29 = vor.u32 1.1754944e-38, %v2672_v39  ;;  %vm2671_vm9 = vcmp.eq.f32.partialorder %v2670_v33, 8.507059e+37  ;;  %v15923_v49 = vld [vmem:[#allocation9] sm:$0xff] }
 0x20f   : > { %v2669_v25 = vsel %vm2668_vm7, %v15366_v0, %v2665_v9  ;;  %v2782_v61 = vmul.f32 %v15368_v3, %v17573_v51  ;;  %v3043_v31 = vadd.f32 %v17430_v42, %v2983_v37  ;;  %15373 = vpow2.f32 %v11389_v19  ;;  %v1248_v46 = vpop.f32.mrf.mxu1 }
 0x210   : > { %v15370_v6 = vpop.eup %15369  ;;  %v17617_v50 = vadd.f32 %v3030_v56, %v2992_v53  ;;  %v2674_v2 = vsel %vm2671_vm9, %v2673_v29, %v2669_v25  ;;  %v17622_v23 = vperm.slane %v15923_v49, 4  ;;  %v2790_v26 = vand.u32 2147483647, %v17573_v51 }
 0x211   : > { %v2993_v34 = vmul.f32 %v2674_v2, %v17428_v22  ;;  %v2783_v57 = vsub.f32 1.0, %v2782_v61  ;;  %v17620_v40 = vadd.f32 1.0, %v15370_v6  ;;  %v2792_v13 = vand.u32 2147483648, %v17573_v51 }
 0x212   : > { %v15372_v14 = vpop.eup %15371  ;;  %vm2787_vm0 = vweird.f32 %v15368_v3  ;;  %v17630_v22 = vperm.slane %v15923_v49, 7  ;;  %vm2786_vm8 = vweird.f32 %v17573_v51  ;;  %v17634_v24 = vadd.f32 %v1246_v18, %v17622_v23 }
 0x213   : > { %v17626_v44 = vadd.f32 %v3043_v31, %v2993_v34  ;;  %v2784_v42 = vmul.f32 %v15368_v3, %v2783_v57  ;;  %v2827_v20 = vmul.f32 %v15372_v14, %v17600_v60  ;;  %15375 = vrcp.f32 %v17620_v40  ;;  %vm2788_vm10 = vmor %vm2786_vm8, %vm2787_vm0 }
 0x214   : > { %vm2791_vm11 = vcmp.eq.f32.partialorder %v2790_v26, 8.507059e+37  ;;  %v2793_v43 = vor.u32 1.1754944e-38, %v2792_v13  ;;  %v2835_v32 = vand.u32 2147483647, %v17600_v60  ;;  %v2837_v48 = vand.u32 2147483648, %v17600_v60 }
 0x215   : > { %v2785_v27 = vadd.f32 %v15368_v3, %v2784_v42  ;;  %v2828_v41 = vsub.f32 1.0, %v2827_v20  ;;  %v15374_v59 = vpop.eup %15373  ;;  %vm2832_vm12 = vweird.f32 %v15372_v14  ;;  %vm2831_vm13 = vweird.f32 %v17600_v60 }
 0x216   : > { %v17638_v0 = vadd.f32 1.0, %v15374_v59  ;;  %v17642_v51 = vadd.f32 %v1333_v1, %v17630_v22  ;;  %v11321_v47 = vmul.f32 -1.442695, %v17634_v24  ;;  %vm2833_vm14 = vmor %vm2831_vm13, %vm2832_vm12  ;;  %v2838_v58 = vor.u32 1.1754944e-38, %v2837_v48  ;;  %v1335_v1 = vpop.f32.mrf.mxu0 }
 0x217   : > { %v2789_v17 = vsel %vm2788_vm10, %v15368_v3, %v2785_v27  ;;  %v2829_v15 = vmul.f32 %v15372_v14, %v2828_v41  ;;  %vm2836_vm15 = vcmp.eq.f32.partialorder %v2835_v32, 8.507059e+37  ;;  %v17648_v35 = vperm.slane %v15923_v49, 5 }
 0x218   : > { %v2794_v4 = vsel %vm2791_vm11, %v2793_v43, %v2789_v17  ;;  %15377 = vrcp.f32 %v17638_v0  ;;  %v2805_v63 = vand.u32 2147483647, %v17620_v40  ;;  %v2807_v36 = vand.u32 2147483648, %v17620_v40 }
 0x219   : > { %v3001_v38 = vmul.f32 %v2794_v4, %v17453_v28  ;;  %v2830_v52 = vadd.f32 %v15372_v14, %v2829_v15  ;;  %v15376_v16 = vpop.eup %15375  ;;  %v11324_v28 = vmul.f32 -1.442695, %v17642_v51  ;;  %15379 = vpow2.f32 %v11321_v47 }
 0x21a   : > { %v2797_v8 = vmul.f32 %v15376_v16, %v17620_v40  ;;  %v17655_v33 = vperm.slane %v15923_v49, 6  ;;  %v17658_v37 = vadd.f32 %v1248_v46, %v17622_v23  ;;  %vm2802_vm3 = vweird.f32 %v15376_v16 }
 0x21b   : > { %v2834_v30 = vsel %vm2833_vm14, %v15372_v14, %v2830_v52  ;;  %v3019_v39 = vadd.f32 %v17595_v21, %v3001_v38  ;;  %v17662_v19 = vadd.f32 %v1275_v5, %v17648_v35  ;;  %15381 = vpow2.f32 %v11324_v28 }
 0x21c   : > { %v2839_v45 = vsel %vm2836_vm15, %v2838_v58, %v2834_v30  ;;  %v2798_v60 = vsub.f32 1.0, %v2797_v8  ;;  %vm2801_vm1 = vweird.f32 %v17620_v40  ;;  %vm2806_vm2 = vcmp.eq.f32.partialorder %v2805_v63, 8.507059e+37  ;;  %v1277_v63 = vpop.f32.mrf.mxu2 }
 0x21d   : > { %v3004_v62 = vmul.f32 %v2839_v45, %v17463_v12  ;;  %v1304_v12 = vpop.f32.mrf.mxu3  ;;  %v3020_v3 = vrot.slane %v3019_v39, 4  ;;  %vm2803_vm4 = vmor %vm2801_vm1, %vm2802_vm3  ;;  %v2808_v29 = vor.u32 1.1754944e-38, %v2807_v36  ;;  %v2822_v31 = vand.u32 2147483648, %v17638_v0 }
 0x21e   : > { %v15378_v11 = vpop.eup %15377  ;;  %v2799_v9 = vmul.f32 %v15376_v16, %v2798_v60  ;;  %v11322_v2 = vmul.f32 -1.442695, %v17662_v19  ;;  %v17670_v34 = vadd.f32 %v1304_v12, %v17655_v33  ;;  %v2820_v40 = vand.u32 2147483647, %v17638_v0 }
 0x21f   : > { %v3058_v10 = vadd.f32 %v17598_v55, %v3004_v62  ;;  %v2812_v21 = vmul.f32 %v15378_v11, %v17638_v0  ;;  %v11331_v55 = vmul.f32 -1.442695, %v17658_v37  ;;  %v15380_v61 = vpop.eup %15379  ;;  %vm2817_vm5 = vweird.f32 %v15378_v11 }
 0x220   : > { %v2800_v56 = vadd.f32 %v15376_v16, %v2799_v9  ;;  %v3021_v18 = vadd.f32 %v3020_v3, %v3019_v39  ;;  %vm2816_vm6 = vweird.f32 %v17638_v0  ;;  %v17675_v20 = vadd.f32 1.0, %v15380_v61 }
 0x221   : > { %v3059_v53 = vrot.slane %v3058_v10, 4  ;;  %v2813_v25 = vsub.f32 1.0, %v2812_v21  ;;  %v15382_v26 = vpop.eup %15381  ;;  %15383 = vpow2.f32 %v11331_v55  ;;  %vm2818_vm7 = vmor %vm2816_vm6, %vm2817_vm5  ;;  %v2823_v41 = vor.u32 1.1754944e-38, %v2822_v31 }
 0x222   : > { %v2804_v6 = vsel %vm2803_vm4, %v15376_v16, %v2800_v56  ;;  %15385 = vpow2.f32 %v11322_v2  ;;  %vm2821_vm9 = vcmp.eq.f32.partialorder %v2820_v40, 8.507059e+37  ;;  %v11323_v43 = vmul.f32 -1.442695, %v17670_v34 }
 0x223   : > { %v2809_v57 = vsel %vm2806_vm2, %v2808_v29, %v2804_v6  ;;  %v2814_v49 = vmul.f32 %v15378_v11, %v2813_v25  ;;  %v3060_v13 = vadd.f32 %v3059_v53, %v3058_v10  ;;  %v3022_v32 = vrot.slane %v3021_v18, 2  ;;  %v1251_v25 = vpop.f32.mrf.mxu1 }
 0x224   : > { %v3002_v14 = vmul.f32 %v2809_v57, %v17466_v7  ;;  %v17679_v17 = vadd.f32 1.0, %v15382_v26  ;;  %15387 = vrcp.f32 %v17675_v20  ;;  %vm3161_vm0 = vcmask 1040384  }
 0x225   : > { %v2815_v42 = vadd.f32 %v15378_v11, %v2814_v49  ;;  %v3061_v15 = vrot.slane %v3060_v13, 2  ;;  %v3023_v16 = vadd.f32 %v3022_v32, %v3021_v18  ;;  %v1306_v12 = vpop.f32.mrf.mxu3  ;;  %vm22681_vm8 = vcmask 1042434  }
 0x226   : > { %v3032_v27 = vadd.f32 %v17617_v50, %v3002_v14  ;;  %v17684_v50 = vadd.f32 %v1335_v1, %v17630_v22  ;;  %15389 = vrcp.f32 %v17679_v17  ;;  %vm22680_vm10 = vcmask 1041408  }
 0x227   : > { %v2819_v59 = vsel %vm2818_vm7, %v15378_v11, %v2815_v42  ;;  %v15384_v38 = vpop.eup %15383  ;;  %v3062_v30 = vadd.f32 %v3061_v15, %v3060_v13  ;;  %15391 = vpow2.f32 %v11323_v43  ;;  %v17696_v11 = vadd.f32 %v1277_v63, %v17648_v35  ;;  %v1338_v43 = vpop.f32.mrf.mxu0 }
 0x228   : > { %v3033_v7 = vrot.slane %v3032_v27, 4  ;;  %v2824_v48 = vsel %vm2821_vm9, %v2823_v41, %v2819_v59  ;;  %v15386_v47 = vpop.eup %15385  ;;  %v11334_v46 = vmul.f32 -1.442695, %v17684_v50  ;;  %v17689_v45 = vadd.f32 1.0, %v15384_v38 }
 0x229   : > { %v3003_v0 = vmul.f32 %v2824_v48, %v17607_v54  ;;  %v17693_v39 = vadd.f32 1.0, %v15386_v47  ;;  %v3063_v60 = vrot.slane %v3062_v30, 1  ;;  %v11332_v6 = vmul.f32 -1.442695, %v17696_v11 }
 0x22a   : > { %v3034_v4 = vadd.f32 %v3033_v7, %v3032_v27  ;;  %v17691_v28 = vpop.eup %15387  ;;  %15393 = vpow2.f32 %v11334_v46  ;;  %v17717_v41 = vadd.f32 %v1306_v12, %v17655_v33  ;;  %v17726_v15 = vadd.f32 %v1251_v25, %v17622_v23 }
 0x22b   : > { %v3045_v52 = vadd.f32 %v17626_v44, %v3003_v0  ;;  %v3024_v44 = vrot.slane %v3023_v16, 1  ;;  %v1792_v21 = vmul.f32 %v17691_v28, %v17675_v20  ;;  %15395 = vrcp.f32 %v17689_v45  ;;  %v1280_v0 = vpop.f32.mrf.mxu2  ;;  %v1253_v63 = vpop.f32.mrf.mxu1 }
 0x22c   : > { %v3035_v58 = vrot.slane %v3034_v4, 2  ;;  %v17698_v10 = vpop.eup %15389  ;;  %15397 = vrcp.f32 %v17693_v39  ;;  %v3064_v55 = vadd.f32 %v3063_v60, %v3062_v30  ;;  %v11333_v48 = vmul.f32 -1.442695, %v17717_v41 }
 0x22d   : > { %v3046_v8 = vrot.slane %v3045_v52, 4  ;;  %v15392_v3 = vpop.eup %15391  ;;  %v3025_v53 = vadd.f32 %v3024_v44, %v3023_v16  ;;  %v1793_v2 = vsub.f32 1.0, %v1792_v21  ;;  %v1837_v57 = vmul.f32 %v17698_v10, %v17679_v17  ;;  %v1309_v47 = vpop.f32.mrf.mxu3 }
 0x22e   : > { %v3036_v54 = vadd.f32 %v3035_v58, %v3034_v4  ;;  %v17708_v49 = vadd.f32 1.0, %v15392_v3  ;;  %v3155_v42 = vrot.slane %v3064_v55, 5  ;;  %15399 = vpow2.f32 %v11332_v6 }
 0x22f   : > { %v3047_v5 = vadd.f32 %v3046_v8, %v3045_v52  ;;  %v1794_v1 = vmul.f32 %v17691_v28, %v1793_v2  ;;  %v1838_v59 = vsub.f32 1.0, %v1837_v57  ;;  %v1800_v38 = vand.u32 2147483647, %v17675_v20 }
 0x230   : > { %v3037_v62 = vrot.slane %v3036_v54, 1  ;;  %v15394_v40 = vpop.eup %15393  ;;  %15401 = vrcp.f32 %v17708_v49  ;;  %vm1796_vm11 = vweird.f32 %v17675_v20  ;;  %v1802_v16 = vand.u32 2147483648, %v17675_v20 }
 0x231   : > { %v3048_v36 = vrot.slane %v3047_v5, 2  ;;  %v17710_v14 = vpop.eup %15395  ;;  %v17712_v26 = vadd.f32 1.0, %v15394_v40  ;;  %v1845_v58 = vand.u32 2147483647, %v17679_v17  ;;  %v17739_v30 = vadd.f32 %v1338_v43, %v17630_v22 }
 0x232   : > { %v3038_v9 = vadd.f32 %v3037_v62, %v3036_v54  ;;  %v17714_v13 = vpop.eup %15397  ;;  %v1942_v7 = vmul.f32 %v17710_v14, %v17689_v45  ;;  %v1795_v8 = vadd.f32 %v17691_v28, %v1794_v1  ;;  %vm1797_vm12 = vweird.f32 %v17691_v28 }
 0x233   : > { %v3049_v56 = vadd.f32 %v3048_v36, %v3047_v5  ;;  %v1807_v52 = vmul.f32 %v17714_v13, %v17693_v39  ;;  %15403 = vrcp.f32 %v17712_v26  ;;  %v1839_v46 = vmul.f32 %v17698_v10, %v1838_v59  ;;  %vm17761_vm14 = vmor %vm1796_vm11, %vm1797_vm12 }
 0x234   : > { %v3153_v29 = vrot.slane %v3038_v9, 7  ;;  %v17745_v54 = vadd.f32 %v1280_v0, %v17648_v35  ;;  %v15400_v5 = vpop.eup %15399  ;;  %v1943_v44 = vsub.f32 1.0, %v1942_v7  ;;  %15405 = vpow2.f32 %v11333_v48 }
 0x235   : > { %v3050_v61 = vrot.slane %v3049_v56, 1  ;;  %v11341_v62 = vmul.f32 -1.442695, %v17726_v15  ;;  %v17749_v60 = vadd.f32 %v1309_v47, %v17655_v33  ;;  %vm17753_vm13 = vcmp.eq.f32.partialorder %v1800_v38, 8.507059e+37 }
 0x236   : > { %v3162_v31 = vsel %vm3161_vm0, %v3025_v53, %v3153_v29  ;;  %v17751_v36 = vpop.eup %15401  ;;  %v1847_v21 = vand.u32 2147483648, %v17679_v17  ;;  %v1808_v12 = vsub.f32 1.0, %v1807_v52  ;;  %v11344_v3 = vmul.f32 -1.442695, %v17739_v30 }
 0x237   : > { %v3051_v18 = vadd.f32 %v3050_v61, %v3049_v56  ;;  %v1803_v53 = vor.u32 1.1754944e-38, %v1802_v16  ;;  %vm1841_vm15 = vweird.f32 %v17679_v17  ;;  %v11342_v29 = vmul.f32 -1.442695, %v17745_v54 }
 0x238   : > { %v17768_v25 = vadd.f32 %v1253_v63, %v17622_v23  ;;  %v1799_v61 = vsel %vm17761_vm14, %v17691_v28, %v1795_v8  ;;  %vm1842_vm3 = vweird.f32 %v17698_v10  ;;  %vm17776_vm1 = vcmp.eq.f32.partialorder %v1845_v58, 8.507059e+37 }
 0x239   : > { %v3154_v27 = vrot.slane %v3051_v18, 6  ;;  %v17770_v55 = vpop.eup %15403  ;;  %v17780_v6 = vadd.f32 1.0, %v15400_v5  ;;  %v1944_v2 = vmul.f32 %v17710_v14, %v1943_v44  ;;  %15407 = vpow2.f32 %v11341_v62  ;;  %vm17798_vm2 = vmor %vm1841_vm15, %vm1842_vm3 }
 0x23a   : > { %v11343_v57 = vmul.f32 -1.442695, %v17749_v60  ;;  %v1848_v40 = vor.u32 1.1754944e-38, %v1847_v21  ;;  %v1809_v18 = vmul.f32 %v17714_v13, %v1808_v12  ;;  %v1822_v28 = vmul.f32 %v17751_v36, %v17708_v49 }
 0x23b   : > { %v3164_v32 = vsel %vm22681_vm8, %v3154_v27, %v3155_v42  ;;  %15409 = vpow2.f32 %v11344_v3  ;;  %v15406_v42 = vpop.eup %15405  ;;  %v1815_v27 = vand.u32 2147483647, %v17693_v39  ;;  %v1987_v1 = vmul.f32 %v17770_v55, %v17712_v26 }
 0x23c   : > { %v17729_v4 = vsel %vm22680_vm10, %v3162_v31, %v3164_v32  ;;  %v1840_v31 = vadd.f32 %v17698_v10, %v1839_v46  ;;  %15411 = vpow2.f32 %v11342_v29  ;;  %v11351_v59 = vmul.f32 -1.442695, %v17768_v25 }
 0x23d   : > { %22799 = vst [vmem:[#allocation37_spill] sm:$0xff] %v17729_v4  ;;  %v1804_v43 = vsel %vm17753_vm13, %v1803_v53, %v1799_v61  ;;  %v1817_v7 = vand.u32 2147483648, %v17693_v39  ;;  %v1952_v48 = vand.u32 2147483648, %v17689_v45  ;;  %15413 = vrcp.f32 %v17780_v6 }
 0x23e   : > { %v1844_v0 = vsel %vm17798_vm2, %v17698_v10, %v1840_v31  ;;  %v1945_v38 = vadd.f32 %v17710_v14, %v1944_v2  ;;  %vm1947_vm4 = vweird.f32 %v17710_v14  ;;  %15415 = vpow2.f32 %v11343_v57 }
 0x23f   : > { %v1810_v17 = vadd.f32 %v17714_v13, %v1809_v18  ;;  %vm1812_vm5 = vweird.f32 %v17714_v13  ;;  %v1823_v52 = vsub.f32 1.0, %v1822_v28  ;;  %v17812_v47 = vadd.f32 1.0, %v15406_v42  ;;  %v15408_v16 = vpop.eup %15407 }
 0x240   : > { %vm1946_vm6 = vweird.f32 %v17689_v45  ;;  %v1950_v58 = vand.u32 2147483647, %v17689_v45  ;;  %v1988_v8 = vsub.f32 1.0, %v1987_v1  ;;  %15417 = vpow2.f32 %v11351_v59 }
 0x241   : > { %v15410_v10 = vpop.eup %15409  ;;  %v1849_v46 = vsel %vm17776_vm1, %v1848_v40, %v1844_v0  ;;  %vm1811_vm7 = vweird.f32 %v17693_v39  ;;  %vm17819_vm9 = vcmp.eq.f32.partialorder %v1815_v27, 8.507059e+37  ;;  %vm17825_vm11 = vmor %vm1946_vm6, %vm1947_vm4  ;;  %v2935_v45 = vmul.f32 %v1804_v43, %v17634_v24 }
 0x242   : > { %v15412_v44 = vpop.eup %15411  ;;  %vm17832_vm12 = vmor %vm1811_vm7, %vm1812_vm5  ;;  %v1818_v39 = vor.u32 1.1754944e-38, %v1817_v7  ;;  %v1949_v9 = vsel %vm17825_vm11, %v17710_v14, %v1945_v38  ;;  %v1953_v21 = vor.u32 1.1754944e-38, %v1952_v48  ;;  %v1824_v24 = vmul.f32 %v17751_v36, %v1823_v52  ;;  %v1340_v38 = vpop.f32.mrf.mxu0 }
 0x243   : > { %v17839_v12 = vpop.eup %15413  ;;  %v1814_v3 = vsel %vm17832_vm12, %v17714_v13, %v1810_v17  ;;  %15419 = vrcp.f32 %v17812_v47  ;;  %v17846_v56 = vadd.f32 1.0, %v15408_v16  ;;  %v17849_v29 = vmul.f32 %v1849_v46, %v17642_v51 }
 0x244   : > { %v15416_v53 = vpop.eup %15415  ;;  %vm1951_vm13 = vcmp.eq.f32.partialorder %v1950_v58, 8.507059e+37  ;;  %v1989_v14 = vmul.f32 %v17770_v55, %v1988_v8  ;;  %v17852_v61 = vadd.f32 1.0, %v15410_v10  ;;  %v1830_v20 = vand.u32 2147483647, %v17708_v49  ;;  %v1282_v10 = vpop.f32.mrf.mxu2 }
 0x245   : > { %v1832_v31 = vand.u32 2147483648, %v17708_v49  ;;  %v1954_v13 = vsel %vm1951_vm13, %v1953_v21, %v1949_v9  ;;  %v17856_v2 = vadd.f32 1.0, %v15412_v44  ;;  %v1819_v40 = vsel %vm17819_vm9, %v1818_v39, %v1814_v3 }
 0x246   : > { %v15418_v57 = vpop.eup %15417  ;;  %v1995_v18 = vand.u32 2147483647, %v17712_v26  ;;  %v1997_v51 = vand.u32 2147483648, %v17712_v26  ;;  %v1957_v28 = vmul.f32 %v17839_v12, %v17780_v6  ;;  %v1825_v42 = vadd.f32 %v17751_v36, %v1824_v24 }
 0x247   : > { %vm1827_vm14 = vweird.f32 %v17751_v36  ;;  %15421 = vrcp.f32 %v17846_v56  ;;  %v17867_v27 = vadd.f32 1.0, %v15416_v53  ;;  %v2945_v1 = vmul.f32 %v1954_v13, %v17658_v37 }
 0x248   : > { %v1990_v59 = vadd.f32 %v17770_v55, %v1989_v14  ;;  %vm1992_vm15 = vweird.f32 %v17770_v55  ;;  %15423 = vrcp.f32 %v17852_v61  ;;  %vm1826_vm3 = vweird.f32 %v17708_v49  ;;  %v1311_v14 = vpop.f32.mrf.mxu3 }
 0x249   : > { %v17873_v43 = vpop.eup %15419  ;;  %vm17876_vm1 = vcmp.eq.f32.partialorder %v1830_v20, 8.507059e+37  ;;  %15425 = vrcp.f32 %v17856_v2  ;;  %v17881_v7 = vadd.f32 1.0, %v15418_v57  ;;  %v17884_v37 = vmul.f32 %v1819_v40, %v17662_v19  ;;  %vm17886_vm2 = vmor %vm1826_vm3, %vm1827_vm14 }
 0x24a   : > { %vm1991_vm4 = vweird.f32 %v17712_v26  ;;  %v1958_v0 = vsub.f32 1.0, %v1957_v28  ;;  %v1967_v49 = vand.u32 2147483648, %v17780_v6  ;;  %v1829_v17 = vsel %vm17886_vm2, %v17751_v36, %v1825_v42 }
 0x24b   : > { %v1833_v52 = vor.u32 1.1754944e-38, %v1832_v31  ;;  %vm17897_vm5 = vmor %vm1991_vm4, %vm1992_vm15  ;;  %vm17901_vm6 = vcmp.eq.f32.partialorder %v1995_v18, 8.507059e+37  ;;  %15427 = vrcp.f32 %v17867_v27  ;;  %v17906_v26 = vadd.f32 %v2945_v1, %v2935_v45 }
 0x24c   : > { %v1994_v58 = vsel %vm17897_vm5, %v17770_v55, %v1990_v59  ;;  %v1998_v36 = vor.u32 1.1754944e-38, %v1997_v51  ;;  %v1972_v8 = vmul.f32 %v17873_v43, %v17812_v47  ;;  %v1965_v63 = vand.u32 2147483647, %v17780_v6 }
 0x24d   : > { %v17913_v46 = vpop.eup %15421  ;;  %v1982_v5 = vand.u32 2147483648, %v17812_v47  ;;  %15429 = vrcp.f32 %v17881_v7  ;;  %v17919_v44 = vadd.f32 %v1340_v38, %v17630_v22  ;;  %v17925_v55 = vsel %vm17876_vm1, %v1833_v52, %v1829_v17 }
 0x24e   : > { %v17921_v45 = vpop.eup %15423  ;;  %v1959_v62 = vmul.f32 %v17839_v12, %v1958_v0  ;;  %vm1961_vm7 = vweird.f32 %v17780_v6  ;;  %v1968_v39 = vor.u32 1.1754944e-38, %v1967_v49  ;;  %v1999_v21 = vsel %vm17901_vm6, %v1998_v36, %v1994_v58  ;;  %v1343_v58 = vpop.f32.mrf.mxu0 }
 0x24f   : > { %v17929_v9 = vpop.eup %15425  ;;  %v1980_v3 = vand.u32 2147483647, %v17812_v47  ;;  %v2102_v24 = vand.u32 2147483648, %v17846_v56  ;;  %v2147_v53 = vand.u32 2147483648, %v17852_v61  ;;  %vm1962_vm9 = vweird.f32 %v17839_v12 }
 0x250   : > { %v1973_v20 = vsub.f32 1.0, %v1972_v8  ;;  %v2092_v31 = vmul.f32 %v17913_v46, %v17846_v56  ;;  %v17940_v13 = vadd.f32 %v1282_v10, %v17648_v35  ;;  %vm17944_vm11 = vcmp.eq.f32.partialorder %v1965_v63, 8.507059e+37  ;;  %vm17977_vm14 = vmor %vm1961_vm7, %vm1962_vm9 }
 0x251   : > { %v17942_v57 = vpop.eup %15427  ;;  %v17948_v18 = vor.u32 1.1754944e-38, %v1982_v5  ;;  %v2100_v51 = vand.u32 2147483647, %v17846_v56  ;;  %v2137_v28 = vmul.f32 %v17921_v45, %v17852_v61  ;;  %v11354_v42 = vmul.f32 -1.442695, %v17919_v44 }
 0x252   : > { %v17955_v1 = vmul.f32 %v1999_v21, %v17684_v50  ;;  %v1960_v59 = vadd.f32 %v17839_v12, %v1959_v62  ;;  %vm1976_vm12 = vweird.f32 %v17812_v47  ;;  %v2145_v32 = vand.u32 2147483647, %v17852_v61  ;;  %v1256_v50 = vpop.f32.mrf.mxu1 }
 0x253   : > { %v2107_v48 = vmul.f32 %v17929_v9, %v17856_v2  ;;  %v17962_v0 = vpop.eup %15429  ;;  %vm1977_vm13 = vweird.f32 %v17873_v43  ;;  %v17965_v49 = vor.u32 1.1754944e-38, %v2102_v24  ;;  %v17967_v38 = vor.u32 1.1754944e-38, %v2147_v53  ;;  %v1285_v53 = vpop.f32.mrf.mxu2 }
 0x254   : > { %15431 = vpow2.f32 %v11354_v42  ;;  %v1974_v17 = vmul.f32 %v17873_v43, %v1973_v20  ;;  %v2093_v52 = vsub.f32 1.0, %v2092_v31  ;;  %v2115_v19 = vand.u32 2147483647, %v17856_v2  ;;  %vm18023_vm5 = vmor %vm1976_vm12, %vm1977_vm13 }
 0x255   : > { %v2122_v16 = vmul.f32 %v17942_v57, %v17867_v27  ;;  %v2138_v8 = vsub.f32 1.0, %v2137_v28  ;;  %v2117_v10 = vand.u32 2147483648, %v17856_v2  ;;  %v11352_v63 = vmul.f32 -1.442695, %v17940_v13 }
 0x256   : > { %v17984_v5 = vadd.f32 %v1311_v14, %v17655_v33  ;;  %v1964_v62 = vsel %vm17977_vm14, %v17839_v12, %v1960_v59  ;;  %vm2096_vm15 = vweird.f32 %v17846_v56  ;;  %v2108_v21 = vsub.f32 1.0, %v2107_v48 }
 0x257   : > { %v2242_v6 = vmul.f32 %v17962_v0, %v17881_v7  ;;  %v17993_v24 = vadd.f32 %v1256_v50, %v17622_v23  ;;  %vm2097_vm3 = vweird.f32 %v17913_v46  ;;  %vm2141_vm1 = vweird.f32 %v17852_v61 }
 0x258   : > { %15433 = vpow2.f32 %v11352_v63  ;;  %v11353_v14 = vmul.f32 -1.442695, %v17984_v5  ;;  %v17999_v20 = vadd.f32 %v1343_v58, %v17630_v22  ;;  %v1975_v12 = vadd.f32 %v17873_v43, %v1974_v17  ;;  %vm18062_vm13 = vmor %vm2096_vm15, %vm2097_vm3 }
 0x259   : > { %vm18002_vm2 = vcmp.eq.f32.partialorder %v1980_v3, 8.507059e+37  ;;  %v2094_v28 = vmul.f32 %v17913_v46, %v2093_v52  ;;  %vm2111_vm4 = vweird.f32 %v17856_v2  ;;  %v2123_v42 = vsub.f32 1.0, %v2122_v16  ;;  %v1314_v3 = vpop.f32.mrf.mxu3 }
 0x25a   : > { %v11361_v59 = vmul.f32 -1.442695, %v17993_v24  ;;  %v15432_v48 = vpop.eup %15431  ;;  %v2139_v50 = vmul.f32 %v17921_v45, %v2138_v8  ;;  %15435 = vpow2.f32 %v11353_v14  ;;  %v11364_v58 = vmul.f32 -1.442695, %v17999_v20 }
 0x25b   : > { %v18012_v36 = vadd.f32 %v1285_v53, %v17648_v35  ;;  %v1969_v17 = vsel %vm17944_vm11, %v1968_v39, %v1964_v62  ;;  %v2109_v52 = vmul.f32 %v17929_v9, %v2108_v21  ;;  %v2243_v63 = vsub.f32 1.0, %v2242_v6 }
 0x25c   : > { %v18017_v4 = vadd.f32 1.0, %v15432_v48  ;;  %vm2142_vm6 = vweird.f32 %v17921_v45  ;;  %v2130_v8 = vand.u32 2147483647, %v17867_v27  ;;  %15437 = vpow2.f32 %v11361_v59 }
 0x25d   : > { %v11362_v39 = vmul.f32 -1.442695, %v18012_v36  ;;  %v1979_v40 = vsel %vm18023_vm5, %v17873_v43, %v1975_v12  ;;  %vm18033_vm7 = vcmp.eq.f32.partialorder %v2100_v51, 8.507059e+37  ;;  %vm18037_vm9 = vcmp.eq.f32.partialorder %v2145_v32, 8.507059e+37  ;;  %vm18072_vm5 = vmor %vm2141_vm1, %vm2142_vm6 }
 0x25e   : > { %vm18041_vm11 = vcmp.eq.f32.partialorder %v2115_v19, 8.507059e+37  ;;  %v2124_v6 = vmul.f32 %v17942_v57, %v2123_v42  ;;  %15439 = vrcp.f32 %v18017_v4  ;;  %v18048_v53 = vadd.f32 %v1314_v3, %v17655_v33  ;;  %v15434_v43 = vpop.eup %15433 }
 0x25f   : > { %v2095_v51 = vadd.f32 %v17913_v46, %v2094_v28  ;;  %v2140_v14 = vadd.f32 %v17921_v45, %v2139_v50  ;;  %vm2112_vm12 = vweird.f32 %v17929_v9  ;;  %15441 = vpow2.f32 %v11364_v58 }
 0x260   : > { %v2110_v32 = vadd.f32 %v17929_v9, %v2109_v52  ;;  %v2244_v19 = vmul.f32 %v17962_v0, %v2243_v63  ;;  %v18055_v12 = vadd.f32 1.0, %v15434_v43  ;;  %15443 = vpow2.f32 %v11362_v39  ;;  %v15436_v42 = vpop.eup %15435  ;;  %vm18090_vm3 = vmor %vm2111_vm4, %vm2112_vm12 }
 0x261   : > { %v2946_v59 = vmul.f32 %v1969_v17, %v17696_v11  ;;  %v2118_v48 = vor.u32 1.1754944e-38, %v2117_v10  ;;  %vm2126_vm14 = vweird.f32 %v17867_v27  ;;  %v2132_v50 = vand.u32 2147483648, %v17867_v27 }
 0x262   : > { %v2125_v11 = vadd.f32 %v17942_v57, %v2124_v6  ;;  %vm2127_vm15 = vweird.f32 %v17942_v57  ;;  %15445 = vrcp.f32 %v18055_v12  ;;  %v11363_v56 = vmul.f32 -1.442695, %v18048_v53  ;;  %v15438_v10 = vpop.eup %15437 }
 0x263   : > { %v1984_v3 = vsel %vm18002_vm2, %v17948_v18, %v1979_v40  ;;  %v2099_v61 = vsel %vm18062_vm13, %v17913_v46, %v2095_v51  ;;  %vm18094_vm1 = vcmp.eq.f32.partialorder %v2130_v8, 8.507059e+37  ;;  %v18098_v63 = vadd.f32 1.0, %v15436_v42  ;;  %vm18114_vm4 = vmor %vm2126_vm14, %vm2127_vm15 }
 0x264   : > { %v18100_v31 = vpop.eup %15439  ;;  %v2144_v46 = vsel %vm18072_vm5, %v17921_v45, %v2140_v14  ;;  %v2114_v2 = vsel %vm18090_vm3, %v17929_v9, %v2110_v32  ;;  %v2245_v18 = vadd.f32 %v17962_v0, %v2244_v19  ;;  %vm2247_vm2 = vweird.f32 %v17962_v0  ;;  %v1258_v9 = vpop.f32.mrf.mxu1 }
 0x265   : > { %v15442_v16 = vpop.eup %15441  ;;  %v2133_v39 = vor.u32 1.1754944e-38, %v2132_v50  ;;  %vm2246_vm6 = vweird.f32 %v17881_v7  ;;  %v2252_v45 = vand.u32 2147483648, %v17881_v7  ;;  %v18120_v40 = vadd.f32 1.0, %v15438_v10 }
 0x266   : > { %v15444_v6 = vpop.eup %15443  ;;  %v2129_v43 = vsel %vm18114_vm4, %v17942_v57, %v2125_v11  ;;  %v2250_v51 = vand.u32 2147483647, %v17881_v7  ;;  %v2287_v27 = vmul.f32 %v18100_v31, %v18017_v4  ;;  %15447 = vpow2.f32 %v11363_v56  ;;  %vm18138_vm12 = vmor %vm2246_vm6, %vm2247_vm2 }
 0x267   : > { %v2104_v14 = vsel %vm18033_vm7, %v17965_v49, %v2099_v61  ;;  %v2149_v32 = vsel %vm18037_vm9, %v17967_v38, %v2144_v46  ;;  %v2119_v19 = vsel %vm18041_vm11, %v2118_v48, %v2114_v2  ;;  %15449 = vrcp.f32 %v18098_v63 }
 0x268   : > { %v18143_v7 = vpop.eup %15445  ;;  %v2249_v49 = vsel %vm18138_vm12, %v17962_v0, %v2245_v18  ;;  %v18148_v62 = vadd.f32 1.0, %v15442_v16  ;;  %v18150_v38 = vadd.f32 1.0, %v15444_v6  ;;  %v18153_v47 = vadd.f32 %v1258_v9, %v17622_v23  ;;  %v1287_v6 = vpop.f32.mrf.mxu2 }
 0x269   : > { %v2947_v21 = vmul.f32 %v1984_v3, %v17717_v41  ;;  %v2134_v42 = vsel %vm18094_vm1, %v2133_v39, %v2129_v43  ;;  %v2253_v28 = vor.u32 1.1754944e-38, %v2252_v45  ;;  %15451 = vrcp.f32 %v18120_v40 }
 0x26a   : > { %v2955_v48 = vmul.f32 %v2104_v14, %v17726_v15  ;;  %v2958_v50 = vmul.f32 %v2149_v32, %v17739_v30  ;;  %vm2251_vm7 = vcmp.eq.f32.partialorder %v2250_v51, 8.507059e+37  ;;  %v2288_v0 = vsub.f32 1.0, %v2287_v27  ;;  %v1316_v32 = vpop.f32.mrf.mxu3 }
 0x26b   : > { %v2956_v58 = vmul.f32 %v2119_v19, %v17745_v54  ;;  %v2254_v11 = vsel %vm2251_vm7, %v2253_v28, %v2249_v49  ;;  %v2257_v56 = vmul.f32 %v18143_v7, %v18055_v12  ;;  %15453 = vrcp.f32 %v18148_v62 }
 0x26c   : > { %v15448_v41 = vpop.eup %15447  ;;  %v2937_v10 = vmul.f32 %v17925_v55, %v17670_v34  ;;  %v2957_v3 = vmul.f32 %v2134_v42, %v17749_v60  ;;  %15455 = vrcp.f32 %v18150_v38  ;;  %v11371_v15 = vmul.f32 -1.442695, %v18153_v47 }
 0x26d   : > { %v18170_v30 = vpop.eup %15449  ;;  %v3104_v54 = vadd.f32 %v17955_v1, %v17849_v29  ;;  %v3078_v61 = vadd.f32 %v2946_v59, %v17884_v37  ;;  %v2295_v17 = vand.u32 2147483647, %v18017_v4  ;;  %v2297_v52 = vand.u32 2147483648, %v18017_v4 }
 0x26e   : > { %v3091_v46 = vadd.f32 %v2947_v21, %v2937_v10  ;;  %v3066_v34 = vadd.f32 %v17906_v26, %v2955_v48  ;;  %v2965_v60 = vmul.f32 %v2254_v11, %v17768_v25  ;;  %v2289_v55 = vmul.f32 %v18100_v31, %v2288_v0  ;;  %v1345_v25 = vpop.f32.mrf.mxu0 }
 0x26f   : > { %v18180_v2 = vpop.eup %15451  ;;  %v18182_v18 = vadd.f32 %v3104_v54, %v2958_v50  ;;  %v18184_v16 = vadd.f32 %v3078_v61, %v2956_v58  ;;  %vm2291_vm9 = vweird.f32 %v18017_v4  ;;  %v2258_v29 = vsub.f32 1.0, %v2257_v56 }
 0x270   : > { %v18187_v37 = vadd.f32 %v3091_v46, %v2957_v3  ;;  %v2272_v1 = vmul.f32 %v18170_v30, %v18098_v63  ;;  %v18191_v59 = vadd.f32 1.0, %v15448_v41  ;;  %15457 = vpow2.f32 %v11371_v15 }
 0x271   : > { %v18193_v26 = vpop.eup %15453  ;;  %vm18195_vm11 = vcmp.eq.f32.partialorder %v2295_v17, 8.507059e+37  ;;  %v2298_v39 = vor.u32 1.1754944e-38, %v2297_v52  ;;  %v2265_v45 = vand.u32 2147483647, %v18055_v12  ;;  %v2267_v9 = vand.u32 2147483648, %v18055_v12 }
 0x272   : > { %v18201_v43 = vpop.eup %15455  ;;  %v18203_v51 = vadd.f32 %v3066_v34, %v2965_v60  ;;  %v2290_v27 = vadd.f32 %v18100_v31, %v2289_v55  ;;  %vm2292_vm13 = vweird.f32 %v18100_v31  ;;  %v2392_v14 = vmul.f32 %v18180_v2, %v18120_v40 }
 0x273   : > { %v2259_v19 = vmul.f32 %v18143_v7, %v2258_v29  ;;  %vm2261_vm14 = vweird.f32 %v18055_v12  ;;  %v2282_v57 = vand.u32 2147483648, %v18098_v63  ;;  %v18213_v49 = vadd.f32 %v1345_v25, %v17630_v22  ;;  %vm18222_vm5 = vmor %vm2291_vm9, %vm2292_vm13 }
 0x274   : > { %v2273_v21 = vsub.f32 1.0, %v2272_v1  ;;  %v2402_v42 = vand.u32 2147483648, %v18120_v40  ;;  %15459 = vrcp.f32 %v18191_v59  ;;  %v18218_v28 = vadd.f32 %v1287_v6, %v17648_v35 }
 0x275   : > { %vm18226_vm15 = vcmp.eq.f32.partialorder %v2265_v45, 8.507059e+37  ;;  %v2268_v0 = vor.u32 1.1754944e-38, %v2267_v9  ;;  %v2437_v58 = vmul.f32 %v18193_v26, %v18148_v62  ;;  %v2407_v11 = vmul.f32 %v18201_v43, %v18150_v38  ;;  %v1319_v45 = vpop.f32.mrf.mxu3 }
 0x276   : > { %v18235_v56 = vadd.f32 %v1316_v32, %v17655_v33  ;;  %v15458_v41 = vpop.eup %15457  ;;  %v2294_v4 = vsel %vm18222_vm5, %v18100_v31, %v2290_v27  ;;  %vm2276_vm3 = vweird.f32 %v18098_v63  ;;  %v2280_v10 = vand.u32 2147483647, %v18098_v63 }
 0x277   : > { %v2393_v3 = vsub.f32 1.0, %v2392_v14  ;;  %v2400_v15 = vand.u32 2147483647, %v18120_v40  ;;  %v2260_v54 = vadd.f32 %v18143_v7, %v2259_v19  ;;  %vm2262_vm1 = vweird.f32 %v18143_v7  ;;  %v1261_v14 = vpop.f32.mrf.mxu1 }
 0x278   : > { %v18245_v61 = vor.u32 1.1754944e-38, %v2282_v57  ;;  %v2447_v17 = vand.u32 2147483648, %v18148_v62  ;;  %v2274_v52 = vmul.f32 %v18170_v30, %v2273_v21  ;;  %v18249_v46 = vor.u32 1.1754944e-38, %v2402_v42  ;;  %vm18262_vm4 = vmor %vm2261_vm14, %vm2262_vm1  ;;  %v1348_v21 = vpop.f32.mrf.mxu0  ;;  %v1290_v42 = vpop.f32.mrf.mxu2 }
 0x279   : > { %v18251_v31 = vadd.f32 1.0, %v15458_v41  ;;  %v11374_v34 = vmul.f32 -1.442695, %v18213_v49  ;;  %v2299_v60 = vsel %vm18195_vm11, %v2298_v39, %v2294_v4  ;;  %vm2396_vm2 = vweird.f32 %v18120_v40 }
 0x27a   : > { %v2438_v55 = vsub.f32 1.0, %v2437_v58  ;;  %v2445_v29 = vand.u32 2147483647, %v18148_v62  ;;  %v2408_v1 = vsub.f32 1.0, %v2407_v11  ;;  %v18258_v25 = vpop.eup %15459  ;;  %vm2277_vm6 = vweird.f32 %v18170_v30 }
 0x27b   : > { %vm18267_vm12 = vcmp.eq.f32.partialorder %v2280_v10, 8.507059e+37  ;;  %v2394_v8 = vmul.f32 %v18180_v2, %v2393_v3  ;;  %vm2397_vm7 = vweird.f32 %v18180_v2  ;;  %vm2441_vm9 = vweird.f32 %v18148_v62  ;;  %vm18306_vm5 = vmor %vm2276_vm3, %vm2277_vm6 }
 0x27c   : > { %15461 = vrcp.f32 %v18251_v31  ;;  %v2264_v12 = vsel %vm18262_vm4, %v18143_v7, %v2260_v54  ;;  %v18278_v39 = vor.u32 1.1754944e-38, %v2447_v17  ;;  %vm2411_vm11 = vweird.f32 %v18150_v38  ;;  %vm18344_vm4 = vmor %vm2396_vm2, %vm2397_vm7 }
 0x27d   : > { %v2415_v6 = vand.u32 2147483647, %v18150_v38  ;;  %v2422_v27 = vmul.f32 %v18258_v25, %v18191_v59  ;;  %v2968_v32 = vmul.f32 %v2299_v60, %v17919_v44  ;;  %v2275_v19 = vadd.f32 %v18170_v30, %v2274_v52 }
 0x27e   : > { %v2417_v57 = vand.u32 2147483648, %v18150_v38  ;;  %15463 = vpow2.f32 %v11374_v34  ;;  %v2439_v7 = vmul.f32 %v18193_v26, %v2438_v55  ;;  %v2409_v48 = vmul.f32 %v18201_v43, %v2408_v1 }
 0x27f   : > { %v11372_v58 = vmul.f32 -1.442695, %v18218_v28  ;;  %v11373_v11 = vmul.f32 -1.442695, %v18235_v56  ;;  %v2269_v41 = vsel %vm18226_vm15, %v2268_v0, %v2264_v12  ;;  %v2395_v44 = vadd.f32 %v18180_v2, %v2394_v8 }
 0x280   : > { %vm18294_vm13 = vcmp.eq.f32.partialorder %v2400_v15, 8.507059e+37  ;;  %vm2442_vm14 = vweird.f32 %v18193_v26  ;;  %v18300_v10 = vadd.f32 %v1261_v14, %v17622_v23  ;;  %vm18310_vm15 = vcmp.eq.f32.partialorder %v2445_v29, 8.507059e+37 }
 0x281   : > { %vm18314_vm1 = vcmp.eq.f32.partialorder %v2415_v6, 8.507059e+37  ;;  %v2423_v15 = vsub.f32 1.0, %v2422_v27  ;;  %15465 = vpow2.f32 %v11372_v58  ;;  %v18319_v54 = vadd.f32 %v1348_v21, %v17630_v22  ;;  %vm18356_vm6 = vmor %vm2441_vm9, %vm2442_vm14 }
 0x282   : > { %v18322_v17 = vadd.f32 %v1290_v42, %v17648_v35  ;;  %v18324_v63 = vpop.eup %15461  ;;  %v2279_v52 = vsel %vm18306_vm5, %v18170_v30, %v2275_v19  ;;  %vm2412_vm3 = vweird.f32 %v18201_v43  ;;  %15467 = vpow2.f32 %v11373_v11 }
 0x283   : > { %v11381_v34 = vmul.f32 -1.442695, %v18300_v10  ;;  %v2440_v60 = vadd.f32 %v18193_v26, %v2439_v7  ;;  %v2410_v55 = vadd.f32 %v18201_v43, %v2409_v48  ;;  %v2542_v29 = vmul.f32 %v18324_v63, %v18251_v31  ;;  %vm18370_vm2 = vmor %vm2411_vm11, %vm2412_vm3 }
 0x284   : > { %v11384_v1 = vmul.f32 -1.442695, %v18319_v54  ;;  %v15464_v8 = vpop.eup %15463  ;;  %v18337_v12 = vadd.f32 %v18182_v18, %v2968_v32  ;;  %v2966_v30 = vmul.f32 %v2269_v41, %v17940_v13  ;;  %v11382_v27 = vmul.f32 -1.442695, %v18322_v17 }
 0x285   : > { %15469 = vpow2.f32 %v11381_v34  ;;  %v2284_v14 = vsel %vm18267_vm12, %v18245_v61, %v2279_v52  ;;  %v2424_v40 = vmul.f32 %v18258_v25, %v2423_v15  ;;  %v18361_v18 = vadd.f32 1.0, %v15464_v8  ;;  %v1263_v52 = vpop.f32.mrf.mxu1 }
 0x286   : > { %15471 = vpow2.f32 %v11384_v1  ;;  %v2399_v32 = vsel %vm18344_vm4, %v18180_v2, %v2395_v44  ;;  %v2418_v62 = vor.u32 1.1754944e-38, %v2417_v57  ;;  %v18375_v9 = vadd.f32 %v1319_v45, %v17655_v33 }
 0x287   : > { %15473 = vpow2.f32 %v11382_v27  ;;  %v15466_v19 = vpop.eup %15465  ;;  %v2444_v21 = vsel %vm18356_vm6, %v18193_v26, %v2440_v60  ;;  %v2414_v2 = vsel %vm18370_vm2, %v18201_v43, %v2410_v55  ;;  %v2543_v42 = vsub.f32 1.0, %v2542_v29 }
 0x288   : > { %15475 = vrcp.f32 %v18361_v18  ;;  %v15468_v38 = vpop.eup %15467  ;;  %v2967_v7 = vmul.f32 %v2284_v14, %v17984_v5  ;;  %v2430_v57 = vand.u32 2147483647, %v18191_v59  ;;  %v2432_v48 = vand.u32 2147483648, %v18191_v59 }
 0x289   : > { %v18387_v58 = vadd.f32 1.0, %v15466_v19  ;;  %v2404_v26 = vsel %vm18294_vm13, %v18249_v46, %v2399_v32  ;;  %v2425_v11 = vadd.f32 %v18258_v25, %v2424_v40  ;;  %vm2427_vm12 = vweird.f32 %v18258_v25 }
 0x28a   : > { %v18394_v43 = vadd.f32 1.0, %v15468_v38  ;;  %v2449_v5 = vsel %vm18310_vm15, %v18278_v39, %v2444_v21  ;;  %v2419_v44 = vsel %vm18314_vm1, %v2418_v62, %v2414_v2  ;;  %v11383_v3 = vmul.f32 -1.442695, %v18375_v9  ;;  %v1292_v21 = vpop.f32.mrf.mxu2 }
 0x28b   : > { %v15470_v41 = vpop.eup %15469  ;;  %15477 = vrcp.f32 %v18387_v58  ;;  %v3080_v46 = vadd.f32 %v18184_v16, %v2966_v30  ;;  %vm2426_vm7 = vweird.f32 %v18191_v59  ;;  %v2544_v15 = vmul.f32 %v18324_v63, %v2543_v42 }
 0x28c   : > { %v15472_v4 = vpop.eup %15471  ;;  %15479 = vrcp.f32 %v18394_v43  ;;  %v3093_v39 = vadd.f32 %v18187_v37, %v2967_v7  ;;  %v2975_v50 = vmul.f32 %v2404_v26, %v17993_v24  ;;  %vm18411_vm9 = vmor %vm2426_vm7, %vm2427_vm12  ;;  %vm18415_vm11 = vcmp.eq.f32.partialorder %v2430_v57, 8.507059e+37 }
 0x28d   : > { %v15474_v34 = vpop.eup %15473  ;;  %v2433_v59 = vor.u32 1.1754944e-38, %v2432_v48  ;;  %v2978_v55 = vmul.f32 %v2449_v5, %v17999_v20  ;;  %v2976_v29 = vmul.f32 %v2419_v44, %v18012_v36  ;;  %v2429_v24 = vsel %vm18411_vm9, %v18258_v25, %v2425_v11 }
 0x28e   : > { %v18419_v60 = vpop.eup %15475  ;;  %v18426_v37 = vadd.f32 1.0, %v15470_v41  ;;  %v2550_v1 = vand.u32 2147483647, %v18251_v31  ;;  %15481 = vpow2.f32 %v11383_v3  ;;  %v18432_v8 = vadd.f32 %v1263_v52, %v17622_v23 }
 0x28f   : > { %v2587_v45 = vmul.f32 %v18419_v60, %v18361_v18  ;;  %v2545_v30 = vadd.f32 %v18324_v63, %v2544_v15  ;;  %vm2547_vm13 = vweird.f32 %v18324_v63  ;;  %v2552_v20 = vand.u32 2147483648, %v18251_v31 }
 0x290   : > { %15483 = vrcp.f32 %v18426_v37  ;;  %v18441_v25 = vadd.f32 %v18203_v51, %v2975_v50  ;;  %v2434_v6 = vsel %vm18415_vm11, %v2433_v59, %v2429_v24  ;;  %v18445_v27 = vadd.f32 1.0, %v15472_v4  ;;  %v1350_v51 = vpop.f32.mrf.mxu0 }
 0x291   : > { %v18438_v36 = vpop.eup %15477  ;;  %v18447_v23 = vadd.f32 1.0, %v15474_v34  ;;  %v18452_v13 = vadd.f32 %v18337_v12, %v2978_v55  ;;  %vm2546_vm14 = vweird.f32 %v18251_v31  ;;  %v2588_v40 = vsub.f32 1.0, %v2587_v45 }
 0x292   : > { %v18449_v14 = vpop.eup %15479  ;;  %v2557_v32 = vmul.f32 %v18438_v36, %v18387_v58  ;;  %v18457_v61 = vadd.f32 %v3080_v46, %v2976_v29  ;;  %vm18461_vm5 = vmor %vm2546_vm14, %vm2547_vm13  ;;  %vm18465_vm15 = vcmp.eq.f32.partialorder %v2550_v1, 8.507059e+37  ;;  %v11391_v12 = vmul.f32 -1.442695, %v18432_v8 }
 0x293   : > { %v2572_v31 = vmul.f32 %v18449_v14, %v18394_v43  ;;  %v2977_v2 = vmul.f32 %v2434_v6, %v18048_v53  ;;  %v2549_v42 = vsel %vm18461_vm5, %v18324_v63, %v2545_v30  ;;  %v2553_v38 = vor.u32 1.1754944e-38, %v2552_v20 }
 0x294   : > { %15485 = vrcp.f32 %v18445_v27  ;;  %v15482_v7 = vpop.eup %15481  ;;  %v2595_v57 = vand.u32 2147483647, %v18361_v18  ;;  %v2597_v48 = vand.u32 2147483648, %v18361_v18  ;;  %v18481_v26 = vadd.f32 %v1350_v51, %v17630_v22 }
 0x295   : > { %15487 = vrcp.f32 %v18447_v23  ;;  %v2589_v53 = vmul.f32 %v18419_v60, %v2588_v40  ;;  %vm2591_vm1 = vweird.f32 %v18361_v18  ;;  %v2558_v63 = vsub.f32 1.0, %v2557_v32 }
 0x296   : > { %v18483_v11 = vpop.eup %15483  ;;  %v18488_v41 = vadd.f32 %v1292_v21, %v17648_v35  ;;  %v2554_v5 = vsel %vm18465_vm15, %v2553_v38, %v2549_v42  ;;  %v2573_v44 = vsub.f32 1.0, %v2572_v31  ;;  %15489 = vpow2.f32 %v11391_v12 }
 0x297   : > { %v2692_v3 = vmul.f32 %v18483_v11, %v18426_v37  ;;  %v18494_v22 = vadd.f32 %v3093_v39, %v2977_v2  ;;  %v2565_v4 = vand.u32 2147483647, %v18387_v58  ;;  %v2567_v46 = vand.u32 2147483648, %v18387_v58 }
 0x298   : > { %v2582_v15 = vand.u32 2147483648, %v18394_v43  ;;  %vm18499_vm3 = vcmp.eq.f32.partialorder %v2595_v57, 8.507059e+37  ;;  %v2598_v35 = vor.u32 1.1754944e-38, %v2597_v48  ;;  %v2580_v34 = vand.u32 2147483647, %v18394_v43 }
 0x299   : > { %v18504_v50 = vadd.f32 1.0, %v15482_v7  ;;  %v2985_v39 = vmul.f32 %v2554_v5, %v18153_v47  ;;  %v2590_v16 = vadd.f32 %v18419_v60, %v2589_v53  ;;  %vm2592_vm4 = vweird.f32 %v18419_v60 }
 0x29a   : > { %v18506_v0 = vpop.eup %15485  ;;  %v2559_v59 = vmul.f32 %v18438_v36, %v2558_v63  ;;  %vm2561_vm6 = vweird.f32 %v18387_v58  ;;  %v2574_v29 = vmul.f32 %v18449_v14, %v2573_v44  ;;  %vm2576_vm2 = vweird.f32 %v18394_v43  ;;  %vm18525_vm7 = vmor %vm2591_vm1, %vm2592_vm4 }
 0x29b   : > { %v18512_v55 = vpop.eup %15487  ;;  %v2693_v24 = vsub.f32 1.0, %v2692_v3  ;;  %vm18517_vm12 = vcmp.eq.f32.partialorder %v2565_v4, 8.507059e+37  ;;  %v2568_v47 = vor.u32 1.1754944e-38, %v2567_v46  ;;  %v2583_v45 = vor.u32 1.1754944e-38, %v2582_v15  ;;  %v1321_v46 = vpop.f32.mrf.mxu3 }
 0x29c   : > { %v2737_v30 = vmul.f32 %v18506_v0, %v18445_v27  ;;  %v15490_v20 = vpop.eup %15489  ;;  %vm18529_vm9 = vcmp.eq.f32.partialorder %v2580_v34, 8.507059e+37  ;;  %v2700_v32 = vand.u32 2147483647, %v18426_v37  ;;  %v2702_v51 = vand.u32 2147483648, %v18426_v37  ;;  %v986_v34 = vld [vmem:[#allocation9 + $0x8] sm:$0x3] }
 0x29d   : > { %v2707_v62 = vmul.f32 %v18512_v55, %v18447_v23  ;;  %15491 = vrcp.f32 %v18504_v50  ;;  %v18539_v19 = vadd.f32 %v18441_v25, %v2985_v39  ;;  %v2594_v18 = vsel %vm18525_vm7, %v18419_v60, %v2590_v16 }
 0x29e   : > { %v2560_v31 = vadd.f32 %v18438_v36, %v2559_v59  ;;  %vm2562_vm11 = vweird.f32 %v18438_v36  ;;  %v2575_v12 = vadd.f32 %v18449_v14, %v2574_v29  ;;  %vm2577_vm13 = vweird.f32 %v18449_v14 }
 0x29f   : > { %v2694_v21 = vmul.f32 %v18483_v11, %v2693_v24  ;;  %v2738_v2 = vsub.f32 1.0, %v2737_v30  ;;  %vm2696_vm14 = vweird.f32 %v18426_v37  ;;  %v2708_v42 = vsub.f32 1.0, %v2707_v62  ;;  %vm18557_vm5 = vmor %vm2561_vm6, %vm2562_vm11 }
 0x2a0   : > { %v18550_v25 = vadd.f32 1.0, %v15490_v20  ;;  %v11394_v38 = vmul.f32 -1.442695, %v18481_v26  ;;  %v2599_v60 = vsel %vm18499_vm3, %v2598_v35, %v2594_v18  ;;  %vm18561_vm15 = vcmp.eq.f32.partialorder %v2700_v32, 8.507059e+37  ;;  %vm18572_vm3 = vmor %vm2576_vm2, %vm2577_vm13  ;;  %v1362_v20 = vpop.f32.mrf.mxu1 }
 0x2a1   : > { %v2703_v48 = vor.u32 1.1754944e-38, %v2702_v51  ;;  %vm2741_vm1 = vweird.f32 %v18445_v27  ;;  %v2747_v53 = vand.u32 2147483648, %v18445_v27  ;;  %v2564_v63 = vsel %vm18557_vm5, %v18438_v36, %v2560_v31 }
 0x2a2   : > { %v2745_v5 = vand.u32 2147483647, %v18445_v27  ;;  %v2715_v44 = vand.u32 2147483647, %v18447_v23  ;;  %15493 = vrcp.f32 %v18550_v25  ;;  %v2579_v4 = vsel %vm18572_vm3, %v18449_v14, %v2575_v12 }
 0x2a3   : > { %v18579_v3 = vpop.eup %15491  ;;  %v2695_v36 = vadd.f32 %v18483_v11, %v2694_v21  ;;  %vm2697_vm4 = vweird.f32 %v18483_v11  ;;  %v2739_v43 = vmul.f32 %v18506_v0, %v2738_v2  ;;  %v2988_v15 = vmul.f32 %v2599_v60, %v18213_v49  ;;  %v1391_v2 = vpop.f32.mrf.mxu2 }
 0x2a4   : > { %v2709_v52 = vmul.f32 %v18512_v55, %v2708_v42  ;;  %15495 = vpow2.f32 %v11394_v38  ;;  %v11392_v35 = vmul.f32 -1.442695, %v18488_v41  ;;  %v2569_v39 = vsel %vm18517_vm12, %v2568_v47, %v2564_v63  ;;  %vm18598_vm2 = vmor %vm2696_vm14, %vm2697_vm4 }
 0x2a5   : > { %v2748_v16 = vor.u32 1.1754944e-38, %v2747_v53  ;;  %vm2711_vm6 = vweird.f32 %v18447_v23  ;;  %v2717_v14 = vand.u32 2147483648, %v18447_v23  ;;  %v2584_v59 = vsel %vm18529_vm9, %v2583_v45, %v2579_v4  ;;  %v18664_v23 = vld [vmem:[#allocation12] ss:$0 sm:$0xff] }
 0x2a6   : > { %vm2742_vm7 = vweird.f32 %v18506_v0  ;;  %vm18603_vm11 = vcmp.eq.f32.partialorder %v2745_v5, 8.507059e+37  ;;  %v2722_v24 = vmul.f32 %v18579_v3, %v18504_v50  ;;  %15497 = vpow2.f32 %v11392_v35  ;;  %v3248_v5 = vpop.f32.mrf.mxu3 }
 0x2a7   : > { %v2699_v1 = vsel %vm18598_vm2, %v18483_v11, %v2695_v36  ;;  %v2740_v37 = vadd.f32 %v18506_v0, %v2739_v43  ;;  %vm18613_vm12 = vcmp.eq.f32.partialorder %v2715_v44, 8.507059e+37  ;;  %v18618_v45 = vadd.f32 %v1321_v46, %v17655_v33  ;;  %vm18639_vm13 = vmor %vm2741_vm1, %vm2742_vm7 }
 0x2a8   : > { %v18620_v30 = vperm.slane %v986_v34, 0  ;;  %v15494_v6 = vpop.eup %15493  ;;  %v18623_v40 = vadd.f32 %v18452_v13, %v2988_v15  ;;  %v2710_v32 = vadd.f32 %v18512_v55, %v2709_v52  ;;  %vm2712_vm9 = vweird.f32 %v18512_v55  ;;  %v1364_v49 = vpop.f32.mrf.mxu1 }
 0x2a9   : > { %v2730_v11 = vand.u32 2147483647, %v18504_v50  ;;  %v2986_v51 = vmul.f32 %v2569_v39, %v18218_v28  ;;  %v2987_v62 = vmul.f32 %v2584_v59, %v18235_v56  ;;  %v2842_v33 = vmul.f32 %v15494_v6, %v18550_v25  ;;  %vm18652_vm14 = vmor %vm2711_vm6, %vm2712_vm9 }
 0x2aa   : > { %v18631_v18 = vperm.slane %v986_v34, 1  ;;  %v15496_v31 = vpop.eup %15495  ;;  %v2704_v12 = vsel %vm18561_vm15, %v2703_v48, %v2699_v1  ;;  %v2723_v21 = vsub.f32 1.0, %v2722_v24  ;;  %v11393_v28 = vmul.f32 -1.442695, %v18618_v45 }
 0x2ab   : > { %v18645_v56 = vadd.f32 %v1362_v20, %v18620_v30  ;;  %v2744_v42 = vsel %vm18639_vm13, %v18506_v0, %v2740_v37  ;;  %v2843_v27 = vsub.f32 1.0, %v2842_v33  ;;  %v2850_v60 = vand.u32 2147483647, %v18550_v25 }
 0x2ac   : > { %v18657_v7 = vadd.f32 1.0, %v15496_v31  ;;  %v15498_v57 = vpop.eup %15497  ;;  %v2714_v48 = vsel %vm18652_vm14, %v18512_v55, %v2710_v32  ;;  %v2852_v53 = vand.u32 2147483648, %v18550_v25  ;;  %15499 = vpow2.f32 %v11393_v28 }
 0x2ad   : > { %v11325_v0 = vmul.f32 -1.442695, %v18645_v56  ;;  %v2844_v63 = vmul.f32 %v15494_v6, %v2843_v27  ;;  %vm2847_vm5 = vweird.f32 %v15494_v6  ;;  %v18668_v58 = vadd.f32 %v1391_v2, %v18631_v18 }
 0x2ae   : > { %15501 = vrcp.f32 %v18657_v7  ;;  %v2718_v44 = vor.u32 1.1754944e-38, %v2717_v14  ;;  %v2732_v4 = vand.u32 2147483648, %v18504_v50  ;;  %v18671_v36 = vadd.f32 1.0, %v15498_v57 }
 0x2af   : > { %15503 = vpow2.f32 %v11325_v0  ;;  %v2995_v55 = vmul.f32 %v2704_v12, %v18300_v10  ;;  %v2749_v43 = vsel %vm18603_vm11, %v2748_v16, %v2744_v42  ;;  %vm2726_vm15 = vweird.f32 %v18504_v50 }
 0x2b0   : > { %v2845_v46 = vadd.f32 %v15494_v6, %v2844_v63  ;;  %vm2846_vm1 = vweird.f32 %v18550_v25  ;;  %v2719_v15 = vsel %vm18613_vm12, %v2718_v44, %v2714_v48  ;;  %v2853_v52 = vor.u32 1.1754944e-38, %v2852_v53 }
 0x2b1   : > { %vm2848_vm3 = vmor %vm2846_vm1, %vm2847_vm5  ;;  %15505 = vrcp.f32 %v18671_v36  ;;  %v18682_v35 = vadd.f32 %v18664_v23, %v3248_v5  ;;  %v2724_v10 = vmul.f32 %v18579_v3, %v2723_v21  ;;  %vm2851_vm4 = vcmp.eq.f32.partialorder %v2850_v60, 8.507059e+37  ;;  %v1393_v60 = vpop.f32.mrf.mxu2 }
 0x2b2   : > { %v2849_v34 = vsel %vm2848_vm3, %v15494_v6, %v2845_v46  ;;  %v11326_v39 = vmul.f32 -1.442695, %v18668_v58  ;;  %v15500_v16 = vpop.eup %15499  ;;  %v3082_v14 = vadd.f32 %v18457_v61, %v2986_v51  ;;  %v18688_v25 = vadd.f32 %v18494_v22, %v2987_v62 }
 0x2b3   : > { %vm2727_vm6 = vweird.f32 %v18579_v3  ;;  %v2854_v59 = vsel %vm2851_vm4, %v2853_v52, %v2849_v34  ;;  %v2998_v24 = vmul.f32 %v2749_v43, %v18319_v54  ;;  %v2996_v1 = vmul.f32 %v2719_v15, %v18322_v17 }
 0x2b4   : > { %v15502_v29 = vpop.eup %15501  ;;  %vm18693_vm2 = vcmp.eq.f32.partialorder %v2730_v11, 8.507059e+37  ;;  %v3005_v47 = vmul.f32 %v2854_v59, %v18432_v8  ;;  %v3070_v61 = vadd.f32 %v18539_v19, %v2995_v55  ;;  %v18700_v6 = vadd.f32 1.0, %v15500_v16  ;;  %vm18717_vm7 = vmor %vm2726_vm15, %vm2727_vm6 }
 0x2b5   : > { %v15504_v20 = vpop.eup %15503  ;;  %v2887_v22 = vmul.f32 %v15502_v29, %v18657_v7  ;;  %v16381_v32 = vmov 0.0   ;;  %v11421_v51 = vmul.f32 -1.442695, %v18682_v35  ;;  %v2725_v54 = vadd.f32 %v18579_v3, %v2724_v10 }
 0x2b6   : > { %705 = vst [vmem:[#allocation2 + $0x8] sm:$0xff] %v16381_v32  ;;  %v2733_v17 = vor.u32 1.1754944e-38, %v2732_v4  ;;  %15507 = vpow2.f32 %v11326_v39  ;;  %v18705_v11 = vadd.f32 %v1364_v49, %v18620_v30  ;;  %v3071_v8 = vadd.f32 %v3070_v61, %v3005_v47  ;;  %v3250_v47 = vpop.f32.mrf.mxu3 }
 0x2b7   : > { %v15506_v62 = vpop.eup %15505  ;;  %v2888_v33 = vsub.f32 1.0, %v2887_v22  ;;  %v2897_v19 = vand.u32 2147483648, %v18657_v7  ;;  %15509 = vrcp.f32 %v18700_v6  ;;  %v3109_v31 = vadd.f32 %v18623_v40, %v2998_v24 }
 0x2b8   : > { %v3083_v12 = vadd.f32 %v3082_v14, %v2996_v1  ;;  %v2857_v13 = vmul.f32 %v15506_v62, %v18671_v36  ;;  %v18711_v21 = vadd.f32 1.0, %v15504_v20  ;;  %vm2892_vm11 = vweird.f32 %v15502_v29 }
 0x2b9   : > { %v2889_v2 = vmul.f32 %v15502_v29, %v2888_v33  ;;  %v2895_v42 = vand.u32 2147483647, %v18657_v7  ;;  %15511 = vpow2.f32 %v11421_v51  ;;  %v2729_v40 = vsel %vm18717_vm7, %v18579_v3, %v2725_v54 }
 0x2ba   : > { %vm2891_vm12 = vweird.f32 %v18657_v7  ;;  %v2858_v38 = vsub.f32 1.0, %v2857_v13  ;;  %v11335_v27 = vmul.f32 -1.442695, %v18705_v11  ;;  %v3072_v50 = vrot.slane %v3071_v8, 4 }
 0x2bb   : > { %v2890_v57 = vadd.f32 %v15502_v29, %v2889_v2  ;;  %v2898_v48 = vor.u32 1.1754944e-38, %v2897_v19  ;;  %v2867_v53 = vand.u32 2147483648, %v18671_v36  ;;  %vm2893_vm9 = vmor %vm2891_vm12, %vm2892_vm11  ;;  %vm2862_vm13 = vweird.f32 %v15506_v62 }
 0x2bc   : > { %v15508_v0 = vpop.eup %15507  ;;  %v2859_v63 = vmul.f32 %v15506_v62, %v2858_v38  ;;  %v2865_v5 = vand.u32 2147483647, %v18671_v36  ;;  %15513 = vrcp.f32 %v18711_v21  ;;  %v2734_v7 = vsel %vm18693_vm2, %v2733_v17, %v2729_v40 }
 0x2bd   : > { %v15510_v3 = vpop.eup %15509  ;;  %v2894_v44 = vsel %vm2893_vm9, %v15502_v29, %v2890_v57  ;;  %vm2896_vm14 = vcmp.eq.f32.partialorder %v2895_v42, 8.507059e+37  ;;  %v18733_v4 = vadd.f32 %v1393_v60, %v18631_v18  ;;  %vm2861_vm5 = vweird.f32 %v18671_v36  ;;  %v1367_v57 = vpop.f32.mrf.mxu1 }
 0x2be   : > { %v2899_v55 = vsel %vm2896_vm14, %v2898_v48, %v2894_v44  ;;  %v2860_v43 = vadd.f32 %v15506_v62, %v2859_v63  ;;  %v2872_v46 = vmul.f32 %v15510_v3, %v18700_v6  ;;  %v3073_v52 = vadd.f32 %v3072_v50, %v3071_v8  ;;  %vm2863_vm15 = vmor %vm2861_vm5, %vm2862_vm13 }
 0x2bf   : > { %v15512_v15 = vpop.eup %15511  ;;  %v3008_v10 = vmul.f32 %v2899_v55, %v18481_v26  ;;  %v2868_v34 = vor.u32 1.1754944e-38, %v2867_v53  ;;  %15515 = vpow2.f32 %v11335_v27  ;;  %vm2866_vm1 = vcmp.eq.f32.partialorder %v2865_v5, 8.507059e+37  ;;  %v1396_v5 = vpop.f32.mrf.mxu2 }
 0x2c0   : > { %v2864_v39 = vsel %vm2863_vm15, %v15506_v62, %v2860_v43  ;;  %v2873_v16 = vsub.f32 1.0, %v2872_v46  ;;  %v18739_v14 = vadd.f32 1.0, %v15508_v0  ;;  %v2880_v29 = vand.u32 2147483647, %v18700_v6 }
 0x2c1   : > { %v3110_v59 = vadd.f32 %v3109_v31, %v3008_v10  ;;  %v2869_v49 = vsel %vm2866_vm1, %v2868_v34, %v2864_v39  ;;  %v2882_v36 = vand.u32 2147483648, %v18700_v6  ;;  %vm2877_vm3 = vweird.f32 %v15510_v3 }
 0x2c2   : > { %v18743_v24 = vpop.eup %15513  ;;  %v3006_v1 = vmul.f32 %v2869_v49, %v18488_v41  ;;  %v2874_v26 = vmul.f32 %v15510_v3, %v2873_v16  ;;  %v18746_v37 = vadd.f32 1.0, %v15512_v15  ;;  %v2997_v20 = vmul.f32 %v2734_v7, %v18375_v9  ;;  %v3253_v16 = vpop.f32.mrf.mxu3 }
 0x2c3   : > { %v3074_v61 = vrot.slane %v3073_v52, 2  ;;  %v3111_v22 = vrot.slane %v3110_v59, 4  ;;  %v11336_v32 = vmul.f32 -1.442695, %v18733_v4  ;;  %vm2876_vm4 = vweird.f32 %v18700_v6 }
 0x2c4   : > { %v3084_v51 = vadd.f32 %v3083_v12, %v3006_v1  ;;  %v2875_v54 = vadd.f32 %v15510_v3, %v2874_v26  ;;  %15517 = vrcp.f32 %v18739_v14  ;;  %vm2878_vm6 = vmor %vm2876_vm4, %vm2877_vm3  ;;  %v2883_v41 = vor.u32 1.1754944e-38, %v2882_v36 }
 0x2c5   : > { %v15516_v17 = vpop.eup %15515  ;;  %v3112_v62 = vadd.f32 %v3111_v22, %v3110_v59  ;;  %v1852_v8 = vmul.f32 %v18743_v24, %v18711_v21  ;;  %v18755_v33 = vadd.f32 %v18664_v23, %v3250_v47  ;;  %vm2881_vm2 = vcmp.eq.f32.partialorder %v2880_v29, 8.507059e+37 }
 0x2c6   : > { %v3085_v9 = vrot.slane %v3084_v51, 4  ;;  %v2879_v19 = vsel %vm2878_vm6, %v15510_v3, %v2875_v54  ;;  %15519 = vrcp.f32 %v18746_v37  ;;  %v3096_v31 = vadd.f32 %v18688_v25, %v2997_v20 }
 0x2c7   : > { %v3075_v6 = vadd.f32 %v3074_v61, %v3073_v52  ;;  %v3113_v12 = vrot.slane %v3112_v62, 2  ;;  %v2884_v13 = vsel %vm2881_vm2, %v2883_v41, %v2879_v19  ;;  %v18760_v42 = vadd.f32 1.0, %v15516_v17 }
 0x2c8   : > { %v3086_v28 = vadd.f32 %v3085_v9, %v3084_v51  ;;  %v3007_v2 = vmul.f32 %v2884_v13, %v18618_v45  ;;  %15521 = vpow2.f32 %v11336_v32  ;;  %v1853_v40 = vsub.f32 1.0, %v1852_v8 }
 0x2c9   : > { %v1862_v50 = vand.u32 2147483648, %v18711_v21  ;;  %v3076_v48 = vrot.slane %v3075_v6, 1  ;;  %v3114_v53 = vadd.f32 %v3113_v12, %v3112_v62  ;;  %15523 = vrcp.f32 %v18760_v42 }
 0x2ca   : > { %v18762_v38 = vpop.eup %15517  ;;  %v3087_v27 = vrot.slane %v3086_v28, 2  ;;  %v3097_v60 = vadd.f32 %v3096_v31, %v3007_v2  ;;  %v11422_v45 = vmul.f32 -1.442695, %v18755_v33  ;;  %vm22679_vm7 = vcmask 1044484  }
 0x2cb   : > { %v1854_v3 = vmul.f32 %v18743_v24, %v1853_v40  ;;  %vm1856_vm11 = vweird.f32 %v18711_v21  ;;  %v1867_v7 = vmul.f32 %v18762_v38, %v18739_v14  ;;  %v18774_v44 = vadd.f32 %v1367_v57, %v18620_v30 }
 0x2cc   : > { %v18765_v25 = vpop.eup %15519  ;;  %v3088_v0 = vadd.f32 %v3087_v27, %v3086_v28  ;;  %v3098_v63 = vrot.slane %v3097_v60, 4  ;;  %v1860_v15 = vand.u32 2147483647, %v18711_v21  ;;  %v18777_v52 = vor.u32 1.1754944e-38, %v1862_v50  ;;  %v1398_v50 = vpop.f32.mrf.mxu2 }
 0x2cd   : > { %v3077_v10 = vadd.f32 %v3076_v48, %v3075_v6  ;;  %v3115_v34 = vrot.slane %v3114_v53, 1  ;;  %vm22676_vm12 = vcmask 1046534   ;;  %vm1857_vm9 = vweird.f32 %v18743_v24  ;;  %v1369_v6 = vpop.f32.mrf.mxu1 }
 0x2ce   : > { %v15522_v55 = vpop.eup %15521  ;;  %v3089_v43 = vrot.slane %v3088_v0, 1  ;;  %v3099_v46 = vadd.f32 %v3098_v63, %v3097_v60  ;;  %v3301_v39 = vmul.f32 %v18765_v25, %v18746_v37  ;;  %vm22675_vm13 = vcmask 1045508   ;;  %vm18814_vm4 = vmor %vm1856_vm11, %vm1857_vm9 }
 0x2cf   : > { %v1875_v29 = vand.u32 2147483647, %v18739_v14  ;;  %v1877_v36 = vand.u32 2147483648, %v18739_v14  ;;  %vm22674_vm14 = vcmask 1043456   ;;  %v1855_v1 = vadd.f32 %v18743_v24, %v1854_v3  ;;  %v18787_v20 = vpop.eup %15523 }
 0x2d0   : > { %v3090_v59 = vadd.f32 %v3089_v43, %v3088_v0  ;;  %v3100_v49 = vrot.slane %v3099_v46, 2  ;;  %v1868_v26 = vsub.f32 1.0, %v1867_v7  ;;  %v18785_v47 = vadd.f32 1.0, %v15522_v55 }
 0x2d1   : > { %15525 = vpow2.f32 %v11422_v45  ;;  %vm18789_vm5 = vcmp.eq.f32.partialorder %v1860_v15, 8.507059e+37  ;;  %v11345_v32 = vmul.f32 -1.442695, %v18774_v44  ;;  %v18795_v51 = vadd.f32 %v1396_v5, %v18631_v18 }
 0x2d2   : > { %v3101_v61 = vadd.f32 %v3100_v49, %v3099_v46  ;;  %v18798_v54 = vadd.f32 %v18664_v23, %v3253_v16  ;;  %v3116_v17 = vadd.f32 %v3115_v34, %v3114_v53  ;;  %v3302_v62 = vsub.f32 1.0, %v3301_v39  ;;  %v22914_v49 = vld [vmem:[#allocation37_spill] sm:$0xff] }
 0x2d3   : > { %v2002_v41 = vmul.f32 %v18787_v20, %v18760_v42  ;;  %15527 = vrcp.f32 %v18785_v47  ;;  %v3156_v8 = vrot.slane %v3077_v10, 4  ;;  %v3157_v9 = vrot.slane %v3090_v59, 3 }
 0x2d4   : > { %v3102_v19 = vrot.slane %v3101_v61, 1  ;;  %vm1871_vm15 = vweird.f32 %v18739_v14  ;;  %v18804_v31 = vor.u32 1.1754944e-38, %v1877_v36  ;;  %v1869_v12 = vmul.f32 %v18762_v38, %v1868_v26  ;;  %v11473_v26 = vld [vmem:[#allocation14 + $0x78] sm:$0xf0] }
 0x2d5   : > { %vm1872_vm1 = vweird.f32 %v18762_v38  ;;  %vm3305_vm3 = vweird.f32 %v18746_v37  ;;  %v3309_v13 = vand.u32 2147483647, %v18746_v37  ;;  %v2003_v28 = vsub.f32 1.0, %v2002_v41 }
 0x2d6   : > { %v3103_v2 = vadd.f32 %v3102_v19, %v3101_v61  ;;  %15529 = vpow2.f32 %v11345_v32  ;;  %v11346_v27 = vmul.f32 -1.442695, %v18795_v51  ;;  %v11423_v60 = vmul.f32 -1.442695, %v18798_v54  ;;  %vm18860_vm9 = vmor %vm1871_vm15, %vm1872_vm1 }
 0x2d7   : > { %v15526_v57 = vpop.eup %15525  ;;  %v3159_v48 = vrot.slane %v3116_v17, 1  ;;  %v1859_v53 = vsel %vm18814_vm4, %v18743_v24, %v1855_v1  ;;  %v3303_v0 = vmul.f32 %v18765_v25, %v3302_v62  ;;  %v18825_v21 = vadd.f32 %v1369_v6, %v18620_v30 }
 0x2d8   : > { %v3168_v63 = vsel %vm22679_vm7, %v3156_v8, %v3157_v9  ;;  %v3158_v45 = vrot.slane %v3103_v2, 2  ;;  %vm18828_vm6 = vcmp.eq.f32.partialorder %v1875_v29, 8.507059e+37  ;;  %v18832_v3 = vadd.f32 1.0, %v15526_v57 }
 0x2d9   : > { %15531 = vpow2.f32 %v11346_v27  ;;  %v18834_v7 = vpop.eup %15527  ;;  %v1870_v55 = vadd.f32 %v18762_v38, %v1869_v12  ;;  %v2004_v24 = vmul.f32 %v18787_v20, %v2003_v28  ;;  %v18839_v43 = vadd.f32 %v1398_v50, %v18631_v18 }
 0x2da   : > { %15533 = vpow2.f32 %v11423_v60  ;;  %v3170_v46 = vsel %vm22676_vm12, %v3158_v45, %v3159_v48  ;;  %v2017_v15 = vmul.f32 %v18834_v7, %v18785_v47  ;;  %v11355_v10 = vmul.f32 -1.442695, %v18825_v21 }
 0x2db   : > { %15535 = vrcp.f32 %v18832_v3  ;;  %v3172_v34 = vsel %vm22675_vm13, %v3168_v63, %v3170_v46  ;;  %v1864_v39 = vsel %vm18789_vm5, %v18777_v52, %v1859_v53  ;;  %v3304_v16 = vadd.f32 %v18765_v25, %v3303_v0  ;;  %v3255_v53 = vpop.f32.mrf.mxu3 }
 0x2dc   : > { %vm3306_vm2 = vweird.f32 %v18765_v25  ;;  %v15530_v59 = vpop.eup %15529  ;;  %v3174_v29 = vsel %vm22674_vm14, %v22914_v49, %v3172_v34  ;;  %v3311_v36 = vand.u32 2147483648, %v18746_v37  ;;  %vm2006_vm11 = vweird.f32 %v18760_v42 }
 0x2dd   : > { %v2018_v1 = vsub.f32 1.0, %v2017_v15  ;;  %v2005_v52 = vadd.f32 %v18787_v20, %v2004_v24  ;;  %vm2007_vm5 = vweird.f32 %v18787_v20  ;;  %v18866_v61 = vadd.f32 1.0, %v15530_v59  ;;  %vm18873_vm4 = vmor %vm3305_vm3, %vm3306_vm2  ;;  %3180 = vst [vmem:[#allocation2] sm:$0xff] %v3174_v29 }
 0x2de   : > { %v1874_v32 = vsel %vm18860_vm9, %v18762_v38, %v1870_v55  ;;  %v2012_v14 = vand.u32 2147483648, %v18760_v42  ;;  %15537 = vpow2.f32 %v11355_v10  ;;  %v11356_v62 = vmul.f32 -1.442695, %v18839_v43  ;;  %vm18891_vm1 = vmor %vm2006_vm11, %vm2007_vm5 }
 0x2df   : > { %v15532_v22 = vpop.eup %15531  ;;  %v3308_v8 = vsel %vm18873_vm4, %v18765_v25, %v3304_v16  ;;  %v2010_v9 = vand.u32 2147483647, %v18760_v42  ;;  %v2019_v38 = vmul.f32 %v18834_v7, %v2018_v1  ;;  %15539 = vrcp.f32 %v18866_v61 }
 0x2e0   : > { %v15534_v41 = vpop.eup %15533  ;;  %vm3310_vm15 = vcmp.eq.f32.partialorder %v3309_v13, 8.507059e+37  ;;  %v3312_v19 = vor.u32 1.1754944e-38, %v3311_v36  ;;  %v18895_v12 = vadd.f32 1.0, %v15532_v22  ;;  %v1879_v28 = vsel %vm18828_vm6, %v18804_v31, %v1874_v32 }
 0x2e1   : > { %v18885_v37 = vpop.eup %15535  ;;  %v18897_v25 = vadd.f32 1.0, %v15534_v41  ;;  %v2009_v13 = vsel %vm18891_vm1, %v18787_v20, %v2005_v52  ;;  %15541 = vpow2.f32 %v11356_v62  ;;  %v2013_v40 = vor.u32 1.1754944e-38, %v2012_v14  ;;  %v1401_v62 = vpop.f32.mrf.mxu2 }
 0x2e2   : > { %v3316_v2 = vmul.f32 %v18885_v37, %v18832_v3  ;;  %v3313_v42 = vsel %vm3310_vm15, %v3312_v19, %v3308_v8  ;;  %v2025_v27 = vand.u32 2147483647, %v18785_v47  ;;  %15543 = vrcp.f32 %v18895_v12 }
 0x2e3   : > { %vm2011_vm3 = vcmp.eq.f32.partialorder %v2010_v9, 8.507059e+37  ;;  %v2020_v60 = vadd.f32 %v18834_v7, %v2019_v38  ;;  %vm2022_vm2 = vweird.f32 %v18834_v7  ;;  %v2939_v57 = vmul.f32 %v1864_v39, %v18645_v56  ;;  %v3258_v55 = vpop.f32.mrf.mxu3 }
 0x2e4   : > { %v3317_v31 = vsub.f32 1.0, %v3316_v2  ;;  %v15538_v50 = vpop.eup %15537  ;;  %v2014_v20 = vsel %vm2011_vm3, %v2013_v40, %v2009_v13  ;;  %v2027_v48 = vand.u32 2147483648, %v18785_v47  ;;  %15545 = vrcp.f32 %v18897_v25 }
 0x2e5   : > { %v18914_v0 = vpop.eup %15539  ;;  %v2940_v63 = vmul.f32 %v1879_v28, %v18668_v58  ;;  %v18918_v45 = vmul.f32 %v3313_v42, %v18682_v35  ;;  %vm2021_vm6 = vweird.f32 %v18785_v47  ;;  %vm18926_vm9 = vcmp.eq.f32.partialorder %v2025_v27, 8.507059e+37 }
 0x2e6   : > { %v3318_v5 = vmul.f32 %v18885_v37, %v3317_v31  ;;  %vm18922_vm11 = vmor %vm2021_vm6, %vm2022_vm2  ;;  %v3324_v24 = vand.u32 2147483647, %v18832_v3  ;;  %v3326_v46 = vand.u32 2147483648, %v18832_v3  ;;  %v2152_v58 = vmul.f32 %v18914_v0, %v18866_v61 }
 0x2e7   : > { %v15542_v35 = vpop.eup %15541  ;;  %v2949_v47 = vmul.f32 %v2014_v20, %v18705_v11  ;;  %v2024_v15 = vsel %vm18922_vm11, %v18834_v7, %v2020_v60  ;;  %v18938_v10 = vadd.f32 1.0, %v15538_v50  ;;  %v18941_v34 = vadd.f32 %v18664_v23, %v3255_v53  ;;  %v1372_v7 = vpop.f32.mrf.mxu1 }
 0x2e8   : > { %v18943_v39 = vpop.eup %15543  ;;  %v2028_v16 = vor.u32 1.1754944e-38, %v2027_v48  ;;  %vm3320_vm5 = vweird.f32 %v18832_v3  ;;  %v2153_v59 = vsub.f32 1.0, %v2152_v58  ;;  %v18946_v49 = vadd.f32 1.0, %v15542_v35  ;;  %v11471_v35 = vld [vmem:[#allocation14 + $0x50] sm:$0xf] }
 0x2e9   : > { %v3319_v29 = vadd.f32 %v18885_v37, %v3318_v5  ;;  %vm3321_vm4 = vweird.f32 %v18885_v37  ;;  %v2167_v11 = vmul.f32 %v18943_v39, %v18895_v12  ;;  %15547 = vrcp.f32 %v18938_v10 }
 0x2ea   : > { %v18953_v36 = vpop.eup %15545  ;;  %v2029_v1 = vsel %vm18926_vm9, %v2028_v16, %v2024_v15  ;;  %vm18957_vm15 = vcmp.eq.f32.partialorder %v3324_v24, 8.507059e+37  ;;  %v3327_v52 = vor.u32 1.1754944e-38, %v3326_v46  ;;  %v2162_v22 = vand.u32 2147483648, %v18866_v61  ;;  %vm18969_vm3 = vmor %vm3320_vm5, %vm3321_vm4 }
 0x2eb   : > { %v18962_v32 = vadd.f32 %v2949_v47, %v2939_v57  ;;  %vm2156_vm1 = vweird.f32 %v18866_v61  ;;  %v2160_v17 = vand.u32 2147483647, %v18866_v61  ;;  %v11424_v14 = vmul.f32 -1.442695, %v18941_v34 }
 0x2ec   : > { %v2154_v8 = vmul.f32 %v18914_v0, %v2153_v59  ;;  %v2168_v9 = vsub.f32 1.0, %v2167_v11  ;;  %v2177_v38 = vand.u32 2147483648, %v18895_v12  ;;  %15549 = vrcp.f32 %v18946_v49  ;;  %v14367_v11 = vld [vmem:[#allocation14 + $0x74] sm:$0xf0] }
 0x2ed   : > { %v2950_v19 = vmul.f32 %v2029_v1, %v18733_v4  ;;  %v3323_v6 = vsel %vm18969_vm3, %v18885_v37, %v3319_v29  ;;  %v3331_v3 = vmul.f32 %v18953_v36, %v18897_v25  ;;  %v18983_v28 = vadd.f32 %v1372_v7, %v18620_v30  ;;  %v14362_v7 = vld [vmem:[#allocation14 + $0x54] sm:$0xf] }
 0x2ee   : > { %v2163_v13 = vor.u32 1.1754944e-38, %v2162_v22  ;;  %v2175_v2 = vand.u32 2147483647, %v18895_v12  ;;  %v3341_v42 = vand.u32 2147483648, %v18897_v25  ;;  %v18988_v40 = vadd.f32 %v1401_v62, %v18631_v18  ;;  %v14368_v22 = vld [vmem:[#allocation14 + $0x7c] sm:$0xf0] }
 0x2ef   : > { %v18990_v27 = vpop.eup %15547  ;;  %vm2157_vm2 = vweird.f32 %v18914_v0  ;;  %vm18993_vm6 = vcmp.eq.f32.partialorder %v2160_v17, 8.507059e+37  ;;  %vm2171_vm11 = vweird.f32 %v18895_v12  ;;  %v3339_v37 = vand.u32 2147483647, %v18897_v25  ;;  %v1374_v29 = vpop.f32.mrf.mxu1 }
 0x2f0   : > { %15551 = vpow2.f32 %v11424_v14  ;;  %v3328_v60 = vsel %vm18957_vm15, %v3327_v52, %v3323_v6  ;;  %v2155_v31 = vadd.f32 %v18914_v0, %v2154_v8  ;;  %v2169_v50 = vmul.f32 %v18943_v39, %v2168_v9  ;;  %vm19026_vm15 = vmor %vm2156_vm1, %vm2157_vm2  ;;  %v11479_v52 = vld [vmem:[#allocation14 + $0x58] sm:$0xf] }
 0x2f1   : > { %v2302_v57 = vmul.f32 %v18990_v27, %v18938_v10  ;;  %v19005_v20 = vadd.f32 %v2950_v19, %v2940_v63  ;;  %v19007_v48 = vor.u32 1.1754944e-38, %v2177_v38  ;;  %v3332_v53 = vsub.f32 1.0, %v3331_v3 }
 0x2f2   : > { %v11365_v5 = vmul.f32 -1.442695, %v18983_v28  ;;  %v19010_v56 = vpop.eup %15549  ;;  %vm2172_vm9 = vweird.f32 %v18943_v39  ;;  %vm19013_vm5 = vcmp.eq.f32.partialorder %v2175_v2, 8.507059e+37  ;;  %vm3335_vm4 = vweird.f32 %v18897_v25 }
 0x2f3   : > { %v19018_v46 = vor.u32 1.1754944e-38, %v3341_v42  ;;  %v2303_v63 = vsub.f32 1.0, %v2302_v57  ;;  %v11366_v58 = vmul.f32 -1.442695, %v18988_v40  ;;  %v3421_v47 = vmul.f32 %v3328_v60, %v18755_v33  ;;  %vm19054_vm2 = vmor %vm2171_vm11, %vm2172_vm9 }
 0x2f4   : > { %vm2306_vm3 = vweird.f32 %v18938_v10  ;;  %v2310_v16 = vand.u32 2147483647, %v18938_v10  ;;  %v2317_v59 = vmul.f32 %v19010_v56, %v18946_v49  ;;  %v2159_v33 = vsel %vm19026_vm15, %v18914_v0, %v2155_v31  ;;  %v14363_v31 = vld [vmem:[#allocation14 + $0x5c] sm:$0xf] }
 0x2f5   : > { %v2170_v61 = vadd.f32 %v18943_v39, %v2169_v50  ;;  %15553 = vpow2.f32 %v11365_v5  ;;  %v19039_v1 = vadd.f32 %v18664_v23, %v3258_v55  ;;  %v3333_v14 = vmul.f32 %v18953_v36, %v3332_v53  ;;  %v11481_v50 = vld [vmem:[#allocation14 + $0x80] sm:$0xf0] }
 0x2f6   : > { %v15552_v17 = vpop.eup %15551  ;;  %v2304_v62 = vmul.f32 %v18990_v27, %v2303_v63  ;;  %v2318_v41 = vsub.f32 1.0, %v2317_v59  ;;  %15555 = vpow2.f32 %v11366_v58  ;;  %vm3336_vm1 = vweird.f32 %v18953_v36  ;;  %v1403_v58 = vpop.f32.mrf.mxu2 }
 0x2f7   : > { %v19044_v8 = vadd.f32 1.0, %v15552_v17  ;;  %v11425_v0 = vmul.f32 -1.442695, %v19039_v1  ;;  %v19048_v9 = vadd.f32 %v1374_v29, %v18620_v30  ;;  %vm19058_vm15 = vcmp.eq.f32.partialorder %v3339_v37, 8.507059e+37 }
 0x2f8   : > { %vm19062_vm14 = vcmp.eq.f32.partialorder %v2310_v16, 8.507059e+37  ;;  %v2312_v3 = vand.u32 2147483648, %v18938_v10  ;;  %v11472_v2 = vor.u32 %v14367_v11, %v11471_v35  ;;  %v11476_v42 = vor.u32 %v14362_v7, %v11473_v26  ;;  %v14357_v26 = vld [vmem:[#allocation14 + $0x24] sm:$0xf0] }
 0x2f9   : > { %v11480_v60 = vor.u32 %v14368_v22, %v11479_v52  ;;  %v2164_v12 = vsel %vm18993_vm6, %v2163_v13, %v2159_v33  ;;  %v2174_v37 = vsel %vm19054_vm2, %v18943_v39, %v2170_v61  ;;  %v2319_v57 = vmul.f32 %v19010_v56, %v2318_v41  ;;  %vm19090_vm6 = vmor %vm3335_vm4, %vm3336_vm1  ;;  %v3260_v61 = vpop.f32.mrf.mxu3 }
 0x2fa   : > { %15557 = vrcp.f32 %v19044_v8  ;;  %v3334_v53 = vadd.f32 %v18953_v36, %v3333_v14  ;;  %v2305_v5 = vadd.f32 %v18990_v27, %v2304_v62  ;;  %vm2307_vm11 = vweird.f32 %v18990_v27  ;;  %3594 = vmatpush.bf16.msrb.mxu0 %v11472_v2  ;;  %3623 = vmatpush.bf16.msrb.mxu1 %v11476_v42 }
 0x2fb   : > { %15559 = vpow2.f32 %v11425_v0  ;;  %v15554_v55 = vpop.eup %15553  ;;  %v19078_v13 = vpack.c.bf16 %v3421_v47, %v18918_v45  ;;  %v2325_v4 = vand.u32 2147483647, %v18946_v49  ;;  %v11375_v39 = vmul.f32 -1.442695, %v19048_v9  ;;  %3652 = vmatpush.bf16.msrb.mxu2 %v11480_v60  ;;  %vm19101_vm9 = vmor %vm2306_vm3, %vm2307_vm11  ;;  %v14353_v45 = vld [vmem:[#allocation14 + $0xc] sm:$0xf] }
 0x2fc   : > { %v11484_v63 = vor.u32 %v14363_v31, %v11481_v50  ;;  %v15556_v35 = vpop.eup %15555  ;;  %v2959_v15 = vmul.f32 %v2164_v12, %v18774_v44  ;;  %v2179_v16 = vsel %vm19013_vm5, %v19007_v48, %v2174_v37  ;;  %v2327_v47 = vand.u32 2147483648, %v18946_v49 }
 0x2fd   : > { %v19095_v59 = vadd.f32 1.0, %v15554_v55  ;;  %v2320_v48 = vadd.f32 %v19010_v56, %v2319_v57  ;;  %vm2322_vm5 = vweird.f32 %v19010_v56  ;;  %v19107_v25 = vadd.f32 1.0, %v15556_v35  ;;  %v11433_v55 = vld [vmem:[#allocation14 + $0x28] sm:$0xf0] }
 0x2fe   : > { %15561 = vpow2.f32 %v11375_v39  ;;  %3681 = vmatpush.bf16.msrb.mxu3 %v11484_v63  ;;  %v3338_v24 = vsel %vm19090_vm6, %v18953_v36, %v3334_v53  ;;  %v2309_v10 = vsel %vm19101_vm9, %v18990_v27, %v2305_v5  ;;  %v19117_v29 = vadd.f32 %v1403_v58, %v18631_v18  ;;  %v11431_v36 = vld [vmem:[#allocation14] sm:$0xf]  ;;  %v14352_v5 = vld [vmem:[#allocation14 + $0x4] sm:$0xf]  ;;  %v11439_v58 = vld [vmem:[#allocation14 + $0x8] sm:$0xf] }
 0x2ff   : > { %15563 = vrcp.f32 %v19095_v59  ;;  %v2960_v7 = vmul.f32 %v2179_v16, %v18795_v51  ;;  %v2313_v33 = vor.u32 1.1754944e-38, %v2312_v3  ;;  %vm2321_vm4 = vweird.f32 %v18946_v49  ;;  %v14358_v16 = vld [vmem:[#allocation14 + $0x2c] sm:$0xf0] }
 0x300   : > { %v19119_v11 = vpop.eup %15557  ;;  %15565 = vrcp.f32 %v19107_v25  ;;  %v3118_v27 = vadd.f32 %v18962_v32, %v2959_v15  ;;  %vm19127_vm3 = vmor %vm2321_vm4, %vm2322_vm5  ;;  %vm19131_vm1 = vcmp.eq.f32.partialorder %v2325_v4, 8.507059e+37  ;;  %v2328_v51 = vor.u32 1.1754944e-38, %v2327_v47 }
 0x301   : > { %v15560_v52 = vpop.eup %15559  ;;  %v3346_v49 = vmul.f32 %v19119_v11, %v19044_v8  ;;  %v3343_v14 = vsel %vm19058_vm15, %v19018_v46, %v3338_v24  ;;  %v2314_v32 = vsel %vm19062_vm14, %v2313_v33, %v2309_v10  ;;  %v2324_v62 = vsel %vm19127_vm3, %v19010_v56, %v2320_v48  ;;  %v11441_v10 = vld [vmem:[#allocation14 + $0x30] sm:$0xf0] }
 0x302   : > { %v19145_v41 = vadd.f32 1.0, %v15560_v52  ;;  %v11376_v38 = vmul.f32 -1.442695, %v19117_v29  ;;  %v19149_v3 = vadd.f32 %v18664_v23, %v3260_v61  ;;  %v11432_v2 = vor.u32 %v14357_v26, %v11431_v36  ;;  %v1406_v26 = vpop.f32.mrf.mxu2 }
 0x303   : > { %v3347_v0 = vsub.f32 1.0, %v3346_v49  ;;  %v3131_v19 = vadd.f32 %v19005_v20, %v2960_v7  ;;  %v3354_v46 = vand.u32 2147483647, %v19044_v8  ;;  %v3356_v6 = vand.u32 2147483648, %v19044_v8  ;;  %v1377_v7 = vpop.f32.mrf.mxu1 }
 0x304   : > { %v15562_v42 = vpop.eup %15561  ;;  %15567 = vrcp.f32 %v19145_v41  ;;  %v2969_v56 = vmul.f32 %v2314_v32, %v18825_v21  ;;  %3595 = vmatpush.bf16.msrb.mxu0 %v11432_v2  ;;  %v2329_v20 = vsel %vm19131_vm1, %v2328_v51, %v2324_v62  ;;  %vm3351_vm14 = vweird.f32 %v19119_v11  ;;  %v3263_v32 = vpop.f32.mrf.mxu3 }
 0x305   : > { %v19155_v60 = vpop.eup %15563  ;;  %v3348_v31 = vmul.f32 %v19119_v11, %v3347_v0  ;;  %v19159_v50 = vadd.f32 1.0, %v15562_v42  ;;  %15569 = vpow2.f32 %v11376_v38  ;;  %v11426_v37 = vmul.f32 -1.442695, %v19149_v3 }
 0x306   : > { %v19161_v23 = vpop.eup %15565  ;;  %v2452_v12 = vmul.f32 %v19155_v60, %v19095_v59  ;;  %v19170_v21 = vmul.f32 %v3343_v14, %v18798_v54  ;;  %vm3350_vm2 = vweird.f32 %v19044_v8  ;;  %vm19176_vm15 = vcmp.eq.f32.partialorder %v3354_v46, 8.507059e+37 }
 0x307   : > { %v3349_v57 = vadd.f32 %v19119_v11, %v3348_v31  ;;  %v2467_v53 = vmul.f32 %v19161_v23, %v19107_v25  ;;  %v3357_v39 = vor.u32 1.1754944e-38, %v3356_v6  ;;  %15571 = vrcp.f32 %v19159_v50  ;;  %vm19188_vm6 = vmor %vm3350_vm2, %vm3351_vm14 }
 0x308   : > { %v2453_v63 = vsub.f32 1.0, %v2452_v12  ;;  %vm22951_vm11 = vcmask 261120   ;;  %v19183_v54 = vadd.f32 %v3118_v27, %v2969_v56  ;;  %v2970_v8 = vmul.f32 %v2329_v20, %v18839_v43 }
 0x309   : > { %11509 = vmatmul.msk.bf16.vlgmr.msrb.gmra.mxu0 %vm22951_vm11, %v19078_v13  ;;  %v2468_v15 = vsub.f32 1.0, %v2467_v53  ;;  %15573 = vpow2.f32 %v11426_v37  ;;  %v3353_v44 = vsel %vm19188_vm6, %v19119_v11, %v3349_v57  ;;  %v2460_v48 = vand.u32 2147483647, %v19095_v59  ;;  %vm22958_vm14 = vmmov %vm22951_vm11 }
 0x30a   : > { %v19192_v47 = vpop.eup %15567  ;;  %v2462_v43 = vand.u32 2147483648, %v19095_v59  ;;  %v11436_v24 = vor.u32 %v14352_v5, %v11433_v55  ;;  %v2454_v61 = vmul.f32 %v19155_v60, %v2453_v63  ;;  %vm2456_vm9 = vweird.f32 %v19095_v59 }
 0x30b   : > { %v15570_v33 = vpop.eup %15569  ;;  %vm2471_vm5 = vweird.f32 %v19107_v25  ;;  %v3361_v36 = vmul.f32 %v19192_v47, %v19145_v41  ;;  %v2475_v11 = vand.u32 2147483647, %v19107_v25  ;;  %v2477_v52 = vand.u32 2147483648, %v19107_v25 }
 0x30c   : > { %v19206_v27 = vadd.f32 1.0, %v15570_v33  ;;  %3624 = vmatpush.bf16.msrb.mxu1 %v11436_v24  ;;  %v11440_v22 = vor.u32 %v14358_v16, %v11439_v58  ;;  %v19208_v17 = vadd.f32 %v3131_v19, %v2970_v8  ;;  %v3358_v51 = vsel %vm19176_vm15, %v3357_v39, %v3353_v44  ;;  %vm22959_vm15 = vmmov %vm22951_vm11 }
 0x30d   : > { %v2469_v49 = vmul.f32 %v19161_v23, %v2468_v15  ;;  %v11444_v14 = vor.u32 %v14353_v45, %v11441_v10  ;;  %v19213_v62 = vpop.eup %15571  ;;  %vm19215_vm4 = vcmp.eq.f32.partialorder %v2460_v48, 8.507059e+37  ;;  %v2463_v38 = vor.u32 1.1754944e-38, %v2462_v43  ;;  %v1408_v48 = vpop.f32.mrf.mxu2 }
 0x30e   : > { %v3371_v2 = vand.u32 2147483648, %v19145_v41  ;;  %15575 = vrcp.f32 %v19206_v27  ;;  %3653 = vmatpush.bf16.msrb.mxu2 %v11440_v22  ;;  %v2455_v19 = vadd.f32 %v19155_v60, %v2454_v61  ;;  %vm2457_vm3 = vweird.f32 %v19155_v60 }
 0x30f   : > { %v15574_v42 = vpop.eup %15573  ;;  %v3362_v46 = vsub.f32 1.0, %v3361_v36  ;;  %v2602_v6 = vmul.f32 %v19213_v62, %v19159_v50  ;;  %3682 = vmatpush.bf16.msrb.mxu3 %v11444_v14  ;;  %v3423_v56 = vmul.f32 %v3358_v51, %v18941_v34  ;;  %vm19226_vm1 = vcmp.eq.f32.partialorder %v2475_v11, 8.507059e+37  ;;  %11513 = vmatmul.msk.bf16.vlgmr.msrb.gmra.mxu1 %vm22958_vm14, %v19078_v13  ;;  %vm19240_vm11 = vmor %vm2456_vm9, %vm2457_vm3  ;;  %v15924_v36 = vld [vmem:[#allocation12] ss:$0 sm:$0xff] }
 0x310   : > { %v2478_v20 = vor.u32 1.1754944e-38, %v2477_v52  ;;  %v3369_v12 = vand.u32 2147483647, %v19145_v41  ;;  %v2470_v37 = vadd.f32 %v19161_v23, %v2469_v49  ;;  %vm2472_vm2 = vweird.f32 %v19161_v23  ;;  %v3265_v52 = vpop.f32.mrf.mxu3 }
 0x311   : > { %v2603_v57 = vsub.f32 1.0, %v2602_v6  ;;  %v2612_v53 = vand.u32 2147483648, %v19159_v50  ;;  %11517 = vmatmul.msk.bf16.vlgmr.msrb.gmra.mxu2 %vm22959_vm15, %v19078_v13  ;;  %vm3365_vm6 = vweird.f32 %v19145_v41  ;;  %v19245_v5 = vadd.f32 1.0, %v15574_v42  ;;  %vm19269_vm9 = vmor %vm2471_vm5, %vm2472_vm2 }
 0x312   : > { %v19248_v55 = vadd.f32 %v1377_v7, %v18620_v30  ;;  %11521 = vmatmul.msk.bf16.vlgmr.msrb.gmra.mxu3 %vm22958_vm14, %v19078_v13  ;;  %v19253_v4 = vadd.f32 %v1406_v26, %v18631_v18  ;;  %v2459_v59 = vsel %vm19240_vm11, %v19155_v60, %v2455_v19  ;;  %v3363_v39 = vmul.f32 %v19192_v47, %v3362_v46  ;;  %v1379_v60 = vpop.f32.mrf.mxu1 }
 0x313   : > { %v3372_v63 = vor.u32 1.1754944e-38, %v3371_v2  ;;  %v2610_v58 = vand.u32 2147483647, %v19159_v50  ;;  %v19263_v35 = vpack.c.bf16 %v3423_v56, %v19170_v21  ;;  %vm3366_vm3 = vweird.f32 %v19192_v47 }
 0x314   : > { %v19260_v8 = vpop.eup %15575  ;;  %vm2606_vm15 = vweird.f32 %v19159_v50  ;;  %15577 = vrcp.f32 %v19245_v5  ;;  %v2474_v21 = vsel %vm19269_vm9, %v19161_v23, %v2470_v37  ;;  %vm19279_vm11 = vcmp.eq.f32.partialorder %v3369_v12, 8.507059e+37 }
 0x315   : > { %v2604_v25 = vmul.f32 %v19213_v62, %v2603_v57  ;;  %v2613_v45 = vor.u32 1.1754944e-38, %v2612_v53  ;;  %v2617_v44 = vmul.f32 %v19260_v8, %v19206_v27  ;;  %v2464_v43 = vsel %vm19215_vm4, %v2463_v38, %v2459_v59 }
 0x316   : > { %vm2621_vm5 = vweird.f32 %v19206_v27  ;;  %v2625_v24 = vand.u32 2147483647, %v19206_v27  ;;  %v11385_v23 = vmul.f32 -1.442695, %v19248_v55  ;;  %v11386_v10 = vmul.f32 -1.442695, %v19253_v4 }
 0x317   : > { %v3364_v7 = vadd.f32 %v19192_v47, %v3363_v39  ;;  %vm19293_vm2 = vcmp.eq.f32.partialorder %v2610_v58, 8.507059e+37  ;;  %v2618_v61 = vsub.f32 1.0, %v2617_v44  ;;  %v19297_v26 = vadd.f32 %v15924_v36, %v3263_v32 }
 0x318   : > { %v19300_v11 = vadd.f32 %v1379_v60, %v18620_v30  ;;  %v2479_v22 = vsel %vm19226_vm1, %v2478_v20, %v2474_v21  ;;  %vm2607_vm4 = vweird.f32 %v19213_v62  ;;  %15579 = vpow2.f32 %v11385_v23  ;;  %vm19318_vm1 = vmor %vm3365_vm6, %vm3366_vm3 }
 0x319   : > { %v19306_v51 = vadd.f32 %v1408_v48, %v18631_v18  ;;  %11510 = vmatmul.msk.bf16.gmra.mxu0 %vm22958_vm14, %v19263_v35  ;;  %v2605_v49 = vadd.f32 %v19213_v62, %v2604_v25  ;;  %v2619_v14 = vmul.f32 %v19260_v8, %v2618_v61  ;;  %15581 = vpow2.f32 %v11386_v10  ;;  %vm19339_vm6 = vmor %vm2606_vm15, %vm2607_vm4 }
 0x31a   : > { %v11427_v30 = vmul.f32 -1.442695, %v19297_v26  ;;  %v15578_v32 = vpop.eup %15577  ;;  %v2979_v0 = vmul.f32 %v2464_v43, %v18983_v28  ;;  %vm19322_vm9 = vcmp.eq.f32.partialorder %v2625_v24, 8.507059e+37  ;;  %v11395_v2 = vmul.f32 -1.442695, %v19300_v11 }
 0x31b   : > { %v19327_v42 = vadd.f32 %v15924_v36, %v3265_v52  ;;  %v2980_v19 = vmul.f32 %v2479_v22, %v18988_v40  ;;  %v3368_v28 = vsel %vm19318_vm1, %v19192_v47, %v3364_v7  ;;  %v3376_v41 = vmul.f32 %v15578_v32, %v19245_v5 }
 0x31c   : > { %v11396_v46 = vmul.f32 -1.442695, %v19306_v51  ;;  %v2620_v56 = vadd.f32 %v19260_v8, %v2619_v14  ;;  %vm2622_vm3 = vweird.f32 %v19260_v8  ;;  %15583 = vpow2.f32 %v11427_v30  ;;  %v14430_v30 = vld [vmem:[#allocation17 + $0x1cc] sm:$0xf0] }
 0x31d   : > { %v11428_v40 = vmul.f32 -1.442695, %v19327_v42  ;;  %v2609_v47 = vsel %vm19339_vm6, %v19213_v62, %v2605_v49  ;;  %v2627_v31 = vand.u32 2147483648, %v19206_v27  ;;  %v3377_v20 = vsub.f32 1.0, %v3376_v41  ;;  %vm19357_vm15 = vmor %vm2621_vm5, %vm2622_vm3 }
 0x31e   : > { %15585 = vpow2.f32 %v11395_v2  ;;  %v15580_v50 = vpop.eup %15579  ;;  %v3120_v12 = vadd.f32 %v19183_v54, %v2979_v0  ;;  %v3373_v37 = vsel %vm19279_vm11, %v3372_v63, %v3368_v28  ;;  %v3384_v57 = vand.u32 2147483647, %v19245_v5  ;;  %vm22976_vm11 = vmmov %vm22958_vm14 }
 0x31f   : > { %v3386_v53 = vand.u32 2147483648, %v19245_v5  ;;  %v15582_v34 = vpop.eup %15581  ;;  %v3378_v62 = vmul.f32 %v15578_v32, %v3377_v20  ;;  %vm3381_vm4 = vweird.f32 %v15578_v32  ;;  %v19361_v39 = vadd.f32 1.0, %v15580_v50  ;;  %11514 = vmatmul.msk.bf16.gmra.mxu1 %vm22976_vm11, %v19263_v35  ;;  %vm22977_vm14 = vmmov %vm22976_vm11 }
 0x320   : > { %15587 = vpow2.f32 %v11396_v46  ;;  %v2614_v54 = vsel %vm19293_vm2, %v2613_v45, %v2609_v47  ;;  %v2624_v63 = vsel %vm19357_vm15, %v19260_v8, %v2620_v56  ;;  %v19368_v58 = vadd.f32 1.0, %v15582_v34  ;;  %vm22978_vm6 = vmmov %vm22976_vm11 }
 0x321   : > { %15589 = vpow2.f32 %v11428_v40  ;;  %v2628_v27 = vor.u32 1.1754944e-38, %v2627_v31  ;;  %v3379_v15 = vadd.f32 %v15578_v32, %v3378_v62  ;;  %vm3380_vm5 = vweird.f32 %v19245_v5  ;;  %11518 = vmatmul.msk.bf16.gmra.mxu2 %vm22977_vm14, %v19263_v35  ;;  %vm22983_vm11 = vmmov %vm22978_vm6 }
 0x322   : > { %15591 = vrcp.f32 %v19361_v39  ;;  %v15584_v60 = vpop.eup %15583  ;;  %v3424_v21 = vmul.f32 %v3373_v37, %v19039_v1  ;;  %vm3382_vm2 = vmor %vm3380_vm5, %vm3381_vm4  ;;  %vm3385_vm1 = vcmp.eq.f32.partialorder %v3384_v57, 8.507059e+37  ;;  %v3387_v8 = vor.u32 1.1754944e-38, %v3386_v53  ;;  %11522 = vmatmul.msk.bf16.gmra.mxu3 %vm22978_vm6, %v19263_v35 }
 0x323   : > { %15593 = vrcp.f32 %v19368_v58  ;;  %v2989_v5 = vmul.f32 %v2614_v54, %v19048_v9  ;;  %v2629_v25 = vsel %vm19322_vm9, %v2628_v27, %v2624_v63  ;;  %v3383_v45 = vsel %vm3382_vm2, %v15578_v32, %v3379_v15 }
 0x324   : > { %v15586_v16 = vpop.eup %15585  ;;  %v19384_v44 = vadd.f32 1.0, %v15584_v60  ;;  %v3388_v48 = vsel %vm3385_vm1, %v3387_v8, %v3383_v45  ;;  %v2760_v1 = vand.u32 2147483647, %v19361_v39  ;;  %v2762_v43 = vand.u32 2147483648, %v19361_v39  ;;  %v14369_v45 = vld [vmem:[#allocation14 + $0x84] sm:$0xf0] }
 0x325   : > { %v19388_v24 = vadd.f32 1.0, %v15586_v16  ;;  %v3425_v10 = vmul.f32 %v3388_v48, %v19149_v3  ;;  %v2775_v7 = vand.u32 2147483647, %v19368_v58  ;;  %v2777_v9 = vand.u32 2147483648, %v19368_v58 }
 0x326   : > { %v15588_v23 = vpop.eup %15587  ;;  %15595 = vrcp.f32 %v19384_v44  ;;  %v19396_v36 = vadd.f32 %v19208_v17, %v2980_v19  ;;  %v19398_v52 = vadd.f32 %v3120_v12, %v2989_v5  ;;  %v19401_v22 = vmul.f32 %v2629_v25, %v19117_v29  ;;  %v15925_v12 = vld [vmem:[#allocation2 + $0x8] sm:$0xff]  ;;  %v11487_v25 = vld [vmem:[#allocation14 + $0x60] sm:$0xf] }
 0x327   : > { %v15590_v33 = vpop.eup %15589  ;;  %15597 = vrcp.f32 %v19388_v24  ;;  %v19403_v49 = vpack.c.bf16 %v3425_v10, %v3424_v21  ;;  %vm2756_vm9 = vweird.f32 %v19361_v39  ;;  %vm19407_vm3 = vcmp.eq.f32.partialorder %v2760_v1, 8.507059e+37  ;;  %v11489_v10 = vld [vmem:[#allocation14 + $0x88] sm:$0xf0] }
 0x328   : > { %v15592_v61 = vpop.eup %15591  ;;  %vm2771_vm15 = vweird.f32 %v19368_v58  ;;  %v2763_v17 = vor.u32 1.1754944e-38, %v2762_v43  ;;  %vm19413_vm4 = vcmp.eq.f32.partialorder %v2775_v7, 8.507059e+37  ;;  %v2778_v29 = vor.u32 1.1754944e-38, %v2777_v9  ;;  %v11495_v7 = vld [vmem:[#allocation14 + $0x68] sm:$0xf] }
 0x329   : > { %v15594_v3 = vpop.eup %15593  ;;  %v2752_v14 = vmul.f32 %v15592_v61, %v19361_v39  ;;  %11511 = vmatmul.msk.bf16.gmra.mxu0 %vm22983_vm11, %v19403_v49  ;;  %v3399_v38 = vand.u32 2147483647, %v19384_v44  ;;  %v706_v2 = vlaneseq  ;;  %v19420_v19 = vadd.f32 1.0, %v15588_v23  ;;  %v14364_v23 = vld [vmem:[#allocation14 + $0x64] sm:$0xf] }
 0x32a   : > { %v2767_v32 = vmul.f32 %v15594_v3, %v19368_v58  ;;  %v3401_v46 = vand.u32 2147483648, %v19384_v44  ;;  %v2910_v6 = vand.u32 2147483647, %v19388_v24  ;;  %v19426_v56 = vadd.f32 1.0, %v15590_v33  ;;  %v14370_v9 = vld [vmem:[#allocation14 + $0x8c] sm:$0xf0] }
 0x32b   : > { %v2753_v18 = vsub.f32 1.0, %v2752_v14  ;;  %vm2757_vm5 = vweird.f32 %v15592_v61  ;;  %vm708_vm14 = vcmp.lt.s32.totalorder %v706_v2, 512  ;;  %vm2772_vm2 = vweird.f32 %v15594_v3 }
 0x32c   : > { %v19422_v28 = vpop.eup %15595  ;;  %v2768_v41 = vsub.f32 1.0, %v2767_v32  ;;  %15599 = vrcp.f32 %v19420_v19  ;;  %710 = vst.msk [vmem:[#allocation2 + $0x10] sm:$0xf] %vm708_vm14, %v15925_v12  ;;  %vm2906_vm1 = vweird.f32 %v19388_v24  ;;  %v2912_v53 = vand.u32 2147483648, %v19388_v24  ;;  %vm2758_vm6 = vmor %vm2756_vm9, %vm2757_vm5  ;;  %v14355_v12 = vld [vmem:[#allocation14 + $0x1c] sm:$0xf] }
 0x32d   : > { %v19428_v40 = vpop.eup %15597  ;;  %v2754_v47 = vmul.f32 %v15592_v61, %v2753_v18  ;;  %v3391_v31 = vmul.f32 %v19422_v28, %v19384_v44  ;;  %v19440_v59 = vor.u32 1.1754944e-38, %v3401_v46  ;;  %15601 = vrcp.f32 %v19426_v56  ;;  %vm2773_vm11 = vmor %vm2771_vm15, %vm2772_vm2  ;;  %v14359_v18 = vld [vmem:[#allocation14 + $0x34] sm:$0xf0] }
 0x32e   : > { %v2769_v20 = vmul.f32 %v15594_v3, %v2768_v41  ;;  %v2902_v50 = vmul.f32 %v19428_v40, %v19388_v24  ;;  %vm19447_vm14 = vcmp.eq.f32.partialorder %v2910_v6, 8.507059e+37  ;;  %v2925_v39 = vand.u32 2147483647, %v19420_v19  ;;  %v14426_v46 = vld [vmem:[#allocation17 + $0x1ac] sm:$0xf0] }
 0x32f   : > { %v2755_v37 = vadd.f32 %v15592_v61, %v2754_v47  ;;  %v3392_v57 = vsub.f32 1.0, %v3391_v31  ;;  %vm22986_vm9 = vcmask 261120   ;;  %vm2907_vm5 = vweird.f32 %v19428_v40  ;;  %v11455_v47 = vld [vmem:[#allocation14 + $0x18] sm:$0xf] }
 0x330   : > { %v2770_v34 = vadd.f32 %v15594_v3, %v2769_v20  ;;  %v2903_v62 = vsub.f32 1.0, %v2902_v50  ;;  %11515 = vmatmul.msk.bf16.gmra.mxu1 %vm22986_vm9, %v19403_v49  ;;  %vm22987_vm15 = vmmov %vm22986_vm9  ;;  %v2913_v16 = vor.u32 1.1754944e-38, %v2912_v53  ;;  %v2927_v5 = vand.u32 2147483648, %v19420_v19  ;;  %v14360_v50 = vld [vmem:[#allocation14 + $0x3c] sm:$0xf0] }
 0x331   : > { %v2759_v54 = vsel %vm2758_vm6, %v15592_v61, %v2755_v37  ;;  %v3393_v63 = vmul.f32 %v19422_v28, %v3392_v57  ;;  %11519 = vmatmul.msk.bf16.gmra.mxu2 %vm22987_vm15, %v19403_v49  ;;  %vm22988_vm2 = vmmov %vm22986_vm9  ;;  %v3414_v43 = vand.u32 2147483647, %v19426_v56  ;;  %v3134_v33 = vadd.f32 %v19396_v36, %v19401_v22  ;;  %v14365_v22 = vld [vmem:[#allocation14 + $0x6c] sm:$0xf]  ;;  %v11457_v37 = vld [vmem:[#allocation14 + $0x40] sm:$0xf0] }
 0x332   : > { %v2764_v15 = vsel %vm19407_vm3, %v2763_v17, %v2759_v54  ;;  %v2774_v60 = vsel %vm2773_vm11, %v15594_v3, %v2770_v34  ;;  %v2904_v21 = vmul.f32 %v19428_v40, %v2903_v62  ;;  %11523 = vmatmul.msk.bf16.gmra.mxu3 %vm22988_vm2, %v19403_v49  ;;  %v19466_v48 = vpop.eup %15599  ;;  %vm3396_vm3 = vweird.f32 %v19422_v28  ;;  %vm19484_vm6 = vmor %vm2906_vm1, %vm2907_vm5  ;;  %v11497_v17 = vld [vmem:[#allocation14 + $0x90] sm:$0xf0]  ;;  %v11743_v54 = vld [vmem:[#allocation17 + $0xe0] sm:$0xf] }
 0x333   : > { %v2999_v58 = vmul.f32 %v2764_v15, %v19248_v55  ;;  %v2779_v8 = vsel %vm19413_vm4, %v2778_v29, %v2774_v60  ;;  %v19469_v1 = vadd.f32 %v19422_v28, %v3393_v63  ;;  %vm19476_vm4 = vcmp.eq.f32.partialorder %v3399_v38, 8.507059e+37  ;;  %v19495_v32 = vpop.eup %15601  ;;  %v11447_v29 = vld [vmem:[#allocation14 + $0x10] sm:$0xf]  ;;  %v14354_v38 = vld [vmem:[#allocation14 + $0x14] sm:$0xf] }
 0x334   : > { %v2905_v55 = vadd.f32 %v19428_v40, %v2904_v21  ;;  %v2917_v14 = vmul.f32 %v19466_v48, %v19420_v19  ;;  %vm19490_vm11 = vcmp.eq.f32.partialorder %v2925_v39, 8.507059e+37  ;;  %v3416_v36 = vand.u32 2147483648, %v19426_v56  ;;  %v14402_v63 = vld [vmem:[#allocation17 + $0xec] sm:$0xf0]  ;;  %v11871_v60 = vld [vmem:[#allocation17 + $0x1e0] sm:$0xf] }
 0x335   : > { %v3000_v0 = vmul.f32 %v2779_v8, %v19253_v4  ;;  %vm3395_vm1 = vweird.f32 %v19384_v44  ;;  %vm2921_vm9 = vweird.f32 %v19420_v19  ;;  %v3122_v41 = vadd.f32 %v19398_v52, %v2999_v58  ;;  %v11855_v61 = vld [vmem:[#allocation17 + $0x1c0] sm:$0xf] }
 0x336   : > { %v2909_v24 = vsel %vm19484_vm6, %v19428_v40, %v2905_v55  ;;  %vm19506_vm5 = vmor %vm3395_vm1, %vm3396_vm3  ;;  %v2918_v44 = vsub.f32 1.0, %v2917_v14  ;;  %v3406_v6 = vmul.f32 %v19495_v32, %v19426_v56  ;;  %v11449_v40 = vld [vmem:[#allocation14 + $0x38] sm:$0xf0]  ;;  %vm2922_vm15 = vweird.f32 %v19466_v48 }
 0x337   : > { %v2914_v4 = vsel %vm19447_vm14, %v2913_v16, %v2909_v24  ;;  %v3398_v52 = vsel %vm19506_vm5, %v19422_v28, %v19469_v1  ;;  %v11488_v20 = vor.u32 %v14369_v45, %v11487_v25  ;;  %v11492_v34 = vor.u32 %v14364_v23, %v11489_v10  ;;  %vm2923_vm2 = vmor %vm2921_vm9, %vm2922_vm15 }
 0x338   : > { %v3009_v31 = vmul.f32 %v2914_v4, %v19300_v11  ;;  %v2919_v57 = vmul.f32 %v19466_v48, %v2918_v44  ;;  %v3407_v53 = vsub.f32 1.0, %v3406_v6  ;;  %v11496_v62 = vor.u32 %v14370_v9, %v11495_v7  ;;  %v14434_v11 = vld [vmem:[#allocation17 + $0x1ec] sm:$0xf0]  ;;  %v11727_v7 = vld [vmem:[#allocation17 + $0xc0] sm:$0xf] }
 0x339   : > { %3710 = vmatpush.bf16.msra.mxu0 %v11488_v20  ;;  %v11500_v39 = vor.u32 %v14365_v22, %v11497_v17  ;;  %v11448_v15 = vor.u32 %v14359_v18, %v11447_v29  ;;  %v11452_v28 = vor.u32 %v14354_v38, %v11449_v40  ;;  %vm3411_vm14 = vweird.f32 %v19495_v32  ;;  %3739 = vmatpush.bf16.msra.mxu1 %v11492_v34  ;;  %v14398_v9 = vld [vmem:[#allocation17 + $0xcc] sm:$0xf0] }
 0x33a   : > { %v3123_v27 = vadd.f32 %v3122_v41, %v3009_v31  ;;  %v2920_v21 = vadd.f32 %v19466_v48, %v2919_v57  ;;  %v3408_v58 = vmul.f32 %v19495_v32, %v3407_v53  ;;  %3768 = vmatpush.bf16.msra.mxu2 %v11496_v62  ;;  %v11456_v8 = vor.u32 %v14360_v50, %v11455_v47  ;;  %v14394_v29 = vld [vmem:[#allocation17 + $0xac] sm:$0xf0]  ;;  %v11839_v41 = vld [vmem:[#allocation17 + $0x1a0] sm:$0xf] }
 0x33b   : > { %v2928_v25 = vor.u32 1.1754944e-38, %v2927_v5  ;;  %3797 = vmatpush.bf16.msra.mxu3 %v11500_v39  ;;  %v11460_v45 = vor.u32 %v14355_v12, %v11457_v37  ;;  %v11744_v1 = vor.u32 %v14402_v63, %v11743_v54  ;;  %vm3410_vm3 = vweird.f32 %v19426_v56  ;;  %v14422_v31 = vld [vmem:[#allocation17 + $0x18c] sm:$0xf0]  ;;  %v11679_v50 = vld [vmem:[#allocation17 + $0x60] sm:$0xf] }
 0x33c   : > { %v3124_v16 = vrot.slane %v3123_v27, 4  ;;  %v2924_v55 = vsel %vm2923_vm2, %v19466_v48, %v2920_v21  ;;  %v3409_v23 = vadd.f32 %v19495_v32, %v3408_v58  ;;  %v11872_v10 = vor.u32 %v14434_v11, %v11871_v60  ;;  %vm3412_vm6 = vmor %vm3410_vm3, %vm3411_vm14  ;;  %v14386_v12 = vld [vmem:[#allocation17 + $0x6c] sm:$0xf0]  ;;  %v11807_v62 = vld [vmem:[#allocation17 + $0x160] sm:$0xf] }
 0x33d   : > { %v3135_v3 = vadd.f32 %v3134_v33, %v3000_v0  ;;  %v3403_v14 = vsel %vm19476_vm4, %v19440_v59, %v3398_v52  ;;  %v2929_v19 = vsel %vm19490_vm11, %v2928_v25, %v2924_v55  ;;  %v3417_v5 = vor.u32 1.1754944e-38, %v3416_v36  ;;  %3711 = vmatpush.bf16.msra.mxu0 %v11448_v15  ;;  %3740 = vmatpush.bf16.msra.mxu1 %v11452_v28  ;;  %v11823_v52 = vld [vmem:[#allocation17 + $0x180] sm:$0xf]  ;;  %v14418_v54 = vld [vmem:[#allocation17 + $0x16c] sm:$0xf0] }
 0x33e   : > { %v3125_v48 = vadd.f32 %v3124_v16, %v3123_v27  ;;  %v3010_v22 = vmul.f32 %v2929_v19, %v19306_v51  ;;  %v3413_v17 = vsel %vm3412_vm6, %v19495_v32, %v3409_v23  ;;  %vm3415_vm1 = vcmp.eq.f32.partialorder %v3414_v43, 8.507059e+37  ;;  %3769 = vmatpush.bf16.msra.mxu2 %v11456_v8  ;;  %v11711_v51 = vld [vmem:[#allocation17 + $0xa0] sm:$0xf]  ;;  %v14382_v39 = vld [vmem:[#allocation17 + $0x4c] sm:$0xf0] }
 0x33f   : > { %v3418_v33 = vsel %vm3415_vm1, %v3417_v5, %v3413_v17  ;;  %3798 = vmatpush.bf16.msra.mxu3 %v11460_v45  ;;  %v11728_v59 = vor.u32 %v14398_v9, %v11727_v7  ;;  %v3426_v0 = vmul.f32 %v3403_v14, %v19297_v26  ;;  %v11856_v43 = vor.u32 %v14430_v30, %v11855_v61  ;;  %v11695_v26 = vld [vmem:[#allocation17 + $0x80] sm:$0xf]  ;;  %v3012_v28 = vld [vmem:[#allocation2 + $0x8] sm:$0x3]  ;;  %v14414_v8 = vld [vmem:[#allocation17 + $0x14c] sm:$0xf0] }
 0x340   : > { %v3136_v36 = vadd.f32 %v3135_v3, %v3010_v22  ;;  %v3427_v24 = vmul.f32 %v3418_v33, %v19327_v42  ;;  %v3126_v32 = vrot.slane %v3125_v48, 2  ;;  %v11712_v38 = vor.u32 %v14394_v29, %v11711_v51  ;;  %v14390_v42 = vld [vmem:[#allocation17 + $0x8c] sm:$0xf0]  ;;  %v11663_v27 = vld [vmem:[#allocation17 + $0x40] sm:$0xf] }
 0x341   : > { %vm22997_vm4 = vcmask 261120   ;;  %v11840_v40 = vor.u32 %v14426_v46, %v11839_v41  ;;  %v11696_v47 = vor.u32 %v14390_v42, %v11695_v26  ;;  %v11824_v53 = vor.u32 %v14422_v31, %v11823_v52  ;;  %v11791_v58 = vld [vmem:[#allocation17 + $0x140] sm:$0xf]  ;;  %v14410_v9 = vld [vmem:[#allocation17 + $0x12c] sm:$0xf0] }
 0x342   : > { %9564 = vmatpush.bf16.msrb.mxu2 %v11744_v1  ;;  %v3137_v18 = vrot.slane %v3136_v36, 4  ;;  %v19546_v56 = vpack.c.bf16 %v3427_v24, %v3426_v0  ;;  %vm22998_vm11 = vmmov %vm22997_vm4  ;;  %v3127_v44 = vadd.f32 %v3126_v32, %v3125_v48  ;;  %v11680_v34 = vor.u32 %v14386_v12, %v11679_v50  ;;  %v11647_v45 = vld [vmem:[#allocation17 + $0x20] sm:$0xf]  ;;  %v14378_v1 = vld [vmem:[#allocation17 + $0x2c] sm:$0xf0] }
 0x343   : > { %9577 = vmatpush.bf16.msrb.mxu3 %v11872_v10  ;;  %vm22999_vm9 = vmmov %vm22997_vm4  ;;  %v11808_v11 = vor.u32 %v14418_v54, %v11807_v62  ;;  %v11664_v21 = vor.u32 %v14382_v39, %v11663_v27  ;;  %vm19558_vm15 = vcmp.lt.s32.totalorder %v706_v2, 256  ;;  %v23001_v25 = vmov 0  ;;  %v11775_v7 = vld [vmem:[#allocation17 + $0x120] sm:$0xf]  ;;  %v14374_v3 = vld [vmem:[#allocation17 + $0xc] sm:$0xf0] }
 0x344   : > { %v3138_v4 = vadd.f32 %v3137_v18, %v3136_v36  ;;  %11512 = vmatmul.msk.bf16.gmra.mxu0 %vm22997_vm4, %v19546_v56  ;;  %11516 = vmatmul.msk.bf16.gmra.mxu1 %vm22998_vm11, %v19546_v56  ;;  %vm23000_vm5 = vmmov %vm22997_vm4  ;;  %v3128_v37 = vrot.slane %v3127_v44, 1  ;;  %v23002_v25 = vsel %vm19558_vm15, 4294967295, %v23001_v25  ;;  %v11792_v23 = vor.u32 %v14414_v8, %v11791_v58  ;;  %v11631_v2 = vld [vmem:[#allocation17] sm:$0xf]  ;;  %v14466_v5 = vld [vmem:[#allocation17 + $0x2ec] sm:$0xf0] }
 0x345   : > { %11520 = vmatmul.msk.bf16.gmra.mxu2 %vm22999_vm9, %v19546_v56  ;;  %11524 = vmatmul.msk.bf16.gmra.mxu3 %vm23000_vm5, %v19546_v56  ;;  %23003 = vst [vmem:[#allocation37_spill] sm:$0xff] %v23002_v25  ;;  %v11648_v10 = vor.u32 %v14378_v1, %v11647_v45  ;;  %vm23004_vm14 = vmmov %vm22997_vm4  ;;  %v11776_v14 = vor.u32 %v14410_v9, %v11775_v7  ;;  %v11999_v19 = vld [vmem:[#allocation17 + $0x2e0] sm:$0xf]  ;;  %v14406_v17 = vld [vmem:[#allocation17 + $0x10c] sm:$0xf0] }
 0x346   : > { %9565 = vmatpush.bf16.msrb.mxu2 %v11728_v59  ;;  %v3139_v6 = vrot.slane %v3138_v4, 2  ;;  %v3129_v15 = vadd.f32 %v3128_v37, %v3127_v44  ;;  %vm23005_vm2 = vmmov %vm22997_vm4  ;;  %v11632_v48 = vor.u32 %v14374_v3, %v11631_v2  ;;  %v11759_v22 = vld [vmem:[#allocation17 + $0x100] sm:$0xf]  ;;  %v12000_v33 = vor.u32 %v14466_v5, %v11999_v19  ;;  %v14498_v61 = vld [vmem:[#allocation17 + $0x3ec] sm:$0xf0] }
 0x347   : > { %9578 = vmatpush.bf16.msrb.mxu3 %v11856_v43  ;;  %vm23006_vm3 = vmmov %vm23005_vm2  ;;  %v12127_v59 = vld [vmem:[#allocation17 + $0x3e0] sm:$0xf]  ;;  %v14462_v0 = vld [vmem:[#allocation17 + $0x2cc] sm:$0xf0]  ;;  %v11760_v36 = vor.u32 %v14406_v17, %v11759_v22 }
 0x348   : > { %v3140_v20 = vadd.f32 %v3139_v6, %v3138_v4  ;;  %vm23007_vm6 = vmmov %vm23005_vm2  ;;  %v11983_v30 = vld [vmem:[#allocation17 + $0x2c0] sm:$0xf]  ;;  %v12128_v24 = vor.u32 %v14498_v61, %v12127_v59  ;;  %v14494_v32 = vld [vmem:[#allocation17 + $0x3cc] sm:$0xf0] }
 0x349   : > { %v11984_v51 = vor.u32 %v14462_v0, %v11983_v30  ;;  %v12111_v29 = vld [vmem:[#allocation17 + $0x3c0] sm:$0xf]  ;;  %v14490_v46 = vld [vmem:[#allocation17 + $0x3ac] sm:$0xf0]  ;;  %vm23008_vm1 = vmmov %vm23005_vm2 }
 0x34a   : > { %9566 = vmatpush.bf16.msrb.mxu2 %v11712_v38  ;;  %v3141_v57 = vrot.slane %v3140_v20, 1  ;;  %v12112_v18 = vor.u32 %v14494_v32, %v12111_v29  ;;  %v11967_v43 = vld [vmem:[#allocation17 + $0x2a0] sm:$0xf]  ;;  %v14458_v38 = vld [vmem:[#allocation17 + $0x2ac] sm:$0xf0]  ;;  %vm23009_vm4 = vmmov %vm23008_vm1 }
 0x34b   : > { %9579 = vmatpush.bf16.msrb.mxu3 %v11840_v40  ;;  %v12095_v41 = vld [vmem:[#allocation17 + $0x3a0] sm:$0xf]  ;;  %v11968_v4 = vor.u32 %v14458_v38, %v11967_v43  ;;  %vm23010_vm11 = vmmov %vm23008_vm1  ;;  %v14454_v44 = vld [vmem:[#allocation17 + $0x28c] sm:$0xf0] }
 0x34c   : > { %v3142_v63 = vadd.f32 %v3141_v57, %v3140_v20  ;;  %v12096_v26 = vor.u32 %v14490_v46, %v12095_v41  ;;  %vm23011_vm9 = vmmov %vm23008_vm1  ;;  %v11951_v42 = vld [vmem:[#allocation17 + $0x280] sm:$0xf]  ;;  %v14450_v20 = vld [vmem:[#allocation17 + $0x26c] sm:$0xf0] }
 0x34d   : > { %v12079_v6 = vld [vmem:[#allocation17 + $0x380] sm:$0xf]  ;;  %v11952_v40 = vor.u32 %v14454_v44, %v11951_v42  ;;  %v14482_v12 = vld [vmem:[#allocation17 + $0x36c] sm:$0xf0]  ;;  %v11503_v37 = vld [vmem:[#allocation14 + $0x70] sm:$0xf] }
 0x34e   : > { %9567 = vmatpush.bf16.msrb.mxu2 %v11696_v47  ;;  %v3160_v60 = vrot.slane %v3142_v63, 7  ;;  %v14486_v47 = vld [vmem:[#allocation17 + $0x38c] sm:$0xf0]  ;;  %v11935_v31 = vld [vmem:[#allocation17 + $0x260] sm:$0xf]  ;;  %vm23012_vm5 = vmmov %vm23008_vm1 }
 0x34f   : > { %9580 = vmatpush.bf16.msrb.mxu3 %v11824_v53  ;;  %v12080_v52 = vor.u32 %v14486_v47, %v12079_v6  ;;  %v12063_v50 = vld [vmem:[#allocation17 + $0x360] sm:$0xf]  ;;  %v14371_v57 = vld [vmem:[#allocation14 + $0x94] sm:$0xf0]  ;;  %v14366_v53 = vld [vmem:[#allocation14 + $0x74] sm:$0xf] }
 0x350   : > { %v3175_v16 = vsel %vm3161_vm0, %v3129_v15, %v3160_v60  ;;  %v11504_v62 = vor.u32 %v14371_v57, %v11503_v37  ;;  %v11505_v54 = vld [vmem:[#allocation14 + $0x98] sm:$0xf0]  ;;  %v12064_v63 = vor.u32 %v14482_v12, %v12063_v50  ;;  %v11919_v27 = vld [vmem:[#allocation17 + $0x240] sm:$0xf]  ;;  %v14356_v7 = vld [vmem:[#allocation14 + $0x24] sm:$0xf] }
 0x351   : > { %v3179_v55 = vadd.f32 %v3175_v16, %v3012_v28  ;;  %v14446_v39 = vld [vmem:[#allocation17 + $0x24c] sm:$0xf0]  ;;  %v11508_v15 = vor.u32 %v14366_v53, %v11505_v54  ;;  %v12047_v28 = vld [vmem:[#allocation17 + $0x340] sm:$0xf] }
 0x352   : > { %9568 = vmatpush.bf16.msrb.mxu2 %v11680_v34  ;;  %v11936_v34 = vor.u32 %v14450_v20, %v11935_v31  ;;  %v14478_v60 = vld [vmem:[#allocation17 + $0x34c] sm:$0xf0]  ;;  %3826 = vmatpush.bf16.msrb.mxu0 %v11504_v62  ;;  %v11903_v58 = vld [vmem:[#allocation17 + $0x220] sm:$0xf] }
 0x353   : > { %9581 = vmatpush.bf16.msrb.mxu3 %v11808_v11  ;;  %3185 = vst.msk [vmem:[#allocation2 + $0x8] sm:$0x3] %vm19558_vm15, %v3179_v55  ;;  %3855 = vmatpush.bf16.msrb.mxu1 %v11508_v15  ;;  %v11920_v11 = vor.u32 %v14446_v39, %v11919_v27  ;;  %v14442_v8 = vld [vmem:[#allocation17 + $0x22c] sm:$0xf0]  ;;  %v12031_v16 = vld [vmem:[#allocation17 + $0x320] sm:$0xf] }
 0x354   : > { %11525 = vmatmul.msk.bf16.vlgmr.msra.gmra.mxu0 %vm23004_vm14, %v19078_v13  ;;  %11529 = vmatmul.msk.bf16.vlgmr.msra.gmra.mxu1 %vm23005_vm2, %v19078_v13  ;;  %v14474_v45 = vld [vmem:[#allocation17 + $0x32c] sm:$0xf0]  ;;  %v11904_v1 = vor.u32 %v14442_v8, %v11903_v58  ;;  %vm23013_vm14 = vmmov %vm23008_vm1  ;;  %v11465_v2 = vld [vmem:[#allocation14 + $0x48] sm:$0xf0] }
 0x355   : > { %11533 = vmatmul.msk.bf16.vlgmr.msra.gmra.mxu2 %vm23006_vm3, %v19078_v13  ;;  %11537 = vmatmul.msk.bf16.vlgmr.msra.gmra.mxu3 %vm23007_vm6, %v19078_v13  ;;  %v12032_v55 = vor.u32 %v14474_v45, %v12031_v16  ;;  %vm23014_vm2 = vmmov %vm23008_vm1  ;;  %v11468_v3 = vor.u32 %v14356_v7, %v11465_v2  ;;  %v14438_v19 = vld [vmem:[#allocation17 + $0x20c] sm:$0xf0]  ;;  %v12015_v5 = vld [vmem:[#allocation17 + $0x300] sm:$0xf] }
 0x356   : > { %9569 = vmatpush.bf16.msrb.mxu2 %v11664_v21  ;;  %v12048_v21 = vor.u32 %v14478_v60, %v12047_v28  ;;  %vm23015_vm3 = vmmov %vm23008_vm1  ;;  %v14470_v22 = vld [vmem:[#allocation17 + $0x30c] sm:$0xf0]  ;;  %v5645_v0 = vld [vmem:[#allocation2] sm:$0xff] }
 0x357   : > { %9582 = vmatpush.bf16.msrb.mxu3 %v11792_v23  ;;  %v11463_v23 = vld [vmem:[#allocation14 + $0x20] sm:$0xf]  ;;  %3856 = vmatpush.bf16.msrb.mxu1 %v11468_v3  ;;  %v12016_v17 = vor.u32 %v14470_v22, %v12015_v5  ;;  %vm23016_vm6 = vmmov %vm23008_vm1  ;;  %v12511_v41 = vld [vmem:[#allocation17 + $0x6e0] sm:$0xf] }
 0x358   : > { %v14626_v42 = vld [vmem:[#allocation17 + $0x7ec] sm:$0xf0]  ;;  %v12495_v12 = vld [vmem:[#allocation17 + $0x6c0] sm:$0xf] }
 0x359   : > { %v14590_v37 = vld [vmem:[#allocation17 + $0x6cc] sm:$0xf0]  ;;  %v12607_v16 = vld [vmem:[#allocation17 + $0x7a0] sm:$0xf] }
 0x35a   : > { %9570 = vmatpush.bf16.msrb.mxu2 %v11648_v10  ;;  %v14361_v10 = vld [vmem:[#allocation14 + $0x44] sm:$0xf0]  ;;  %v14622_v62 = vld [vmem:[#allocation17 + $0x7cc] sm:$0xf0]  ;;  %v12496_v15 = vor.u32 %v14590_v37, %v12495_v12 }
 0x35b   : > { %9583 = vmatpush.bf16.msrb.mxu3 %v11776_v14  ;;  %v11464_v9 = vor.u32 %v14361_v10, %v11463_v23  ;;  %v11887_v14 = vld [vmem:[#allocation17 + $0x200] sm:$0xf]  ;;  %v14618_v45 = vld [vmem:[#allocation17 + $0x7ac] sm:$0xf0] }
 0x35c   : > { %v12608_v22 = vor.u32 %v14618_v45, %v12607_v16  ;;  %v12575_v12 = vld [vmem:[#allocation17 + $0x760] sm:$0xf]  ;;  %v14610_v37 = vld [vmem:[#allocation17 + $0x76c] sm:$0xf0] }
 0x35d   : > { %3827 = vmatpush.bf16.msrb.mxu0 %v11464_v9  ;;  %v12576_v45 = vor.u32 %v14610_v37, %v12575_v12  ;;  %v14742_v25 = vld [vmem:[#allocation17 + $0xb8c] sm:$0xf0] }
 0x35e   : > { %9571 = vmatpush.bf16.msrb.mxu2 %v11632_v48  ;;  %v11888_v48 = vor.u32 %v14438_v19, %v11887_v14 }
 0x35f   : > { %9584 = vmatpush.bf16.msrb.mxu3 %v11760_v36 }
 0x362   : > { %9590 = vmatpush.bf16.msra.mxu2 %v12000_v33  ;;  %v3452_v33 = vld [vmem:[#allocation15] sm:$0xff] }
 0x363   : > { %9603 = vmatpush.bf16.msra.mxu3 %v12128_v24  ;;  %v19588_v59 = vperm.slane %v3452_v33, 0  ;;  %v19602_v24 = vperm.slane %v3452_v33, 1  ;;  %v19620_v50 = vperm.slane %v3452_v33, 3 }
 0x364   : > { %11526 = vmatmul.msk.bf16.gmra.mxu0 %vm23008_vm1, %v19263_v35  ;;  %11530 = vmatmul.msk.bf16.gmra.mxu1 %vm23009_vm4, %v19263_v35  ;;  %vm23017_vm4 = vmmov %vm23008_vm1 }
 0x365   : > { %11534 = vmatmul.msk.bf16.gmra.mxu2 %vm23010_vm11, %v19263_v35  ;;  %11538 = vmatmul.msk.bf16.gmra.mxu3 %vm23011_vm9, %v19263_v35  ;;  %vm23018_vm11 = vmmov %vm23008_vm1 }
 0x366   : > { %9591 = vmatpush.bf16.msra.mxu2 %v11984_v51  ;;  %v19604_v51 = vmul.f32 0.015625, %v5645_v0  ;;  %vm23021_vm9 = vmmov %vm23008_vm1  ;;  %v12591_v0 = vld [vmem:[#allocation17 + $0x780] sm:$0xf] }
 0x367   : > { %9604 = vmatpush.bf16.msra.mxu3 %v12112_v18 }
 0x368   : > { %v5654_v43 = vperm.slane %v19604_v51, 0  ;;  %v5655_v38 = vperm.slane %v19604_v51, 1  ;;  %v5656_v10 = vperm.slane %v19604_v51, 2  ;;  %v5657_v7 = vperm.slane %v19604_v51, 3 }
 0x369   : > { %v5660_v14 = vperm.slane %v19604_v51, 6 }
 0x36a   : > { %9592 = vmatpush.bf16.msra.mxu2 %v11968_v4  ;;  %v14594_v4 = vld [vmem:[#allocation17 + $0x6ec] sm:$0xf0]  ;;  %v19623_v57 = vpack.c.bf16 %v5654_v43, %v5654_v43  ;;  %v19625_v53 = vpack.c.bf16 %v5655_v38, %v5655_v38  ;;  %v19661_v38 = vpack.c.bf16 %v5656_v10, %v5656_v10 }
 0x36b   : > { %9605 = vmatpush.bf16.msra.mxu3 %v12096_v26  ;;  %v12639_v26 = vld [vmem:[#allocation17 + $0x7e0] sm:$0xf]  ;;  %v12512_v31 = vor.u32 %v14594_v4, %v12511_v41 }
 0x36c   : > { %v12640_v20 = vor.u32 %v14626_v42, %v12639_v26  ;;  %23019 = vst [vmem:[#allocation38_spill] sm:$0xff] %v19623_v57  ;;  %v19666_v26 = vpack.c.bf16 %v5657_v7, %v5657_v7  ;;  %v12447_v42 = vld [vmem:[#allocation17 + $0x660] sm:$0xf] }
 0x36d   : > { %23020 = vst [vmem:[#allocation39_spill] sm:$0xff] %v19625_v53 }
 0x36e   : > { %9593 = vmatpush.bf16.msra.mxu2 %v11952_v40  ;;  %23023 = vst [vmem:[#allocation40_spill] sm:$0xff] %v19661_v38 }
 0x36f   : > { %9606 = vmatpush.bf16.msra.mxu3 %v12080_v52  ;;  %v19618_v52 = vperm.slane %v3452_v33, 2  ;;  %v14582_v33 = vld [vmem:[#allocation17 + $0x68c] sm:$0xf0]  ;;  %23024 = vst [vmem:[#allocation41_spill] sm:$0xff] %v19666_v26 }
 0x372   : > { %9594 = vmatpush.bf16.msra.mxu2 %v11936_v34  ;;  %v12623_v34 = vld [vmem:[#allocation17 + $0x7c0] sm:$0xf] }
 0x373   : > { %9607 = vmatpush.bf16.msra.mxu3 %v12064_v63 }
 0x374   : > { %11527 = vmatmul.msk.bf16.gmra.mxu0 %vm23012_vm5, %v19403_v49  ;;  %11531 = vmatmul.msk.bf16.gmra.mxu1 %vm23013_vm14, %v19403_v49  ;;  %vm23022_vm5 = vmmov %vm23008_vm1 }
 0x375   : > { %11535 = vmatmul.msk.bf16.gmra.mxu2 %vm23014_vm2, %v19403_v49  ;;  %11539 = vmatmul.msk.bf16.gmra.mxu3 %vm23015_vm3, %v19403_v49 }
 0x376   : > { %9595 = vmatpush.bf16.msra.mxu2 %v11920_v11  ;;  %v12479_v11 = vld [vmem:[#allocation17 + $0x6a0] sm:$0xf] }
 0x377   : > { %9608 = vmatpush.bf16.msra.mxu3 %v12048_v21  ;;  %v14586_v21 = vld [vmem:[#allocation17 + $0x6ac] sm:$0xf0] }
 0x37a   : > { %9596 = vmatpush.bf16.msra.mxu2 %v11904_v1 }
 0x37b   : > { %9609 = vmatpush.bf16.msra.mxu3 %v12032_v55 }
 0x37e   : > { %9597 = vmatpush.bf16.msra.mxu2 %v11888_v48  ;;  %v12480_v48 = vor.u32 %v14586_v21, %v12479_v11 }
 0x37f   : > { %9610 = vmatpush.bf16.msra.mxu3 %v12016_v17  ;;  %v12463_v17 = vld [vmem:[#allocation17 + $0x680] sm:$0xf] }
 0x384   : > { %11528 = vmatmul.msk.bf16.gmra.mxu0 %vm23016_vm6, %v19546_v56  ;;  %11532 = vmatmul.msk.bf16.gmra.mxu1 %vm23008_vm1, %v19546_v56  ;;  %vm23029_vm6 = vmmov %vm23008_vm1 }
 0x385   : > { %11536 = vmatmul.msk.bf16.gmra.mxu2 %vm23017_vm4, %v19546_v56  ;;  %11540 = vmatmul.msk.bf16.gmra.mxu3 %vm23018_vm11, %v19546_v56 }
 0x386   : > { %v3597_v61 = vpop.f32.mrf.mxu0 }
 0x387   : > { %v19599_v30 = vadd.f32 %v3597_v61, %v19588_v59 }
 0x389   : > { %v11549_v36 = vmul.f32 -1.442695, %v19599_v30 }
 0x38b   : > { %15603 = vpow2.f32 %v11549_v36  ;;  %v14614_v36 = vld [vmem:[#allocation17 + $0x78c] sm:$0xf0] }
 0x38c   : > { %v3626_v29 = vpop.f32.mrf.mxu1 }
 0x38d   : > { %v19607_v18 = vadd.f32 %v3626_v29, %v19602_v24 }
 0x38e   : > { %v3599_v32 = vpop.f32.mrf.mxu0 }
 0x38f   : > { %v19612_v46 = vadd.f32 %v3599_v32, %v19588_v59  ;;  %v11550_v6 = vmul.f32 -1.442695, %v19607_v18 }
 0x391   : > { %v15604_v44 = vpop.eup %15603  ;;  %v11559_v40 = vmul.f32 -1.442695, %v19612_v46  ;;  %15605 = vpow2.f32 %v11550_v6  ;;  %v5661_v6 = vperm.slane %v19604_v51, 7 }
 0x392   : > { %v19616_v47 = vadd.f32 1.0, %v15604_v44  ;;  %v14578_v44 = vld [vmem:[#allocation17 + $0x66c] sm:$0xf0] }
 0x393   : > { %v12448_v21 = vor.u32 %v14578_v44, %v12447_v42 }
 0x394   : > { %15607 = vrcp.f32 %v19616_v47  ;;  %11541 = vmatmul.msk.bf16.vlgmr.msrb.gmra.mxu0 %vm23021_vm9, %v19078_v13  ;;  %11545 = vmatmul.msk.bf16.vlgmr.msrb.gmra.mxu1 %vm23022_vm5, %v19078_v13  ;;  %v3655_v54 = vpop.f32.mrf.mxu2  ;;  %v3628_v39 = vpop.f32.mrf.mxu1  ;;  %v12624_v13 = vor.u32 %v14622_v62, %v12623_v34  ;;  %vm4203_vm2 = vweird.f32 %v19616_v47 }
 0x395   : > { %15609 = vpow2.f32 %v11559_v40  ;;  %9572 = vmatmul.bf16.vlgmr.msrb.gmra.mxu2 %v19623_v57  ;;  %9585 = vmatmul.bf16.vlgmr.msrb.gmra.mxu3 %v19625_v53  ;;  %v19634_v63 = vadd.f32 %v3655_v54, %v19618_v52  ;;  %v3684_v27 = vpop.f32.mrf.mxu3  ;;  %v19640_v60 = vadd.f32 %v3628_v39, %v19602_v24  ;;  %v14570_v53 = vld [vmem:[#allocation17 + $0x62c] sm:$0xf0]  ;;  %v13103_v57 = vld [vmem:[#allocation17 + $0xb80] sm:$0xf] }
 0x396   : > { %9642 = vmatpush.bf16.msrb.mxu2 %v12512_v31  ;;  %9655 = vmatpush.bf16.msrb.mxu3 %v12640_v20  ;;  %v19637_v28 = vadd.f32 %v3684_v27, %v19620_v50  ;;  %v3602_v58 = vpop.f32.mrf.mxu0  ;;  %v12464_v31 = vor.u32 %v14582_v33, %v12463_v17  ;;  %v12592_v20 = vor.u32 %v14614_v36, %v12591_v0 }
 0x397   : > { %v11551_v8 = vmul.f32 -1.442695, %v19634_v63  ;;  %v19644_v1 = vadd.f32 %v3602_v58, %v19588_v59  ;;  %v15606_v55 = vpop.eup %15605  ;;  %v11560_v3 = vmul.f32 -1.442695, %v19640_v60  ;;  %v19675_v27 = vpack.c.bf16 %v5660_v14, %v5660_v14 }
 0x398   : > { %v11552_v23 = vmul.f32 -1.442695, %v19637_v28  ;;  %v19651_v2 = vadd.f32 1.0, %v15606_v55  ;;  %v19693_v14 = vpack.c.bf16 %v5661_v6, %v5661_v6 }
 0x399   : > { %15611 = vpow2.f32 %v11551_v8  ;;  %v11569_v61 = vmul.f32 -1.442695, %v19644_v1  ;;  %23025 = vst [vmem:[#allocation42_spill] sm:$0xff] %v19675_v27 }
 0x39a   : > { %v19649_v9 = vpop.eup %15607  ;;  %15613 = vpow2.f32 %v11552_v23  ;;  %9643 = vmatpush.bf16.msrb.mxu2 %v12496_v15  ;;  %9656 = vmatpush.bf16.msrb.mxu3 %v12624_v13  ;;  %v4207_v15 = vand.u32 2147483647, %v19616_v47  ;;  %v4209_v13 = vand.u32 2147483648, %v19616_v47  ;;  %v4224_v8 = vand.u32 2147483648, %v19651_v2  ;;  %23026 = vst [vmem:[#allocation43_spill] sm:$0xff] %v19693_v14 }
 0x39b   : > { %v15610_v19 = vpop.eup %15609  ;;  %v4199_v5 = vmul.f32 %v19649_v9, %v19616_v47  ;;  %15615 = vrcp.f32 %v19651_v2  ;;  %vm4204_vm14 = vweird.f32 %v19649_v9  ;;  %v4222_v36 = vand.u32 2147483647, %v19651_v2 }
 0x39c   : > { %v19659_v32 = vadd.f32 1.0, %v15610_v19  ;;  %v3657_v43 = vpop.f32.mrf.mxu2  ;;  %15617 = vpow2.f32 %v11560_v3  ;;  %vm19699_vm3 = vcmp.eq.f32.partialorder %v4207_v15, 8.507059e+37  ;;  %v3631_v17 = vpop.f32.mrf.mxu1  ;;  %vm19710_vm4 = vmor %vm4203_vm2, %vm4204_vm14  ;;  %v4210_v0 = vor.u32 1.1754944e-38, %v4209_v13 }
 0x39d   : > { %v4200_v29 = vsub.f32 1.0, %v4199_v5  ;;  %v19664_v41 = vadd.f32 %v3657_v43, %v19618_v52  ;;  %v3686_v4 = vpop.f32.mrf.mxu3  ;;  %vm4218_vm11 = vweird.f32 %v19651_v2  ;;  %vm19752_vm2 = vcmp.eq.f32.partialorder %v4222_v36, 8.507059e+37 }
 0x39e   : > { %15619 = vrcp.f32 %v19659_v32  ;;  %9644 = vmatpush.bf16.msrb.mxu2 %v12480_v48  ;;  %9657 = vmatpush.bf16.msrb.mxu3 %v12608_v22  ;;  %v19673_v54 = vadd.f32 %v3686_v4, %v19620_v50  ;;  %v4357_v7 = vand.u32 2147483647, %v19659_v32  ;;  %v3604_v33 = vpop.f32.mrf.mxu0  ;;  %v4359_v43 = vand.u32 2147483648, %v19659_v32 }
 0x39f   : > { %v4201_v40 = vmul.f32 %v19649_v9, %v4200_v29  ;;  %v15612_v34 = vpop.eup %15611  ;;  %v11561_v62 = vmul.f32 -1.442695, %v19664_v41  ;;  %15621 = vpow2.f32 %v11569_v61  ;;  %v19715_v29 = vor.u32 1.1754944e-38, %v4224_v8 }
 0x3a0   : > { %v15614_v39 = vpop.eup %15613  ;;  %v19679_v11 = vadd.f32 1.0, %v15612_v34  ;;  %v11562_v3 = vmul.f32 -1.442695, %v19673_v54  ;;  %vm4353_vm9 = vweird.f32 %v19659_v32  ;;  %vm19729_vm5 = vcmp.eq.f32.partialorder %v4357_v7, 8.507059e+37 }
 0x3a1   : > { %v19681_v58 = vpop.eup %15615  ;;  %v19684_v16 = vadd.f32 1.0, %v15614_v39  ;;  %15623 = vpow2.f32 %v11561_v62  ;;  %v4202_v55 = vadd.f32 %v19649_v9, %v4201_v40  ;;  %v19734_v40 = vadd.f32 %v3631_v17, %v19602_v24 }
 0x3a2   : > { %v4214_v23 = vmul.f32 %v19681_v58, %v19651_v2  ;;  %15625 = vrcp.f32 %v19679_v11  ;;  %9645 = vmatpush.bf16.msrb.mxu2 %v12464_v31  ;;  %9658 = vmatpush.bf16.msrb.mxu3 %v12592_v20  ;;  %v15618_v10 = vpop.eup %15617  ;;  %vm4219_vm14 = vweird.f32 %v19681_v58  ;;  %v4360_v39 = vor.u32 1.1754944e-38, %v4359_v43 }
 0x3a3   : > { %15627 = vrcp.f32 %v19684_v16  ;;  %v19727_v42 = vadd.f32 1.0, %v15618_v10  ;;  %v4254_v47 = vand.u32 2147483648, %v19684_v16  ;;  %vm19786_vm13 = vmor %vm4218_vm11, %vm4219_vm14 }
 0x3a4   : > { %v19696_v5 = vpop.eup %15619  ;;  %v4215_v22 = vsub.f32 1.0, %v4214_v23  ;;  %11542 = vmatmul.msk.bf16.gmra.mxu0 %vm23029_vm6, %v19263_v35  ;;  %11546 = vmatmul.msk.bf16.gmra.mxu1 %vm23008_vm1, %v19263_v35  ;;  %v4206_v35 = vsel %vm19710_vm4, %v19649_v9, %v4202_v55  ;;  %15629 = vpow2.f32 %v11562_v3  ;;  %v19737_v9 = vadd.f32 %v3604_v33, %v19588_v59 }
 0x3a5   : > { %v15622_v61 = vpop.eup %15621  ;;  %9598 = vmatmul.bf16.vlgmr.msra.gmra.mxu2 %v19661_v38  ;;  %9611 = vmatmul.bf16.vlgmr.msra.gmra.mxu3 %v19666_v26  ;;  %v4349_v4 = vmul.f32 %v19696_v5, %v19659_v32  ;;  %15631 = vrcp.f32 %v19727_v42  ;;  %v4211_v34 = vsel %vm19699_vm3, %v4210_v0, %v4206_v35  ;;  %vm4354_vm6 = vweird.f32 %v19696_v5 }
 0x3a6   : > { %9646 = vmatpush.bf16.msrb.mxu2 %v12448_v21  ;;  %9659 = vmatpush.bf16.msrb.mxu3 %v12576_v45  ;;  %v4216_v20 = vmul.f32 %v19681_v58, %v4215_v22  ;;  %v19743_v37 = vadd.f32 1.0, %v15622_v61  ;;  %v4239_v21 = vand.u32 2147483648, %v19679_v11  ;;  %vm4233_vm3 = vweird.f32 %v19679_v11  ;;  %vm4355_vm4 = vmor %vm4353_vm9, %vm4354_vm6 }
 0x3a7   : > { %v15624_v44 = vpop.eup %15623  ;;  %v4350_v12 = vsub.f32 1.0, %v4349_v4  ;;  %v4237_v23 = vand.u32 2147483647, %v19679_v11  ;;  %v5398_v7 = vmul.f32 %v4211_v34, %v19599_v30  ;;  %vm4248_vm1 = vweird.f32 %v19684_v16 }
 0x3a8   : > { %v19739_v31 = vpop.eup %15625  ;;  %v19759_v45 = vadd.f32 1.0, %v15624_v44  ;;  %v4217_v3 = vadd.f32 %v19681_v58, %v4216_v20  ;;  %15633 = vrcp.f32 %v19743_v37  ;;  %v19776_v30 = vor.u32 1.1754944e-38, %v4239_v21 }
 0x3a9   : > { %v4229_v62 = vmul.f32 %v19739_v31, %v19679_v11  ;;  %v19750_v15 = vpop.eup %15627  ;;  %v4351_v8 = vmul.f32 %v19696_v5, %v4350_v12  ;;  %vm4234_vm9 = vweird.f32 %v19739_v31  ;;  %vm4368_vm11 = vweird.f32 %v19727_v42 }
 0x3aa   : > { %v4244_v10 = vmul.f32 %v19750_v15, %v19684_v16  ;;  %v15630_v22 = vpop.eup %15629  ;;  %15635 = vrcp.f32 %v19759_v45  ;;  %v4221_v44 = vsel %vm19786_vm13, %v19681_v58, %v4217_v3  ;;  %v4389_v20 = vand.u32 2147483648, %v19759_v45 }
 0x3ab   : > { %v4230_v55 = vsub.f32 1.0, %v4229_v62  ;;  %v4352_v48 = vadd.f32 %v19696_v5, %v4351_v8  ;;  %v19774_v61 = vpop.eup %15631  ;;  %v19780_v36 = vadd.f32 1.0, %v15630_v22  ;;  %vm4249_vm13 = vweird.f32 %v19750_v15  ;;  %v14574_v22 = vld [vmem:[#allocation17 + $0x64c] sm:$0xf0] }
 0x3ac   : > { %v4245_v33 = vsub.f32 1.0, %v4244_v10  ;;  %v4364_v4 = vmul.f32 %v19774_v61, %v19727_v42  ;;  %v19813_v58 = vor.u32 1.1754944e-38, %v4254_v47  ;;  %vm4369_vm14 = vweird.f32 %v19774_v61 }
 0x3ad   : > { %v4231_v17 = vmul.f32 %v19739_v31, %v4230_v55  ;;  %v4356_v0 = vsel %vm4355_vm4, %v19696_v5, %v4352_v48  ;;  %v4374_v5 = vand.u32 2147483648, %v19727_v42  ;;  %15637 = vrcp.f32 %v19780_v36 }
 0x3ae   : > { %v4246_v32 = vmul.f32 %v19750_v15, %v4245_v33  ;;  %v4361_v35 = vsel %vm19729_vm5, %v4360_v39, %v4356_v0  ;;  %v4365_v34 = vsub.f32 1.0, %v4364_v4  ;;  %v19807_v62 = vpop.eup %15633  ;;  %v4372_v55 = vand.u32 2147483647, %v19727_v42  ;;  %vm19831_vm5 = vmor %vm4233_vm3, %vm4234_vm9  ;;  %v3633_v0 = vpop.f32.mrf.mxu1 }
 0x3af   : > { %v19803_v12 = vadd.f32 %v19739_v31, %v4231_v17  ;;  %v5408_v6 = vmul.f32 %v4361_v35, %v19612_v46  ;;  %v19821_v46 = vsel %vm19752_vm2, %v19715_v29, %v4221_v44  ;;  %v19825_v10 = vor.u32 1.1754944e-38, %v4374_v5  ;;  %vm19854_vm3 = vmor %vm4248_vm1, %vm4249_vm13  ;;  %v3660_v35 = vpop.f32.mrf.mxu2 }
 0x3b0   : > { %v19810_v39 = vadd.f32 %v19750_v15, %v4246_v32  ;;  %v19816_v21 = vpop.eup %15635  ;;  %v4366_v8 = vmul.f32 %v19774_v61, %v4365_v34  ;;  %vm4383_vm2 = vweird.f32 %v19759_v45  ;;  %v4387_v13 = vand.u32 2147483647, %v19759_v45  ;;  %vm19880_vm13 = vmor %vm4368_vm11, %vm4369_vm14 }
 0x3b1   : > { %v4379_v29 = vmul.f32 %v19816_v21, %v19759_v45  ;;  %v19840_v48 = vor.u32 1.1754944e-38, %v4389_v20  ;;  %vm23040_vm6 = vcmask 261120   ;;  %v19858_v33 = vadd.f32 %v5408_v6, %v5398_v7  ;;  %v3689_v20 = vpop.f32.mrf.mxu3  ;;  %v12415_v45 = vld [vmem:[#allocation17 + $0x620] sm:$0xf] }
 0x3b2   : > { %vm23041_vm4 = vmmov %vm23040_vm6  ;;  %v19861_v47 = vadd.f32 %v19774_v61, %v4366_v8  ;;  %vm4398_vm9 = vweird.f32 %v19780_v36  ;;  %v4402_v32 = vand.u32 2147483647, %v19780_v36  ;;  %vm4384_vm1 = vweird.f32 %v19816_v21 }
 0x3b3   : > { %v4380_v43 = vsub.f32 1.0, %v4379_v29  ;;  %v19871_v4 = vpop.eup %15637  ;;  %v4404_v7 = vand.u32 2147483648, %v19780_v36  ;;  %v11570_v44 = vmul.f32 -1.442695, %v19734_v40  ;;  %vm19897_vm11 = vcmp.eq.f32.partialorder %v4387_v13, 8.507059e+37  ;;  %vm19933_vm10 = vmor %vm4383_vm2, %vm4384_vm1 }
 0x3b4   : > { %11543 = vmatmul.msk.bf16.gmra.mxu0 %vm23040_vm6, %v19403_v49  ;;  %11547 = vmatmul.msk.bf16.gmra.mxu1 %vm23041_vm4, %v19403_v49  ;;  %v4499_v49 = vmul.f32 %v19807_v62, %v19743_v37  ;;  %vm19884_vm6 = vcmp.eq.f32.partialorder %v4372_v55, 8.507059e+37  ;;  %v4394_v29 = vmul.f32 %v19871_v4, %v19780_v36  ;;  %vm4503_vm4 = vweird.f32 %v19743_v37 }
 0x3b5   : > { %v4381_v8 = vmul.f32 %v19816_v21, %v4380_v43  ;;  %v4371_v42 = vsel %vm19880_vm13, %v19774_v61, %v19861_v47  ;;  %vm4504_vm14 = vweird.f32 %v19807_v62  ;;  %v4507_v43 = vand.u32 2147483647, %v19743_v37 }
 0x3b6   : > { %v4500_v5 = vsub.f32 1.0, %v4499_v49  ;;  %v4509_v49 = vand.u32 2147483648, %v19743_v37  ;;  %vm19906_vm12 = vcmp.eq.f32.partialorder %v4237_v23, 8.507059e+37  ;;  %v4395_v61 = vsub.f32 1.0, %v4394_v29  ;;  %v12431_v23 = vld [vmem:[#allocation17 + $0x640] sm:$0xf]  ;;  %vm4505_vm7 = vmor %vm4503_vm4, %vm4504_vm14 }
 0x3b7   : > { %v4382_v6 = vadd.f32 %v19816_v21, %v4381_v8  ;;  %15639 = vpow2.f32 %v11570_v44  ;;  %v19912_v13 = vadd.f32 %v3660_v35, %v19618_v52  ;;  %vm4399_vm13 = vweird.f32 %v19871_v4  ;;  %v12559_v29 = vld [vmem:[#allocation17 + $0x740] sm:$0xf] }
 0x3b8   : > { %v4501_v55 = vmul.f32 %v19807_v62, %v4500_v5  ;;  %v19917_v5 = vadd.f32 %v3689_v20, %v19620_v50  ;;  %v11579_v11 = vmul.f32 -1.442695, %v19737_v9  ;;  %v4396_v26 = vmul.f32 %v19871_v4, %v4395_v61  ;;  %v3662_v20 = vpop.f32.mrf.mxu2 }
 0x3b9   : > { %v4510_v35 = vor.u32 1.1754944e-38, %v4509_v49  ;;  %v11571_v44 = vmul.f32 -1.442695, %v19912_v13  ;;  %v19927_v8 = vadd.f32 %v3633_v0, %v19602_v24  ;;  %vm4508_vm8 = vcmp.eq.f32.partialorder %v4507_v43, 8.507059e+37  ;;  %v14606_v49 = vld [vmem:[#allocation17 + $0x74c] sm:$0xf0] }
 0x3ba   : > { %v4502_v47 = vadd.f32 %v19807_v62, %v4501_v55  ;;  %v11572_v37 = vmul.f32 -1.442695, %v19917_v5  ;;  %15641 = vpow2.f32 %v11579_v11  ;;  %v4386_v0 = vsel %vm19933_vm10, %v19816_v21, %v4382_v6  ;;  %v12543_v6 = vld [vmem:[#allocation17 + $0x720] sm:$0xf] }
 0x3bb   : > { %v4397_v61 = vadd.f32 %v19871_v4, %v4396_v26  ;;  %15643 = vpow2.f32 %v11571_v44  ;;  %v12432_v21 = vor.u32 %v14574_v22, %v12431_v23  ;;  %v14602_v26 = vld [vmem:[#allocation17 + $0x72c] sm:$0xf0]  ;;  %v4405_v44 = vor.u32 1.1754944e-38, %v4404_v7  ;;  %v3691_v23 = vpop.f32.mrf.mxu3 }
 0x3bc   : > { %v4506_v55 = vsel %vm4505_vm7, %v19807_v62, %v4502_v47  ;;  %vm19947_vm7 = vmor %vm4398_vm9, %vm4399_vm13  ;;  %15645 = vpow2.f32 %v11572_v37  ;;  %v11580_v47 = vmul.f32 -1.442695, %v19927_v8  ;;  %v12560_v36 = vor.u32 %v14606_v49, %v12559_v29 }
 0x3bd   : > { %v4511_v38 = vsel %vm4508_vm8, %v4510_v35, %v4506_v55  ;;  %v15640_v11 = vpop.eup %15639  ;;  %v4401_v35 = vsel %vm19947_vm7, %v19871_v4, %v4397_v61  ;;  %vm4403_vm8 = vcmp.eq.f32.partialorder %v4402_v32, 8.507059e+37  ;;  %v4376_v55 = vsel %vm19884_vm6, %v19825_v10, %v4371_v42  ;;  %9647 = vmatpush.bf16.msrb.mxu2 %v12432_v21 }
 0x3be   : > { %v5418_v43 = vmul.f32 %v4511_v38, %v19644_v1  ;;  %v19962_v38 = vadd.f32 1.0, %v15640_v11  ;;  %v12416_v22 = vor.u32 %v14570_v53, %v12415_v45  ;;  %v4391_v4 = vsel %vm19897_vm11, %v19840_v48, %v4386_v0  ;;  %9660 = vmatpush.bf16.msrb.mxu3 %v12560_v36 }
 0x3bf   : > { %v4406_v32 = vsel %vm4403_vm8, %v4405_v44, %v4401_v35  ;;  %15647 = vpow2.f32 %v11580_v47  ;;  %v12544_v7 = vor.u32 %v14602_v26, %v12543_v6  ;;  %v23056_v10 = vsel %vm19831_vm5, %v19739_v31, %v19803_v12 }
 0x3c0   : > { %v19960_v1 = vadd.f32 %v19858_v33, %v5418_v43  ;;  %v15642_v29 = vpop.eup %15641  ;;  %v4241_v33 = vsel %vm19906_vm12, %v19776_v30, %v23056_v10  ;;  %v23057_v53 = vand.u32 2147483647, %v19684_v16  ;;  %15649 = vrcp.f32 %v19962_v38  ;;  %v14566_v43 = vld [vmem:[#allocation17 + $0x60c] sm:$0xf0] }
 0x3c1   : > { %v19979_v19 = vadd.f32 %v3662_v20, %v19618_v52  ;;  %v15644_v48 = vpop.eup %15643  ;;  %v23058_v3 = vsel %vm19854_vm3, %v19750_v15, %v19810_v39  ;;  %v5409_v12 = vmul.f32 %v4376_v55, %v19640_v60  ;;  %v19988_v2 = vadd.f32 1.0, %v15642_v29  ;;  %9648 = vmatpush.bf16.msrb.mxu2 %v12416_v22 }
 0x3c2   : > { %vm4253_vm10 = vcmp.eq.f32.partialorder %v23057_v53, 8.507059e+37  ;;  %v19991_v16 = vadd.f32 %v3691_v23, %v19620_v50  ;;  %vm23059_vm12 = vcmask 261120   ;;  %v15646_v30 = vpop.eup %15645  ;;  %v5399_v17 = vmul.f32 %v19821_v46, %v19607_v18  ;;  %9661 = vmatpush.bf16.msrb.mxu3 %v12544_v7 }
 0x3c3   : > { %v4256_v31 = vsel %vm4253_vm10, %v19813_v58, %v23058_v3  ;;  %vm23060_vm5 = vmmov %vm23059_vm12  ;;  %v5410_v15 = vmul.f32 %v4391_v4, %v19664_v41  ;;  %v5411_v39 = vmul.f32 %v4406_v32, %v19673_v54  ;;  %v20001_v60 = vadd.f32 1.0, %v15644_v48  ;;  %v12527_v3 = vld [vmem:[#allocation17 + $0x700] sm:$0xf] }
 0x3c4   : > { %11544 = vmatmul.msk.bf16.gmra.mxu0 %vm23059_vm12, %v19546_v56  ;;  %11548 = vmatmul.msk.bf16.gmra.mxu1 %vm23060_vm5, %v19546_v56  ;;  %v4522_v58 = vand.u32 2147483647, %v19962_v38  ;;  %v4524_v34 = vand.u32 2147483648, %v19962_v38  ;;  %v20005_v42 = vadd.f32 1.0, %v15646_v30  ;;  %15651 = vrcp.f32 %v19988_v2  ;;  %v3607_v56 = vpop.f32.mrf.mxu0 }
 0x3c5   : > { %v5400_v37 = vmul.f32 %v4241_v33, %v19634_v63  ;;  %v5401_v18 = vmul.f32 %v4256_v31, %v19637_v28  ;;  %15653 = vrcp.f32 %v20001_v60  ;;  %v11581_v41 = vmul.f32 -1.442695, %v19979_v19  ;;  %v15648_v54 = vpop.eup %15647  ;;  %v12399_v28 = vld [vmem:[#allocation17 + $0x600] sm:$0xf] }
 0x3c6   : > { %v20012_v46 = vadd.f32 %v5409_v12, %v5399_v17  ;;  %15655 = vrcp.f32 %v20005_v42  ;;  %v11582_v49 = vmul.f32 -1.442695, %v19991_v16  ;;  %v5659_v0 = vperm.slane %v19604_v51, 5  ;;  %v15650_v61 = vpop.eup %15649 }
 0x3c7   : > { %v20017_v45 = vadd.f32 %v5410_v15, %v5400_v37  ;;  %v20019_v62 = vadd.f32 %v5411_v39, %v5401_v18  ;;  %vm4518_vm2 = vweird.f32 %v19962_v38  ;;  %v20023_v63 = vadd.f32 %v3607_v56, %v19588_v59  ;;  %v14598_v15 = vld [vmem:[#allocation17 + $0x70c] sm:$0xf0] }
 0x3c8   : > { %v4514_v47 = vmul.f32 %v15650_v61, %v19962_v38  ;;  %vm20026_vm3 = vcmp.eq.f32.partialorder %v4522_v58, 8.507059e+37  ;;  %v4525_v6 = vor.u32 1.1754944e-38, %v4524_v34  ;;  %v4537_v26 = vand.u32 2147483647, %v20001_v60 }
 0x3c9   : > { %v4657_v11 = vand.u32 2147483647, %v19988_v2  ;;  %v4539_v35 = vand.u32 2147483648, %v20001_v60  ;;  %v4552_v44 = vand.u32 2147483647, %v20005_v42  ;;  %vm4653_vm9 = vweird.f32 %v19988_v2 }
 0x3ca   : > { %v20035_v36 = vadd.f32 1.0, %v15648_v54  ;;  %15657 = vpow2.f32 %v11581_v41  ;;  %v20037_v20 = vpop.eup %15651  ;;  %v4515_v55 = vsub.f32 1.0, %v4514_v47  ;;  %vm4533_vm1 = vweird.f32 %v20001_v60  ;;  %v3636_v41 = vpop.f32.mrf.mxu1 }
 0x3cb   : > { %v4659_v22 = vand.u32 2147483648, %v19988_v2  ;;  %15659 = vpow2.f32 %v11582_v49  ;;  %v12400_v23 = vor.u32 %v14566_v43, %v12399_v28  ;;  %v15654_v4 = vpop.eup %15653  ;;  %vm4548_vm6 = vweird.f32 %v20005_v42 }
 0x3cc   : > { %v4554_v32 = vand.u32 2147483648, %v20005_v42  ;;  %v4649_v7 = vmul.f32 %v20037_v20, %v19988_v2  ;;  %15661 = vrcp.f32 %v20035_v36  ;;  %v11589_v29 = vmul.f32 -1.442695, %v20023_v63  ;;  %v15656_v10 = vpop.eup %15655 }
 0x3cd   : > { %v4516_v33 = vmul.f32 %v15650_v61, %v4515_v55  ;;  %vm4519_vm4 = vweird.f32 %v15650_v61  ;;  %v4529_v53 = vmul.f32 %v15654_v4, %v20001_v60  ;;  %vm20048_vm11 = vcmp.eq.f32.partialorder %v4537_v26, 8.507059e+37  ;;  %9649 = vmatpush.bf16.msrb.mxu2 %v12400_v23 }
 0x3ce   : > { %v4540_v31 = vor.u32 1.1754944e-38, %v4539_v35  ;;  %v4544_v12 = vmul.f32 %v15656_v10, %v20005_v42  ;;  %v4650_v30 = vsub.f32 1.0, %v4649_v7  ;;  %vm20053_vm14 = vcmp.eq.f32.partialorder %v4657_v11, 8.507059e+37  ;;  %vm4520_vm7 = vmor %vm4518_vm2, %vm4519_vm4 }
 0x3cf   : > { %v4517_v39 = vadd.f32 %v15650_v61, %v4516_v33  ;;  %v4530_v58 = vsub.f32 1.0, %v4529_v53  ;;  %vm4654_vm13 = vweird.f32 %v20037_v20  ;;  %v4660_v34 = vor.u32 1.1754944e-38, %v4659_v22 }
 0x3d0   : > { %v15658_v56 = vpop.eup %15657  ;;  %vm4534_vm8 = vweird.f32 %v15654_v4  ;;  %v4545_v37 = vsub.f32 1.0, %v4544_v12  ;;  %v4651_v18 = vmul.f32 %v20037_v20, %v4650_v30  ;;  %15663 = vpow2.f32 %v11589_v29  ;;  %9650 = vmatmul.bf16.vlgmr.msrb.gmra.mxu2 %v19675_v27  ;;  %vm20075_vm12 = vmor %vm4653_vm9, %vm4654_vm13 }
 0x3d1   : > { %v15660_v54 = vpop.eup %15659  ;;  %v4521_v49 = vsel %vm4520_vm7, %v15650_v61, %v4517_v39  ;;  %v4531_v28 = vmul.f32 %v15654_v4, %v4530_v58  ;;  %v20063_v43 = vadd.f32 1.0, %v15658_v56  ;;  %v12528_v47 = vor.u32 %v14598_v15, %v12527_v3  ;;  %vm4535_vm5 = vmor %vm4533_vm1, %vm4534_vm8  ;;  %v12255_v58 = vld [vmem:[#allocation17 + $0x4e0] sm:$0xf]  ;;  %v14530_v56 = vld [vmem:[#allocation17 + $0x4ec] sm:$0xf0] }
 0x3d2   : > { %v20065_v26 = vpop.eup %15661  ;;  %v4526_v38 = vsel %vm20026_vm3, %v4525_v6, %v4521_v49  ;;  %v4546_v11 = vmul.f32 %v15656_v10, %v4545_v37  ;;  %vm4549_vm10 = vweird.f32 %v15656_v10  ;;  %v4652_v35 = vadd.f32 %v20037_v20, %v4651_v18  ;;  %v12383_v37 = vld [vmem:[#allocation17 + $0x5e0] sm:$0xf]  ;;  %v3665_v18 = vpop.f32.mrf.mxu2 }
 0x3d3   : > { %v5419_v55 = vmul.f32 %v4526_v38, %v19734_v40  ;;  %v4532_v22 = vadd.f32 %v15654_v4, %v4531_v28  ;;  %v4664_v23 = vmul.f32 %v20065_v26, %v20035_v36  ;;  %v20082_v21 = vadd.f32 %v3636_v41, %v19602_v24  ;;  %9662 = vmatpush.bf16.msrb.mxu3 %v12528_v47  ;;  %vm4550_vm2 = vmor %vm4548_vm6, %vm4549_vm10  ;;  %v3694_v38 = vpop.f32.mrf.mxu3 }
 0x3d4   : > { %v4547_v40 = vadd.f32 %v15656_v10, %v4546_v11  ;;  %v4656_v2 = vsel %vm20075_vm12, %v20037_v20, %v4652_v35  ;;  %15665 = vrcp.f32 %v20063_v43  ;;  %v20091_v6 = vadd.f32 1.0, %v15660_v54 }
 0x3d5   : > { %v20094_v7 = vadd.f32 %v20012_v46, %v5419_v55  ;;  %v4536_v29 = vsel %vm4535_vm5, %v15654_v4, %v4532_v22  ;;  %v4555_v33 = vor.u32 1.1754944e-38, %v4554_v32  ;;  %v4665_v60 = vsub.f32 1.0, %v4664_v23  ;;  %v3609_v23 = vpop.f32.mrf.mxu0 }
 0x3d6   : > { %v15664_v53 = vpop.eup %15663  ;;  %v4541_v3 = vsel %vm20048_vm11, %v4540_v31, %v4536_v29  ;;  %v4551_v12 = vsel %vm4550_vm2, %v15656_v10, %v4547_v40  ;;  %vm4553_vm3 = vcmp.eq.f32.partialorder %v4552_v44, 8.507059e+37  ;;  %v4661_v20 = vsel %vm20053_vm14, %v4660_v34, %v4656_v2  ;;  %9663 = vmatmul.bf16.vlgmr.msrb.gmra.mxu3 %v19693_v14  ;;  %v12239_v40 = vld [vmem:[#allocation17 + $0x4c0] sm:$0xf]  ;;  %v14710_v14 = vld [vmem:[#allocation17 + $0xa8c] sm:$0xf0] }
 0x3d7   : > { %v5420_v46 = vmul.f32 %v4541_v3, %v19912_v13  ;;  %v4556_v4 = vsel %vm4553_vm3, %v4555_v33, %v4551_v12  ;;  %v4666_v30 = vmul.f32 %v20065_v26, %v4665_v60  ;;  %v11590_v32 = vmul.f32 -1.442695, %v20082_v21  ;;  %v14526_v60 = vld [vmem:[#allocation17 + $0x4cc] sm:$0xf0] }
 0x3d8   : > { %v5421_v15 = vmul.f32 %v4556_v4, %v19917_v5  ;;  %v4672_v48 = vand.u32 2147483647, %v20035_v36  ;;  %v4674_v10 = vand.u32 2147483648, %v20035_v36  ;;  %15667 = vrcp.f32 %v20091_v6 }
 0x3d9   : > { %v20114_v42 = vadd.f32 %v20017_v45, %v5420_v46  ;;  %v5428_v44 = vmul.f32 %v4661_v20, %v19737_v9  ;;  %v4667_v13 = vadd.f32 %v20065_v26, %v4666_v30  ;;  %vm4669_vm9 = vweird.f32 %v20065_v26 }
 0x3da   : > { %v20119_v31 = vpop.eup %15665  ;;  %v20122_v17 = vadd.f32 %v20019_v62, %v5421_v15  ;;  %v4689_v5 = vand.u32 2147483648, %v20063_v43  ;;  %v20125_v39 = vadd.f32 1.0, %v15664_v53  ;;  %v23069_v34 = vperm.slane %v19604_v51, 4  ;;  %v14562_v62 = vld [vmem:[#allocation17 + $0x5ec] sm:$0xf0] }
 0x3db   : > { %vm4668_vm1 = vweird.f32 %v20035_v36  ;;  %v4679_v9 = vmul.f32 %v20119_v31, %v20063_v43  ;;  %15669 = vpow2.f32 %v11590_v32  ;;  %v20138_v41 = vpack.c.bf16 %v5659_v0, %v5659_v0 }
 0x3dc   : > { %v20130_v45 = vpack.c.bf16 %v23069_v34, %v23069_v34  ;;  %vm20142_vm6 = vmor %vm4668_vm1, %vm4669_vm9  ;;  %vm20146_vm4 = vcmp.eq.f32.partialorder %v4672_v48, 8.507059e+37  ;;  %v4675_v49 = vor.u32 1.1754944e-38, %v4674_v10  ;;  %v4687_v28 = vand.u32 2147483647, %v20063_v43 }
 0x3dd   : > { %23071 = vst [vmem:[#allocation45_spill] sm:$0xff] %v20138_v41  ;;  %15671 = vrcp.f32 %v20125_v39  ;;  %v20153_v51 = vadd.f32 %v19960_v1, %v5428_v44  ;;  %v4671_v0 = vsel %vm20142_vm6, %v20065_v26, %v4667_v13  ;;  %v4680_v47 = vsub.f32 1.0, %v4679_v9  ;;  %v3638_v1 = vpop.f32.mrf.mxu1 }
 0x3de   : > { %23070 = vst [vmem:[#allocation44_spill] sm:$0xff] %v20130_v45  ;;  %vm4683_vm11 = vweird.f32 %v20063_v43  ;;  %v20159_v11 = vpop.eup %15667  ;;  %v20161_v35 = vor.u32 1.1754944e-38, %v4689_v5  ;;  %v12256_v55 = vor.u32 %v14530_v56, %v12255_v58  ;;  %v12384_v22 = vor.u32 %v14562_v62, %v12383_v37  ;;  %v12367_v37 = vld [vmem:[#allocation17 + $0x5c0] sm:$0xf]  ;;  %v14558_v62 = vld [vmem:[#allocation17 + $0x5cc] sm:$0xf0] }
 0x3df   : > { %v20164_v61 = vadd.f32 %v3665_v18, %v19618_v52  ;;  %v4681_v2 = vmul.f32 %v20119_v31, %v4680_v47  ;;  %v4694_v26 = vmul.f32 %v20159_v11, %v20091_v6  ;;  %v4702_v29 = vand.u32 2147483647, %v20091_v6 }
 0x3e0   : > { %v4704_v33 = vand.u32 2147483648, %v20091_v6  ;;  %v4676_v53 = vsel %vm20146_vm4, %v4675_v49, %v4671_v0  ;;  %vm4684_vm14 = vweird.f32 %v20119_v31  ;;  %vm20174_vm13 = vcmp.eq.f32.partialorder %v4687_v28, 8.507059e+37  ;;  %9616 = vmatpush.bf16.msra.mxu0 %v12256_v55  ;;  %9629 = vmatpush.bf16.msra.mxu1 %v12384_v22  ;;  %v12223_v49 = vld [vmem:[#allocation17 + $0x4a0] sm:$0xf]  ;;  %v14522_v28 = vld [vmem:[#allocation17 + $0x4ac] sm:$0xf0] }
 0x3e1   : > { %v11591_v12 = vmul.f32 -1.442695, %v20164_v61  ;;  %v20180_v20 = vadd.f32 %v3694_v38, %v19620_v50  ;;  %v15670_v46 = vpop.eup %15669  ;;  %v4682_v4 = vadd.f32 %v20119_v31, %v4681_v2  ;;  %v4695_v30 = vsub.f32 1.0, %v4694_v26  ;;  %vm20206_vm12 = vmor %vm4683_vm11, %vm4684_vm14 }
 0x3e2   : > { %v20184_v32 = vadd.f32 %v3609_v23, %v19588_v59  ;;  %v20187_v15 = vadd.f32 %v3638_v1, %v19602_v24  ;;  %v20189_v10 = vadd.f32 1.0, %v15670_v46  ;;  %v12240_v13 = vor.u32 %v14526_v60, %v12239_v40  ;;  %v12351_v23 = vld [vmem:[#allocation17 + $0x5a0] sm:$0xf]  ;;  %v14554_v1 = vld [vmem:[#allocation17 + $0x5ac] sm:$0xf0]  ;;  %v3667_v40 = vpop.f32.mrf.mxu2 }
 0x3e3   : > { %v15672_v48 = vpop.eup %15671  ;;  %15673 = vpow2.f32 %v11591_v12  ;;  %v11592_v44 = vmul.f32 -1.442695, %v20180_v20  ;;  %v5429_v5 = vmul.f32 %v4676_v53, %v19927_v8  ;;  %v4696_v58 = vmul.f32 %v20159_v11, %v4695_v30 }
 0x3e4   : > { %vm4698_vm7 = vweird.f32 %v20091_v6  ;;  %v4799_v34 = vmul.f32 %v15672_v48, %v20125_v39  ;;  %vm4699_vm8 = vweird.f32 %v20159_v11  ;;  %vm20197_vm10 = vcmp.eq.f32.partialorder %v4702_v29, 8.507059e+37  ;;  %9617 = vmatpush.bf16.msra.mxu0 %v12240_v13 }
 0x3e5   : > { %v4705_v56 = vor.u32 1.1754944e-38, %v4704_v33  ;;  %15675 = vrcp.f32 %v20189_v10  ;;  %v4697_v18 = vadd.f32 %v20159_v11, %v4696_v58  ;;  %vm4803_vm5 = vweird.f32 %v20125_v39  ;;  %vm20225_vm2 = vmor %vm4698_vm7, %vm4699_vm8 }
 0x3e6   : > { %v4800_v54 = vsub.f32 1.0, %v4799_v34  ;;  %v4809_v36 = vand.u32 2147483648, %v20125_v39  ;;  %v4686_v0 = vsel %vm20206_vm12, %v20119_v31, %v4682_v4  ;;  %15677 = vpow2.f32 %v11592_v44  ;;  %v3696_v44 = vpop.f32.mrf.mxu3 }
 0x3e7   : > { %v11599_v43 = vmul.f32 -1.442695, %v20184_v32  ;;  %v11600_v47 = vmul.f32 -1.442695, %v20187_v15  ;;  %v20219_v38 = vadd.f32 %v20094_v7, %v5429_v5  ;;  %vm4804_vm3 = vweird.f32 %v15672_v48 }
 0x3e8   : > { %v4801_v22 = vmul.f32 %v15672_v48, %v4800_v54  ;;  %v4807_v31 = vand.u32 2147483647, %v20125_v39  ;;  %v4701_v7 = vsel %vm20225_vm2, %v20159_v11, %v4697_v18  ;;  %v12368_v26 = vor.u32 %v14558_v62, %v12367_v37  ;;  %vm4805_vm9 = vmor %vm4803_vm5, %vm4804_vm3  ;;  %v3612_v18 = vpop.f32.mrf.mxu0 }
 0x3e9   : > { %v15674_v2 = vpop.eup %15673  ;;  %15679 = vpow2.f32 %v11599_v43  ;;  %v12224_v29 = vor.u32 %v14522_v28, %v12223_v49  ;;  %v4691_v6 = vsel %vm20174_vm13, %v20161_v35, %v4686_v0  ;;  %v4810_v12 = vor.u32 1.1754944e-38, %v4809_v36 }
 0x3ea   : > { %v4802_v33 = vadd.f32 %v15672_v48, %v4801_v22  ;;  %v20236_v60 = vadd.f32 1.0, %v15674_v2  ;;  %15681 = vpow2.f32 %v11600_v47  ;;  %v4822_v46 = vand.u32 2147483647, %v20189_v10  ;;  %9630 = vmatpush.bf16.msra.mxu1 %v12368_v26 }
 0x3eb   : > { %v15676_v53 = vpop.eup %15675  ;;  %9618 = vmatpush.bf16.msra.mxu0 %v12224_v29  ;;  %v12352_v11 = vor.u32 %v14554_v1, %v12351_v23  ;;  %v20243_v4 = vadd.f32 %v3667_v40, %v19618_v52  ;;  %v4706_v35 = vsel %vm20197_vm10, %v4705_v56, %v4701_v7  ;;  %vm4808_vm1 = vcmp.eq.f32.partialorder %v4807_v31, 8.507059e+37 }
 0x3ec   : > { %v4806_v3 = vsel %vm4805_vm9, %v15672_v48, %v4802_v33  ;;  %v4814_v30 = vmul.f32 %v15676_v53, %v20189_v10  ;;  %v15678_v13 = vpop.eup %15677  ;;  %v5430_v39 = vmul.f32 %v4691_v6, %v19979_v19  ;;  %vm4818_vm6 = vweird.f32 %v20189_v10 }
 0x3ed   : > { %v4811_v5 = vsel %vm4808_vm1, %v4810_v12, %v4806_v3  ;;  %15683 = vrcp.f32 %v20236_v60  ;;  %v4824_v37 = vand.u32 2147483648, %v20189_v10  ;;  %v20253_v9 = vadd.f32 1.0, %v15678_v13 }
 0x3ee   : > { %v5438_v58 = vmul.f32 %v4811_v5, %v20023_v63  ;;  %v4815_v34 = vsub.f32 1.0, %v4814_v30  ;;  %v5431_v56 = vmul.f32 %v4706_v35, %v19991_v16  ;;  %vm20256_vm4 = vcmp.eq.f32.partialorder %v4822_v46, 8.507059e+37  ;;  %9631 = vmatpush.bf16.msra.mxu1 %v12352_v11 }
 0x3ef   : > { %v15680_v48 = vpop.eup %15679  ;;  %v11601_v19 = vmul.f32 -1.442695, %v20243_v4  ;;  %v20262_v8 = vadd.f32 %v3696_v44, %v19620_v50  ;;  %vm4819_vm11 = vweird.f32 %v15676_v53  ;;  %15685 = vrcp.f32 %v20253_v9 }
 0x3f0   : > { %v15682_v63 = vpop.eup %15681  ;;  %v20265_v54 = vadd.f32 %v20153_v51, %v5438_v58  ;;  %v4816_v36 = vmul.f32 %v15676_v53, %v4815_v34  ;;  %v20269_v16 = vadd.f32 %v20114_v42, %v5430_v39  ;;  %v4837_v49 = vand.u32 2147483647, %v20236_v60  ;;  %vm4820_vm14 = vmor %vm4818_vm6, %vm4819_vm11 }
 0x3f1   : > { %v4839_v28 = vand.u32 2147483648, %v20236_v60  ;;  %v20273_v0 = vadd.f32 1.0, %v15680_v48  ;;  %v20275_v47 = vadd.f32 1.0, %v15682_v63  ;;  %15687 = vpow2.f32 %v11601_v19  ;;  %v12207_v48 = vld [vmem:[#allocation17 + $0x480] sm:$0xf] }
 0x3f2   : > { %v4817_v43 = vadd.f32 %v15676_v53, %v4816_v36  ;;  %v20278_v51 = vadd.f32 %v3612_v18, %v19588_v59  ;;  %v20281_v22 = vadd.f32 %v20122_v17, %v5431_v56  ;;  %v4825_v42 = vor.u32 1.1754944e-38, %v4824_v37  ;;  %v14518_v36 = vld [vmem:[#allocation17 + $0x48c] sm:$0xf0] }
 0x3f3   : > { %v15684_v55 = vpop.eup %15683  ;;  %v4852_v31 = vand.u32 2147483647, %v20253_v9  ;;  %15689 = vrcp.f32 %v20273_v0  ;;  %vm4833_vm13 = vweird.f32 %v20236_v60  ;;  %v11602_v40 = vmul.f32 -1.442695, %v20262_v8 }
 0x3f4   : > { %v4821_v23 = vsel %vm4820_vm14, %v15676_v53, %v4817_v43  ;;  %v4829_v1 = vmul.f32 %v15684_v55, %v20236_v60  ;;  %vm20292_vm7 = vcmp.eq.f32.partialorder %v4837_v49, 8.507059e+37  ;;  %v4854_v10 = vand.u32 2147483648, %v20253_v9 }
 0x3f5   : > { %v4826_v2 = vsel %vm20256_vm4, %v4825_v42, %v4821_v23  ;;  %15691 = vrcp.f32 %v20275_v47  ;;  %v15686_v7 = vpop.eup %15685  ;;  %v4840_v6 = vor.u32 1.1754944e-38, %v4839_v28  ;;  %v11609_v33 = vmul.f32 -1.442695, %v20278_v51 }
 0x3f6   : > { %v5439_v26 = vmul.f32 %v4826_v2, %v20082_v21  ;;  %v4830_v29 = vsub.f32 1.0, %v4829_v1  ;;  %vm4834_vm8 = vweird.f32 %v15684_v55  ;;  %v4844_v53 = vmul.f32 %v15686_v7, %v20253_v9 }
 0x3f7   : > { %vm4848_vm10 = vweird.f32 %v20253_v9  ;;  %vm20302_vm12 = vcmp.eq.f32.partialorder %v4852_v31, 8.507059e+37  ;;  %v15688_v46 = vpop.eup %15687  ;;  %v4957_v21 = vand.u32 2147483647, %v20273_v0  ;;  %15693 = vpow2.f32 %v11602_v40  ;;  %vm4835_vm2 = vmor %vm4833_vm13, %vm4834_vm8 }
 0x3f8   : > { %v20307_v11 = vadd.f32 %v20219_v38, %v5439_v26  ;;  %v4831_v35 = vmul.f32 %v15684_v55, %v4830_v29  ;;  %v4845_v30 = vsub.f32 1.0, %v4844_v53  ;;  %v4855_v44 = vor.u32 1.1754944e-38, %v4854_v10  ;;  %v3641_v38 = vpop.f32.mrf.mxu1 }
 0x3f9   : > { %v20310_v3 = vpop.eup %15689  ;;  %vm4953_vm5 = vweird.f32 %v20273_v0  ;;  %v20313_v13 = vadd.f32 1.0, %v15688_v46  ;;  %v4959_v58 = vand.u32 2147483648, %v20273_v0  ;;  %15695 = vpow2.f32 %v11609_v33 }
 0x3fa   : > { %v4832_v39 = vadd.f32 %v15684_v55, %v4831_v35  ;;  %v4949_v5 = vmul.f32 %v20310_v3, %v20273_v0  ;;  %v4846_v37 = vmul.f32 %v15686_v7, %v4845_v30  ;;  %vm4849_vm3 = vweird.f32 %v15686_v7  ;;  %v12335_v0 = vld [vmem:[#allocation17 + $0x580] sm:$0xf]  ;;  %v14550_v35 = vld [vmem:[#allocation17 + $0x58c] sm:$0xf0] }
 0x3fb   : > { %v15692_v34 = vpop.eup %15691  ;;  %vm4968_vm9 = vweird.f32 %v20275_v47  ;;  %15697 = vrcp.f32 %v20313_v13  ;;  %vm20323_vm1 = vcmp.eq.f32.partialorder %v4957_v21, 8.507059e+37  ;;  %v4972_v63 = vand.u32 2147483647, %v20275_v47  ;;  %vm4850_vm6 = vmor %vm4848_vm10, %vm4849_vm3 }
 0x3fc   : > { %v4836_v56 = vsel %vm4835_vm2, %v15684_v55, %v4832_v39  ;;  %v4950_v62 = vsub.f32 1.0, %v4949_v5  ;;  %v4964_v18 = vmul.f32 %v15692_v34, %v20275_v47  ;;  %v4847_v49 = vadd.f32 %v15686_v7, %v4846_v37  ;;  %v12191_v39 = vld [vmem:[#allocation17 + $0x460] sm:$0xf] }
 0x3fd   : > { %v4841_v60 = vsel %vm20292_vm7, %v4840_v6, %v4836_v56  ;;  %v4974_v28 = vand.u32 2147483648, %v20275_v47  ;;  %v20333_v43 = vadd.f32 %v3641_v38, %v19602_v24  ;;  %v15694_v55 = vpop.eup %15693  ;;  %vm4954_vm4 = vweird.f32 %v20310_v3 }
 0x3fe   : > { %v5440_v42 = vmul.f32 %v4841_v60, %v20164_v61  ;;  %v4951_v31 = vmul.f32 %v20310_v3, %v4950_v62  ;;  %v4965_v23 = vsub.f32 1.0, %v4964_v18  ;;  %v4851_v1 = vsel %vm4850_vm6, %v15686_v7, %v4847_v49  ;;  %vm20354_vm14 = vmor %vm4953_vm5, %vm4954_vm4 }
 0x3ff   : > { %vm4969_vm11 = vweird.f32 %v15692_v34  ;;  %v20341_v40 = vadd.f32 1.0, %v15694_v55  ;;  %v12208_v2 = vor.u32 %v14518_v36, %v12207_v48  ;;  %v15696_v17 = vpop.eup %15695  ;;  %v4856_v61 = vsel %vm20302_vm12, %v4855_v44, %v4851_v1  ;;  %v14514_v48 = vld [vmem:[#allocation17 + $0x46c] sm:$0xf0]  ;;  %v3670_v36 = vpop.f32.mrf.mxu2 }
 0x400   : > { %v20344_v10 = vadd.f32 %v20269_v16, %v5440_v42  ;;  %v4952_v9 = vadd.f32 %v20310_v3, %v4951_v31  ;;  %v4966_v26 = vmul.f32 %v15692_v34, %v4965_v23  ;;  %v5441_v6 = vmul.f32 %v4856_v61, %v20180_v20  ;;  %vm4970_vm7 = vmor %vm4968_vm9, %vm4969_vm11  ;;  %v3699_v55 = vpop.f32.mrf.mxu3  ;;  %v3614_v42 = vpop.f32.mrf.mxu0 }
 0x401   : > { %v20349_v29 = vpop.eup %15697  ;;  %v4960_v33 = vor.u32 1.1754944e-38, %v4959_v58  ;;  %15699 = vrcp.f32 %v20341_v40  ;;  %v11610_v16 = vmul.f32 -1.442695, %v20333_v43  ;;  %9619 = vmatpush.bf16.msra.mxu0 %v12208_v2  ;;  %vm20363_vm13 = vcmp.eq.f32.partialorder %v4972_v63, 8.507059e+37  ;;  %v14546_v63 = vld [vmem:[#allocation17 + $0x56c] sm:$0xf0] }
 0x402   : > { %v4956_v53 = vsel %vm20354_vm14, %v20310_v3, %v4952_v9  ;;  %v4967_v12 = vadd.f32 %v15692_v34, %v4966_v26  ;;  %v4979_v20 = vmul.f32 %v20349_v29, %v20313_v13  ;;  %v20370_v21 = vadd.f32 %v20281_v22, %v5441_v6  ;;  %v12175_v2 = vld [vmem:[#allocation17 + $0x440] sm:$0xf] }
 0x403   : > { %v4975_v30 = vor.u32 1.1754944e-38, %v4974_v28  ;;  %v4987_v3 = vand.u32 2147483647, %v20313_v13  ;;  %v4989_v44 = vand.u32 2147483648, %v20313_v13  ;;  %v5002_v38 = vand.u32 2147483647, %v20341_v40 }
 0x404   : > { %v4971_v5 = vsel %vm4970_vm7, %v15692_v34, %v4967_v12  ;;  %v4980_v58 = vsub.f32 1.0, %v4979_v20  ;;  %v20378_v37 = vadd.f32 1.0, %v15696_v17  ;;  %v4961_v22 = vsel %vm20323_vm1, %v4960_v33, %v4956_v53  ;;  %v12319_v34 = vld [vmem:[#allocation17 + $0x560] sm:$0xf] }
 0x405   : > { %v5004_v56 = vand.u32 2147483648, %v20341_v40  ;;  %15701 = vpow2.f32 %v11610_v16  ;;  %v12336_v47 = vor.u32 %v14550_v35, %v12335_v0  ;;  %v4976_v62 = vsel %vm20363_vm13, %v4975_v30, %v4971_v5 }
 0x406   : > { %v4981_v18 = vmul.f32 %v20349_v29, %v4980_v58  ;;  %vm4984_vm8 = vweird.f32 %v20349_v29  ;;  %15703 = vrcp.f32 %v20378_v37  ;;  %vm4983_vm10 = vweird.f32 %v20313_v13  ;;  %v14510_v13 = vld [vmem:[#allocation17 + $0x44c] sm:$0xf0] }
 0x407   : > { %v20388_v60 = vpop.eup %15699  ;;  %vm20391_vm12 = vcmp.eq.f32.partialorder %v4987_v3, 8.507059e+37  ;;  %v4990_v49 = vor.u32 1.1754944e-38, %v4989_v44  ;;  %9632 = vmatpush.bf16.msra.mxu1 %v12336_v47  ;;  %v12192_v28 = vor.u32 %v14514_v48, %v12191_v39  ;;  %v5448_v31 = vmul.f32 %v4961_v22, %v20184_v32  ;;  %vm4985_vm2 = vmor %vm4983_vm10, %vm4984_vm8  ;;  %v3643_v32 = vpop.f32.mrf.mxu1  ;;  %v12303_v3 = vld [vmem:[#allocation17 + $0x540] sm:$0xf]  ;;  %v14542_v58 = vld [vmem:[#allocation17 + $0x54c] sm:$0xf0] }
 0x408   : > { %v4982_v23 = vadd.f32 %v20349_v29, %v4981_v18  ;;  %v4994_v1 = vmul.f32 %v20388_v60, %v20341_v40  ;;  %vm4998_vm5 = vweird.f32 %v20341_v40  ;;  %v5449_v17 = vmul.f32 %v4976_v62, %v20187_v15  ;;  %v3672_v19 = vpop.f32.mrf.mxu2 }
 0x409   : > { %v5005_v61 = vor.u32 1.1754944e-38, %v5004_v56  ;;  %9620 = vmatpush.bf16.msra.mxu0 %v12192_v28  ;;  %v12320_v9 = vor.u32 %v14546_v63, %v12319_v34  ;;  %v20404_v26 = vadd.f32 %v3670_v36, %v19618_v52  ;;  %vm20407_vm3 = vcmp.eq.f32.partialorder %v5002_v38, 8.507059e+37  ;;  %v14506_v56 = vld [vmem:[#allocation17 + $0x42c] sm:$0xf0] }
 0x40a   : > { %v4986_v6 = vsel %vm4985_vm2, %v20349_v29, %v4982_v23  ;;  %v4995_v7 = vsub.f32 1.0, %v4994_v1  ;;  %v20412_v16 = vadd.f32 %v3699_v55, %v19620_v50  ;;  %v20415_v15 = vadd.f32 %v3614_v42, %v19588_v59  ;;  %v14538_v34 = vld [vmem:[#allocation17 + $0x52c] sm:$0xf0]  ;;  %v3701_v55 = vpop.f32.mrf.mxu3  ;;  %v12143_v42 = vld [vmem:[#allocation17 + $0x400] sm:$0xf] }
 0x40b   : > { %v15702_v53 = vpop.eup %15701  ;;  %v4991_v12 = vsel %vm20391_vm12, %v4990_v49, %v4986_v6  ;;  %vm4999_vm9 = vweird.f32 %v20388_v60  ;;  %9633 = vmatpush.bf16.msra.mxu1 %v12320_v9  ;;  %v11611_v29 = vmul.f32 -1.442695, %v20404_v26  ;;  %v12176_v46 = vor.u32 %v14510_v13, %v12175_v2 }
 0x40c   : > { %v20421_v20 = vpop.eup %15703  ;;  %v4996_v0 = vmul.f32 %v20388_v60, %v4995_v7  ;;  %v20424_v35 = vadd.f32 1.0, %v15702_v53  ;;  %v11612_v30 = vmul.f32 -1.442695, %v20412_v16  ;;  %v20428_v59 = vadd.f32 %v3643_v32, %v19602_v24  ;;  %v12159_v24 = vld [vmem:[#allocation17 + $0x420] sm:$0xf]  ;;  %vm20443_vm1 = vmor %vm4998_vm5, %vm4999_vm9 }
 0x40d   : > { %v5099_v44 = vmul.f32 %v20421_v20, %v20378_v37  ;;  %v5107_v39 = vand.u32 2147483647, %v20378_v37  ;;  %15705 = vpow2.f32 %v11611_v29  ;;  %v11619_v5 = vmul.f32 -1.442695, %v20415_v15  ;;  %9621 = vmatpush.bf16.msra.mxu0 %v12176_v46 }
 0x40e   : > { %v5450_v38 = vmul.f32 %v4991_v12, %v20243_v4  ;;  %v4997_v48 = vadd.f32 %v20388_v60, %v4996_v0  ;;  %v5109_v22 = vand.u32 2147483648, %v20378_v37  ;;  %15707 = vrcp.f32 %v20424_v35  ;;  %v12287_v4 = vld [vmem:[#allocation17 + $0x520] sm:$0xf] }
 0x40f   : > { %v5484_v47 = vadd.f32 %v20265_v54, %v5448_v31  ;;  %v5100_v18 = vsub.f32 1.0, %v5099_v44  ;;  %vm5103_vm6 = vweird.f32 %v20378_v37  ;;  %15709 = vpow2.f32 %v11612_v30  ;;  %v14502_v31 = vld [vmem:[#allocation17 + $0x40c] sm:$0xf0] }
 0x410   : > { %v5001_v63 = vsel %vm20443_vm1, %v20388_v60, %v4997_v48  ;;  %15711 = vpow2.f32 %v11619_v5  ;;  %v11620_v54 = vmul.f32 -1.442695, %v20428_v59  ;;  %v12304_v36 = vor.u32 %v14542_v58, %v12303_v3 }
 0x411   : > { %v20453_v40 = vadd.f32 %v20307_v11, %v5449_v17  ;;  %v5101_v49 = vmul.f32 %v20421_v20, %v5100_v18  ;;  %vm5104_vm4 = vweird.f32 %v20421_v20  ;;  %vm20457_vm11 = vcmp.eq.f32.partialorder %v5107_v39, 8.507059e+37 }
 0x412   : > { %v20462_v60 = vadd.f32 %v20344_v10, %v5450_v38  ;;  %v5110_v23 = vor.u32 1.1754944e-38, %v5109_v22  ;;  %9634 = vmatpush.bf16.msra.mxu1 %v12304_v36  ;;  %v12160_v1 = vor.u32 %v14506_v56, %v12159_v24  ;;  %v12288_v2 = vor.u32 %v14538_v34, %v12287_v4  ;;  %vm5105_vm14 = vmor %vm5103_vm6, %vm5104_vm4  ;;  %v20505_v22 = vld [vmem:[#allocation15] sm:$0xff] }
 0x413   : > { %v15706_v11 = vpop.eup %15705  ;;  %v5006_v13 = vsel %vm20407_vm3, %v5005_v61, %v5001_v63  ;;  %v5102_v17 = vadd.f32 %v20421_v20, %v5101_v49  ;;  %15713 = vpow2.f32 %v11620_v54  ;;  %v20468_v9 = vadd.f32 %v3672_v19, %v19618_v52 }
 0x414   : > { %v15708_v32 = vpop.eup %15707  ;;  %vm5118_vm13 = vweird.f32 %v20424_v35  ;;  %v20475_v10 = vadd.f32 1.0, %v15706_v11  ;;  %9622 = vmatpush.bf16.msra.mxu0 %v12160_v1  ;;  %v20478_v6 = vadd.f32 %v3701_v55, %v19620_v50  ;;  %v12144_v61 = vor.u32 %v14502_v31, %v12143_v42 }
 0x415   : > { %v15710_v7 = vpop.eup %15709  ;;  %v5106_v33 = vsel %vm5105_vm14, %v20421_v20, %v5102_v17  ;;  %v5114_v52 = vmul.f32 %v15708_v32, %v20424_v35  ;;  %v5122_v53 = vand.u32 2147483647, %v20424_v35  ;;  %v11621_v12 = vmul.f32 -1.442695, %v20468_v9 }
 0x416   : > { %v15712_v37 = vpop.eup %15711  ;;  %v5451_v29 = vmul.f32 %v5006_v13, %v20262_v8  ;;  %v5111_v46 = vsel %vm20457_vm11, %v5110_v23, %v5106_v33  ;;  %v5124_v0 = vand.u32 2147483648, %v20424_v35  ;;  %15715 = vrcp.f32 %v20475_v10  ;;  %9635 = vmatpush.bf16.msra.mxu1 %v12288_v2 }
 0x417   : > { %v5458_v50 = vmul.f32 %v5111_v46, %v20278_v51  ;;  %v5115_v20 = vsub.f32 1.0, %v5114_v52  ;;  %vm5119_vm7 = vweird.f32 %v15708_v32  ;;  %v20490_v30 = vadd.f32 1.0, %v15710_v7  ;;  %v3713_v52 = vpop.f32.mrf.mxu0 }
 0x418   : > { %v5137_v3 = vand.u32 2147483647, %v20475_v10  ;;  %v20493_v44 = vadd.f32 1.0, %v15712_v37  ;;  %15717 = vpow2.f32 %v11621_v12  ;;  %v11622_v8 = vmul.f32 -1.442695, %v20478_v6  ;;  %9623 = vmatpush.bf16.msra.mxu0 %v12144_v61  ;;  %vm5120_vm10 = vmor %vm5118_vm13, %vm5119_vm7 }
 0x419   : > { %v15714_v39 = vpop.eup %15713  ;;  %v20496_v5 = vadd.f32 %v5484_v47, %v5458_v50  ;;  %v5116_v58 = vmul.f32 %v15708_v32, %v5115_v20  ;;  %v5139_v38 = vand.u32 2147483648, %v20475_v10  ;;  %15719 = vrcp.f32 %v20490_v30 }
 0x41a   : > { %vm20500_vm8 = vcmp.eq.f32.partialorder %v5122_v53, 8.507059e+37  ;;  %v5125_v48 = vor.u32 1.1754944e-38, %v5124_v0  ;;  %15721 = vrcp.f32 %v20493_v44  ;;  %v20508_v24 = vperm.slane %v20505_v22, 4 }
 0x41b   : > { %v20511_v56 = vadd.f32 %v20370_v21, %v5451_v29  ;;  %v5117_v47 = vadd.f32 %v15708_v32, %v5116_v58  ;;  %v5154_v62 = vand.u32 2147483648, %v20490_v30  ;;  %v20515_v18 = vperm.slane %v20505_v22, 5  ;;  %9624 = vmatmul.bf16.vlgmr.msra.gmra.mxu0 %v20130_v45 }
 0x41c   : > { %v15716_v4 = vpop.eup %15715  ;;  %vm5133_vm12 = vweird.f32 %v20475_v10  ;;  %v5152_v34 = vand.u32 2147483647, %v20490_v30  ;;  %v20523_v63 = vadd.f32 1.0, %v15714_v39  ;;  %15723 = vpow2.f32 %v11622_v8 }
 0x41d   : > { %v5121_v21 = vsel %vm5120_vm10, %v15708_v32, %v5117_v47  ;;  %v5129_v54 = vmul.f32 %v15716_v4, %v20475_v10  ;;  %vm20526_vm5 = vcmp.eq.f32.partialorder %v5137_v3, 8.507059e+37  ;;  %v5140_v19 = vor.u32 1.1754944e-38, %v5139_v38 }
 0x41e   : > { %v15718_v49 = vpop.eup %15717  ;;  %v5126_v35 = vsel %vm20500_vm8, %v5125_v48, %v5121_v21  ;;  %vm5148_vm2 = vweird.f32 %v20490_v30  ;;  %v5257_v28 = vand.u32 2147483647, %v20493_v44  ;;  %v5259_v55 = vand.u32 2147483648, %v20493_v44 }
 0x41f   : > { %15725 = vrcp.f32 %v20523_v63  ;;  %v15720_v42 = vpop.eup %15719  ;;  %v5459_v31 = vmul.f32 %v5126_v35, %v20333_v43  ;;  %v5130_v23 = vsub.f32 1.0, %v5129_v54  ;;  %v5155_v1 = vor.u32 1.1754944e-38, %v5154_v62 }
 0x420   : > { %vm5253_vm3 = vweird.f32 %v20493_v44  ;;  %v15722_v2 = vpop.eup %15721  ;;  %vm5134_vm9 = vweird.f32 %v15716_v4  ;;  %v5144_v11 = vmul.f32 %v15720_v42, %v20490_v30  ;;  %vm20539_vm1 = vcmp.eq.f32.partialorder %v5152_v34, 8.507059e+37 }
 0x421   : > { %v5272_v17 = vand.u32 2147483647, %v20523_v63  ;;  %v20544_v32 = vadd.f32 1.0, %v15718_v49  ;;  %v20547_v61 = vadd.f32 %v20453_v40, %v5459_v31  ;;  %v5131_v43 = vmul.f32 %v15716_v4, %v5130_v23  ;;  %vm5135_vm14 = vmor %vm5133_vm12, %vm5134_vm9  ;;  %v12271_v23 = vld [vmem:[#allocation17 + $0x500] sm:$0xf] }
 0x422   : > { %v5249_v7 = vmul.f32 %v15722_v2, %v20493_v44  ;;  %v5274_v33 = vand.u32 2147483648, %v20523_v63  ;;  %v15724_v53 = vpop.eup %15723  ;;  %v5145_v12 = vsub.f32 1.0, %v5144_v11  ;;  %vm20551_vm6 = vcmp.eq.f32.partialorder %v5257_v28, 8.507059e+37  ;;  %v3742_v28 = vpop.f32.mrf.mxu1  ;;  %v14534_v11 = vld [vmem:[#allocation17 + $0x50c] sm:$0xf0] }
 0x423   : > { %v5260_v29 = vor.u32 1.1754944e-38, %v5259_v55  ;;  %15727 = vrcp.f32 %v20544_v32  ;;  %v5132_v46 = vadd.f32 %v15716_v4, %v5131_v43  ;;  %vm5149_vm4 = vweird.f32 %v15720_v42 }
 0x424   : > { %v5250_v0 = vsub.f32 1.0, %v5249_v7  ;;  %vm5268_vm11 = vweird.f32 %v20523_v63  ;;  %v5146_v50 = vmul.f32 %v15720_v42, %v5145_v12  ;;  %vm5254_vm13 = vweird.f32 %v15722_v2  ;;  %vm5150_vm8 = vmor %vm5148_vm2, %vm5149_vm4 }
 0x425   : > { %v15726_v40 = vpop.eup %15725  ;;  %v20560_v20 = vadd.f32 1.0, %v15724_v53  ;;  %v20563_v3 = vadd.f32 %v3713_v52, %v20508_v24  ;;  %v5136_v8 = vsel %vm5135_vm14, %v15716_v4, %v5132_v46  ;;  %vm20566_vm7 = vcmp.eq.f32.partialorder %v5272_v17, 8.507059e+37  ;;  %vm5255_vm10 = vmor %vm5253_vm3, %vm5254_vm13 }
 0x426   : > { %v5251_v39 = vmul.f32 %v15722_v2, %v5250_v0  ;;  %v5264_v58 = vmul.f32 %v15726_v40, %v20523_v63  ;;  %v5275_v51 = vor.u32 1.1754944e-38, %v5274_v33  ;;  %v5141_v10 = vsel %vm20526_vm5, %v5140_v19, %v5136_v8  ;;  %v3715_v8 = vpop.f32.mrf.mxu0 }
 0x427   : > { %v5147_v48 = vadd.f32 %v15720_v42, %v5146_v50  ;;  %v5287_v47 = vand.u32 2147483647, %v20544_v32  ;;  %v5289_v62 = vand.u32 2147483648, %v20544_v32  ;;  %v5460_v34 = vmul.f32 %v5141_v10, %v20404_v26 }
 0x428   : > { %v5252_v4 = vadd.f32 %v15722_v2, %v5251_v39  ;;  %v5265_v21 = vsub.f32 1.0, %v5264_v58  ;;  %15729 = vrcp.f32 %v20560_v20  ;;  %vm5269_vm12 = vweird.f32 %v15726_v40 }
 0x429   : > { %v20579_v54 = vpop.eup %15727  ;;  %v5151_v49 = vsel %vm5150_vm8, %v15720_v42, %v5147_v48  ;;  %vm5283_vm5 = vweird.f32 %v20544_v32  ;;  %v11553_v26 = vmul.f32 -1.442695, %v20563_v3  ;;  %v20587_v36 = vadd.f32 %v20462_v60, %v5460_v34  ;;  %vm5270_vm3 = vmor %vm5268_vm11, %vm5269_vm12 }
 0x42a   : > { %v5156_v30 = vsel %vm20539_vm1, %v5155_v1, %v5151_v49  ;;  %v5256_v19 = vsel %vm5255_vm10, %v15722_v2, %v5252_v4  ;;  %v5266_v35 = vmul.f32 %v15726_v40, %v5265_v21  ;;  %v5279_v42 = vmul.f32 %v20579_v54, %v20544_v32 }
 0x42b   : > { %v5461_v55 = vmul.f32 %v5156_v30, %v20412_v16  ;;  %v5261_v44 = vsel %vm20551_vm6, %v5260_v29, %v5256_v19  ;;  %vm20596_vm2 = vcmp.eq.f32.partialorder %v5287_v47, 8.507059e+37  ;;  %v5290_v60 = vor.u32 1.1754944e-38, %v5289_v62 }
 0x42c   : > { %v5468_v1 = vmul.f32 %v5261_v44, %v20415_v15  ;;  %v5267_v2 = vadd.f32 %v15726_v40, %v5266_v35  ;;  %v5302_v13 = vand.u32 2147483647, %v20560_v20  ;;  %v5304_v16 = vand.u32 2147483648, %v20560_v20  ;;  %v3771_v15 = vpop.f32.mrf.mxu2 }
 0x42d   : > { %v20604_v17 = vadd.f32 %v20511_v56, %v5461_v55  ;;  %v5280_v43 = vsub.f32 1.0, %v5279_v42  ;;  %vm5298_vm9 = vweird.f32 %v20560_v20  ;;  %15731 = vpow2.f32 %v11553_v26 }
 0x42e   : > { %v20611_v7 = vadd.f32 %v3742_v28, %v20515_v18  ;;  %v15730_v33 = vpop.eup %15729  ;;  %v5486_v52 = vadd.f32 %v20496_v5, %v5468_v1  ;;  %v5271_v53 = vsel %vm5270_vm3, %v15726_v40, %v5267_v2  ;;  %v12272_v12 = vor.u32 %v14534_v11, %v12271_v23  ;;  %v3800_v40 = vpop.f32.mrf.mxu3 }
 0x42f   : > { %v20615_v56 = vperm.slane %v20505_v22, 6  ;;  %v5276_v63 = vsel %vm20566_vm7, %v5275_v51, %v5271_v53  ;;  %v5281_v37 = vmul.f32 %v20579_v54, %v5280_v43  ;;  %vm5284_vm1 = vweird.f32 %v20579_v54 }
 0x430   : > { %v5294_v29 = vmul.f32 %v15730_v33, %v20560_v20  ;;  %v5487_v46 = vrot.slane %v5486_v52, 4  ;;  %v5469_v0 = vmul.f32 %v5276_v63, %v20428_v59  ;;  %v11554_v50 = vmul.f32 -1.442695, %v20611_v7  ;;  %9636 = vmatpush.bf16.msra.mxu1 %v12272_v12  ;;  %vm5285_vm4 = vmor %vm5283_vm5, %vm5284_vm1 }
 0x431   : > { %v20625_v5 = vadd.f32 %v3771_v15, %v20615_v56  ;;  %v5282_v39 = vadd.f32 %v20579_v54, %v5281_v37  ;;  %vm5299_vm6 = vweird.f32 %v15730_v33  ;;  %v20629_v38 = vperm.slane %v20505_v22, 7 }
 0x432   : > { %v5295_v58 = vsub.f32 1.0, %v5294_v29  ;;  %v5488_v51 = vadd.f32 %v5487_v46, %v5486_v52  ;;  %v5499_v10 = vadd.f32 %v20547_v61, %v5469_v0  ;;  %15733 = vpow2.f32 %v11554_v50  ;;  %vm5300_vm11 = vmor %vm5298_vm9, %vm5299_vm6 }
 0x433   : > { %v11555_v59 = vmul.f32 -1.442695, %v20625_v5  ;;  %v15732_v48 = vpop.eup %15731  ;;  %v5286_v47 = vsel %vm5285_vm4, %v20579_v54, %v5282_v39  ;;  %9637 = vmatmul.bf16.vlgmr.msra.gmra.mxu1 %v20138_v41  ;;  %v20640_v22 = vadd.f32 %v3800_v40, %v20629_v38  ;;  %v20643_v34 = vadd.f32 %v3715_v8, %v20508_v24  ;;  %v3744_v40 = vpop.f32.mrf.mxu1 }
 0x434   : > { %v5296_v62 = vmul.f32 %v15730_v33, %v5295_v58  ;;  %v5489_v61 = vrot.slane %v5488_v51, 2  ;;  %v5500_v4 = vrot.slane %v5499_v10, 4  ;;  %v5291_v32 = vsel %vm20596_vm2, %v5290_v60, %v5286_v47 }
 0x435   : > { %v20647_v21 = vadd.f32 1.0, %v15732_v48  ;;  %v5470_v49 = vmul.f32 %v5291_v32, %v20468_v9  ;;  %15735 = vpow2.f32 %v11555_v59  ;;  %v11556_v54 = vmul.f32 -1.442695, %v20640_v22 }
 0x436   : > { %v5297_v26 = vadd.f32 %v15730_v33, %v5296_v62  ;;  %v5501_v30 = vadd.f32 %v5500_v4, %v5499_v10  ;;  %v5305_v19 = vor.u32 1.1754944e-38, %v5304_v16  ;;  %vm5303_vm14 = vcmp.eq.f32.partialorder %v5302_v13, 8.507059e+37  ;;  %v3773_v4 = vpop.f32.mrf.mxu2 }
 0x437   : > { %15737 = vrcp.f32 %v20647_v21  ;;  %v5512_v35 = vadd.f32 %v20587_v36, %v5470_v49  ;;  %v5490_v44 = vadd.f32 %v5489_v61, %v5488_v51  ;;  %v11563_v23 = vmul.f32 -1.442695, %v20643_v34 }
 0x438   : > { %v5301_v28 = vsel %vm5300_vm11, %v15730_v33, %v5297_v26  ;;  %v15734_v55 = vpop.eup %15733  ;;  %v5502_v42 = vrot.slane %v5501_v30, 2  ;;  %15739 = vpow2.f32 %v11556_v54  ;;  %v4269_v48 = vand.u32 2147483648, %v20647_v21 }
 0x439   : > { %v5306_v9 = vsel %vm5303_vm14, %v5305_v19, %v5301_v28  ;;  %v5513_v31 = vrot.slane %v5512_v35, 4  ;;  %v20658_v20 = vadd.f32 1.0, %v15734_v55  ;;  %v5491_v13 = vrot.slane %v5490_v44, 1 }
 0x43a   : > { %v5471_v60 = vmul.f32 %v5306_v9, %v20478_v6  ;;  %v5503_v11 = vadd.f32 %v5502_v42, %v5501_v30  ;;  %v4267_v62 = vand.u32 2147483647, %v20647_v21  ;;  %v20685_v54 = vadd.f32 %v3744_v40, %v20515_v18 }
 0x43b   : > { %v15736_v1 = vpop.eup %15735  ;;  %v5514_v2 = vadd.f32 %v5513_v31, %v5512_v35  ;;  %15741 = vrcp.f32 %v20658_v20  ;;  %v4284_v49 = vand.u32 2147483648, %v20658_v20  ;;  %vm4263_vm13 = vweird.f32 %v20647_v21 }
 0x43c   : > { %v5525_v16 = vadd.f32 %v20604_v17, %v5471_v60  ;;  %v5504_v43 = vrot.slane %v5503_v11, 1  ;;  %15743 = vpow2.f32 %v11563_v23  ;;  %v20664_v53 = vadd.f32 1.0, %v15736_v1  ;;  %v3802_v1 = vpop.f32.mrf.mxu3 }
 0x43d   : > { %v20661_v36 = vpop.eup %15737  ;;  %v5515_v15 = vrot.slane %v5514_v2, 2  ;;  %v5492_v17 = vadd.f32 %v5491_v13, %v5490_v44  ;;  %v4270_v44 = vor.u32 1.1754944e-38, %v4269_v48  ;;  %v20695_v42 = vadd.f32 %v3773_v4, %v20615_v56 }
 0x43e   : > { %v5526_v33 = vrot.slane %v5525_v16, 4  ;;  %v15740_v52 = vpop.eup %15739  ;;  %v5505_v6 = vadd.f32 %v5504_v43, %v5503_v11  ;;  %v4259_v37 = vmul.f32 %v20661_v36, %v20647_v21  ;;  %15745 = vrcp.f32 %v20664_v53  ;;  %v3776_v48 = vpop.f32.mrf.mxu2 }
 0x43f   : > { %v5516_v12 = vadd.f32 %v5515_v15, %v5514_v2  ;;  %v20668_v29 = vadd.f32 1.0, %v15740_v52  ;;  %vm20697_vm7 = vcmp.eq.f32.partialorder %v4267_v62, 8.507059e+37  ;;  %vm4264_vm8 = vweird.f32 %v20661_v36  ;;  %v3747_v52 = vpop.f32.mrf.mxu1 }
 0x440   : > { %v5527_v63 = vadd.f32 %v5526_v33, %v5525_v16  ;;  %v5620_v46 = vrot.slane %v5505_v6, 7  ;;  %v4260_v59 = vsub.f32 1.0, %v4259_v37  ;;  %vm4278_vm10 = vweird.f32 %v20658_v20  ;;  %v3718_v33 = vpop.f32.mrf.mxu0  ;;  %vm20726_vm9 = vmor %vm4263_vm13, %vm4264_vm8 }
 0x441   : > { %v5517_v0 = vrot.slane %v5516_v12, 1  ;;  %v20671_v8 = vpop.eup %15741  ;;  %15747 = vrcp.f32 %v20668_v29  ;;  %v4282_v2 = vand.u32 2147483647, %v20658_v20  ;;  %v11564_v16 = vmul.f32 -1.442695, %v20685_v54 }
 0x442   : > { %v5528_v50 = vrot.slane %v5527_v63, 2  ;;  %v5628_v39 = vsel %vm3161_vm0, %v5492_v17, %v5620_v46  ;;  %v15744_v58 = vpop.eup %15743  ;;  %v4274_v61 = vmul.f32 %v20671_v8, %v20658_v20  ;;  %v4261_v35 = vmul.f32 %v20661_v36, %v4260_v59 }
 0x443   : > { %v5518_v51 = vadd.f32 %v5517_v0, %v5516_v12  ;;  %v20682_v26 = vadd.f32 1.0, %v15744_v58  ;;  %vm23118_vm12 = vcmask 1042434   ;;  %v20709_v15 = vor.u32 1.1754944e-38, %v4284_v49 }
 0x444   : > { %v5529_v10 = vadd.f32 %v5528_v50, %v5527_v63  ;;  %v20679_v32 = vpop.eup %15745  ;;  %v4275_v60 = vsub.f32 1.0, %v4274_v61  ;;  %v4262_v43 = vadd.f32 %v20661_v36, %v4261_v35  ;;  %vm4293_vm5 = vweird.f32 %v20664_v53 }
 0x445   : > { %v5621_v30 = vrot.slane %v5518_v51, 6  ;;  %v4289_v28 = vmul.f32 %v20679_v32, %v20664_v53  ;;  %15749 = vrcp.f32 %v20682_v26  ;;  %vm23119_vm2 = vcmask 1041408  }
 0x446   : > { %v5530_v47 = vrot.slane %v5529_v10, 1  ;;  %v4297_v12 = vand.u32 2147483647, %v20664_v53  ;;  %v4299_v63 = vand.u32 2147483648, %v20664_v53  ;;  %v4276_v17 = vmul.f32 %v20671_v8, %v4275_v60 }
 0x447   : > { %v20690_v55 = vpop.eup %15747  ;;  %v4290_v23 = vsub.f32 1.0, %v4289_v28  ;;  %vm4279_vm3 = vweird.f32 %v20671_v8  ;;  %15751 = vpow2.f32 %v11564_v16  ;;  %vm4308_vm1 = vweird.f32 %v20668_v29 }
 0x448   : > { %v5531_v19 = vadd.f32 %v5530_v47, %v5529_v10  ;;  %v4304_v11 = vmul.f32 %v20690_v55, %v20668_v29  ;;  %v11565_v40 = vmul.f32 -1.442695, %v20695_v42  ;;  %v20736_v58 = vadd.f32 %v3718_v33, %v20508_v24  ;;  %vm20771_vm14 = vmor %vm4278_vm10, %vm4279_vm3 }
 0x449   : > { %v4291_v46 = vmul.f32 %v20679_v32, %v4290_v23  ;;  %v20739_v51 = vadd.f32 %v3747_v52, %v20515_v18  ;;  %v4266_v21 = vsel %vm20726_vm9, %v20661_v36, %v4262_v43  ;;  %vm4294_vm6 = vweird.f32 %v20679_v32 }
 0x44a   : > { %v5622_v9 = vrot.slane %v5531_v19, 5  ;;  %v4305_v37 = vsub.f32 1.0, %v4304_v11  ;;  %v4312_v10 = vand.u32 2147483647, %v20668_v29  ;;  %vm20748_vm4 = vcmp.eq.f32.partialorder %v4282_v2, 8.507059e+37  ;;  %v3805_v11 = vpop.f32.mrf.mxu3 }
 0x44b   : > { %v20720_v0 = vpop.eup %15749  ;;  %15753 = vpow2.f32 %v11565_v40  ;;  %v11573_v4 = vmul.f32 -1.442695, %v20736_v58  ;;  %v4277_v36 = vadd.f32 %v20671_v8, %v4276_v17  ;;  %v4292_v49 = vadd.f32 %v20679_v32, %v4291_v46 }
 0x44c   : > { %v5629_v13 = vsel %vm23118_vm12, %v5621_v30, %v5622_v9  ;;  %v4409_v59 = vmul.f32 %v20720_v0, %v20682_v26  ;;  %v4306_v62 = vmul.f32 %v20690_v55, %v4305_v37  ;;  %v11574_v19 = vmul.f32 -1.442695, %v20739_v51 }
 0x44d   : > { %v20713_v6 = vsel %vm23119_vm2, %v5628_v39, %v5629_v13  ;;  %v20733_v39 = vadd.f32 %v3802_v1, %v20629_v38  ;;  %v4271_v35 = vsel %vm20697_vm7, %v4270_v44, %v4266_v21  ;;  %vm20760_vm11 = vcmp.eq.f32.partialorder %v4297_v12, 8.507059e+37  ;;  %v15752_v60 = vpop.eup %15751  ;;  %vm20782_vm7 = vmor %vm4293_vm5, %vm4294_vm6 }
 0x44e   : > { %v4410_v30 = vsub.f32 1.0, %v4409_v59  ;;  %v20765_v9 = vadd.f32 %v3776_v48, %v20615_v56  ;;  %vm4309_vm13 = vweird.f32 %v20690_v55  ;;  %v4314_v44 = vand.u32 2147483648, %v20668_v29  ;;  %v3749_v29 = vpop.f32.mrf.mxu1 }
 0x44f   : > { %v11566_v61 = vmul.f32 -1.442695, %v20733_v39  ;;  %v4307_v20 = vadd.f32 %v20690_v55, %v4306_v62  ;;  %v20787_v2 = vadd.f32 1.0, %v15752_v60  ;;  %v4281_v13 = vsel %vm20771_vm14, %v20671_v8, %v4277_v36  ;;  %v3720_v8 = vpop.f32.mrf.mxu0  ;;  %vm20813_vm12 = vmor %vm4308_vm1, %vm4309_vm13  ;;  %v3778_v60 = vpop.f32.mrf.mxu2 }
 0x450   : > { %v4411_v31 = vmul.f32 %v20720_v0, %v4410_v30  ;;  %v11575_v16 = vmul.f32 -1.442695, %v20765_v9  ;;  %v4296_v43 = vsel %vm20782_vm7, %v20679_v32, %v4292_v49  ;;  %v4300_v53 = vor.u32 1.1754944e-38, %v4299_v63 }
 0x451   : > { %15755 = vpow2.f32 %v11566_v61  ;;  %vm20796_vm8 = vcmp.eq.f32.partialorder %v4312_v10, 8.507059e+37  ;;  %v15754_v52 = vpop.eup %15753  ;;  %vm4414_vm10 = vweird.f32 %v20720_v0  ;;  %v20804_v37 = vadd.f32 %v3805_v11, %v20629_v38 }
 0x452   : > { %15757 = vpow2.f32 %v11573_v4  ;;  %v4412_v12 = vadd.f32 %v20720_v0, %v4411_v31  ;;  %v20807_v17 = vmul.f32 %v4271_v35, %v20563_v3  ;;  %v4315_v63 = vor.u32 1.1754944e-38, %v4314_v44 }
 0x453   : > { %15759 = vpow2.f32 %v11574_v19  ;;  %v4419_v46 = vand.u32 2147483648, %v20682_v26  ;;  %v20818_v50 = vadd.f32 1.0, %v15754_v52  ;;  %v4311_v21 = vsel %vm20813_vm12, %v20690_v55, %v4307_v20 }
 0x454   : > { %15761 = vrcp.f32 %v20787_v2  ;;  %vm4413_vm5 = vweird.f32 %v20682_v26  ;;  %v4417_v3 = vand.u32 2147483647, %v20682_v26  ;;  %v4286_v59 = vsel %vm20748_vm4, %v20709_v15, %v4281_v13 }
 0x455   : > { %15763 = vpow2.f32 %v11575_v16  ;;  %v4301_v48 = vsel %vm20760_vm11, %v4300_v53, %v4296_v43  ;;  %vm20832_vm2 = vmor %vm4413_vm5, %vm4414_vm10  ;;  %v20838_v26 = vadd.f32 %v3720_v8, %v20508_v24  ;;  %v11576_v4 = vmul.f32 -1.442695, %v20804_v37 }
 0x456   : > { %15765 = vrcp.f32 %v20818_v50  ;;  %v4416_v47 = vsel %vm20832_vm2, %v20720_v0, %v4412_v12  ;;  %v4316_v36 = vsel %vm20796_vm8, %v4315_v63, %v4311_v21  ;;  %v4420_v49 = vor.u32 1.1754944e-38, %v4419_v46 }
 0x457   : > { %v15756_v40 = vpop.eup %15755  ;;  %v20853_v19 = vadd.f32 %v3749_v29, %v20515_v18  ;;  %v20858_v28 = vmul.f32 %v4286_v59, %v20611_v7  ;;  %v20861_v0 = vmul.f32 %v4301_v48, %v20625_v5  ;;  %vm4418_vm3 = vcmp.eq.f32.partialorder %v4417_v3, 8.507059e+37 }
 0x458   : > { %v15758_v10 = vpop.eup %15757  ;;  %v20843_v15 = vadd.f32 1.0, %v15756_v40  ;;  %v4421_v23 = vsel %vm4418_vm3, %v4420_v49, %v4416_v47  ;;  %v11583_v31 = vmul.f32 -1.442695, %v20838_v26  ;;  %v20869_v1 = vmul.f32 %v4316_v36, %v20640_v22 }
 0x459   : > { %v15760_v55 = vpop.eup %15759  ;;  %v20845_v61 = vadd.f32 1.0, %v15758_v10  ;;  %v4432_v7 = vand.u32 2147483647, %v20787_v2  ;;  %v4434_v5 = vand.u32 2147483648, %v20787_v2  ;;  %v11584_v13 = vmul.f32 -1.442695, %v20853_v19 }
 0x45a   : > { %v20850_v30 = vadd.f32 1.0, %v15760_v55  ;;  %v20855_v35 = vpop.eup %15761  ;;  %15767 = vrcp.f32 %v20843_v15  ;;  %v20878_v43 = vadd.f32 %v3778_v60, %v20615_v56  ;;  %v5412_v53 = vmul.f32 %v4421_v23, %v20643_v34 }
 0x45b   : > { %v4424_v44 = vmul.f32 %v20855_v35, %v20787_v2  ;;  %15769 = vrcp.f32 %v20845_v61  ;;  %v15764_v11 = vpop.eup %15763  ;;  %vm4428_vm9 = vweird.f32 %v20787_v2  ;;  %v4447_v33 = vand.u32 2147483647, %v20818_v50 }
 0x45c   : > { %15771 = vpow2.f32 %v11576_v4  ;;  %v20873_v20 = vpop.eup %15765  ;;  %v4449_v12 = vand.u32 2147483648, %v20818_v50  ;;  %v20887_v8 = vadd.f32 1.0, %v15764_v11  ;;  %vm20891_vm1 = vcmp.eq.f32.partialorder %v4432_v7, 8.507059e+37 }
 0x45d   : > { %v4425_v16 = vsub.f32 1.0, %v4424_v44  ;;  %15773 = vrcp.f32 %v20850_v30  ;;  %v4439_v22 = vmul.f32 %v20873_v20, %v20818_v50  ;;  %v4435_v34 = vor.u32 1.1754944e-38, %v4434_v5 }
 0x45e   : > { %15775 = vpow2.f32 %v11583_v31  ;;  %vm4443_vm6 = vweird.f32 %v20818_v50  ;;  %vm4429_vm4 = vweird.f32 %v20855_v35  ;;  %v20903_v10 = vadd.f32 %v5412_v53, %v20807_v17 }
 0x45f   : > { %v4426_v52 = vmul.f32 %v20855_v35, %v4425_v16  ;;  %v4440_v46 = vsub.f32 1.0, %v4439_v22  ;;  %15777 = vpow2.f32 %v11584_v13  ;;  %v4462_v48 = vand.u32 2147483647, %v20843_v15  ;;  %vm20919_vm13 = vmor %vm4428_vm9, %vm4429_vm4 }
 0x460   : > { %v20889_v32 = vpop.eup %15767  ;;  %vm20911_vm11 = vcmp.eq.f32.partialorder %v4447_v33, 8.507059e+37  ;;  %v4450_v4 = vor.u32 1.1754944e-38, %v4449_v12  ;;  %vm4458_vm14 = vweird.f32 %v20843_v15  ;;  %15779 = vrcp.f32 %v20887_v8 }
 0x461   : > { %v20896_v40 = vpop.eup %15769  ;;  %v4427_v21 = vadd.f32 %v20855_v35, %v4426_v52  ;;  %v4454_v3 = vmul.f32 %v20889_v32, %v20843_v15  ;;  %v4441_v59 = vmul.f32 %v20873_v20, %v4440_v46  ;;  %vm4444_vm7 = vweird.f32 %v20873_v20 }
 0x462   : > { %v15772_v29 = vpop.eup %15771  ;;  %v4559_v62 = vmul.f32 %v20896_v40, %v20845_v61  ;;  %v4464_v49 = vand.u32 2147483648, %v20843_v15  ;;  %vm20934_vm8 = vcmp.eq.f32.partialorder %v4462_v48, 8.507059e+37  ;;  %vm4563_vm10 = vweird.f32 %v20845_v61  ;;  %vm20950_vm5 = vmor %vm4443_vm6, %vm4444_vm7 }
 0x463   : > { %v20909_v55 = vpop.eup %15773  ;;  %v4455_v36 = vsub.f32 1.0, %v4454_v3  ;;  %v4431_v31 = vsel %vm20919_vm13, %v20855_v35, %v4427_v21  ;;  %v4442_v11 = vadd.f32 %v20873_v20, %v4441_v59  ;;  %v20932_v7 = vadd.f32 1.0, %v15772_v29 }
 0x464   : > { %v4560_v60 = vsub.f32 1.0, %v4559_v62  ;;  %v4574_v23 = vmul.f32 %v20909_v55, %v20850_v30  ;;  %v15776_v44 = vpop.eup %15775  ;;  %vm4459_vm12 = vweird.f32 %v20889_v32  ;;  %v4567_v35 = vand.u32 2147483647, %v20845_v61 }
 0x465   : > { %v4456_v2 = vmul.f32 %v20889_v32, %v4455_v36  ;;  %v15778_v53 = vpop.eup %15777  ;;  %v4569_v33 = vand.u32 2147483648, %v20845_v61  ;;  %v4436_v52 = vsel %vm20891_vm1, %v4435_v34, %v4431_v31  ;;  %v4582_v21 = vand.u32 2147483647, %v20850_v30  ;;  %vm20968_vm3 = vmor %vm4458_vm14, %vm4459_vm12 }
 0x466   : > { %v4561_v16 = vmul.f32 %v20896_v40, %v4560_v60  ;;  %v4575_v13 = vsub.f32 1.0, %v4574_v23  ;;  %v20956_v3 = vadd.f32 1.0, %v15776_v44  ;;  %v20958_v29 = vpop.eup %15779  ;;  %v4446_v63 = vsel %vm20950_vm5, %v20873_v20, %v4442_v11  ;;  %v3807_v23 = vpop.f32.mrf.mxu3 }
 0x467   : > { %v4457_v22 = vadd.f32 %v20889_v32, %v4456_v2  ;;  %vm4564_vm2 = vweird.f32 %v20896_v40  ;;  %15781 = vrcp.f32 %v20932_v7  ;;  %v4465_v59 = vor.u32 1.1754944e-38, %v4464_v49 }
 0x468   : > { %v4576_v46 = vmul.f32 %v20909_v55, %v4575_v13  ;;  %v4562_v34 = vadd.f32 %v20896_v40, %v4561_v16  ;;  %vm4578_vm9 = vweird.f32 %v20850_v30  ;;  %v4584_v48 = vand.u32 2147483648, %v20850_v30  ;;  %vm20987_vm1 = vmor %vm4563_vm10, %vm4564_vm2 }
 0x469   : > { %v20974_v62 = vadd.f32 1.0, %v15778_v53  ;;  %v5413_v20 = vmul.f32 %v4436_v52, %v20685_v54  ;;  %v4461_v36 = vsel %vm20968_vm3, %v20889_v32, %v4457_v22  ;;  %v4589_v15 = vmul.f32 %v20958_v29, %v20887_v8  ;;  %v3723_v22 = vpop.f32.mrf.mxu0 }
 0x46a   : > { %v4599_v17 = vand.u32 2147483648, %v20887_v8  ;;  %v4451_v49 = vsel %vm20911_vm11, %v4450_v4, %v4446_v63  ;;  %vm20991_vm6 = vcmp.eq.f32.partialorder %v4567_v35, 8.507059e+37  ;;  %v4577_v32 = vadd.f32 %v20909_v55, %v4576_v46 }
 0x46b   : > { %vm4579_vm4 = vweird.f32 %v20909_v55  ;;  %v4566_v47 = vsel %vm20987_vm1, %v20896_v40, %v4562_v34  ;;  %v4570_v4 = vor.u32 1.1754944e-38, %v4569_v33  ;;  %vm21000_vm11 = vcmp.eq.f32.partialorder %v4582_v21, 8.507059e+37  ;;  %v3752_v33 = vpop.f32.mrf.mxu1 }
 0x46c   : > { %15783 = vrcp.f32 %v20956_v3  ;;  %v4466_v44 = vsel %vm20934_vm8, %v4465_v59, %v4461_v36  ;;  %v4585_v31 = vor.u32 1.1754944e-38, %v4584_v48  ;;  %v4590_v11 = vsub.f32 1.0, %v4589_v15  ;;  %vm21018_vm14 = vmor %vm4578_vm9, %vm4579_vm4 }
 0x46d   : > { %v4597_v2 = vand.u32 2147483647, %v20887_v8  ;;  %v21008_v16 = vpop.eup %15781  ;;  %v21011_v13 = vadd.f32 %v5413_v20, %v20858_v28  ;;  %v21014_v40 = vmul.f32 %v4451_v49, %v20695_v42  ;;  %v21022_v5 = vor.u32 1.1754944e-38, %v4599_v17 }
 0x46e   : > { %15785 = vrcp.f32 %v20974_v62  ;;  %v4571_v35 = vsel %vm20991_vm6, %v4570_v4, %v4566_v47  ;;  %v4581_v28 = vsel %vm21018_vm14, %v20909_v55, %v4577_v32  ;;  %vm4593_vm13 = vweird.f32 %v20887_v8 }
 0x46f   : > { %v4604_v42 = vmul.f32 %v21008_v16, %v20932_v7  ;;  %v4614_v30 = vand.u32 2147483648, %v20932_v7  ;;  %v21035_v52 = vmul.f32 %v4466_v44, %v20733_v39  ;;  %vm4594_vm7 = vweird.f32 %v20958_v29  ;;  %v3810_v44 = vpop.f32.mrf.mxu3 }
 0x470   : > { %vm4608_vm8 = vweird.f32 %v20932_v7  ;;  %v4612_v12 = vand.u32 2147483647, %v20932_v7  ;;  %v4591_v46 = vmul.f32 %v20958_v29, %v4590_v11  ;;  %v11585_v21 = vmul.f32 -1.442695, %v20878_v43  ;;  %vm21091_vm9 = vmor %vm4593_vm13, %vm4594_vm7 }
 0x471   : > { %v4605_v55 = vsub.f32 1.0, %v4604_v42  ;;  %v21043_v63 = vadd.f32 %v3807_v23, %v20629_v38  ;;  %v21048_v50 = vmul.f32 %v4571_v35, %v20736_v58  ;;  %v4586_v39 = vsel %vm21000_vm11, %v4585_v31, %v4581_v28  ;;  %v3781_v23 = vpop.f32.mrf.mxu2 }
 0x472   : > { %v21045_v34 = vpop.eup %15783  ;;  %v21053_v59 = vadd.f32 %v3723_v22, %v20508_v24  ;;  %v21056_v48 = vadd.f32 %v3752_v33, %v20515_v18  ;;  %v4615_v36 = vor.u32 1.1754944e-38, %v4614_v30  ;;  %vm4713_vm10 = vweird.f32 %v20956_v3  ;;  %v3725_v33 = vpop.f32.mrf.mxu0 }
 0x473   : > { %v4606_v20 = vmul.f32 %v21008_v16, %v4605_v55  ;;  %v4709_v15 = vmul.f32 %v21045_v34, %v20956_v3  ;;  %vm21064_vm12 = vcmp.eq.f32.partialorder %v4597_v2, 8.507059e+37  ;;  %vm21068_vm5 = vcmp.eq.f32.partialorder %v4612_v12, 8.507059e+37 }
 0x474   : > { %v21062_v17 = vpop.eup %15785  ;;  %v4717_v60 = vand.u32 2147483647, %v20956_v3  ;;  %v4719_v54 = vand.u32 2147483648, %v20956_v3  ;;  %15787 = vpow2.f32 %v11585_v21  ;;  %v11586_v32 = vmul.f32 -1.442695, %v21043_v63 }
 0x475   : > { %v4592_v47 = vadd.f32 %v20958_v29, %v4591_v46  ;;  %vm4609_vm2 = vweird.f32 %v21008_v16  ;;  %v4710_v4 = vsub.f32 1.0, %v4709_v15  ;;  %v4724_v61 = vmul.f32 %v21062_v17, %v20974_v62 }
 0x476   : > { %v4607_v31 = vadd.f32 %v21008_v16, %v4606_v20  ;;  %15789 = vpow2.f32 %v11586_v32  ;;  %v11593_v11 = vmul.f32 -1.442695, %v21053_v59  ;;  %v11594_v2 = vmul.f32 -1.442695, %v21056_v48  ;;  %vm21104_vm6 = vmor %vm4608_vm8, %vm4609_vm2 }
 0x477   : > { %v4711_v53 = vmul.f32 %v21045_v34, %v4710_v4  ;;  %v4725_v22 = vsub.f32 1.0, %v4724_v61  ;;  %vm4728_vm3 = vweird.f32 %v20974_v62  ;;  %v21085_v35 = vadd.f32 %v3781_v23, %v20615_v56 }
 0x478   : > { %vm4714_vm1 = vweird.f32 %v21045_v34  ;;  %v4732_v42 = vand.u32 2147483647, %v20974_v62  ;;  %15791 = vpow2.f32 %v11593_v11  ;;  %v21098_v30 = vadd.f32 %v3810_v44, %v20629_v38 }
 0x479   : > { %v4712_v8 = vadd.f32 %v21045_v34, %v4711_v53  ;;  %v4726_v46 = vmul.f32 %v21062_v17, %v4725_v22  ;;  %vm4729_vm4 = vweird.f32 %v21062_v17  ;;  %15793 = vpow2.f32 %v11594_v2  ;;  %vm21123_vm11 = vmor %vm4713_vm10, %vm4714_vm1  ;;  %v3754_v2 = vpop.f32.mrf.mxu1 }
 0x47a   : > { %v15788_v55 = vpop.eup %15787  ;;  %v4596_v21 = vsel %vm21091_vm9, %v20958_v29, %v4592_v47  ;;  %v4611_v7 = vsel %vm21104_vm6, %v21008_v16, %v4607_v31  ;;  %v4734_v20 = vand.u32 2147483648, %v20974_v62  ;;  %v11595_v15 = vmul.f32 -1.442695, %v21085_v35  ;;  %vm21142_vm14 = vmor %vm4728_vm3, %vm4729_vm4 }
 0x47b   : > { %v4727_v23 = vadd.f32 %v21062_v17, %v4726_v46  ;;  %v21128_v4 = vadd.f32 1.0, %v15788_v55  ;;  %v11596_v29 = vmul.f32 -1.442695, %v21098_v30  ;;  %v21132_v16 = vadd.f32 %v3725_v33, %v20508_v24  ;;  %v3783_v46 = vpop.f32.mrf.mxu2 }
 0x47c   : > { %v15790_v47 = vpop.eup %15789  ;;  %v5423_v61 = vmul.f32 %v4586_v39, %v20739_v51  ;;  %v4716_v3 = vsel %vm21123_vm11, %v21045_v34, %v4712_v8  ;;  %v4720_v44 = vor.u32 1.1754944e-38, %v4719_v54  ;;  %15795 = vpow2.f32 %v11595_v15 }
 0x47d   : > { %v4601_v11 = vsel %vm21064_vm12, %v21022_v5, %v4596_v21  ;;  %v4616_v51 = vsel %vm21068_vm5, %v4615_v36, %v4611_v7  ;;  %v4731_v34 = vsel %vm21142_vm14, %v21062_v17, %v4727_v23  ;;  %15797 = vrcp.f32 %v21128_v4 }
 0x47e   : > { %v15792_v39 = vpop.eup %15791  ;;  %vm4718_vm13 = vcmp.eq.f32.partialorder %v4717_v60, 8.507059e+37  ;;  %vm4733_vm7 = vcmp.eq.f32.partialorder %v4732_v42, 8.507059e+37  ;;  %v4735_v62 = vor.u32 1.1754944e-38, %v4734_v20  ;;  %v21155_v54 = vadd.f32 1.0, %v15790_v47  ;;  %v3812_v47 = vpop.f32.mrf.mxu3 }
 0x47f   : > { %v15794_v53 = vpop.eup %15793  ;;  %v4721_v22 = vsel %vm4718_vm13, %v4720_v44, %v4716_v3  ;;  %v21157_v58 = vadd.f32 1.0, %v15792_v39  ;;  %15799 = vpow2.f32 %v11596_v29  ;;  %v11603_v5 = vmul.f32 -1.442695, %v21132_v16 }
 0x480   : > { %v5424_v36 = vmul.f32 %v4601_v11, %v20765_v9  ;;  %v5425_v17 = vmul.f32 %v4616_v51, %v20804_v37  ;;  %v4736_v49 = vsel %vm4733_vm7, %v4735_v62, %v4731_v34  ;;  %15801 = vrcp.f32 %v21155_v54 }
 0x481   : > { %v5558_v60 = vadd.f32 %v21014_v40, %v20861_v0  ;;  %v5571_v28 = vadd.f32 %v21035_v52, %v20869_v1  ;;  %15803 = vrcp.f32 %v21157_v58  ;;  %v21169_v42 = vadd.f32 %v3754_v2, %v20515_v18 }
 0x482   : > { %v15796_v33 = vpop.eup %15795  ;;  %v5533_v9 = vadd.f32 %v20903_v10, %v21048_v50  ;;  %v5432_v37 = vmul.f32 %v4721_v22, %v20838_v26  ;;  %v4747_v12 = vand.u32 2147483647, %v21128_v4  ;;  %v21175_v8 = vadd.f32 1.0, %v15794_v53 }
 0x483   : > { %v21177_v0 = vpop.eup %15797  ;;  %v5433_v1 = vmul.f32 %v4736_v49, %v20853_v19  ;;  %v4749_v40 = vand.u32 2147483648, %v21128_v4  ;;  %v21181_v52 = vadd.f32 1.0, %v15796_v33  ;;  %15805 = vpow2.f32 %v11603_v5 }
 0x484   : > { %v5546_v55 = vadd.f32 %v21011_v13, %v5423_v61  ;;  %v21184_v21 = vadd.f32 %v5558_v60, %v5424_v36  ;;  %v21186_v10 = vadd.f32 %v5571_v28, %v5425_v17  ;;  %v4739_v26 = vmul.f32 %v21177_v0, %v21128_v4 }
 0x485   : > { %v15800_v50 = vpop.eup %15799  ;;  %vm4743_vm8 = vweird.f32 %v21128_v4  ;;  %15807 = vrcp.f32 %v21175_v8  ;;  %v11604_v19 = vmul.f32 -1.442695, %v21169_v42  ;;  %v21194_v7 = vadd.f32 %v3783_v46, %v20615_v56 }
 0x486   : > { %v15802_v20 = vpop.eup %15801  ;;  %v21196_v15 = vadd.f32 %v5533_v9, %v5432_v37  ;;  %v4740_v13 = vsub.f32 1.0, %v4739_v26  ;;  %v4762_v32 = vand.u32 2147483647, %v21155_v54  ;;  %15809 = vrcp.f32 %v21181_v52 }
 0x487   : > { %v15804_v23 = vpop.eup %15803  ;;  %v21200_v29 = vadd.f32 %v5546_v55, %v5433_v1  ;;  %vm21202_vm10 = vcmp.eq.f32.partialorder %v4747_v12, 8.507059e+37  ;;  %v4750_v61 = vor.u32 1.1754944e-38, %v4749_v40  ;;  %v4754_v3 = vmul.f32 %v15802_v20, %v21155_v54  ;;  %v3757_v55 = vpop.f32.mrf.mxu1 }
 0x488   : > { %vm4758_vm12 = vweird.f32 %v21155_v54  ;;  %v4741_v44 = vmul.f32 %v21177_v0, %v4740_v13  ;;  %v4764_v31 = vand.u32 2147483648, %v21155_v54  ;;  %v4859_v11 = vmul.f32 %v15804_v23, %v21157_v58 }
 0x489   : > { %vm4863_vm5 = vweird.f32 %v21157_v58  ;;  %v15806_v51 = vpop.eup %15805  ;;  %vm4744_vm2 = vweird.f32 %v21177_v0  ;;  %v4755_v34 = vsub.f32 1.0, %v4754_v3  ;;  %v4867_v39 = vand.u32 2147483647, %v21157_v58 }
 0x48a   : > { %v21214_v62 = vadd.f32 1.0, %v15800_v50  ;;  %v4742_v2 = vadd.f32 %v21177_v0, %v4741_v44  ;;  %vm21217_vm3 = vcmp.eq.f32.partialorder %v4762_v32, 8.507059e+37  ;;  %v4860_v22 = vsub.f32 1.0, %v4859_v11  ;;  %vm21231_vm1 = vmor %vm4743_vm8, %vm4744_vm2 }
 0x48b   : > { %v4869_v5 = vand.u32 2147483648, %v21157_v58  ;;  %v21222_v36 = vpop.eup %15807  ;;  %v4756_v17 = vmul.f32 %v15802_v20, %v4755_v34  ;;  %vm4759_vm9 = vweird.f32 %v15802_v20  ;;  %v21225_v49 = vadd.f32 1.0, %v15806_v51 }
 0x48c   : > { %15811 = vrcp.f32 %v21214_v62  ;;  %v21227_v60 = vpop.eup %15809  ;;  %v4861_v33 = vmul.f32 %v15804_v23, %v4860_v22  ;;  %vm4864_vm6 = vweird.f32 %v15804_v23  ;;  %v4874_v9 = vmul.f32 %v21222_v36, %v21175_v8  ;;  %vm21244_vm4 = vmor %vm4758_vm12, %vm4759_vm9 }
 0x48d   : > { %15813 = vpow2.f32 %v11604_v19  ;;  %v4746_v37 = vsel %vm21231_vm1, %v21177_v0, %v4742_v2  ;;  %v4757_v12 = vadd.f32 %v15802_v20, %v4756_v17  ;;  %v4765_v46 = vor.u32 1.1754944e-38, %v4764_v31  ;;  %vm21256_vm14 = vmor %vm4863_vm5, %vm4864_vm6 }
 0x48e   : > { %v4889_v1 = vmul.f32 %v21227_v60, %v21181_v52  ;;  %v4862_v40 = vadd.f32 %v15804_v23, %v4861_v33  ;;  %vm21248_vm11 = vcmp.eq.f32.partialorder %v4867_v39, 8.507059e+37  ;;  %v4870_v26 = vor.u32 1.1754944e-38, %v4869_v5 }
 0x48f   : > { %v4875_v50 = vsub.f32 1.0, %v4874_v9  ;;  %v4761_v0 = vsel %vm21244_vm4, %v15802_v20, %v4757_v12  ;;  %v4882_v54 = vand.u32 2147483647, %v21175_v8  ;;  %15815 = vrcp.f32 %v21225_v49 }
 0x490   : > { %v4890_v13 = vsub.f32 1.0, %v4889_v1  ;;  %v4751_v32 = vsel %vm21202_vm10, %v4750_v61, %v4746_v37  ;;  %v4866_v3 = vsel %vm21256_vm14, %v15804_v23, %v4862_v40  ;;  %v4884_v20 = vand.u32 2147483648, %v21175_v8 }
 0x491   : > { %v4876_v44 = vmul.f32 %v21222_v36, %v4875_v50  ;;  %v4766_v31 = vsel %vm21217_vm3, %v4765_v46, %v4761_v0  ;;  %vm4878_vm13 = vweird.f32 %v21175_v8  ;;  %vm4893_vm7 = vweird.f32 %v21181_v52  ;;  %v3728_v46 = vpop.f32.mrf.mxu0 }
 0x492   : > { %v21268_v58 = vpop.eup %15811  ;;  %v4891_v11 = vmul.f32 %v21227_v60, %v4890_v13  ;;  %v4871_v23 = vsel %vm21248_vm11, %v4870_v26, %v4866_v3  ;;  %v4897_v51 = vand.u32 2147483647, %v21181_v52  ;;  %v4899_v34 = vand.u32 2147483648, %v21181_v52 }
 0x493   : > { %v15814_v61 = vpop.eup %15813  ;;  %v4904_v39 = vmul.f32 %v21268_v58, %v21214_v62  ;;  %v5434_v2 = vmul.f32 %v4751_v32, %v20878_v43  ;;  %v4877_v53 = vadd.f32 %v21222_v36, %v4876_v44  ;;  %vm4879_vm8 = vweird.f32 %v21222_v36  ;;  %v3786_v32 = vpop.f32.mrf.mxu2 }
 0x494   : > { %vm21284_vm10 = vcmp.eq.f32.partialorder %v4882_v54, 8.507059e+37  ;;  %v5435_v5 = vmul.f32 %v4766_v31, %v21043_v63  ;;  %v4885_v17 = vor.u32 1.1754944e-38, %v4884_v20  ;;  %v4892_v28 = vadd.f32 %v21227_v60, %v4891_v11  ;;  %vm21299_vm5 = vmor %vm4878_vm13, %vm4879_vm8  ;;  %v3815_v11 = vpop.f32.mrf.mxu3 }
 0x495   : > { %vm4894_vm12 = vweird.f32 %v21227_v60  ;;  %v21291_v33 = vpop.eup %15815  ;;  %v5442_v9 = vmul.f32 %v4871_v23, %v21053_v59  ;;  %v4905_v43 = vsub.f32 1.0, %v4904_v39  ;;  %v4914_v37 = vand.u32 2147483648, %v21214_v62 }
 0x496   : > { %v21295_v12 = vadd.f32 1.0, %v15814_v61  ;;  %vm21303_vm2 = vcmp.eq.f32.partialorder %v4897_v51, 8.507059e+37  ;;  %v4900_v4 = vor.u32 1.1754944e-38, %v4899_v34  ;;  %v5009_v59 = vmul.f32 %v21291_v33, %v21225_v49  ;;  %vm21320_vm3 = vmor %vm4893_vm7, %vm4894_vm12 }
 0x497   : > { %v11605_v40 = vmul.f32 -1.442695, %v21194_v7  ;;  %v21311_v26 = vadd.f32 %v21184_v21, %v5434_v2  ;;  %v4881_v8 = vsel %vm21299_vm5, %v21222_v36, %v4877_v53  ;;  %vm4908_vm9 = vweird.f32 %v21214_v62 }
 0x498   : > { %vm4909_vm1 = vweird.f32 %v21268_v58  ;;  %v4912_v0 = vand.u32 2147483647, %v21214_v62  ;;  %v21328_v21 = vadd.f32 %v21186_v10, %v5435_v5  ;;  %v4896_v36 = vsel %vm21320_vm3, %v21227_v60, %v4892_v28 }
 0x499   : > { %v5010_v19 = vsub.f32 1.0, %v5009_v59  ;;  %15817 = vrcp.f32 %v21295_v12  ;;  %v21335_v52 = vadd.f32 %v21196_v15, %v5442_v9  ;;  %v4906_v54 = vmul.f32 %v21268_v58, %v4905_v43  ;;  %vm21387_vm7 = vmor %vm4908_vm9, %vm4909_vm1 }
 0x49a   : > { %v4915_v13 = vor.u32 1.1754944e-38, %v4914_v37  ;;  %vm5013_vm6 = vweird.f32 %v21225_v49  ;;  %v4886_v10 = vsel %vm21284_vm10, %v4885_v17, %v4881_v8  ;;  %15819 = vpow2.f32 %v11605_v40 }
 0x49b   : > { %v5011_v3 = vmul.f32 %v21291_v33, %v5010_v19  ;;  %v21343_v60 = vadd.f32 %v3812_v47, %v20629_v38  ;;  %v4901_v44 = vsel %vm21303_vm2, %v4900_v4, %v4896_v36  ;;  %vm21347_vm4 = vcmp.eq.f32.partialorder %v4912_v0, 8.507059e+37  ;;  %v3759_v4 = vpop.f32.mrf.mxu1  ;;  %v3788_v19 = vpop.f32.mrf.mxu2 }
 0x49c   : > { %vm5014_vm11 = vweird.f32 %v21291_v33  ;;  %v5017_v20 = vand.u32 2147483647, %v21225_v49  ;;  %v21354_v31 = vadd.f32 %v3728_v46, %v20508_v24  ;;  %v5019_v47 = vand.u32 2147483648, %v21225_v49  ;;  %v3817_v15 = vpop.f32.mrf.mxu3 }
 0x49d   : > { %v5012_v61 = vadd.f32 %v21291_v33, %v5011_v3  ;;  %v11606_v23 = vmul.f32 -1.442695, %v21343_v60  ;;  %v21360_v51 = vadd.f32 %v3757_v55, %v20515_v18  ;;  %v5443_v34 = vmul.f32 %v4886_v10, %v21056_v48  ;;  %vm21371_vm14 = vmor %vm5013_vm6, %vm5014_vm11 }
 0x49e   : > { %v4907_v39 = vadd.f32 %v21268_v58, %v4906_v54  ;;  %v11613_v2 = vmul.f32 -1.442695, %v21354_v31  ;;  %v21366_v53 = vadd.f32 %v3786_v32, %v20615_v56  ;;  %v5444_v5 = vmul.f32 %v4901_v44, %v21085_v35  ;;  %v3730_v35 = vpop.f32.mrf.mxu0 }
 0x49f   : > { %v15818_v22 = vpop.eup %15817  ;;  %15821 = vpow2.f32 %v11606_v23  ;;  %v11614_v28 = vmul.f32 -1.442695, %v21360_v51  ;;  %v21377_v48 = vadd.f32 %v3815_v11, %v20629_v38  ;;  %v5016_v9 = vsel %vm21371_vm14, %v21291_v33, %v5012_v61 }
 0x4a0   : > { %vm5018_vm13 = vcmp.eq.f32.partialorder %v5017_v20, 8.507059e+37  ;;  %v5024_v43 = vmul.f32 %v15818_v22, %v21295_v12  ;;  %15823 = vpow2.f32 %v11613_v2  ;;  %v15820_v49 = vpop.eup %15819  ;;  %v5020_v46 = vor.u32 1.1754944e-38, %v5019_v47 }
 0x4a1   : > { %v5032_v1 = vand.u32 2147483647, %v21295_v12  ;;  %v5034_v63 = vand.u32 2147483648, %v21295_v12  ;;  %v11615_v33 = vmul.f32 -1.442695, %v21366_v53  ;;  %v4911_v59 = vsel %vm21387_vm7, %v21268_v58, %v4907_v39 }
 0x4a2   : > { %v5025_v40 = vsub.f32 1.0, %v5024_v43  ;;  %v21397_v55 = vadd.f32 1.0, %v15820_v49  ;;  %15825 = vpow2.f32 %v11614_v28  ;;  %v5021_v62 = vsel %vm5018_vm13, %v5020_v46, %v5016_v9 }
 0x4a3   : > { %15827 = vpow2.f32 %v11615_v33  ;;  %v11616_v8 = vmul.f32 -1.442695, %v21377_v48  ;;  %v21401_v50 = vadd.f32 %v3730_v35, %v20508_v24  ;;  %vm5029_vm8 = vweird.f32 %v15818_v22 }
 0x4a4   : > { %v5026_v0 = vmul.f32 %v15818_v22, %v5025_v40  ;;  %15829 = vrcp.f32 %v21397_v55  ;;  %v21405_v36 = vadd.f32 %v3759_v4, %v20515_v18  ;;  %v5548_v54 = vadd.f32 %v21200_v29, %v5443_v34 }
 0x4a5   : > { %v15822_v58 = vpop.eup %15821  ;;  %v21409_v32 = vadd.f32 %v21311_v26, %v5444_v5  ;;  %v4916_v10 = vsel %vm21347_vm4, %v4915_v13, %v4911_v59  ;;  %vm5028_vm10 = vweird.f32 %v21295_v12  ;;  %v5452_v3 = vmul.f32 %v5021_v62, %v21132_v16 }
 0x4a6   : > { %v15824_v24 = vpop.eup %15823  ;;  %v5027_v44 = vadd.f32 %v15818_v22, %v5026_v0  ;;  %v5035_v20 = vor.u32 1.1754944e-38, %v5034_v63  ;;  %v21415_v11 = vadd.f32 1.0, %v15822_v58  ;;  %vm5030_vm12 = vmor %vm5028_vm10, %vm5029_vm8  ;;  %15831 = vpow2.f32 %v11616_v8 }
 0x4a7   : > { %v21417_v18 = vadd.f32 1.0, %v15824_v24  ;;  %v11623_v29 = vmul.f32 -1.442695, %v21401_v50  ;;  %v21421_v26 = vadd.f32 %v3788_v19, %v20615_v56  ;;  %vm5033_vm5 = vcmp.eq.f32.partialorder %v5032_v1, 8.507059e+37 }
 0x4a8   : > { %v15826_v13 = vpop.eup %15825  ;;  %v5031_v61 = vsel %vm5030_vm12, %v15818_v22, %v5027_v44  ;;  %15833 = vrcp.f32 %v21415_v11  ;;  %v11624_v16 = vmul.f32 -1.442695, %v21405_v36  ;;  %v5047_v23 = vand.u32 2147483647, %v21397_v55 }
 0x4a9   : > { %v15828_v12 = vpop.eup %15827  ;;  %v5036_v47 = vsel %vm5033_vm5, %v5035_v20, %v5031_v61  ;;  %v5049_v34 = vand.u32 2147483648, %v21397_v55  ;;  %15835 = vrcp.f32 %v21417_v18  ;;  %v21431_v56 = vmul.f32 %v4916_v10, %v21098_v30 }
 0x4aa   : > { %v21428_v39 = vpop.eup %15829  ;;  %v21434_v2 = vadd.f32 %v21335_v52, %v5452_v3  ;;  %vm5043_vm2 = vweird.f32 %v21397_v55  ;;  %v21438_v22 = vadd.f32 %v3817_v15, %v20629_v38  ;;  %v21442_v17 = vadd.f32 1.0, %v15826_v13 }
 0x4ab   : > { %v5039_v5 = vmul.f32 %v21428_v39, %v21397_v55  ;;  %15837 = vpow2.f32 %v11623_v29  ;;  %v11625_v28 = vmul.f32 -1.442695, %v21421_v26  ;;  %v5453_v9 = vmul.f32 %v5036_v47, %v21169_v42  ;;  %v21505_v47 = vpop.f32.mrf.mxu3 }
 0x4ac   : > { %v5064_v30 = vand.u32 2147483648, %v21415_v11  ;;  %v21447_v43 = vadd.f32 1.0, %v15828_v12  ;;  %15839 = vpow2.f32 %v11624_v16  ;;  %v15832_v52 = vpop.eup %15831  ;;  %vm21449_vm3 = vcmp.eq.f32.partialorder %v5047_v23, 8.507059e+37  ;;  %v21503_v12 = vpop.f32.mrf.mxu2 }
 0x4ad   : > { %v5040_v35 = vsub.f32 1.0, %v5039_v5  ;;  %v5050_v49 = vor.u32 1.1754944e-38, %v5049_v34  ;;  %15841 = vrcp.f32 %v21442_v17  ;;  %v5167_v46 = vand.u32 2147483647, %v21417_v18 }
 0x4ae   : > { %v21454_v37 = vpop.eup %15833  ;;  %v5169_v42 = vand.u32 2147483648, %v21417_v18  ;;  %15843 = vrcp.f32 %v21447_v43  ;;  %v21460_v1 = vmul.f32 -1.442695, %v21438_v22  ;;  %vm5044_vm9 = vweird.f32 %v21428_v39 }
 0x4af   : > { %v21462_v63 = vpop.eup %15835  ;;  %v5041_v33 = vmul.f32 %v21428_v39, %v5040_v35  ;;  %v5054_v4 = vmul.f32 %v21454_v37, %v21415_v11  ;;  %vm5058_vm1 = vweird.f32 %v21415_v11  ;;  %v5062_v59 = vand.u32 2147483647, %v21415_v11  ;;  %vm21483_vm4 = vmor %vm5043_vm2, %vm5044_vm9 }
 0x4b0   : > { %v21470_v40 = vadd.f32 %v5548_v54, %v5453_v9  ;;  %v21472_v62 = vor.u32 1.1754944e-38, %v5064_v30  ;;  %v5159_v8 = vmul.f32 %v21462_v63, %v21417_v18  ;;  %vm5163_vm6 = vweird.f32 %v21417_v18 }
 0x4b1   : > { %v15838_v0 = vpop.eup %15837  ;;  %v5042_v19 = vadd.f32 %v21428_v39, %v5041_v33  ;;  %v5055_v58 = vsub.f32 1.0, %v5054_v4  ;;  %v5182_v10 = vand.u32 2147483647, %v21442_v17  ;;  %v21479_v24 = vadd.f32 1.0, %v15832_v52 }
 0x4b2   : > { %v15840_v3 = vpop.eup %15839  ;;  %v5160_v44 = vsub.f32 1.0, %v5159_v8  ;;  %vm21487_vm11 = vcmp.eq.f32.partialorder %v5167_v46, 8.507059e+37  ;;  %v5170_v29 = vor.u32 1.1754944e-38, %v5169_v42  ;;  %vm5178_vm14 = vweird.f32 %v21442_v17 }
 0x4b3   : > { %v5184_v15 = vand.u32 2147483648, %v21442_v17  ;;  %v15842_v13 = vpop.eup %15841  ;;  %v5046_v61 = vsel %vm21483_vm4, %v21428_v39, %v5042_v19  ;;  %v5056_v55 = vmul.f32 %v21454_v37, %v5055_v58  ;;  %vm21497_vm13 = vcmp.eq.f32.partialorder %v5062_v59, 8.507059e+37 }
 0x4b4   : > { %vm5193_vm7 = vweird.f32 %v21447_v43  ;;  %15845 = vrcp.f32 %v21479_v24  ;;  %v15844_v23 = vpop.eup %15843  ;;  %v5161_v34 = vmul.f32 %v21462_v63, %v5160_v44  ;;  %vm5164_vm8 = vweird.f32 %v21462_v63 }
 0x4b5   : > { %v5174_v39 = vmul.f32 %v15842_v13, %v21442_v17  ;;  %v5197_v5 = vand.u32 2147483647, %v21447_v43  ;;  %v5057_v9 = vadd.f32 %v21454_v37, %v5056_v55  ;;  %vm5059_vm10 = vweird.f32 %v21454_v37  ;;  %vm21524_vm5 = vmor %vm5163_vm6, %vm5164_vm8 }
 0x4b6   : > { %vm21513_vm12 = vcmp.eq.f32.partialorder %v5182_v10, 8.507059e+37  ;;  %v5189_v52 = vmul.f32 %v15844_v23, %v21447_v43  ;;  %v5051_v35 = vsel %vm21449_vm3, %v5050_v49, %v5046_v61  ;;  %v5162_v46 = vadd.f32 %v21462_v63, %v5161_v34  ;;  %vm21532_vm2 = vmor %vm5058_vm1, %vm5059_vm10  ;;  %v9575_v34 = vpop.f32.mrf.mxu2 }
 0x4b7   : > { %v5175_v42 = vsub.f32 1.0, %v5174_v39  ;;  %v5199_v33 = vand.u32 2147483648, %v21447_v43  ;;  %v5185_v59 = vor.u32 1.1754944e-38, %v5184_v15  ;;  %v21528_v19 = vadd.f32 1.0, %v15838_v0  ;;  %v3829_v15 = vpop.f32.mrf.mxu0  ;;  %v9588_v39 = vpop.f32.mrf.mxu3 }
 0x4b8   : > { %v5190_v8 = vsub.f32 1.0, %v5189_v52  ;;  %15847 = vpow2.f32 %v11625_v28  ;;  %v5166_v49 = vsel %vm21524_vm5, %v21462_v63, %v5162_v46  ;;  %vm5179_vm3 = vweird.f32 %v15842_v13 }
 0x4b9   : > { %v5176_v18 = vmul.f32 %v15842_v13, %v5175_v42  ;;  %v21539_v58 = vadd.f32 1.0, %v15840_v3  ;;  %v5454_v0 = vmul.f32 %v5051_v35, %v21194_v7  ;;  %v5061_v11 = vsel %vm21532_vm2, %v21454_v37, %v5057_v9  ;;  %vm21557_vm6 = vmor %vm5178_vm14, %vm5179_vm3  ;;  %v3858_v9 = vpop.f32.mrf.mxu1 }
 0x4ba   : > { %v21541_v10 = vpop.eup %15845  ;;  %v5191_v28 = vmul.f32 %v15844_v23, %v5190_v8  ;;  %vm5194_vm9 = vweird.f32 %v15844_v23  ;;  %vm21547_vm1 = vcmp.eq.f32.partialorder %v5197_v5, 8.507059e+37  ;;  %v5200_v63 = vor.u32 1.1754944e-38, %v5199_v33  ;;  %v3453_v33 = vld [vmem:[#allocation15 + $0x8] sm:$0x3] }
 0x4bb   : > { %v5177_v54 = vadd.f32 %v15842_v13, %v5176_v18  ;;  %v5204_v3 = vmul.f32 %v21541_v10, %v21479_v24  ;;  %v5171_v61 = vsel %vm21487_vm11, %v5170_v29, %v5166_v49  ;;  %vm5208_vm4 = vweird.f32 %v21479_v24  ;;  %vm5195_vm11 = vmor %vm5193_vm7, %vm5194_vm9 }
 0x4bc   : > { %v5192_v37 = vadd.f32 %v15844_v23, %v5191_v28  ;;  %v5214_v55 = vand.u32 2147483648, %v21479_v24  ;;  %15849 = vrcp.f32 %v21528_v19  ;;  %v5066_v20 = vsel %vm21497_vm13, %v21472_v62, %v5061_v11 }
 0x4bd   : > { %v5181_v17 = vsel %vm21557_vm6, %v15842_v13, %v5177_v54  ;;  %v5205_v29 = vsub.f32 1.0, %v5204_v3  ;;  %v5212_v5 = vand.u32 2147483647, %v21479_v24  ;;  %v5562_v35 = vadd.f32 %v21409_v32, %v5454_v0 }
 0x4be   : > { %v15848_v52 = vpop.eup %15847  ;;  %v5186_v46 = vsel %vm21513_vm12, %v5185_v59, %v5181_v17  ;;  %v5196_v42 = vsel %vm5195_vm11, %v15844_v23, %v5192_v37  ;;  %15851 = vrcp.f32 %v21539_v58  ;;  %v5462_v62 = vmul.f32 %v5171_v61, %v21354_v31 }
 0x4bf   : > { %v5201_v13 = vsel %vm21547_vm1, %v5200_v63, %v5196_v42  ;;  %v5206_v43 = vmul.f32 %v21541_v10, %v5205_v29  ;;  %v5317_v16 = vand.u32 2147483647, %v21528_v19  ;;  %v21583_v4 = vmul.f32 %v5066_v20, %v21343_v60  ;;  %v3831_v61 = vpop.f32.mrf.mxu0 }
 0x4c0   : > { %v5463_v32 = vmul.f32 %v5186_v46, %v21360_v51  ;;  %v21586_v30 = vor.u32 1.1754944e-38, %v5214_v55  ;;  %v5319_v23 = vand.u32 2147483648, %v21528_v19  ;;  %v5464_v59 = vmul.f32 %v5201_v13, %v21366_v53 }
 0x4c1   : > { %vm5209_vm14 = vweird.f32 %v21541_v10  ;;  %v5332_v31 = vand.u32 2147483647, %v21539_v58  ;;  %v21592_v8 = vadd.f32 1.0, %v15848_v52  ;;  %v21595_v49 = vadd.f32 %v21541_v10, %v5206_v43  ;;  %v3860_v29 = vpop.f32.mrf.mxu1 }
 0x4c2   : > { %v15850_v38 = vpop.eup %15849  ;;  %vm5313_vm13 = vweird.f32 %v21528_v19  ;;  %15853 = vpow2.f32 %v21460_v1  ;;  %v21599_v60 = vperm.slane %v3453_v33, 0  ;;  %v21602_v51 = vadd.f32 %v21434_v2, %v5462_v62  ;;  %v6354_v1 = vld [vmem:[#allocation18] sm:$0xf]  ;;  %vm21621_vm10 = vmor %vm5208_vm4, %vm5209_vm14 }
 0x4c3   : > { %v5309_v53 = vmul.f32 %v15850_v38, %v21528_v19  ;;  %vm21605_vm7 = vcmp.eq.f32.partialorder %v5317_v16, 8.507059e+37  ;;  %v5334_v0 = vand.u32 2147483648, %v21539_v58  ;;  %v21611_v28 = vadd.f32 %v21470_v40, %v5463_v32  ;;  %v12767_v19 = vld [vmem:[#allocation17 + $0x8e0] sm:$0xf] }
 0x4c4   : > { %v15852_v11 = vpop.eup %15851  ;;  %v5320_v54 = vor.u32 1.1754944e-38, %v5319_v23  ;;  %vm5328_vm8 = vweird.f32 %v21539_v58  ;;  %15855 = vrcp.f32 %v21592_v8  ;;  %v21615_v2 = vadd.f32 %v5562_v35, %v5464_v59 }
 0x4c5   : > { %v5310_v63 = vsub.f32 1.0, %v5309_v53  ;;  %v5324_v40 = vmul.f32 %v15852_v11, %v21539_v58  ;;  %vm21626_vm12 = vcmp.eq.f32.partialorder %v5332_v31, 8.507059e+37  ;;  %v5211_v7 = vsel %vm21621_vm10, %v21541_v10, %v21595_v49  ;;  %v13023_v58 = vld [vmem:[#allocation17 + $0xae0] sm:$0xf] }
 0x4c6   : > { %vm5314_vm5 = vweird.f32 %v15850_v38  ;;  %v21635_v37 = vadd.f32 %v3829_v15, %v21599_v60  ;;  %v21637_v55 = vperm.slane %v3453_v33, 1  ;;  %v5335_v20 = vor.u32 1.1754944e-38, %v5334_v0 }
 0x4c7   : > { %v5311_v34 = vmul.f32 %v15850_v38, %v5310_v63  ;;  %v5325_v39 = vsub.f32 1.0, %v5324_v40  ;;  %v9556_v17 = vperm.slane %v6354_v1, 0  ;;  %v5347_v35 = vand.u32 2147483647, %v21592_v8  ;;  %vm5315_vm3 = vmor %vm5313_vm13, %vm5314_vm5 }
 0x4c8   : > { %v15854_v52 = vpop.eup %15853  ;;  %v11557_v46 = vmul.f32 -1.442695, %v21635_v37  ;;  %v21642_v42 = vadd.f32 %v3858_v9, %v21637_v55  ;;  %v21645_v62 = vadd.f32 %v3831_v61, %v21599_v60  ;;  %vm5329_vm2 = vweird.f32 %v15852_v11 }
 0x4c9   : > { %v5312_v15 = vadd.f32 %v15850_v38, %v5311_v34  ;;  %v5326_v13 = vmul.f32 %v15852_v11, %v5325_v39  ;;  %v21647_v43 = vadd.f32 1.0, %v15854_v52  ;;  %v5349_v33 = vand.u32 2147483648, %v21592_v8  ;;  %vm5330_vm6 = vmor %vm5328_vm8, %vm5329_vm2 }
 0x4ca   : > { %v21649_v16 = vpop.eup %15855  ;;  %15857 = vpow2.f32 %v11557_v46  ;;  %v11558_v9 = vmul.f32 -1.442695, %v21642_v42  ;;  %v9574_v32 = vadd.f32 %v21503_v12, %v9556_v17  ;;  %vm21659_vm9 = vcmp.eq.f32.partialorder %v5212_v5, 8.507059e+37  ;;  %v14658_v5 = vld [vmem:[#allocation17 + $0x8ec] sm:$0xf0] }
 0x4cb   : > { %v5316_v59 = vsel %vm5315_vm3, %v15850_v38, %v5312_v15  ;;  %v5327_v31 = vadd.f32 %v15852_v11, %v5326_v13  ;;  %v5339_v53 = vmul.f32 %v21649_v16, %v21592_v8  ;;  %vm5343_vm1 = vweird.f32 %v21592_v8  ;;  %v12895_v38 = vld [vmem:[#allocation17 + $0x9e0] sm:$0xf]  ;;  %v14722_v17 = vld [vmem:[#allocation17 + $0xaec] sm:$0xf0] }
 0x4cc   : > { %v5321_v0 = vsel %vm21605_vm7, %v5320_v54, %v5316_v59  ;;  %15859 = vrcp.f32 %v21647_v43  ;;  %v11567_v24 = vmul.f32 -1.442695, %v21645_v62  ;;  %v21674_v12 = vadd.f32 %v3860_v29, %v21637_v55  ;;  %v14690_v54 = vld [vmem:[#allocation17 + $0x9ec] sm:$0xf0]  ;;  %v13151_v29 = vld [vmem:[#allocation17 + $0xbe0] sm:$0xf]  ;;  %v21697_v59 = vpop.f32.mrf.mxu1 }
 0x4cd   : > { %v5472_v1 = vmul.f32 %v5321_v0, %v21401_v50  ;;  %v5331_v63 = vsel %vm5330_vm6, %v15852_v11, %v5327_v31  ;;  %v5340_v40 = vsub.f32 1.0, %v5339_v53  ;;  %vm21677_vm4 = vcmp.eq.f32.partialorder %v5347_v35, 8.507059e+37  ;;  %v14754_v35 = vld [vmem:[#allocation17 + $0xbec] sm:$0xf0]  ;;  %v12751_v46 = vld [vmem:[#allocation17 + $0x8c0] sm:$0xf] }
 0x4ce   : > { %23220 = vst [vmem:[#allocation46_spill] sm:$0xff] %v21674_v12  ;;  %v5336_v61 = vsel %vm21626_vm12, %v5335_v20, %v5331_v63  ;;  %v5350_v34 = vor.u32 1.1754944e-38, %v5349_v33  ;;  %15861 = vpow2.f32 %v11558_v9  ;;  %v21684_v39 = vadd.f32 %v21505_v47, %v9574_v32  ;;  %v14654_v15 = vld [vmem:[#allocation17 + $0x8cc] sm:$0xf0]  ;;  %v12879_v63 = vld [vmem:[#allocation17 + $0x9c0] sm:$0xf] }
 0x4cf   : > { %v5538_v50 = vadd.f32 %v21602_v51, %v5472_v1  ;;  %v5473_v11 = vmul.f32 %v5336_v61, %v21405_v36  ;;  %v5341_v52 = vmul.f32 %v21649_v16, %v5340_v40  ;;  %vm5344_vm11 = vweird.f32 %v21649_v16  ;;  %v21695_v36 = vpop.f32.mrf.mxu0  ;;  %v14686_v8 = vld [vmem:[#allocation17 + $0x9cc] sm:$0xf0] }
 0x4d0   : > { %v15858_v3 = vpop.eup %15857  ;;  %15863 = vpow2.f32 %v11567_v24  ;;  %v11568_v20 = vmul.f32 -1.442695, %v21674_v12  ;;  %v12768_v13 = vor.u32 %v14658_v5, %v12767_v19  ;;  %v12896_v47 = vor.u32 %v14690_v54, %v12895_v38  ;;  %vm21703_vm14 = vmor %vm5343_vm1, %vm5344_vm11 }
 0x4d1   : > { %v5539_v33 = vrot.slane %v5538_v50, 4  ;;  %v5551_v9 = vadd.f32 %v21611_v28, %v5473_v11  ;;  %v5342_v51 = vadd.f32 %v21649_v16, %v5341_v52  ;;  %v21693_v32 = vadd.f32 1.0, %v15858_v3 }
 0x4d2   : > { %v15860_v31 = vpop.eup %15859  ;;  %15865 = vpow2.f32 %v11568_v20  ;;  %9668 = vmatpush.bf16.msrb.mxu0 %v12768_v13  ;;  %9681 = vmatpush.bf16.msrb.mxu1 %v12896_v47  ;;  %v13024_v28 = vor.u32 %v14722_v17, %v13023_v58  ;;  %v13152_v19 = vor.u32 %v14754_v35, %v13151_v29  ;;  %v12752_v0 = vor.u32 %v14654_v15, %v12751_v46  ;;  %v21725_v17 = vpop.f32.mrf.mxu3 }
 0x4d3   : > { %v5540_v24 = vadd.f32 %v5539_v33, %v5538_v50  ;;  %v5552_v5 = vrot.slane %v5551_v9, 4  ;;  %v5346_v38 = vsel %vm21703_vm14, %v21649_v16, %v5342_v51  ;;  %v5354_v1 = vmul.f32 %v15860_v31, %v21647_v43  ;;  %v21723_v16 = vpop.f32.mrf.mxu2 }
 0x4d4   : > { %v15862_v40 = vpop.eup %15861  ;;  %v5216_v54 = vsel %vm21659_vm9, %v21586_v30, %v5211_v7  ;;  %v5351_v58 = vsel %vm21677_vm4, %v5350_v34, %v5346_v38  ;;  %v5362_v61 = vand.u32 2147483647, %v21647_v43  ;;  %15867 = vrcp.f32 %v21693_v32  ;;  %9694 = vmatpush.bf16.msra.mxu2 %v13024_v28  ;;  %9707 = vmatpush.bf16.msra.mxu3 %v13152_v19  ;;  %v21745_v51 = vpop.f32.mrf.mxu1 }
 0x4d5   : > { %v5541_v44 = vrot.slane %v5540_v24, 2  ;;  %v5553_v29 = vadd.f32 %v5552_v5, %v5551_v9  ;;  %v5474_v10 = vmul.f32 %v5351_v58, %v21421_v26  ;;  %v5355_v49 = vsub.f32 1.0, %v5354_v1 }
 0x4d6   : > { %v15864_v23 = vpop.eup %15863  ;;  %vm5359_vm13 = vweird.f32 %v15860_v31  ;;  %v5364_v30 = vand.u32 2147483648, %v21647_v43  ;;  %v21729_v7 = vadd.f32 1.0, %v15862_v40  ;;  %9669 = vmatpush.bf16.msrb.mxu0 %v12752_v0  ;;  %v12880_v18 = vor.u32 %v14686_v8, %v12879_v63 }
 0x4d7   : > { %v5542_v34 = vadd.f32 %v5541_v44, %v5540_v24  ;;  %v5554_v50 = vrot.slane %v5553_v29, 2  ;;  %v5564_v11 = vadd.f32 %v21615_v2, %v5474_v10  ;;  %v5356_v52 = vmul.f32 %v15860_v31, %v5355_v49 }
 0x4d8   : > { %v15866_v35 = vpop.eup %15865  ;;  %v5574_v46 = vadd.f32 %v21328_v21, %v21431_v56  ;;  %v5465_v26 = vmul.f32 %v5216_v54, %v21377_v48  ;;  %vm5358_vm7 = vweird.f32 %v21647_v43  ;;  %15869 = vrcp.f32 %v21729_v7  ;;  %9682 = vmatpush.bf16.msrb.mxu1 %v12880_v18  ;;  %v21743_v43 = vpop.f32.mrf.mxu0  ;;  %v14718_v18 = vld [vmem:[#allocation17 + $0xacc] sm:$0xf0] }
 0x4d9   : > { %v5543_v15 = vrot.slane %v5542_v34, 1  ;;  %v5555_v3 = vadd.f32 %v5554_v50, %v5553_v29  ;;  %v5565_v20 = vrot.slane %v5564_v11, 4  ;;  %v5357_v13 = vadd.f32 %v15860_v31, %v5356_v52  ;;  %vm5360_vm8 = vmor %vm5358_vm7, %vm5359_vm13  ;;  %v13007_v29 = vld [vmem:[#allocation17 + $0xac0] sm:$0xf] }
 0x4da   : > { %v21737_v47 = vpop.eup %15867  ;;  %v5575_v2 = vadd.f32 %v5574_v46, %v21583_v4  ;;  %v5365_v33 = vor.u32 1.1754944e-38, %v5364_v30  ;;  %v21741_v9 = vadd.f32 1.0, %v15864_v23  ;;  %vm5363_vm10 = vcmp.eq.f32.partialorder %v5362_v61, 8.507059e+37  ;;  %v9614_v0 = vpop.f32.mrf.mxu3  ;;  %v13135_v52 = vld [vmem:[#allocation17 + $0xbc0] sm:$0xf] }
 0x4db   : > { %v5556_v21 = vrot.slane %v5555_v3, 1  ;;  %v5566_v48 = vadd.f32 %v5565_v20, %v5564_v11  ;;  %v5361_v56 = vsel %vm5360_vm8, %v15860_v31, %v5357_v13  ;;  %v4319_v28 = vmul.f32 %v21737_v47, %v21693_v32  ;;  %v9601_v19 = vpop.f32.mrf.mxu2 }
 0x4dc   : > { %v5366_v53 = vsel %vm5363_vm10, %v5365_v33, %v5361_v56  ;;  %v5576_v4 = vadd.f32 %v5575_v2, %v5465_v26  ;;  %v5544_v24 = vadd.f32 %v5543_v15, %v5542_v34  ;;  %15871 = vrcp.f32 %v21741_v9  ;;  %v14650_v19 = vld [vmem:[#allocation17 + $0x8ac] sm:$0xf0] }
 0x4dd   : > { %v5567_v5 = vrot.slane %v5566_v48, 2  ;;  %v5475_v38 = vmul.f32 %v5366_v53, %v21438_v22  ;;  %v5557_v63 = vadd.f32 %v5556_v21, %v5555_v3  ;;  %v4320_v31 = vsub.f32 1.0, %v4319_v28  ;;  %v14750_v21 = vld [vmem:[#allocation17 + $0xbcc] sm:$0xf0]  ;;  %v12735_v28 = vld [vmem:[#allocation17 + $0x8a0] sm:$0xf] }
 0x4de   : > { %v21750_v1 = vpop.eup %15869  ;;  %v21753_v8 = vadd.f32 1.0, %v15866_v35  ;;  %v4329_v58 = vand.u32 2147483648, %v21693_v32  ;;  %vm4323_vm12 = vweird.f32 %v21693_v32  ;;  %vm4324_vm5 = vweird.f32 %v21737_v47 }
 0x4df   : > { %v5568_v40 = vadd.f32 %v5567_v5, %v5566_v48  ;;  %v5577_v54 = vadd.f32 %v5576_v4, %v5475_v38  ;;  %v4334_v61 = vmul.f32 %v21750_v1, %v21729_v7  ;;  %v4321_v44 = vmul.f32 %v21737_v47, %v4320_v31  ;;  %vm21782_vm2 = vmor %vm4323_vm12, %vm4324_vm5  ;;  %v12863_v5 = vld [vmem:[#allocation17 + $0x9a0] sm:$0xf]  ;;  %v14682_v38 = vld [vmem:[#allocation17 + $0x9ac] sm:$0xf0] }
 0x4e0   : > { %v4344_v22 = vand.u32 2147483648, %v21729_v7  ;;  %v5623_v10 = vrot.slane %v5544_v24, 4  ;;  %v5624_v34 = vrot.slane %v5557_v63, 3  ;;  %v4479_v11 = vand.u32 2147483648, %v21741_v9  ;;  %v12991_v63 = vld [vmem:[#allocation17 + $0xaa0] sm:$0xf] }
 0x4e1   : > { %v5569_v49 = vrot.slane %v5568_v40, 1  ;;  %v5578_v23 = vrot.slane %v5577_v54, 4  ;;  %v4335_v30 = vsub.f32 1.0, %v4334_v61  ;;  %v21763_v50 = vadd.f32 %v21737_v47, %v4321_v44  ;;  %v14714_v31 = vld [vmem:[#allocation17 + $0xaac] sm:$0xf0] }
 0x4e2   : > { %15873 = vrcp.f32 %v21753_v8  ;;  %v4327_v46 = vand.u32 2147483647, %v21693_v32  ;;  %v21768_v26 = vor.u32 1.1754944e-38, %v4329_v58  ;;  %v4477_v15 = vand.u32 2147483647, %v21741_v9  ;;  %v21771_v3 = vpop.eup %15871 }
 0x4e3   : > { %v5579_v35 = vadd.f32 %v5578_v23, %v5577_v54  ;;  %v21773_v20 = vadd.f32 %v5569_v49, %v5568_v40  ;;  %v4342_v13 = vand.u32 2147483647, %v21729_v7  ;;  %v21776_v2 = vor.u32 1.1754944e-38, %v4344_v22  ;;  %v21801_v40 = vpop.f32.mrf.mxu0  ;;  %v21803_v54 = vpop.f32.mrf.mxu1  ;;  %v14746_v49 = vld [vmem:[#allocation17 + $0xbac] sm:$0xf0] }
 0x4e4   : > { %v13008_v33 = vor.u32 %v14718_v18, %v13007_v29  ;;  %v4336_v53 = vmul.f32 %v21750_v1, %v4335_v30  ;;  %vm4338_vm3 = vweird.f32 %v21729_v7  ;;  %vm4339_vm9 = vweird.f32 %v21750_v1  ;;  %v12719_v23 = vld [vmem:[#allocation17 + $0x880] sm:$0xf]  ;;  %v21811_v30 = vpop.f32.mrf.mxu2  ;;  %v21813_v18 = vpop.f32.mrf.mxu3 }
 0x4e5   : > { %v5580_v48 = vrot.slane %v5579_v35, 2  ;;  %vm4473_vm1 = vweird.f32 %v21741_v9  ;;  %vm23227_vm6 = vcmask 1044484   ;;  %v4469_v4 = vmul.f32 %v21771_v3, %v21741_v9  ;;  %23230 = vst [vmem:[#allocation47_spill] sm:$0xff] %v21811_v30  ;;  %vm21858_vm10 = vmor %vm4338_vm3, %vm4339_vm9  ;;  %v13071_v44 = vld [vmem:[#allocation17 + $0xb40] sm:$0xf] }
 0x4e6   : > { %v21791_v0 = vsel %vm23227_vm6, %v5623_v10, %v5624_v34  ;;  %v21799_v24 = vor.u32 1.1754944e-38, %v4479_v11  ;;  %9695 = vmatpush.bf16.msra.mxu2 %v13008_v33  ;;  %vm21805_vm4 = vcmp.eq.f32.partialorder %v4477_v15, 8.507059e+37  ;;  %v13136_v29 = vor.u32 %v14750_v21, %v13135_v52  ;;  %v13119_v10 = vld [vmem:[#allocation17 + $0xba0] sm:$0xf]  ;;  %23231 = vst [vmem:[#allocation48_spill] sm:$0xff] %v21813_v18 }
 0x4e7   : > { %v5581_v58 = vadd.f32 %v5580_v48, %v5579_v35  ;;  %v5625_v11 = vrot.slane %v21773_v20, 2  ;;  %v4470_v35 = vsub.f32 1.0, %v4469_v4  ;;  %v21820_v15 = vadd.f32 %v21695_v36, %v21599_v60  ;;  %v14646_v52 = vld [vmem:[#allocation17 + $0x88c] sm:$0xf0]  ;;  %v12847_v21 = vld [vmem:[#allocation17 + $0x980] sm:$0xf] }
 0x4e8   : > { %v21815_v34 = vpop.eup %15873  ;;  %v21824_v33 = vadd.f32 %v21697_v59, %v21637_v55  ;;  %vm21826_vm11 = vcmp.eq.f32.partialorder %v4327_v46, 8.507059e+37  ;;  %v21831_v22 = vadd.f32 %v21750_v1, %v4336_v53  ;;  %vm21833_vm14 = vcmp.eq.f32.partialorder %v4342_v13, 8.507059e+37  ;;  %9708 = vmatpush.bf16.msra.mxu3 %v13136_v29  ;;  %v14678_v59 = vld [vmem:[#allocation17 + $0x98c] sm:$0xf0]  ;;  %v12975_v4 = vld [vmem:[#allocation17 + $0xa80] sm:$0xf] }
 0x4e9   : > { %v5582_v48 = vrot.slane %v5581_v58, 1  ;;  %vm4474_vm13 = vweird.f32 %v21771_v3  ;;  %v4484_v36 = vmul.f32 %v21815_v34, %v21753_v8  ;;  %v4471_v46 = vmul.f32 %v21771_v3, %v4470_v35 }
 0x4ea   : > { %v11577_v32 = vmul.f32 -1.442695, %v21820_v15  ;;  %v11578_v18 = vmul.f32 -1.442695, %v21824_v33  ;;  %v12736_v53 = vor.u32 %v14650_v19, %v12735_v28  ;;  %vm4488_vm7 = vweird.f32 %v21753_v8  ;;  %vm21849_vm8 = vmor %vm4473_vm1, %vm4474_vm13  ;;  %v12671_v28 = vld [vmem:[#allocation17 + $0x820] sm:$0xf] }
 0x4eb   : > { %v5583_v13 = vadd.f32 %v5582_v48, %v5581_v58  ;;  %v4485_v27 = vsub.f32 1.0, %v4484_v36  ;;  %v12864_v41 = vor.u32 %v14682_v38, %v12863_v5  ;;  %v12992_v45 = vor.u32 %v14714_v31, %v12991_v63  ;;  %v5478_v31 = vld [vmem:[#allocation2 + $0xa] sm:$0xff]  ;;  %v12687_v36 = vld [vmem:[#allocation17 + $0x840] sm:$0xf] }
 0x4ec   : > { %v4472_v29 = vadd.f32 %v21771_v3, %v4471_v46  ;;  %15875 = vpow2.f32 %v11577_v32  ;;  %9670 = vmatpush.bf16.msrb.mxu0 %v12736_v53  ;;  %v13120_v30 = vor.u32 %v14746_v49, %v13119_v10  ;;  %v12720_v35 = vor.u32 %v14646_v52, %v12719_v23  ;;  %v14706_v10 = vld [vmem:[#allocation17 + $0xa6c] sm:$0xf0]  ;;  %v21889_v49 = vpop.f32.mrf.mxu0  ;;  %v21891_v23 = vpop.f32.mrf.mxu1  ;;  %v12799_v32 = vld [vmem:[#allocation17 + $0x920] sm:$0xf] }
 0x4ed   : > { %v5626_v12 = vrot.slane %v5583_v13, 1  ;;  %v4486_v19 = vmul.f32 %v21815_v34, %v4485_v27  ;;  %15877 = vpow2.f32 %v11578_v18  ;;  %9683 = vmatpush.bf16.msrb.mxu1 %v12864_v41  ;;  %9696 = vmatpush.bf16.msra.mxu2 %v12992_v45  ;;  %v12848_v5 = vor.u32 %v14678_v59, %v12847_v21  ;;  %v12703_v45 = vld [vmem:[#allocation17 + $0x860] sm:$0xf]  ;;  %v14642_v41 = vld [vmem:[#allocation17 + $0x86c] sm:$0xf0] }
 0x4ee   : > { %v4476_v9 = vsel %vm21849_vm8, %v21771_v3, %v4472_v29  ;;  %9709 = vmatpush.bf16.msra.mxu3 %v13120_v30  ;;  %v12976_v38 = vor.u32 %v14710_v14, %v12975_v4  ;;  %v13104_v63 = vor.u32 %v14742_v25, %v13103_v57  ;;  %v9600_v27 = vadd.f32 %v21723_v16, %v21684_v39  ;;  %v12831_v25 = vld [vmem:[#allocation17 + $0x960] sm:$0xf]  ;;  %v9653_v57 = vpop.f32.mrf.mxu2  ;;  %v9666_v14 = vpop.f32.mrf.mxu3  ;;  %v14638_v59 = vld [vmem:[#allocation17 + $0x84c] sm:$0xf0] }
 0x4ef   : > { %vm23240_vm12 = vcmask 1046534   ;;  %v4341_v7 = vsel %vm21858_vm10, %v21750_v1, %v21831_v22  ;;  %vm4489_vm5 = vweird.f32 %v21815_v34  ;;  %v21875_v3 = vadd.f32 %v21743_v43, %v21599_v60  ;;  %v14674_v43 = vld [vmem:[#allocation17 + $0x96c] sm:$0xf0]  ;;  %v12959_v22 = vld [vmem:[#allocation17 + $0xa60] sm:$0xf] }
 0x4f0   : > { %v5632_v58 = vsel %vm23240_vm12, %v5625_v11, %v5626_v12  ;;  %vm23241_vm3 = vcmask 1045508   ;;  %v4481_v12 = vsel %vm21805_vm4, %v21799_v24, %v4476_v9  ;;  %9671 = vmatpush.bf16.msrb.mxu0 %v12720_v35  ;;  %v21883_v16 = vadd.f32 %v21725_v17, %v9600_v27  ;;  %v13087_v30 = vld [vmem:[#allocation17 + $0xb60] sm:$0xf]  ;;  %v14670_v46 = vld [vmem:[#allocation17 + $0x94c] sm:$0xf0] }
 0x4f1   : > { %v5633_v39 = vsel %vm23241_vm3, %v21791_v0, %v5632_v58  ;;  %v21887_v1 = vadd.f32 %v21745_v51, %v21637_v55  ;;  %vm23242_vm9 = vcmask 1043456   ;;  %v4487_v24 = vadd.f32 %v21815_v34, %v4486_v19  ;;  %9684 = vmatpush.bf16.msrb.mxu1 %v12848_v5  ;;  %9697 = vmatpush.bf16.msra.mxu2 %v12976_v38  ;;  %v14738_v51 = vld [vmem:[#allocation17 + $0xb6c] sm:$0xf0]  ;;  %v12815_v4 = vld [vmem:[#allocation17 + $0x940] sm:$0xf] }
 0x4f2   : > { %v5634_v0 = vsel %vm23242_vm9, %v20713_v6, %v5633_v39  ;;  %v11587_v17 = vmul.f32 -1.442695, %v21875_v3  ;;  %v12704_v61 = vor.u32 %v14642_v41, %v12703_v45  ;;  %v15876_v18 = vpop.eup %15875  ;;  %v23243_v52 = vsel %vm21782_vm2, %v21737_v47, %v21763_v50  ;;  %9710 = vmatpush.bf16.msra.mxu3 %v13104_v63  ;;  %v12943_v50 = vld [vmem:[#allocation17 + $0xa40] sm:$0xf]  ;;  %vm21916_vm2 = vmor %vm4488_vm7, %vm4489_vm5  ;;  %v14734_v35 = vld [vmem:[#allocation17 + $0xb4c] sm:$0xf0] }
 0x4f3   : > { %v5638_v11 = vadd.f32 %v5634_v0, %v5478_v31  ;;  %v4331_v6 = vsel %vm21826_vm11, %v21768_v26, %v23243_v52  ;;  %v4346_v21 = vsel %vm21833_vm14, %v21776_v2, %v4341_v7  ;;  %v11588_v48 = vmul.f32 -1.442695, %v21887_v1  ;;  %v15878_v53 = vpop.eup %15877  ;;  %v14702_v26 = vld [vmem:[#allocation17 + $0xa4c] sm:$0xf0]  ;;  %v12927_v45 = vld [vmem:[#allocation17 + $0xa20] sm:$0xf] }
 0x4f4   : > { %v5416_v56 = vmul.f32 %v4481_v12, %v21645_v62  ;;  %v21910_v13 = vadd.f32 1.0, %v15876_v18  ;;  %15879 = vpow2.f32 %v11587_v17  ;;  %v12832_v47 = vor.u32 %v14674_v43, %v12831_v25  ;;  %9672 = vmatpush.bf16.msrb.mxu0 %v12704_v61  ;;  %v14634_v5 = vld [vmem:[#allocation17 + $0x82c] sm:$0xf0]  ;;  %v13055_v25 = vld [vmem:[#allocation17 + $0xb20] sm:$0xf]  ;;  %v21950_v52 = vpop.f32.mrf.mxu1 }
 0x4f5   : > { %5640 = vst [vmem:[#allocation2 + $0xa] sm:$0xff] %v5638_v11  ;;  %v21920_v20 = vadd.f32 1.0, %v15878_v53  ;;  %15881 = vpow2.f32 %v11588_v48  ;;  %v12960_v62 = vor.u32 %v14706_v10, %v12959_v22  ;;  %v13088_v29 = vor.u32 %v14738_v51, %v13087_v30  ;;  %v14666_v9 = vld [vmem:[#allocation17 + $0x92c] sm:$0xf0]  ;;  %v12655_v51 = vld [vmem:[#allocation17 + $0x800] sm:$0xf]  ;;  %v21948_v11 = vpop.f32.mrf.mxu0 }
 0x4f6   : > { %v4491_v19 = vsel %vm21916_vm2, %v21815_v34, %v4487_v24  ;;  %15883 = vrcp.f32 %v21910_v13  ;;  %9685 = vmatpush.bf16.msrb.mxu1 %v12832_v47  ;;  %v5406_v38 = vmul.f32 %v4331_v6, %v21635_v37  ;;  %v23246_v63 = vand.u32 2147483648, %v21753_v8  ;;  %v14698_v41 = vld [vmem:[#allocation17 + $0xa2c] sm:$0xf0] }
 0x4f7   : > { %15885 = vrcp.f32 %v21920_v20  ;;  %9698 = vmatpush.bf16.msra.mxu2 %v12960_v62  ;;  %9711 = vmatpush.bf16.msra.mxu3 %v13088_v29  ;;  %v21931_v31 = vmul.f32 %v4346_v21, %v21642_v42  ;;  %v23247_v34 = vand.u32 2147483647, %v21753_v8  ;;  %v12688_v58 = vor.u32 %v14638_v59, %v12687_v36  ;;  %v14730_v57 = vld [vmem:[#allocation17 + $0xb2c] sm:$0xf0]  ;;  %v12783_v36 = vld [vmem:[#allocation17 + $0x900] sm:$0xf] }
 0x4f8   : > { %v4495_v27 = vor.u32 1.1754944e-38, %v23246_v63  ;;  %v12816_v7 = vor.u32 %v14670_v46, %v12815_v4  ;;  %v21935_v37 = vadd.f32 %v5416_v56, %v5406_v38  ;;  %v12944_v39 = vor.u32 %v14702_v26, %v12943_v50  ;;  %v14630_v18 = vld [vmem:[#allocation17 + $0x80c] sm:$0xf0]  ;;  %v12911_v50 = vld [vmem:[#allocation17 + $0xa00] sm:$0xf] }
 0x4f9   : > { %vm4493_vm1 = vcmp.eq.f32.partialorder %v23247_v34, 8.507059e+37  ;;  %v13072_v12 = vor.u32 %v14734_v35, %v13071_v44  ;;  %v4627_v22 = vand.u32 2147483647, %v21910_v13  ;;  %9673 = vmatpush.bf16.msrb.mxu0 %v12688_v58  ;;  %v21940_v42 = vadd.f32 %v21801_v40, %v21599_v60  ;;  %v14662_v59 = vld [vmem:[#allocation17 + $0x90c] sm:$0xf0] }
 0x4fa   : > { %v4496_v14 = vsel %vm4493_vm1, %v4495_v27, %v4491_v19  ;;  %v15880_v43 = vpop.eup %15879  ;;  %9686 = vmatpush.bf16.msrb.mxu1 %v12816_v7  ;;  %v21944_v8 = vadd.f32 %v21803_v54, %v21637_v55  ;;  %v12672_v10 = vor.u32 %v14634_v5, %v12671_v28  ;;  %v12800_v17 = vor.u32 %v14666_v9, %v12799_v32  ;;  %v23248_v46 = vld [vmem:[#allocation46_spill] sm:$0xff]  ;;  %v13039_v29 = vld [vmem:[#allocation17 + $0xb00] sm:$0xf] }
 0x4fb   : > { %v15882_v0 = vpop.eup %15881  ;;  %v21946_v24 = vadd.f32 1.0, %v15880_v43  ;;  %9699 = vmatpush.bf16.msra.mxu2 %v12944_v39  ;;  %9712 = vmatpush.bf16.msra.mxu3 %v13072_v12  ;;  %v12928_v61 = vor.u32 %v14698_v41, %v12927_v45  ;;  %v13056_v30 = vor.u32 %v14730_v57, %v13055_v25  ;;  %v4629_v54 = vand.u32 2147483648, %v21910_v13  ;;  %v14694_v26 = vld [vmem:[#allocation17 + $0xa0c] sm:$0xf0]  ;;  %v13279_v28 = vld [vmem:[#allocation17 + $0xce0] sm:$0xf] }
 0x4fc   : > { %v21952_v40 = vpop.eup %15883  ;;  %v4642_v6 = vand.u32 2147483647, %v21920_v20  ;;  %v4644_v21 = vand.u32 2147483648, %v21920_v20  ;;  %v21957_v48 = vadd.f32 1.0, %v15882_v0  ;;  %v21962_v53 = vmul.f32 %v4496_v14, %v23248_v46  ;;  %v14726_v35 = vld [vmem:[#allocation17 + $0xb0c] sm:$0xf0] }
 0x4fd   : > { %v21959_v4 = vpop.eup %15885  ;;  %v4619_v56 = vmul.f32 %v21952_v40, %v21910_v13  ;;  %15887 = vrcp.f32 %v21946_v24  ;;  %v11597_v47 = vmul.f32 -1.442695, %v21940_v42  ;;  %vm4623_vm6 = vweird.f32 %v21910_v13  ;;  %9674 = vmatpush.bf16.msrb.mxu0 %v12672_v10  ;;  %v14786_v32 = vld [vmem:[#allocation17 + $0xcec] sm:$0xf0]  ;;  %v13407_v9 = vld [vmem:[#allocation17 + $0xde0] sm:$0xf] }
 0x4fe   : > { %v4634_v44 = vmul.f32 %v21959_v4, %v21920_v20  ;;  %v11598_v2 = vmul.f32 -1.442695, %v21944_v8  ;;  %9687 = vmatpush.bf16.msrb.mxu1 %v12800_v17  ;;  %v12656_v62 = vor.u32 %v14630_v18, %v12655_v51  ;;  %vm21972_vm4 = vcmp.eq.f32.partialorder %v4627_v22, 8.507059e+37  ;;  %v14818_v41 = vld [vmem:[#allocation17 + $0xdec] sm:$0xf0] }
 0x4ff   : > { %v4620_v19 = vsub.f32 1.0, %v4619_v56  ;;  %vm4638_vm11 = vweird.f32 %v21920_v20  ;;  %15889 = vrcp.f32 %v21957_v48  ;;  %9700 = vmatpush.bf16.msra.mxu2 %v12928_v61  ;;  %9713 = vmatpush.bf16.msra.mxu3 %v13056_v30  ;;  %v4630_v38 = vor.u32 1.1754944e-38, %v4629_v54  ;;  %v13535_v7 = vld [vmem:[#allocation17 + $0xee0] sm:$0xf]  ;;  %v14850_v25 = vld [vmem:[#allocation17 + $0xeec] sm:$0xf0]  ;;  %v22020_v56 = vpop.f32.mrf.mxu0 }
 0x500   : > { %v4635_v63 = vsub.f32 1.0, %v4634_v44  ;;  %vm21978_vm14 = vcmp.eq.f32.partialorder %v4642_v6, 8.507059e+37  ;;  %v4645_v45 = vor.u32 1.1754944e-38, %v4644_v21  ;;  %vm4624_vm13 = vweird.f32 %v21952_v40  ;;  %v13663_v39 = vld [vmem:[#allocation17 + $0xfe0] sm:$0xf] }
 0x501   : > { %v4621_v34 = vmul.f32 %v21952_v40, %v4620_v19  ;;  %15891 = vpow2.f32 %v11597_v47  ;;  %v12784_v58 = vor.u32 %v14662_v59, %v12783_v36  ;;  %vm4639_vm7 = vweird.f32 %v21959_v4  ;;  %9675 = vmatpush.bf16.msrb.mxu0 %v12656_v62  ;;  %v14882_v12 = vld [vmem:[#allocation17 + $0xfec] sm:$0xf0]  ;;  %vm21994_vm10 = vmor %vm4623_vm6, %vm4624_vm13  ;;  %v13247_v13 = vld [vmem:[#allocation17 + $0xca0] sm:$0xf] }
 0x502   : > { %v4636_v57 = vmul.f32 %v21959_v4, %v4635_v63  ;;  %vm4773_vm8 = vweird.f32 %v21946_v24  ;;  %15893 = vpow2.f32 %v11598_v2  ;;  %v12912_v14 = vor.u32 %v14694_v26, %v12911_v50  ;;  %vm22011_vm12 = vmor %vm4638_vm11, %vm4639_vm7 }
 0x503   : > { %v21987_v43 = vpop.eup %15887  ;;  %v4622_v22 = vadd.f32 %v21952_v40, %v4621_v34  ;;  %9688 = vmatpush.bf16.msrb.mxu1 %v12784_v58  ;;  %v13040_v10 = vor.u32 %v14726_v35, %v13039_v29  ;;  %v13280_v0 = vor.u32 %v14786_v32, %v13279_v28  ;;  %v13408_v17 = vor.u32 %v14818_v41, %v13407_v9  ;;  %v14782_v41 = vld [vmem:[#allocation17 + $0xccc] sm:$0xf0]  ;;  %v13391_v34 = vld [vmem:[#allocation17 + $0xdc0] sm:$0xf] }
 0x504   : > { %v4637_v30 = vadd.f32 %v21959_v4, %v4636_v57  ;;  %v4769_v51 = vmul.f32 %v21987_v43, %v21946_v24  ;;  %v4777_v18 = vand.u32 2147483647, %v21946_v24  ;;  %9701 = vmatpush.bf16.msra.mxu2 %v12912_v14  ;;  %v13536_v54 = vor.u32 %v14850_v25, %v13535_v7  ;;  %v14814_v58 = vld [vmem:[#allocation17 + $0xdcc] sm:$0xf0]  ;;  %v13519_v25 = vld [vmem:[#allocation17 + $0xec0] sm:$0xf] }
 0x505   : > { %v22002_v6 = vpop.eup %15889  ;;  %v4626_v21 = vsel %vm21994_vm10, %v21952_v40, %v4622_v22  ;;  %v4779_v36 = vand.u32 2147483648, %v21946_v24  ;;  %9714 = vmatpush.bf16.msra.mxu3 %v13040_v10  ;;  %9720 = vmatpush.bf16.msra.mxu0 %v13280_v0  ;;  %v13664_v59 = vor.u32 %v14882_v12, %v13663_v39  ;;  %v22018_v46 = vadd.f32 %v21889_v49, %v21599_v60  ;;  %v22022_v40 = vpop.f32.mrf.mxu1  ;;  %v14846_v57 = vld [vmem:[#allocation17 + $0xecc] sm:$0xf0]  ;;  %v13647_v39 = vld [vmem:[#allocation17 + $0xfc0] sm:$0xf] }
 0x506   : > { %v4631_v20 = vsel %vm21972_vm4, %v4630_v38, %v4626_v21  ;;  %v4641_v47 = vsel %vm22011_vm12, %v21959_v4, %v4637_v30  ;;  %v4770_v50 = vsub.f32 1.0, %v4769_v51  ;;  %v4784_v26 = vmul.f32 %v22002_v6, %v21957_v48  ;;  %v14878_v12 = vld [vmem:[#allocation17 + $0xfcc] sm:$0xf0] }
 0x507   : > { %9733 = vmatpush.bf16.msra.mxu1 %v13408_v17  ;;  %v15892_v44 = vpop.eup %15891  ;;  %v4646_v49 = vsel %vm21978_vm14, %v4645_v45, %v4641_v47  ;;  %v4792_v2 = vand.u32 2147483647, %v21957_v48  ;;  %v4794_v62 = vand.u32 2147483648, %v21957_v48  ;;  %v11607_v29 = vmul.f32 -1.442695, %v22018_v46  ;;  %v22065_v22 = vpop.f32.mrf.mxu0 }
 0x508   : > { %9746 = vmatpush.bf16.msrb.mxu2 %v13536_v54  ;;  %v15894_v35 = vpop.eup %15893  ;;  %v4771_v4 = vmul.f32 %v21987_v43, %v4770_v50  ;;  %vm4774_vm5 = vweird.f32 %v21987_v43  ;;  %v4785_v28 = vsub.f32 1.0, %v4784_v26  ;;  %v22038_v19 = vadd.f32 1.0, %v15892_v44  ;;  %v13263_v45 = vld [vmem:[#allocation17 + $0xcc0] sm:$0xf]  ;;  %v14810_v47 = vld [vmem:[#allocation17 + $0xdac] sm:$0xf0] }
 0x509   : > { %9759 = vmatpush.bf16.msrb.mxu3 %v13664_v59  ;;  %v5426_v5 = vmul.f32 %v4631_v20, %v21820_v15  ;;  %v5427_v32 = vmul.f32 %v4646_v49, %v21824_v33  ;;  %v22042_v9 = vadd.f32 1.0, %v15894_v35  ;;  %15895 = vpow2.f32 %v11607_v29  ;;  %vm4775_vm3 = vmor %vm4773_vm8, %vm4774_vm5  ;;  %v13375_v20 = vld [vmem:[#allocation17 + $0xda0] sm:$0xf] }
 0x50a   : > { %v4772_v38 = vadd.f32 %v21987_v43, %v4771_v4  ;;  %v4786_v63 = vmul.f32 %v22002_v6, %v4785_v28  ;;  %15897 = vrcp.f32 %v22038_v19  ;;  %v22049_v27 = vadd.f32 %v21891_v23, %v21637_v55  ;;  %v13631_v28 = vld [vmem:[#allocation17 + $0xfa0] sm:$0xf] }
 0x50b   : > { %v5597_v15 = vadd.f32 %v21962_v53, %v21931_v31  ;;  %v4780_v33 = vor.u32 1.1754944e-38, %v4779_v36  ;;  %vm4788_vm9 = vweird.f32 %v21957_v48  ;;  %15899 = vrcp.f32 %v22042_v9  ;;  %v14778_v36 = vld [vmem:[#allocation17 + $0xcac] sm:$0xf0]  ;;  %v13599_v29 = vld [vmem:[#allocation17 + $0xf60] sm:$0xf] }
 0x50c   : > { %v4776_v7 = vsel %vm4775_vm3, %v21987_v43, %v4772_v38  ;;  %vm4778_vm2 = vcmp.eq.f32.partialorder %v4777_v18, 8.507059e+37  ;;  %v4787_v23 = vadd.f32 %v22002_v6, %v4786_v63  ;;  %vm4789_vm1 = vweird.f32 %v22002_v6  ;;  %v14838_v53 = vld [vmem:[#allocation17 + $0xe8c] sm:$0xf0] }
 0x50d   : > { %v5585_v31 = vadd.f32 %v21935_v37, %v5426_v5  ;;  %v4781_v24 = vsel %vm4778_vm2, %v4780_v33, %v4776_v7  ;;  %vm22061_vm6 = vcmp.eq.f32.partialorder %v4792_v2, 8.507059e+37  ;;  %v4795_v14 = vor.u32 1.1754944e-38, %v4794_v62  ;;  %v22067_v43 = vpop.f32.mrf.mxu1  ;;  %vm22079_vm4 = vmor %vm4788_vm9, %vm4789_vm1  ;;  %v13503_v62 = vld [vmem:[#allocation17 + $0xea0] sm:$0xf]  ;;  %v14874_v5 = vld [vmem:[#allocation17 + $0xfac] sm:$0xf0] }
 0x50e   : > { %v22069_v10 = vadd.f32 %v5597_v15, %v5427_v32  ;;  %v4927_v0 = vand.u32 2147483647, %v22038_v19  ;;  %v4929_v17 = vand.u32 2147483648, %v22038_v19  ;;  %v11608_v37 = vmul.f32 -1.442695, %v22049_v27 }
 0x50f   : > { %v15896_v61 = vpop.eup %15895  ;;  %v5436_v30 = vmul.f32 %v4781_v24, %v21875_v3  ;;  %vm4923_vm11 = vweird.f32 %v22038_v19  ;;  %v4944_v18 = vand.u32 2147483648, %v22042_v9  ;;  %v13264_v54 = vor.u32 %v14782_v41, %v13263_v45  ;;  %v13231_v41 = vld [vmem:[#allocation17 + $0xc80] sm:$0xf]  ;;  %v14774_v15 = vld [vmem:[#allocation17 + $0xc8c] sm:$0xf0] }
 0x510   : > { %v13392_v21 = vor.u32 %v14814_v58, %v13391_v34  ;;  %v22085_v59 = vpop.eup %15897  ;;  %v4791_v3 = vsel %vm22079_vm4, %v22002_v6, %v4787_v23  ;;  %vm4938_vm14 = vweird.f32 %v22042_v9  ;;  %v22091_v48 = vadd.f32 1.0, %v15896_v61  ;;  %v14842_v6 = vld [vmem:[#allocation17 + $0xeac] sm:$0xf0]  ;;  %v13359_v23 = vld [vmem:[#allocation17 + $0xd80] sm:$0xf] }
 0x511   : > { %15901 = vpow2.f32 %v11608_v37  ;;  %v22093_v50 = vpop.eup %15899  ;;  %v4919_v26 = vmul.f32 %v22085_v59, %v22038_v19  ;;  %v4942_v44 = vand.u32 2147483647, %v22042_v9  ;;  %9721 = vmatpush.bf16.msra.mxu0 %v13264_v54  ;;  %v13520_v49 = vor.u32 %v14846_v57, %v13519_v25  ;;  %v14806_v25 = vld [vmem:[#allocation17 + $0xd8c] sm:$0xf0]  ;;  %v13487_v24 = vld [vmem:[#allocation17 + $0xe80] sm:$0xf] }
 0x512   : > { %9734 = vmatpush.bf16.msra.mxu1 %v13392_v21  ;;  %v13648_v2 = vor.u32 %v14878_v12, %v13647_v39  ;;  %vm22098_vm13 = vcmp.eq.f32.partialorder %v4927_v0, 8.507059e+37  ;;  %v4930_v35 = vor.u32 1.1754944e-38, %v4929_v17  ;;  %v4934_v4 = vmul.f32 %v22093_v50, %v22042_v9  ;;  %v13615_v21 = vld [vmem:[#allocation17 + $0xf80] sm:$0xf] }
 0x513   : > { %15903 = vrcp.f32 %v22091_v48  ;;  %v22105_v32 = vadd.f32 %v5585_v31, %v5436_v30  ;;  %v4796_v38 = vsel %vm22061_vm6, %v4795_v14, %v4791_v3  ;;  %v4920_v63 = vsub.f32 1.0, %v4919_v26  ;;  %9747 = vmatpush.bf16.msrb.mxu2 %v13520_v49  ;;  %v9627_v14 = vpop.f32.mrf.mxu0 }
 0x514   : > { %v4945_v45 = vor.u32 1.1754944e-38, %v4944_v18  ;;  %9760 = vmatpush.bf16.msrb.mxu3 %v13648_v2  ;;  %v4935_v33 = vsub.f32 1.0, %v4934_v4  ;;  %v13248_v34 = vor.u32 %v14778_v36, %v13247_v13  ;;  %v13376_v58 = vor.u32 %v14810_v47, %v13375_v20  ;;  %v14870_v47 = vld [vmem:[#allocation17 + $0xf8c] sm:$0xf0]  ;;  %v13343_v4 = vld [vmem:[#allocation17 + $0xd60] sm:$0xf] }
 0x515   : > { %v13504_v7 = vor.u32 %v14842_v6, %v13503_v62  ;;  %v4921_v57 = vmul.f32 %v22085_v59, %v4920_v63  ;;  %vm4924_vm7 = vweird.f32 %v22085_v59  ;;  %vm4939_vm8 = vweird.f32 %v22093_v50  ;;  %v9640_v39 = vpop.f32.mrf.mxu1  ;;  %v13215_v62 = vld [vmem:[#allocation17 + $0xc60] sm:$0xf]  ;;  %v14770_v6 = vld [vmem:[#allocation17 + $0xc6c] sm:$0xf0] }
 0x516   : > { %v13632_v31 = vor.u32 %v14874_v5, %v13631_v28  ;;  %v4936_v0 = vmul.f32 %v22093_v50, %v4935_v33  ;;  %v5077_v17 = vand.u32 2147483647, %v22091_v48  ;;  %9722 = vmatpush.bf16.msra.mxu0 %v13248_v34  ;;  %9735 = vmatpush.bf16.msra.mxu1 %v13376_v58  ;;  %v22116_v37 = vadd.f32 %v21948_v11, %v21599_v60  ;;  %vm22131_vm10 = vmor %vm4923_vm11, %vm4924_vm7  ;;  %v14802_v28 = vld [vmem:[#allocation17 + $0xd6c] sm:$0xf0]  ;;  %v13455_v14 = vld [vmem:[#allocation17 + $0xe40] sm:$0xf] }
 0x517   : > { %v15902_v12 = vpop.eup %15901  ;;  %v22120_v61 = vadd.f32 %v21950_v52, %v21637_v55  ;;  %v4922_v30 = vadd.f32 %v22085_v59, %v4921_v57  ;;  %9748 = vmatpush.bf16.msrb.mxu2 %v13504_v7  ;;  %v13232_v18 = vor.u32 %v14774_v15, %v13231_v41  ;;  %v13360_v54 = vor.u32 %v14806_v25, %v13359_v23  ;;  %vm22145_vm12 = vmor %vm4938_vm14, %vm4939_vm8  ;;  %v13471_v41 = vld [vmem:[#allocation17 + $0xe60] sm:$0xf]  ;;  %v14834_v15 = vld [vmem:[#allocation17 + $0xe6c] sm:$0xf0] }
 0x518   : > { %v22123_v51 = vadd.f32 1.0, %v15902_v12  ;;  %9761 = vmatpush.bf16.msrb.mxu3 %v13632_v31  ;;  %v4937_v52 = vadd.f32 %v22093_v50, %v4936_v0  ;;  %v5079_v36 = vand.u32 2147483648, %v22091_v48  ;;  %v11617_v3 = vmul.f32 -1.442695, %v22116_v37  ;;  %v13327_v23 = vld [vmem:[#allocation17 + $0xd40] sm:$0xf] }
 0x519   : > { %v22125_v13 = vpop.eup %15903  ;;  %v13488_v20 = vor.u32 %v14838_v53, %v13487_v24  ;;  %v4926_v26 = vsel %vm22131_vm10, %v22085_v59, %v4922_v30  ;;  %v11618_v2 = vmul.f32 -1.442695, %v22120_v61  ;;  %v22154_v59 = vmul.f32 %v4796_v38, %v21887_v1  ;;  %v14766_v38 = vld [vmem:[#allocation17 + $0xc4c] sm:$0xf0] }
 0x51a   : > { %v5069_v49 = vmul.f32 %v22125_v13, %v22091_v48  ;;  %15905 = vrcp.f32 %v22123_v51  ;;  %v4931_v5 = vsel %vm22098_vm13, %v4930_v35, %v4926_v26  ;;  %v4941_v63 = vsel %vm22145_vm12, %v22093_v50, %v4937_v52  ;;  %9723 = vmatpush.bf16.msra.mxu0 %v13232_v18  ;;  %9736 = vmatpush.bf16.msra.mxu1 %v13360_v54  ;;  %v14866_v35 = vld [vmem:[#allocation17 + $0xf6c] sm:$0xf0]  ;;  %v13183_v54 = vld [vmem:[#allocation17 + $0xc20] sm:$0xf] }
 0x51b   : > { %vm4943_vm5 = vcmp.eq.f32.partialorder %v4942_v44, 8.507059e+37  ;;  %vm5073_vm3 = vweird.f32 %v22091_v48  ;;  %vm22164_vm9 = vcmp.eq.f32.partialorder %v5077_v17, 8.507059e+37  ;;  %9749 = vmatpush.bf16.msrb.mxu2 %v13488_v20  ;;  %vm5074_vm2 = vweird.f32 %v22125_v13  ;;  %v13199_v44 = vld [vmem:[#allocation17 + $0xc40] sm:$0xf]  ;;  %v14798_v25 = vld [vmem:[#allocation17 + $0xd4c] sm:$0xf0] }
 0x51c   : > { %v4946_v33 = vsel %vm4943_vm5, %v4945_v45, %v4941_v63  ;;  %v5070_v34 = vsub.f32 1.0, %v5069_v49  ;;  %v5080_v50 = vor.u32 1.1754944e-38, %v5079_v36  ;;  %15907 = vpow2.f32 %v11617_v3  ;;  %v14830_v39 = vld [vmem:[#allocation17 + $0xe4c] sm:$0xf0]  ;;  %vm22190_vm1 = vmor %vm5073_vm3, %vm5074_vm2  ;;  %v13311_v52 = vld [vmem:[#allocation17 + $0xd20] sm:$0xf] }
 0x51d   : > { %v13616_v9 = vor.u32 %v14870_v47, %v13615_v21  ;;  %v5446_v58 = vmul.f32 %v4931_v5, %v21940_v42  ;;  %v5092_v7 = vand.u32 2147483647, %v22123_v51  ;;  %15909 = vpow2.f32 %v11618_v2  ;;  %v14862_v18 = vld [vmem:[#allocation17 + $0xf4c] sm:$0xf0]  ;;  %v5646_v63 = vld [vmem:[#allocation2 + $0x8] sm:$0xff] }
 0x51e   : > { %v5071_v45 = vmul.f32 %v22125_v13, %v5070_v34  ;;  %v22173_v57 = vmul.f32 %v4946_v33, %v21944_v8  ;;  %v13216_v31 = vor.u32 %v14770_v6, %v13215_v62  ;;  %v13344_v24 = vor.u32 %v14802_v28, %v13343_v4  ;;  %v13583_v8 = vld [vmem:[#allocation17 + $0xf40] sm:$0xf]  ;;  %v14794_v47 = vld [vmem:[#allocation17 + $0xd2c] sm:$0xf0] }
 0x51f   : > { %9762 = vmatpush.bf16.msrb.mxu3 %v13616_v9  ;;  %v13472_v53 = vor.u32 %v14834_v15, %v13471_v41  ;;  %v13600_v0 = vor.u32 %v14866_v35, %v13599_v29  ;;  %v22180_v17 = vadd.f32 %v22020_v56, %v21599_v60  ;;  %v22184_v30 = vadd.f32 %v22022_v40, %v21637_v55  ;;  %v14762_v40 = vld [vmem:[#allocation17 + $0xc2c] sm:$0xf0]  ;;  %v13439_v62 = vld [vmem:[#allocation17 + $0xe20] sm:$0xf] }
 0x520   : > { %v22175_v12 = vpop.eup %15905  ;;  %v5072_v42 = vadd.f32 %v22125_v13, %v5071_v45  ;;  %v5094_v60 = vand.u32 2147483648, %v22123_v51  ;;  %9724 = vmatpush.bf16.msra.mxu0 %v13216_v31  ;;  %9737 = vmatpush.bf16.msra.mxu1 %v13344_v24  ;;  %v13200_v55 = vor.u32 %v14766_v38, %v13199_v44  ;;  %v13328_v56 = vor.u32 %v14798_v25, %v13327_v23  ;;  %v14826_v6 = vld [vmem:[#allocation17 + $0xe2c] sm:$0xf0]  ;;  %v13567_v34 = vld [vmem:[#allocation17 + $0xf20] sm:$0xf] }
 0x521   : > { %v5084_v11 = vmul.f32 %v22175_v12, %v22123_v51  ;;  %9750 = vmatpush.bf16.msrb.mxu2 %v13472_v53  ;;  %v11627_v48 = vmul.f32 -1.442695, %v22180_v17  ;;  %v11628_v3 = vmul.f32 -1.442695, %v22184_v30  ;;  %v13456_v20 = vor.u32 %v14830_v39, %v13455_v14  ;;  %v14858_v1 = vld [vmem:[#allocation17 + $0xf2c] sm:$0xf0] }
 0x522   : > { %v5076_v36 = vsel %vm22190_vm1, %v22125_v13, %v5072_v42  ;;  %v15908_v26 = vpop.eup %15907  ;;  %vm5089_vm6 = vweird.f32 %v22175_v12  ;;  %v13584_v2 = vor.u32 %v14862_v18, %v13583_v8  ;;  %v13184_v5 = vor.u32 %v14762_v40, %v13183_v54  ;;  %v14758_v9 = vld [vmem:[#allocation17 + $0xc0c] sm:$0xf0]  ;;  %v13295_v38 = vld [vmem:[#allocation17 + $0xd00] sm:$0xf] }
 0x523   : > { %v5081_v19 = vsel %vm22164_vm9, %v5080_v50, %v5076_v36  ;;  %v5085_v49 = vsub.f32 1.0, %v5084_v11  ;;  %9763 = vmatpush.bf16.msrb.mxu3 %v13600_v0  ;;  %v15910_v4 = vpop.eup %15909  ;;  %v22206_v28 = vadd.f32 1.0, %v15908_v26  ;;  %15911 = vpow2.f32 %v11627_v48  ;;  %v13167_v50 = vld [vmem:[#allocation17 + $0xc00] sm:$0xf]  ;;  %v14790_v45 = vld [vmem:[#allocation17 + $0xd0c] sm:$0xf0] }
 0x524   : > { %v5456_v13 = vmul.f32 %v5081_v19, %v22018_v46  ;;  %v22209_v15 = vadd.f32 1.0, %v15910_v4  ;;  %15913 = vpow2.f32 %v11628_v3  ;;  %9725 = vmatpush.bf16.msra.mxu0 %v13200_v55  ;;  %9738 = vmatpush.bf16.msra.mxu1 %v13328_v56  ;;  %v13312_v33 = vor.u32 %v14794_v47, %v13311_v52  ;;  %v13423_v25 = vld [vmem:[#allocation17 + $0xe00] sm:$0xf]  ;;  %v14822_v31 = vld [vmem:[#allocation17 + $0xe0c] sm:$0xf0] }
 0x525   : > { %v5086_v41 = vmul.f32 %v22175_v12, %v5085_v49  ;;  %v5599_v29 = vadd.f32 %v22069_v10, %v22154_v59  ;;  %v5587_v46 = vadd.f32 %v22105_v32, %v5446_v58  ;;  %15915 = vrcp.f32 %v22206_v28  ;;  %9751 = vmatpush.bf16.msrb.mxu2 %v13456_v20  ;;  %v13551_v14 = vld [vmem:[#allocation17 + $0xf00] sm:$0xf]  ;;  %v14854_v39 = vld [vmem:[#allocation17 + $0xf0c] sm:$0xf0] }
 0x526   : > { %v13440_v35 = vor.u32 %v14826_v6, %v13439_v62  ;;  %vm5088_vm4 = vweird.f32 %v22123_v51  ;;  %15917 = vrcp.f32 %v22209_v15  ;;  %v22218_v23 = vmul.f32 0.015625, %v5646_v63  ;;  %v13791_v3 = vld [vmem:[#allocation17 + $0x10e0] sm:$0xf]  ;;  %v14914_v19 = vld [vmem:[#allocation17 + $0x10ec] sm:$0xf0] }
 0x527   : > { %v5087_v44 = vadd.f32 %v22175_v12, %v5086_v41  ;;  %9764 = vmatpush.bf16.msrb.mxu3 %v13584_v2  ;;  %v5600_v10 = vadd.f32 %v5599_v29, %v22173_v57  ;;  %v22221_v32 = vadd.f32 %v5587_v46, %v5456_v13  ;;  %vm5090_vm11 = vmor %vm5088_vm4, %vm5089_vm6  ;;  %v5095_v59 = vor.u32 1.1754944e-38, %v5094_v60  ;;  %v13919_v4 = vld [vmem:[#allocation17 + $0x11e0] sm:$0xf] }
 0x528   : > { %v13568_v58 = vor.u32 %v14858_v1, %v13567_v34  ;;  %vm5093_vm14 = vcmp.eq.f32.partialorder %v5092_v7, 8.507059e+37  ;;  %9726 = vmatpush.bf16.msra.mxu0 %v13184_v5  ;;  %9739 = vmatpush.bf16.msra.mxu1 %v13312_v33  ;;  %v9626_v53 = vadd.f32 %v22065_v22, %v21883_v16  ;;  %v13168_v57 = vor.u32 %v14758_v9, %v13167_v50  ;;  %v23275_v5 = vld [vmem:[#allocation47_spill] sm:$0xff]  ;;  %v14946_v33 = vld [vmem:[#allocation17 + $0x11ec] sm:$0xf0]  ;;  %v14047_v34 = vld [vmem:[#allocation17 + $0x12e0] sm:$0xf] }
 0x529   : > { %v5091_v24 = vsel %vm5090_vm11, %v22175_v12, %v5087_v44  ;;  %v15912_v42 = vpop.eup %15911  ;;  %v5227_v8 = vand.u32 2147483647, %v22206_v28  ;;  %v5229_v18 = vand.u32 2147483648, %v22206_v28  ;;  %9752 = vmatpush.bf16.msrb.mxu2 %v13440_v35  ;;  %v13296_v54 = vor.u32 %v14790_v45, %v13295_v38  ;;  %v14978_v1 = vld [vmem:[#allocation17 + $0x12ec] sm:$0xf0] }
 0x52a   : > { %v5096_v0 = vsel %vm5093_vm14, %v5095_v59, %v5091_v24  ;;  %v15914_v12 = vpop.eup %15913  ;;  %v5244_v51 = vand.u32 2147483648, %v22209_v15  ;;  %v22233_v7 = vadd.f32 1.0, %v15912_v42  ;;  %v9639_v21 = vadd.f32 %v22067_v43, %v9626_v53  ;;  %v14175_v50 = vld [vmem:[#allocation17 + $0x13e0] sm:$0xf]  ;;  %v15010_v9 = vld [vmem:[#allocation17 + $0x13ec] sm:$0xf0] }
 0x52b   : > { %9765 = vmatpush.bf16.msrb.mxu3 %v13568_v58  ;;  %v13424_v16 = vor.u32 %v14822_v31, %v13423_v25  ;;  %v22236_v22 = vpop.eup %15915  ;;  %v5457_v11 = vmul.f32 %v5096_v0, %v22049_v27  ;;  %v5242_v60 = vand.u32 2147483647, %v22209_v15  ;;  %v22240_v55 = vadd.f32 1.0, %v15914_v12  ;;  %v13775_v58 = vld [vmem:[#allocation17 + $0x10c0] sm:$0xf] }
 0x52c   : > { %v13552_v56 = vor.u32 %v14854_v39, %v13551_v14  ;;  %v22242_v40 = vpop.eup %15917  ;;  %v5219_v52 = vmul.f32 %v22236_v22, %v22206_v28  ;;  %vm5223_vm13 = vweird.f32 %v22206_v28  ;;  %15919 = vrcp.f32 %v22233_v7  ;;  %9727 = vmatpush.bf16.msra.mxu0 %v13168_v57  ;;  %9740 = vmatpush.bf16.msra.mxu1 %v13296_v54  ;;  %v14910_v25 = vld [vmem:[#allocation17 + $0x10cc] sm:$0xf0]  ;;  %v13903_v39 = vld [vmem:[#allocation17 + $0x11c0] sm:$0xf] }
 0x52d   : > { %v5662_v43 = vperm.slane %v22218_v23, 0  ;;  %vm22249_vm7 = vcmp.eq.f32.partialorder %v5227_v8, 8.507059e+37  ;;  %v5234_v36 = vmul.f32 %v22242_v40, %v22209_v15  ;;  %vm5238_vm8 = vweird.f32 %v22209_v15  ;;  %9753 = vmatpush.bf16.msrb.mxu2 %v13424_v16  ;;  %v14942_v28 = vld [vmem:[#allocation17 + $0x11cc] sm:$0xf0]  ;;  %v14031_v42 = vld [vmem:[#allocation17 + $0x12c0] sm:$0xf] }
 0x52e   : > { %v5663_v48 = vperm.slane %v22218_v23, 1  ;;  %v5220_v20 = vsub.f32 1.0, %v5219_v52  ;;  %v5230_v47 = vor.u32 1.1754944e-38, %v5229_v18  ;;  %v22257_v26 = vor.u32 1.1754944e-38, %v5244_v51  ;;  %v14159_v16 = vld [vmem:[#allocation17 + $0x13c0] sm:$0xf] }
 0x52f   : > { %15921 = vrcp.f32 %v22240_v55  ;;  %9766 = vmatpush.bf16.msrb.mxu3 %v13552_v56  ;;  %v22260_v49 = vadd.f32 %v5600_v10, %v5457_v11  ;;  %vm5224_vm10 = vweird.f32 %v22236_v22  ;;  %v5235_v2 = vsub.f32 1.0, %v5234_v36  ;;  %v15006_v56 = vld [vmem:[#allocation17 + $0x13cc] sm:$0xf0]  ;;  %v13759_v52 = vld [vmem:[#allocation17 + $0x10a0] sm:$0xf] }
 0x530   : > { %vm22263_vm12 = vcmp.eq.f32.partialorder %v5242_v60, 8.507059e+37  ;;  %v5377_v6 = vand.u32 2147483647, %v22233_v7  ;;  %v5221_v13 = vmul.f32 %v22236_v22, %v5220_v20  ;;  %vm5239_vm5 = vweird.f32 %v22242_v40  ;;  %vm22290_vm9 = vmor %vm5223_vm13, %vm5224_vm10  ;;  %v14998_v57 = vld [vmem:[#allocation17 + $0x138c] sm:$0xf0] }
 0x531   : > { %v22271_v63 = vadd.f32 %v23275_v5, %v9639_v21  ;;  %v22273_v41 = vpack.c.bf16 %v5662_v43, %v5662_v43  ;;  %v5236_v29 = vmul.f32 %v22242_v40, %v5235_v2  ;;  %vm5373_vm3 = vweird.f32 %v22233_v7  ;;  %vm22312_vm6 = vmor %vm5238_vm8, %vm5239_vm5  ;;  %v14974_v21 = vld [vmem:[#allocation17 + $0x12cc] sm:$0xf0] }
 0x532   : > { %v5379_v46 = vand.u32 2147483648, %v22233_v7  ;;  %v22278_v35 = vpack.c.bf16 %v5663_v48, %v5663_v48  ;;  %v22280_v44 = vpop.eup %15919  ;;  %v5222_v38 = vadd.f32 %v22236_v22, %v5221_v13  ;;  %v5664_v45 = vperm.slane %v22218_v23, 2  ;;  %v14906_v48 = vld [vmem:[#allocation17 + $0x10ac] sm:$0xf0] }
 0x533   : > { %9676 = vmatmul.bf16.vlgmr.msrb.gmra.mxu0 %v22273_v41  ;;  %v5665_v10 = vperm.slane %v22218_v23, 3  ;;  %v13792_v59 = vor.u32 %v14914_v19, %v13791_v3  ;;  %v5237_v24 = vadd.f32 %v22242_v40, %v5236_v29  ;;  %v5369_v53 = vmul.f32 %v22280_v44, %v22233_v7  ;;  %v13887_v19 = vld [vmem:[#allocation17 + $0x11a0] sm:$0xf]  ;;  %v14938_v2 = vld [vmem:[#allocation17 + $0x11ac] sm:$0xf0] }
 0x534   : > { %vm22297_vm2 = vcmp.eq.f32.partialorder %v5377_v6, 8.507059e+37  ;;  %vm5388_vm1 = vweird.f32 %v22240_v55  ;;  %9689 = vmatmul.bf16.vlgmr.msrb.gmra.mxu1 %v22278_v35  ;;  %v13920_v14 = vor.u32 %v14946_v33, %v13919_v4  ;;  %v5226_v8 = vsel %vm22290_vm9, %v22236_v22, %v5222_v38  ;;  %v14015_v33 = vld [vmem:[#allocation17 + $0x12a0] sm:$0xf] }
 0x535   : > { %v22303_v0 = vpop.eup %15921  ;;  %v22316_v54 = vpack.c.bf16 %v5664_v45, %v5664_v45  ;;  %v22318_v12 = vpack.c.bf16 %v5665_v10, %v5665_v10  ;;  %9772 = vmatpush.bf16.msrb.mxu0 %v13792_v59  ;;  %v14048_v51 = vor.u32 %v14978_v1, %v14047_v34  ;;  %v5231_v11 = vsel %vm22249_vm7, %v5230_v47, %v5226_v8  ;;  %v14970_v34 = vld [vmem:[#allocation17 + $0x12ac] sm:$0xf0]  ;;  %v13743_v38 = vld [vmem:[#allocation17 + $0x1080] sm:$0xf] }
 0x536   : > { %v5241_v22 = vsel %vm22312_vm6, %v22242_v40, %v5237_v24  ;;  %v5370_v15 = vsub.f32 1.0, %v5369_v53  ;;  %v5384_v60 = vmul.f32 %v22303_v0, %v22240_v55  ;;  %9785 = vmatpush.bf16.msrb.mxu1 %v13920_v14  ;;  %vm5374_vm4 = vweird.f32 %v22280_v44  ;;  %v13871_v7 = vld [vmem:[#allocation17 + $0x1180] sm:$0xf] }
 0x537   : > { %v5392_v43 = vand.u32 2147483647, %v22240_v55  ;;  %v5394_v36 = vand.u32 2147483648, %v22240_v55  ;;  %9702 = vmatmul.bf16.vlgmr.msra.gmra.mxu2 %v22316_v54  ;;  %9715 = vmatmul.bf16.vlgmr.msra.gmra.mxu3 %v22318_v12  ;;  %v14176_v27 = vor.u32 %v15010_v9, %v14175_v50  ;;  %v5466_v40 = vmul.f32 %v5231_v11, %v22116_v37  ;;  %v14143_v50 = vld [vmem:[#allocation17 + $0x13a0] sm:$0xf]  ;;  %vm22344_vm14 = vmor %vm5373_vm3, %vm5374_vm4 }
 0x538   : > { %v5371_v3 = vmul.f32 %v22280_v44, %v5370_v15  ;;  %v5385_v20 = vsub.f32 1.0, %v5384_v60  ;;  %9798 = vmatpush.bf16.msra.mxu2 %v14048_v51  ;;  %v13776_v47 = vor.u32 %v14910_v25, %v13775_v58  ;;  %v5246_v6 = vsel %vm22263_vm12, %v22257_v26, %v5241_v22  ;;  %v15002_v9 = vld [vmem:[#allocation17 + $0x13ac] sm:$0xf0]  ;;  %v14127_v51 = vld [vmem:[#allocation17 + $0x1380] sm:$0xf] }
 0x539   : > { %9811 = vmatpush.bf16.msra.mxu3 %v14176_v27  ;;  %v13904_v4 = vor.u32 %v14942_v28, %v13903_v39  ;;  %v14032_v13 = vor.u32 %v14974_v21, %v14031_v42  ;;  %v14160_v5 = vor.u32 %v15006_v56, %v14159_v16  ;;  %vm5389_vm11 = vweird.f32 %v22303_v0  ;;  %v14902_v58 = vld [vmem:[#allocation17 + $0x108c] sm:$0xf0]  ;;  %v13999_v28 = vld [vmem:[#allocation17 + $0x1280] sm:$0xf] }
 0x53a   : > { %v5372_v1 = vadd.f32 %v22280_v44, %v5371_v3  ;;  %v5386_v37 = vmul.f32 %v22303_v0, %v5385_v20  ;;  %9773 = vmatpush.bf16.msrb.mxu0 %v13776_v47  ;;  %v13760_v29 = vor.u32 %v14906_v48, %v13759_v52  ;;  %v5380_v62 = vor.u32 1.1754944e-38, %v5379_v46  ;;  %v14934_v46 = vld [vmem:[#allocation17 + $0x118c] sm:$0xf0]  ;;  %vm5390_vm7 = vmor %vm5388_vm1, %vm5389_vm11  ;;  %v13727_v11 = vld [vmem:[#allocation17 + $0x1060] sm:$0xf] }
 0x53b   : > { %vm22350_vm13 = vcmp.eq.f32.partialorder %v5392_v43, 8.507059e+37  ;;  %v5395_v10 = vor.u32 1.1754944e-38, %v5394_v36  ;;  %9786 = vmatpush.bf16.msrb.mxu1 %v13904_v4  ;;  %v13888_v59 = vor.u32 %v14938_v2, %v13887_v19  ;;  %v5467_v25 = vmul.f32 %v5246_v6, %v22120_v61  ;;  %v14898_v22 = vld [vmem:[#allocation17 + $0x106c] sm:$0xf0]  ;;  %v13855_v56 = vld [vmem:[#allocation17 + $0x1160] sm:$0xf] }
 0x53c   : > { %v5376_v31 = vsel %vm22344_vm14, %v22280_v44, %v5372_v1  ;;  %v5387_v24 = vadd.f32 %v22303_v0, %v5386_v37  ;;  %9799 = vmatpush.bf16.msra.mxu2 %v14032_v13  ;;  %v14016_v53 = vor.u32 %v14970_v34, %v14015_v33  ;;  %v5589_v14 = vadd.f32 %v22221_v32, %v5466_v40  ;;  %v14966_v44 = vld [vmem:[#allocation17 + $0x128c] sm:$0xf0]  ;;  %v13983_v40 = vld [vmem:[#allocation17 + $0x1260] sm:$0xf] }
 0x53d   : > { %v5381_v39 = vsel %vm22297_vm2, %v5380_v62, %v5376_v31  ;;  %9812 = vmatpush.bf16.msra.mxu3 %v14160_v5  ;;  %v14144_v61 = vor.u32 %v15002_v9, %v14143_v50  ;;  %v5666_v42 = vperm.slane %v22218_v23, 4  ;;  %v13744_v32 = vor.u32 %v14902_v58, %v13743_v38  ;;  %v14930_v52 = vld [vmem:[#allocation17 + $0x116c] sm:$0xf0]  ;;  %v14111_v19 = vld [vmem:[#allocation17 + $0x1360] sm:$0xf] }
 0x53e   : > { %v5476_v8 = vmul.f32 %v5381_v39, %v22180_v17  ;;  %v5391_v18 = vsel %vm5390_vm7, %v22303_v0, %v5387_v24  ;;  %9774 = vmatpush.bf16.msrb.mxu0 %v13760_v29  ;;  %v5667_v21 = vperm.slane %v22218_v23, 5  ;;  %v13872_v16 = vor.u32 %v14934_v46, %v13871_v7  ;;  %v14962_v3 = vld [vmem:[#allocation17 + $0x126c] sm:$0xf0]  ;;  %v13711_v6 = vld [vmem:[#allocation17 + $0x1040] sm:$0xf] }
 0x53f   : > { %v5396_v55 = vsel %vm22350_vm13, %v5395_v10, %v5391_v18  ;;  %9787 = vmatpush.bf16.msrb.mxu1 %v13888_v59  ;;  %v5602_v15 = vadd.f32 %v22260_v49, %v5467_v25  ;;  %v14000_v0 = vor.u32 %v14966_v44, %v13999_v28  ;;  %v14128_v43 = vor.u32 %v14998_v57, %v14127_v51  ;;  %v14994_v2 = vld [vmem:[#allocation17 + $0x136c] sm:$0xf0]  ;;  %v13839_v34 = vld [vmem:[#allocation17 + $0x1140] sm:$0xf] }
 0x540   : > { %v5590_v60 = vadd.f32 %v5589_v14, %v5476_v8  ;;  %v5477_v17 = vmul.f32 %v5396_v55, %v22184_v30  ;;  %9800 = vmatpush.bf16.msra.mxu2 %v14016_v53  ;;  %v22374_v36 = vpack.c.bf16 %v5666_v42, %v5666_v42  ;;  %v5668_v27 = vperm.slane %v22218_v23, 6  ;;  %v14894_v4 = vld [vmem:[#allocation17 + $0x104c] sm:$0xf0]  ;;  %v13967_v9 = vld [vmem:[#allocation17 + $0x1240] sm:$0xf] }
 0x541   : > { %9813 = vmatpush.bf16.msra.mxu3 %v14144_v61  ;;  %v5669_v48 = vperm.slane %v22218_v23, 7  ;;  %v22378_v49 = vpack.c.bf16 %v5667_v21, %v5667_v21  ;;  %v13728_v30 = vor.u32 %v14898_v22, %v13727_v11  ;;  %v13856_v23 = vor.u32 %v14930_v52, %v13855_v56  ;;  %v14926_v50 = vld [vmem:[#allocation17 + $0x114c] sm:$0xf0]  ;;  %v14095_v10 = vld [vmem:[#allocation17 + $0x1340] sm:$0xf] }
 0x542   : > { %v5591_v20 = vrot.slane %v5590_v60, 4  ;;  %v5603_v47 = vadd.f32 %v5602_v15, %v5477_v17  ;;  %9775 = vmatpush.bf16.msrb.mxu0 %v13744_v32  ;;  %v13984_v33 = vor.u32 %v14962_v3, %v13983_v40  ;;  %v22382_v1 = vpack.c.bf16 %v5668_v27, %v5668_v27  ;;  %v14958_v38 = vld [vmem:[#allocation17 + $0x124c] sm:$0xf0]  ;;  %v13695_v58 = vld [vmem:[#allocation17 + $0x1020] sm:$0xf] }
 0x543   : > { %9788 = vmatpush.bf16.msrb.mxu1 %v13872_v16  ;;  %9728 = vmatmul.bf16.vlgmr.msra.gmra.mxu0 %v22374_v36  ;;  %v22384_v37 = vpack.c.bf16 %v5669_v48, %v5669_v48  ;;  %v14112_v29 = vor.u32 %v14994_v2, %v14111_v19  ;;  %v13712_v45 = vor.u32 %v14894_v4, %v13711_v6  ;;  %v14990_v59 = vld [vmem:[#allocation17 + $0x134c] sm:$0xf0]  ;;  %v13823_v46 = vld [vmem:[#allocation17 + $0x1120] sm:$0xf]  ;;  %v11745_v17 = vld [vmem:[#allocation17 + $0xf0] sm:$0xf0] }
 0x544   : > { %v5592_v13 = vadd.f32 %v5591_v20, %v5590_v60  ;;  %v5604_v5 = vrot.slane %v5603_v47, 4  ;;  %9801 = vmatpush.bf16.msra.mxu2 %v14000_v0  ;;  %9741 = vmatmul.bf16.vlgmr.msra.gmra.mxu1 %v22378_v49  ;;  %v14890_v25 = vld [vmem:[#allocation17 + $0x102c] sm:$0xf0]  ;;  %v13840_v53 = vor.u32 %v14926_v50, %v13839_v34  ;;  %v13968_v7 = vor.u32 %v14958_v38, %v13967_v9  ;;  %v13951_v61 = vld [vmem:[#allocation17 + $0x1220] sm:$0xf] }
 0x545   : > { %9814 = vmatpush.bf16.msra.mxu3 %v14128_v43  ;;  %v14922_v14 = vld [vmem:[#allocation17 + $0x112c] sm:$0xf0]  ;;  %v14096_v39 = vor.u32 %v14990_v59, %v14095_v10  ;;  %v14079_v44 = vld [vmem:[#allocation17 + $0x1320] sm:$0xf]  ;;  %v13696_v8 = vor.u32 %v14890_v25, %v13695_v58  ;;  %v14400_v60 = vld [vmem:[#allocation17 + $0xe4] sm:$0xf] }
 0x546   : > { %v5593_v26 = vrot.slane %v5592_v13, 2  ;;  %v5605_v62 = vadd.f32 %v5604_v5, %v5603_v47  ;;  %9776 = vmatpush.bf16.msrb.mxu0 %v13728_v30  ;;  %v14954_v28 = vld [vmem:[#allocation17 + $0x122c] sm:$0xf0]  ;;  %v13679_v32 = vld [vmem:[#allocation17 + $0x1000] sm:$0xf]  ;;  %v13824_v22 = vor.u32 %v14922_v14, %v13823_v46  ;;  %v11748_v30 = vor.u32 %v14400_v60, %v11745_v17 }
 0x547   : > { %9754 = vmatmul.bf16.vlgmr.msrb.gmra.mxu2 %v22382_v1  ;;  %9767 = vmatmul.bf16.vlgmr.msrb.gmra.mxu3 %v22384_v37  ;;  %v14986_v18 = vld [vmem:[#allocation17 + $0x132c] sm:$0xf0]  ;;  %v13807_v57 = vld [vmem:[#allocation17 + $0x1100] sm:$0xf]  ;;  %v13952_v15 = vor.u32 %v14954_v28, %v13951_v61  ;;  %v5479_v27 = vld [vmem:[#allocation2 + $0x12] sm:$0x3] }
 0x548   : > { %v5594_v31 = vadd.f32 %v5593_v26, %v5592_v13  ;;  %v5606_v24 = vrot.slane %v5605_v62, 2  ;;  %9789 = vmatpush.bf16.msrb.mxu1 %v13856_v23  ;;  %9802 = vmatpush.bf16.msra.mxu2 %v13984_v33  ;;  %v14886_v51 = vld [vmem:[#allocation17 + $0x100c] sm:$0xf0]  ;;  %v13935_v55 = vld [vmem:[#allocation17 + $0x1200] sm:$0xf]  ;;  %v14080_v0 = vor.u32 %v14986_v18, %v14079_v44 }
 0x549   : > { %9815 = vmatpush.bf16.msra.mxu3 %v14112_v29  ;;  %v14918_v21 = vld [vmem:[#allocation17 + $0x110c] sm:$0xf0]  ;;  %v14063_v52 = vld [vmem:[#allocation17 + $0x1300] sm:$0xf]  ;;  %v13680_v40 = vor.u32 %v14886_v51, %v13679_v32  ;;  %v14432_v3 = vld [vmem:[#allocation17 + $0x1e4] sm:$0xf] }
 0x54a   : > { %v5607_v42 = vadd.f32 %v5606_v24, %v5605_v62  ;;  %9777 = vmatpush.bf16.msrb.mxu0 %v13712_v45  ;;  %v5595_v16 = vrot.slane %v5594_v31, 1  ;;  %v14950_v56 = vld [vmem:[#allocation17 + $0x120c] sm:$0xf0]  ;;  %v11873_v20 = vld [vmem:[#allocation17 + $0x1f0] sm:$0xf0]  ;;  %v13808_v5 = vor.u32 %v14918_v21, %v13807_v57 }
 0x54b   : > { %v14982_v43 = vld [vmem:[#allocation17 + $0x130c] sm:$0xf0]  ;;  %v14464_v47 = vld [vmem:[#allocation17 + $0x2e4] sm:$0xf]  ;;  %v12001_v19 = vld [vmem:[#allocation17 + $0x2f0] sm:$0xf0]  ;;  %v13936_v23 = vor.u32 %v14950_v56, %v13935_v55  ;;  %v11876_v50 = vor.u32 %v14432_v3, %v11873_v20 }
 0x54c   : > { %v5608_v11 = vrot.slane %v5607_v42, 1  ;;  %9790 = vmatpush.bf16.msrb.mxu1 %v13840_v53  ;;  %9803 = vmatpush.bf16.msra.mxu2 %v13968_v7  ;;  %v14496_v2 = vld [vmem:[#allocation17 + $0x3e4] sm:$0xf]  ;;  %v12129_v6 = vld [vmem:[#allocation17 + $0x3f0] sm:$0xf0]  ;;  %v5596_v4 = vadd.f32 %v5595_v16, %v5594_v31  ;;  %v14064_v29 = vor.u32 %v14982_v43, %v14063_v52  ;;  %v12004_v38 = vor.u32 %v14464_v47, %v12001_v19 }
 0x54d   : > { %9816 = vmatpush.bf16.msra.mxu3 %v14096_v39  ;;  %v14396_v33 = vld [vmem:[#allocation17 + $0xc4] sm:$0xf]  ;;  %v11729_v34 = vld [vmem:[#allocation17 + $0xd0] sm:$0xf0]  ;;  %v12132_v26 = vor.u32 %v14496_v2, %v12129_v6 }
 0x54e   : > { %v5609_v48 = vadd.f32 %v5608_v11, %v5607_v42  ;;  %9778 = vmatpush.bf16.msrb.mxu0 %v13696_v8  ;;  %v14428_v62 = vld [vmem:[#allocation17 + $0x1c4] sm:$0xf]  ;;  %v11857_v45 = vld [vmem:[#allocation17 + $0x1d0] sm:$0xf0]  ;;  %v11732_v58 = vor.u32 %v14396_v33, %v11729_v34 }
 0x54f   : > { %v14460_v10 = vld [vmem:[#allocation17 + $0x2c4] sm:$0xf]  ;;  %v11985_v25 = vld [vmem:[#allocation17 + $0x2d0] sm:$0xf0]  ;;  %v11860_v14 = vor.u32 %v14428_v62, %v11857_v45 }
 0x550   : > { %v5627_v13 = vrot.slane %v5609_v48, 7  ;;  %9791 = vmatpush.bf16.msrb.mxu1 %v13824_v22  ;;  %9804 = vmatpush.bf16.msra.mxu2 %v13952_v15  ;;  %v14492_v31 = vld [vmem:[#allocation17 + $0x3c4] sm:$0xf]  ;;  %v12113_v24 = vld [vmem:[#allocation17 + $0x3d0] sm:$0xf0]  ;;  %v11988_v39 = vor.u32 %v14460_v10, %v11985_v25 }
 0x551   : > { %9817 = vmatpush.bf16.msra.mxu3 %v14080_v0  ;;  %v14392_v53 = vld [vmem:[#allocation17 + $0xa4] sm:$0xf]  ;;  %v11713_v7 = vld [vmem:[#allocation17 + $0xb0] sm:$0xf0]  ;;  %v12116_v61 = vor.u32 %v14492_v31, %v12113_v24 }
 0x552   : > { %v5635_v9 = vsel %vm3161_vm0, %v5596_v4, %v5627_v13  ;;  %9779 = vmatpush.bf16.msrb.mxu0 %v13680_v40  ;;  %v14424_v28 = vld [vmem:[#allocation17 + $0x1a4] sm:$0xf]  ;;  %v11841_v44 = vld [vmem:[#allocation17 + $0x1b0] sm:$0xf0]  ;;  %v11716_v8 = vor.u32 %v14392_v53, %v11713_v7  ;;  %vm10921_vm0 = vcmask 24576  }
 0x553   : > { %v5639_v59 = vadd.f32 %v5635_v9, %v5479_v27  ;;  %v14456_v42 = vld [vmem:[#allocation17 + $0x2a4] sm:$0xf]  ;;  %v11969_v18 = vld [vmem:[#allocation17 + $0x2b0] sm:$0xf0]  ;;  %v11844_v55 = vor.u32 %v14424_v28, %v11841_v44 }
 0x554   : > { %9792 = vmatpush.bf16.msrb.mxu1 %v13808_v5  ;;  %9805 = vmatpush.bf16.msra.mxu2 %v13936_v23  ;;  %v14488_v32 = vld [vmem:[#allocation17 + $0x3a4] sm:$0xf]  ;;  %v12097_v51 = vld [vmem:[#allocation17 + $0x3b0] sm:$0xf0]  ;;  %v11972_v22 = vor.u32 %v14456_v42, %v11969_v18 }
 0x555   : > { %5641 = vst.msk [vmem:[#allocation2 + $0x12] sm:$0x3] %vm19558_vm15, %v5639_v59  ;;  %9818 = vmatpush.bf16.msra.mxu3 %v14064_v29  ;;  %v14388_v57 = vld [vmem:[#allocation17 + $0x84] sm:$0xf]  ;;  %v11697_v21 = vld [vmem:[#allocation17 + $0x90] sm:$0xf0]  ;;  %v12100_v15 = vor.u32 %v14488_v32, %v12097_v51 }
 0x556   : > { %9824 = vmatpush.bf16.msra.mxu0 %v11748_v30  ;;  %v14420_v16 = vld [vmem:[#allocation17 + $0x184] sm:$0xf]  ;;  %v11825_v11 = vld [vmem:[#allocation17 + $0x190] sm:$0xf0]  ;;  %v11700_v56 = vor.u32 %v14388_v57, %v11697_v21 }
 0x557   : > { %v14452_v60 = vld [vmem:[#allocation17 + $0x284] sm:$0xf]  ;;  %v11953_v17 = vld [vmem:[#allocation17 + $0x290] sm:$0xf0]  ;;  %v11828_v40 = vor.u32 %v14420_v16, %v11825_v11 }
 0x558   : > { %9837 = vmatpush.bf16.msra.mxu1 %v11876_v50  ;;  %9850 = vmatpush.bf16.msrb.mxu2 %v12004_v38  ;;  %v14484_v0 = vld [vmem:[#allocation17 + $0x384] sm:$0xf]  ;;  %v12081_v52 = vld [vmem:[#allocation17 + $0x390] sm:$0xf0]  ;;  %v11956_v30 = vor.u32 %v14452_v60, %v11953_v17 }
 0x559   : > { %9863 = vmatpush.bf16.msrb.mxu3 %v12132_v26  ;;  %v14384_v43 = vld [vmem:[#allocation17 + $0x64] sm:$0xf]  ;;  %v11681_v27 = vld [vmem:[#allocation17 + $0x70] sm:$0xf0]  ;;  %v12084_v19 = vor.u32 %v14484_v0, %v12081_v52 }
 0x55a   : > { %9825 = vmatpush.bf16.msra.mxu0 %v11732_v58  ;;  %v14416_v3 = vld [vmem:[#allocation17 + $0x164] sm:$0xf]  ;;  %v11809_v20 = vld [vmem:[#allocation17 + $0x170] sm:$0xf0]  ;;  %v11684_v2 = vor.u32 %v14384_v43, %v11681_v27 }
 0x55b   : > { %v14448_v6 = vld [vmem:[#allocation17 + $0x264] sm:$0xf]  ;;  %v11937_v4 = vld [vmem:[#allocation17 + $0x270] sm:$0xf0]  ;;  %v11812_v50 = vor.u32 %v14416_v3, %v11809_v20 }
 0x55c   : > { %9838 = vmatpush.bf16.msra.mxu1 %v11860_v14  ;;  %9851 = vmatpush.bf16.msrb.mxu2 %v11988_v39  ;;  %v5647_v48 = vld [vmem:[#allocation2 + $0x10] sm:$0xf]  ;;  %v14480_v13 = vld [vmem:[#allocation17 + $0x364] sm:$0xf]  ;;  %v12065_v5 = vld [vmem:[#allocation17 + $0x370] sm:$0xf0]  ;;  %v11940_v59 = vor.u32 %v14448_v6, %v11937_v4 }
 0x55d   : > { %9864 = vmatpush.bf16.msrb.mxu3 %v12116_v61  ;;  %v5650_v47 = vmul.f32 0.015625, %v5647_v48  ;;  %v14380_v9 = vld [vmem:[#allocation17 + $0x44] sm:$0xf]  ;;  %v11665_v38 = vld [vmem:[#allocation17 + $0x50] sm:$0xf0]  ;;  %v12068_v58 = vor.u32 %v14480_v13, %v12065_v5 }
 0x55e   : > { %9826 = vmatpush.bf16.msra.mxu0 %v11716_v8  ;;  %v14412_v25 = vld [vmem:[#allocation17 + $0x144] sm:$0xf]  ;;  %v11793_v31 = vld [vmem:[#allocation17 + $0x150] sm:$0xf0]  ;;  %v11668_v53 = vor.u32 %v14380_v9, %v11665_v38 }
 0x55f   : > { %v5670_v23 = vperm.slane %v5650_v47, 0  ;;  %v5671_v33 = vperm.slane %v5650_v47, 1  ;;  %v5672_v34 = vperm.slane %v5650_v47, 2  ;;  %v5673_v29 = vperm.slane %v5650_v47, 3  ;;  %v14444_v24 = vld [vmem:[#allocation17 + $0x244] sm:$0xf] }
 0x560   : > { %9839 = vmatpush.bf16.msra.mxu1 %v11844_v55  ;;  %9852 = vmatpush.bf16.msrb.mxu2 %v11972_v22  ;;  %v11921_v7 = vld [vmem:[#allocation17 + $0x250] sm:$0xf0]  ;;  %v14476_v46 = vld [vmem:[#allocation17 + $0x344] sm:$0xf]  ;;  %v11796_v28 = vor.u32 %v14412_v25, %v11793_v31 }
 0x561   : > { %9865 = vmatpush.bf16.msrb.mxu3 %v12100_v15  ;;  %v22391_v26 = vpack.c.bf16 %v5670_v23, %v5670_v23  ;;  %v22393_v62 = vpack.c.bf16 %v5671_v33, %v5671_v33  ;;  %v22395_v45 = vpack.c.bf16 %v5672_v34, %v5672_v34  ;;  %v22397_v10 = vpack.c.bf16 %v5673_v29, %v5673_v29  ;;  %v12049_v14 = vld [vmem:[#allocation17 + $0x350] sm:$0xf0]  ;;  %v14376_v39 = vld [vmem:[#allocation17 + $0x24] sm:$0xf] }
 0x562   : > { %9827 = vmatpush.bf16.msra.mxu0 %v11700_v56  ;;  %v11649_v61 = vld [vmem:[#allocation17 + $0x30] sm:$0xf0]  ;;  %v11924_v44 = vor.u32 %v14444_v24, %v11921_v7  ;;  %v12052_v42 = vor.u32 %v14476_v46, %v12049_v14  ;;  %v14408_v8 = vld [vmem:[#allocation17 + $0x124] sm:$0xf] }
 0x563   : > { %9793 = vmatmul.bf16.vlgmr.msrb.gmra.mxu1 %v22393_v62  ;;  %9780 = vmatmul.bf16.vlgmr.msrb.gmra.mxu0 %v22391_v26  ;;  %v11777_v18 = vld [vmem:[#allocation17 + $0x130] sm:$0xf0]  ;;  %v14440_v32 = vld [vmem:[#allocation17 + $0x224] sm:$0xf]  ;;  %v11652_v51 = vor.u32 %v14376_v39, %v11649_v61 }
 0x564   : > { %9840 = vmatpush.bf16.msra.mxu1 %v11828_v40  ;;  %9853 = vmatpush.bf16.msrb.mxu2 %v11956_v30  ;;  %v11905_v57 = vld [vmem:[#allocation17 + $0x230] sm:$0xf0]  ;;  %v14472_v21 = vld [vmem:[#allocation17 + $0x324] sm:$0xf]  ;;  %v11780_v15 = vor.u32 %v14408_v8, %v11777_v18 }
 0x565   : > { %9866 = vmatpush.bf16.msrb.mxu3 %v12084_v19  ;;  %9806 = vmatmul.bf16.vlgmr.msra.gmra.mxu2 %v22395_v45  ;;  %v12033_v55 = vld [vmem:[#allocation17 + $0x330] sm:$0xf0]  ;;  %v14372_v16 = vld [vmem:[#allocation17 + $0x4] sm:$0xf]  ;;  %v11908_v56 = vor.u32 %v14440_v32, %v11905_v57 }
 0x566   : > { %9828 = vmatpush.bf16.msra.mxu0 %v11684_v2  ;;  %9819 = vmatmul.bf16.vlgmr.msra.gmra.mxu3 %v22397_v10  ;;  %v11633_v11 = vld [vmem:[#allocation17 + $0x10] sm:$0xf0]  ;;  %v14404_v22 = vld [vmem:[#allocation17 + $0x104] sm:$0xf]  ;;  %v12036_v52 = vor.u32 %v14472_v21, %v12033_v55 }
 0x567   : > { %v11761_v60 = vld [vmem:[#allocation17 + $0x110] sm:$0xf0]  ;;  %v14528_v17 = vld [vmem:[#allocation17 + $0x4e4] sm:$0xf]  ;;  %v11636_v40 = vor.u32 %v14372_v16, %v11633_v11  ;;  %v23288_v16 = vld [vmem:[#allocation39_spill] sm:$0xff] }
 0x568   : > { %9841 = vmatpush.bf16.msra.mxu1 %v11812_v50  ;;  %9854 = vmatpush.bf16.msrb.mxu2 %v11940_v59  ;;  %v12257_v0 = vld [vmem:[#allocation17 + $0x4f0] sm:$0xf0]  ;;  %v14436_v43 = vld [vmem:[#allocation17 + $0x204] sm:$0xf]  ;;  %v11764_v4 = vor.u32 %v14404_v22, %v11761_v60  ;;  %v23290_v22 = vld [vmem:[#allocation41_spill] sm:$0xff] }
 0x569   : > { %9867 = vmatpush.bf16.msrb.mxu3 %v12068_v58  ;;  %v11889_v27 = vld [vmem:[#allocation17 + $0x210] sm:$0xf0]  ;;  %v14468_v48 = vld [vmem:[#allocation17 + $0x304] sm:$0xf]  ;;  %v12260_v30 = vor.u32 %v14528_v17, %v12257_v0 }
 0x56a   : > { %9829 = vmatpush.bf16.msra.mxu0 %v11668_v53  ;;  %v12017_v3 = vld [vmem:[#allocation17 + $0x310] sm:$0xf0]  ;;  %v14560_v20 = vld [vmem:[#allocation17 + $0x5e4] sm:$0xf]  ;;  %v11892_v33 = vor.u32 %v14436_v43, %v11889_v27 }
 0x56b   : > { %v12385_v47 = vld [vmem:[#allocation17 + $0x5f0] sm:$0xf0]  ;;  %v14592_v19 = vld [vmem:[#allocation17 + $0x6e4] sm:$0xf]  ;;  %v12020_v34 = vor.u32 %v14468_v48, %v12017_v3 }
 0x56c   : > { %9842 = vmatpush.bf16.msra.mxu1 %v11796_v28  ;;  %9855 = vmatpush.bf16.msrb.mxu2 %v11924_v44  ;;  %v12513_v2 = vld [vmem:[#allocation17 + $0x6f0] sm:$0xf0]  ;;  %v14624_v6 = vld [vmem:[#allocation17 + $0x7e4] sm:$0xf]  ;;  %v12388_v29 = vor.u32 %v14560_v20, %v12385_v47 }
 0x56d   : > { %9868 = vmatpush.bf16.msrb.mxu3 %v12052_v42  ;;  %v12641_v13 = vld [vmem:[#allocation17 + $0x7f0] sm:$0xf0]  ;;  %v14524_v5 = vld [vmem:[#allocation17 + $0x4c4] sm:$0xf]  ;;  %v12516_v50 = vor.u32 %v14592_v19, %v12513_v2 }
 0x56e   : > { %9830 = vmatpush.bf16.msra.mxu0 %v11652_v51  ;;  %v12241_v23 = vld [vmem:[#allocation17 + $0x4d0] sm:$0xf0]  ;;  %v14556_v9 = vld [vmem:[#allocation17 + $0x5c4] sm:$0xf]  ;;  %v12644_v59 = vor.u32 %v14624_v6, %v12641_v13 }
 0x56f   : > { %v12369_v38 = vld [vmem:[#allocation17 + $0x5d0] sm:$0xf0]  ;;  %v12244_v58 = vor.u32 %v14524_v5, %v12241_v23  ;;  %v14588_v25 = vld [vmem:[#allocation17 + $0x6c4] sm:$0xf] }
 0x570   : > { %9843 = vmatpush.bf16.msra.mxu1 %v11780_v15  ;;  %9856 = vmatpush.bf16.msrb.mxu2 %v11908_v56  ;;  %v12497_v31 = vld [vmem:[#allocation17 + $0x6d0] sm:$0xf0]  ;;  %v14620_v24 = vld [vmem:[#allocation17 + $0x7c4] sm:$0xf]  ;;  %v12372_v14 = vor.u32 %v14556_v9, %v12369_v38 }
 0x571   : > { %9869 = vmatpush.bf16.msrb.mxu3 %v12036_v52  ;;  %v12625_v53 = vld [vmem:[#allocation17 + $0x7d0] sm:$0xf0]  ;;  %v14520_v7 = vld [vmem:[#allocation17 + $0x4a4] sm:$0xf]  ;;  %v12500_v39 = vor.u32 %v14588_v25, %v12497_v31 }
 0x572   : > { %9831 = vmatpush.bf16.msra.mxu0 %v11636_v40  ;;  %v12225_v46 = vld [vmem:[#allocation17 + $0x4b0] sm:$0xf0]  ;;  %v14552_v61 = vld [vmem:[#allocation17 + $0x5a4] sm:$0xf]  ;;  %v12628_v44 = vor.u32 %v14620_v24, %v12625_v53 }
 0x573   : > { %v12353_v28 = vld [vmem:[#allocation17 + $0x5b0] sm:$0xf0]  ;;  %v12228_v42 = vor.u32 %v14520_v7, %v12225_v46  ;;  %v14584_v8 = vld [vmem:[#allocation17 + $0x6a4] sm:$0xf] }
 0x574   : > { %9844 = vmatpush.bf16.msra.mxu1 %v11764_v4  ;;  %9857 = vmatpush.bf16.msrb.mxu2 %v11892_v33  ;;  %v12481_v18 = vld [vmem:[#allocation17 + $0x6b0] sm:$0xf0]  ;;  %v14616_v32 = vld [vmem:[#allocation17 + $0x7a4] sm:$0xf]  ;;  %v12356_v15 = vor.u32 %v14552_v61, %v12353_v28 }
 0x575   : > { %9870 = vmatpush.bf16.msrb.mxu3 %v12020_v34  ;;  %v12609_v51 = vld [vmem:[#allocation17 + $0x7b0] sm:$0xf0]  ;;  %v14516_v57 = vld [vmem:[#allocation17 + $0x484] sm:$0xf]  ;;  %v12484_v60 = vor.u32 %v14584_v8, %v12481_v18 }
 0x576   : > { %9876 = vmatpush.bf16.msrb.mxu0 %v12260_v30  ;;  %v12209_v21 = vld [vmem:[#allocation17 + $0x490] sm:$0xf0]  ;;  %v23289_v11 = vld [vmem:[#allocation40_spill] sm:$0xff]  ;;  %v12612_v56 = vor.u32 %v14616_v32, %v12609_v51 }
 0x577   : > { %v23287_v55 = vld [vmem:[#allocation38_spill] sm:$0xff]  ;;  %9845 = vmatmul.bf16.vlgmr.msra.gmra.mxu1 %v23288_v16  ;;  %9858 = vmatmul.bf16.vlgmr.msrb.gmra.mxu2 %v23289_v11  ;;  %v14548_v17 = vld [vmem:[#allocation17 + $0x584] sm:$0xf]  ;;  %v12212_v52 = vor.u32 %v14516_v57, %v12209_v21 }
 0x578   : > { %9889 = vmatpush.bf16.msrb.mxu1 %v12388_v29  ;;  %9902 = vmatpush.bf16.msra.mxu2 %v12516_v50  ;;  %v12337_v0 = vld [vmem:[#allocation17 + $0x590] sm:$0xf0]  ;;  %v14580_v43 = vld [vmem:[#allocation17 + $0x684] sm:$0xf] }
 0x579   : > { %9915 = vmatpush.bf16.msra.mxu3 %v12644_v59  ;;  %9832 = vmatmul.bf16.vlgmr.msra.gmra.mxu0 %v23287_v55  ;;  %v12465_v27 = vld [vmem:[#allocation17 + $0x690] sm:$0xf0]  ;;  %v14612_v48 = vld [vmem:[#allocation17 + $0x784] sm:$0xf]  ;;  %v12340_v47 = vor.u32 %v14548_v17, %v12337_v0 }
 0x57a   : > { %9877 = vmatpush.bf16.msrb.mxu0 %v12244_v58  ;;  %9871 = vmatmul.bf16.vlgmr.msrb.gmra.mxu3 %v23290_v22  ;;  %v12593_v40 = vld [vmem:[#allocation17 + $0x790] sm:$0xf0]  ;;  %v14512_v3 = vld [vmem:[#allocation17 + $0x464] sm:$0xf]  ;;  %v12468_v30 = vor.u32 %v14580_v43, %v12465_v27 }
 0x57b   : > { %v12193_v20 = vld [vmem:[#allocation17 + $0x470] sm:$0xf0]  ;;  %v14544_v19 = vld [vmem:[#allocation17 + $0x564] sm:$0xf]  ;;  %v12596_v6 = vor.u32 %v14612_v48, %v12593_v40 }
 0x57c   : > { %9890 = vmatpush.bf16.msrb.mxu1 %v12372_v14  ;;  %9903 = vmatpush.bf16.msra.mxu2 %v12500_v39  ;;  %v12321_v2 = vld [vmem:[#allocation17 + $0x570] sm:$0xf0]  ;;  %v12196_v4 = vor.u32 %v14512_v3, %v12193_v20  ;;  %v14576_v13 = vld [vmem:[#allocation17 + $0x664] sm:$0xf] }
 0x57d   : > { %9916 = vmatpush.bf16.msra.mxu3 %v12628_v44  ;;  %v12449_v5 = vld [vmem:[#allocation17 + $0x670] sm:$0xf0]  ;;  %v14608_v23 = vld [vmem:[#allocation17 + $0x764] sm:$0xf]  ;;  %v12324_v50 = vor.u32 %v14544_v19, %v12321_v2 }
 0x57e   : > { %9878 = vmatpush.bf16.msrb.mxu0 %v12228_v42  ;;  %v12577_v33 = vld [vmem:[#allocation17 + $0x770] sm:$0xf0]  ;;  %v14508_v34 = vld [vmem:[#allocation17 + $0x444] sm:$0xf]  ;;  %v12452_v9 = vor.u32 %v14576_v13, %v12449_v5 }
 0x57f   : > { %v12177_v29 = vld [vmem:[#allocation17 + $0x450] sm:$0xf0]  ;;  %v14540_v38 = vld [vmem:[#allocation17 + $0x544] sm:$0xf]  ;;  %v12580_v58 = vor.u32 %v14608_v23, %v12577_v33 }
 0x580   : > { %9891 = vmatpush.bf16.msrb.mxu1 %v12356_v15  ;;  %9904 = vmatpush.bf16.msra.mxu2 %v12484_v60  ;;  %v12305_v59 = vld [vmem:[#allocation17 + $0x550] sm:$0xf0]  ;;  %v12180_v25 = vor.u32 %v14508_v34, %v12177_v29  ;;  %v14572_v31 = vld [vmem:[#allocation17 + $0x644] sm:$0xf] }
 0x581   : > { %9917 = vmatpush.bf16.msra.mxu3 %v12612_v56  ;;  %v12433_v24 = vld [vmem:[#allocation17 + $0x650] sm:$0xf0]  ;;  %v14604_v53 = vld [vmem:[#allocation17 + $0x744] sm:$0xf]  ;;  %v12308_v39 = vor.u32 %v14540_v38, %v12305_v59 }
 0x582   : > { %9879 = vmatpush.bf16.msrb.mxu0 %v12212_v52  ;;  %v12561_v7 = vld [vmem:[#allocation17 + $0x750] sm:$0xf0]  ;;  %v14504_v46 = vld [vmem:[#allocation17 + $0x424] sm:$0xf]  ;;  %v12436_v61 = vor.u32 %v14572_v31, %v12433_v24 }
 0x583   : > { %v12161_v14 = vld [vmem:[#allocation17 + $0x430] sm:$0xf0]  ;;  %v14536_v28 = vld [vmem:[#allocation17 + $0x524] sm:$0xf]  ;;  %v12564_v42 = vor.u32 %v14604_v53, %v12561_v7 }
 0x584   : > { %9892 = vmatpush.bf16.msrb.mxu1 %v12340_v47  ;;  %9905 = vmatpush.bf16.msra.mxu2 %v12468_v30  ;;  %v12289_v44 = vld [vmem:[#allocation17 + $0x530] sm:$0xf0]  ;;  %v12164_v8 = vor.u32 %v14504_v46, %v12161_v14  ;;  %v14568_v18 = vld [vmem:[#allocation17 + $0x624] sm:$0xf] }
 0x585   : > { %9918 = vmatpush.bf16.msra.mxu3 %v12596_v6  ;;  %v12417_v32 = vld [vmem:[#allocation17 + $0x630] sm:$0xf0]  ;;  %v14600_v51 = vld [vmem:[#allocation17 + $0x724] sm:$0xf]  ;;  %v12292_v0 = vor.u32 %v14536_v28, %v12289_v44 }
 0x586   : > { %9880 = vmatpush.bf16.msrb.mxu0 %v12196_v4  ;;  %v12545_v57 = vld [vmem:[#allocation17 + $0x730] sm:$0xf0]  ;;  %v14500_v21 = vld [vmem:[#allocation17 + $0x404] sm:$0xf]  ;;  %v12420_v56 = vor.u32 %v14568_v18, %v12417_v32 }
 0x587   : > { %v12145_v15 = vld [vmem:[#allocation17 + $0x410] sm:$0xf0]  ;;  %v14656_v60 = vld [vmem:[#allocation17 + $0x8e4] sm:$0xf]  ;;  %v12548_v48 = vor.u32 %v14600_v51, %v12545_v57  ;;  %v23292_v51 = vld [vmem:[#allocation45_spill] sm:$0xff] }
 0x588   : > { %9893 = vmatpush.bf16.msrb.mxu1 %v12324_v50  ;;  %9906 = vmatpush.bf16.msra.mxu2 %v12452_v9  ;;  %v12769_v17 = vld [vmem:[#allocation17 + $0x8f0] sm:$0xf0]  ;;  %v14532_v52 = vld [vmem:[#allocation17 + $0x504] sm:$0xf]  ;;  %v12148_v40 = vor.u32 %v14500_v21, %v12145_v15 }
 0x589   : > { %9919 = vmatpush.bf16.msra.mxu3 %v12580_v58  ;;  %v12273_v43 = vld [vmem:[#allocation17 + $0x510] sm:$0xf0]  ;;  %v14564_v27 = vld [vmem:[#allocation17 + $0x604] sm:$0xf]  ;;  %v12772_v30 = vor.u32 %v14656_v60, %v12769_v17  ;;  %v23294_v17 = vld [vmem:[#allocation43_spill] sm:$0xff] }
 0x58a   : > { %9881 = vmatpush.bf16.msrb.mxu0 %v12180_v25  ;;  %v12401_v3 = vld [vmem:[#allocation17 + $0x610] sm:$0xf0]  ;;  %v14596_v20 = vld [vmem:[#allocation17 + $0x704] sm:$0xf]  ;;  %v12276_v23 = vor.u32 %v14532_v52, %v12273_v43 }
 0x58b   : > { %v12529_v47 = vld [vmem:[#allocation17 + $0x710] sm:$0xf0]  ;;  %v14688_v19 = vld [vmem:[#allocation17 + $0x9e4] sm:$0xf]  ;;  %v12404_v33 = vor.u32 %v14564_v27, %v12401_v3 }
 0x58c   : > { %9894 = vmatpush.bf16.msrb.mxu1 %v12308_v39  ;;  %9907 = vmatpush.bf16.msra.mxu2 %v12436_v61  ;;  %v12897_v2 = vld [vmem:[#allocation17 + $0x9f0] sm:$0xf0]  ;;  %v14720_v6 = vld [vmem:[#allocation17 + $0xae4] sm:$0xf]  ;;  %v12532_v34 = vor.u32 %v14596_v20, %v12529_v47 }
 0x58d   : > { %9920 = vmatpush.bf16.msra.mxu3 %v12564_v42  ;;  %v13025_v4 = vld [vmem:[#allocation17 + $0xaf0] sm:$0xf0]  ;;  %v14752_v13 = vld [vmem:[#allocation17 + $0xbe4] sm:$0xf]  ;;  %v12900_v29 = vor.u32 %v14688_v19, %v12897_v2 }
 0x58e   : > { %9882 = vmatpush.bf16.msrb.mxu0 %v12164_v8  ;;  %v13153_v5 = vld [vmem:[#allocation17 + $0xbf0] sm:$0xf0]  ;;  %v14652_v50 = vld [vmem:[#allocation17 + $0x8c4] sm:$0xf]  ;;  %v13028_v38 = vor.u32 %v14720_v6, %v13025_v4 }
 0x58f   : > { %v12753_v9 = vld [vmem:[#allocation17 + $0x8d0] sm:$0xf0]  ;;  %v13156_v59 = vor.u32 %v14752_v13, %v13153_v5  ;;  %v14684_v58 = vld [vmem:[#allocation17 + $0x9c4] sm:$0xf] }
 0x590   : > { %9895 = vmatpush.bf16.msrb.mxu1 %v12292_v0  ;;  %9908 = vmatpush.bf16.msra.mxu2 %v12420_v56  ;;  %v12881_v25 = vld [vmem:[#allocation17 + $0x9d0] sm:$0xf0]  ;;  %v14716_v31 = vld [vmem:[#allocation17 + $0xac4] sm:$0xf]  ;;  %v12756_v46 = vor.u32 %v14652_v50, %v12753_v9 }
 0x591   : > { %9921 = vmatpush.bf16.msra.mxu3 %v12548_v48  ;;  %v13009_v24 = vld [vmem:[#allocation17 + $0xad0] sm:$0xf0]  ;;  %v14748_v53 = vld [vmem:[#allocation17 + $0xbc4] sm:$0xf]  ;;  %v12884_v14 = vor.u32 %v14684_v58, %v12881_v25 }
 0x592   : > { %9883 = vmatpush.bf16.msrb.mxu0 %v12148_v40  ;;  %v13137_v7 = vld [vmem:[#allocation17 + $0xbd0] sm:$0xf0]  ;;  %v14648_v39 = vld [vmem:[#allocation17 + $0x8a4] sm:$0xf]  ;;  %v13012_v28 = vor.u32 %v14716_v31, %v13009_v24 }
 0x593   : > { %v12737_v61 = vld [vmem:[#allocation17 + $0x8b0] sm:$0xf0]  ;;  %v13140_v44 = vor.u32 %v14748_v53, %v13137_v7  ;;  %v14680_v42 = vld [vmem:[#allocation17 + $0x9a4] sm:$0xf] }
 0x594   : > { %9896 = vmatpush.bf16.msrb.mxu1 %v12276_v23  ;;  %9909 = vmatpush.bf16.msra.mxu2 %v12404_v33  ;;  %v12865_v8 = vld [vmem:[#allocation17 + $0x9b0] sm:$0xf0]  ;;  %v14712_v18 = vld [vmem:[#allocation17 + $0xaa4] sm:$0xf]  ;;  %v12740_v0 = vor.u32 %v14648_v39, %v12737_v61 }
 0x595   : > { %9922 = vmatpush.bf16.msra.mxu3 %v12532_v34  ;;  %v23291_v32 = vld [vmem:[#allocation44_spill] sm:$0xff]  ;;  %v12993_v57 = vld [vmem:[#allocation17 + $0xab0] sm:$0xf0]  ;;  %v12868_v56 = vor.u32 %v14680_v42, %v12865_v8 }
 0x596   : > { %9928 = vmatpush.bf16.msra.mxu0 %v12772_v30  ;;  %v14744_v21 = vld [vmem:[#allocation17 + $0xba4] sm:$0xf]  ;;  %v13121_v15 = vld [vmem:[#allocation17 + $0xbb0] sm:$0xf0]  ;;  %v12996_v27 = vor.u32 %v14712_v18, %v12993_v57 }
 0x597   : > { %9884 = vmatmul.bf16.vlgmr.msrb.gmra.mxu0 %v23291_v32  ;;  %9897 = vmatmul.bf16.vlgmr.msrb.gmra.mxu1 %v23292_v51  ;;  %v23293_v60 = vld [vmem:[#allocation42_spill] sm:$0xff]  ;;  %v14644_v52 = vld [vmem:[#allocation17 + $0x884] sm:$0xf]  ;;  %v13124_v48 = vor.u32 %v14744_v21, %v13121_v15 }
 0x598   : > { %9941 = vmatpush.bf16.msra.mxu1 %v12900_v29  ;;  %9954 = vmatpush.bf16.msrb.mxu2 %v13028_v38  ;;  %v12721_v43 = vld [vmem:[#allocation17 + $0x890] sm:$0xf0]  ;;  %v14676_v40 = vld [vmem:[#allocation17 + $0x984] sm:$0xf] }
 0x599   : > { %9967 = vmatpush.bf16.msrb.mxu3 %v13156_v59  ;;  %9910 = vmatmul.bf16.vlgmr.msra.gmra.mxu2 %v23293_v60  ;;  %v12849_v3 = vld [vmem:[#allocation17 + $0x990] sm:$0xf0]  ;;  %v14708_v20 = vld [vmem:[#allocation17 + $0xa84] sm:$0xf]  ;;  %v12724_v2 = vor.u32 %v14644_v52, %v12721_v43 }
 0x59a   : > { %9923 = vmatmul.bf16.vlgmr.msra.gmra.mxu3 %v23294_v17  ;;  %9929 = vmatpush.bf16.msra.mxu0 %v12756_v46  ;;  %v12977_v47 = vld [vmem:[#allocation17 + $0xa90] sm:$0xf0]  ;;  %v14740_v30 = vld [vmem:[#allocation17 + $0xb84] sm:$0xf]  ;;  %v12852_v6 = vor.u32 %v14676_v40, %v12849_v3 }
 0x59b   : > { %v13105_v19 = vld [vmem:[#allocation17 + $0xb90] sm:$0xf0]  ;;  %v14640_v4 = vld [vmem:[#allocation17 + $0x864] sm:$0xf]  ;;  %v12980_v5 = vor.u32 %v14708_v20, %v12977_v47 }
 0x59c   : > { %9942 = vmatpush.bf16.msra.mxu1 %v12884_v14  ;;  %9955 = vmatpush.bf16.msrb.mxu2 %v13012_v28  ;;  %v12705_v13 = vld [vmem:[#allocation17 + $0x870] sm:$0xf0]  ;;  %v13108_v23 = vor.u32 %v14740_v30, %v13105_v19  ;;  %v14672_v33 = vld [vmem:[#allocation17 + $0x964] sm:$0xf] }
 0x59d   : > { %9968 = vmatpush.bf16.msrb.mxu3 %v13140_v44  ;;  %v12833_v34 = vld [vmem:[#allocation17 + $0x970] sm:$0xf0]  ;;  %v14704_v29 = vld [vmem:[#allocation17 + $0xa64] sm:$0xf]  ;;  %v12708_v59 = vor.u32 %v14640_v4, %v12705_v13 }
 0x59e   : > { %9930 = vmatpush.bf16.msra.mxu0 %v12740_v0  ;;  %v12961_v50 = vld [vmem:[#allocation17 + $0xa70] sm:$0xf0]  ;;  %v14736_v9 = vld [vmem:[#allocation17 + $0xb64] sm:$0xf]  ;;  %v12836_v58 = vor.u32 %v14672_v33, %v12833_v34 }
 0x59f   : > { %v13089_v38 = vld [vmem:[#allocation17 + $0xb70] sm:$0xf0]  ;;  %v14636_v25 = vld [vmem:[#allocation17 + $0x844] sm:$0xf]  ;;  %v12964_v24 = vor.u32 %v14704_v29, %v12961_v50 }
 0x5a0   : > { %9943 = vmatpush.bf16.msra.mxu1 %v12868_v56  ;;  %9956 = vmatpush.bf16.msrb.mxu2 %v12996_v27  ;;  %v12689_v31 = vld [vmem:[#allocation17 + $0x850] sm:$0xf0]  ;;  %v13092_v53 = vor.u32 %v14736_v9, %v13089_v38  ;;  %v14668_v7 = vld [vmem:[#allocation17 + $0x944] sm:$0xf] }
 0x5a1   : > { %9969 = vmatpush.bf16.msrb.mxu3 %v13124_v48  ;;  %v12817_v46 = vld [vmem:[#allocation17 + $0x950] sm:$0xf0]  ;;  %v14700_v14 = vld [vmem:[#allocation17 + $0xa44] sm:$0xf]  ;;  %v12692_v44 = vor.u32 %v14636_v25, %v12689_v31 }
 0x5a2   : > { %9931 = vmatpush.bf16.msra.mxu0 %v12724_v2  ;;  %v12945_v39 = vld [vmem:[#allocation17 + $0xa50] sm:$0xf0]  ;;  %v14732_v61 = vld [vmem:[#allocation17 + $0xb44] sm:$0xf]  ;;  %v12820_v42 = vor.u32 %v14668_v7, %v12817_v46 }
 0x5a3   : > { %v13073_v28 = vld [vmem:[#allocation17 + $0xb50] sm:$0xf0]  ;;  %v14632_v8 = vld [vmem:[#allocation17 + $0x824] sm:$0xf]  ;;  %v12948_v57 = vor.u32 %v14700_v14, %v12945_v39 }
 0x5a4   : > { %9944 = vmatpush.bf16.msra.mxu1 %v12852_v6  ;;  %9957 = vmatpush.bf16.msrb.mxu2 %v12980_v5  ;;  %v12673_v18 = vld [vmem:[#allocation17 + $0x830] sm:$0xf0]  ;;  %v13076_v21 = vor.u32 %v14732_v61, %v13073_v28  ;;  %v14664_v15 = vld [vmem:[#allocation17 + $0x924] sm:$0xf] }
 0x5a5   : > { %9970 = vmatpush.bf16.msrb.mxu3 %v13108_v23  ;;  %v12801_v0 = vld [vmem:[#allocation17 + $0x930] sm:$0xf0]  ;;  %v14696_v56 = vld [vmem:[#allocation17 + $0xa24] sm:$0xf]  ;;  %v12676_v40 = vor.u32 %v14632_v8, %v12673_v18 }
 0x5a6   : > { %9932 = vmatpush.bf16.msra.mxu0 %v12708_v59  ;;  %v12929_v52 = vld [vmem:[#allocation17 + $0xa30] sm:$0xf0]  ;;  %v14728_v43 = vld [vmem:[#allocation17 + $0xb24] sm:$0xf]  ;;  %v12804_v3 = vor.u32 %v14664_v15, %v12801_v0 }
 0x5a7   : > { %v13057_v27 = vld [vmem:[#allocation17 + $0xb30] sm:$0xf0]  ;;  %v14628_v48 = vld [vmem:[#allocation17 + $0x804] sm:$0xf]  ;;  %v12932_v19 = vor.u32 %v14696_v56, %v12929_v52 }
 0x5a8   : > { %9945 = vmatpush.bf16.msra.mxu1 %v12836_v58  ;;  %9958 = vmatpush.bf16.msrb.mxu2 %v12964_v24  ;;  %v12657_v20 = vld [vmem:[#allocation17 + $0x810] sm:$0xf0]  ;;  %v14660_v47 = vld [vmem:[#allocation17 + $0x904] sm:$0xf]  ;;  %v13060_v2 = vor.u32 %v14728_v43, %v13057_v27 }
 0x5a9   : > { %9971 = vmatpush.bf16.msrb.mxu3 %v13092_v53  ;;  %v12785_v30 = vld [vmem:[#allocation17 + $0x910] sm:$0xf0]  ;;  %v14692_v6 = vld [vmem:[#allocation17 + $0xa04] sm:$0xf]  ;;  %v12660_v9 = vor.u32 %v14628_v48, %v12657_v20 }
 0x5aa   : > { %9933 = vmatpush.bf16.msra.mxu0 %v12692_v44  ;;  %v12913_v4 = vld [vmem:[#allocation17 + $0xa10] sm:$0xf0]  ;;  %v14724_v13 = vld [vmem:[#allocation17 + $0xb04] sm:$0xf]  ;;  %v12788_v38 = vor.u32 %v14660_v47, %v12785_v30 }
 0x5ab   : > { %v13041_v5 = vld [vmem:[#allocation17 + $0xb10] sm:$0xf0]  ;;  %v14784_v23 = vld [vmem:[#allocation17 + $0xce4] sm:$0xf]  ;;  %v12916_v31 = vor.u32 %v14692_v6, %v12913_v4 }
 0x5ac   : > { %9946 = vmatpush.bf16.msra.mxu1 %v12820_v42  ;;  %9959 = vmatpush.bf16.msrb.mxu2 %v12948_v57  ;;  %v13281_v33 = vld [vmem:[#allocation17 + $0xcf0] sm:$0xf0]  ;;  %v14816_v34 = vld [vmem:[#allocation17 + $0xde4] sm:$0xf]  ;;  %v13044_v24 = vor.u32 %v14724_v13, %v13041_v5 }
 0x5ad   : > { %9972 = vmatpush.bf16.msrb.mxu3 %v13076_v21  ;;  %v13409_v29 = vld [vmem:[#allocation17 + $0xdf0] sm:$0xf0]  ;;  %v14848_v50 = vld [vmem:[#allocation17 + $0xee4] sm:$0xf]  ;;  %v13284_v53 = vor.u32 %v14784_v23, %v13281_v33 }
 0x5ae   : > { %9934 = vmatpush.bf16.msra.mxu0 %v12676_v40  ;;  %v13537_v59 = vld [vmem:[#allocation17 + $0xef0] sm:$0xf0]  ;;  %v14880_v58 = vld [vmem:[#allocation17 + $0xfe4] sm:$0xf]  ;;  %v13412_v7 = vor.u32 %v14816_v34, %v13409_v29 }
 0x5af   : > { %v13665_v25 = vld [vmem:[#allocation17 + $0xff0] sm:$0xf0]  ;;  %v14780_v46 = vld [vmem:[#allocation17 + $0xcc4] sm:$0xf]  ;;  %v13540_v39 = vor.u32 %v14848_v50, %v13537_v59 }
 0x5b0   : > { %9947 = vmatpush.bf16.msra.mxu1 %v12804_v3  ;;  %9960 = vmatpush.bf16.msrb.mxu2 %v12932_v19  ;;  %v13265_v14 = vld [vmem:[#allocation17 + $0xcd0] sm:$0xf0]  ;;  %v13668_v61 = vor.u32 %v14880_v58, %v13665_v25  ;;  %v14812_v28 = vld [vmem:[#allocation17 + $0xdc4] sm:$0xf] }
 0x5b1   : > { %9973 = vmatpush.bf16.msrb.mxu3 %v13060_v2  ;;  %v13393_v44 = vld [vmem:[#allocation17 + $0xdd0] sm:$0xf0]  ;;  %v14844_v42 = vld [vmem:[#allocation17 + $0xec4] sm:$0xf]  ;;  %v13268_v21 = vor.u32 %v14780_v46, %v13265_v14  ;;  %v9677_v2 = vpop.f32.mrf.mxu0  ;;  %v9690_v4 = vpop.f32.mrf.mxu1 }
 0x5b2   : > { %9935 = vmatpush.bf16.msra.mxu0 %v12660_v9  ;;  %v13521_v8 = vld [vmem:[#allocation17 + $0xed0] sm:$0xf0]  ;;  %v14876_v18 = vld [vmem:[#allocation17 + $0xfc4] sm:$0xf]  ;;  %v13396_v15 = vor.u32 %v14812_v28, %v13393_v44 }
 0x5b3   : > { %v13649_v57 = vld [vmem:[#allocation17 + $0xfd0] sm:$0xf0]  ;;  %v14776_v0 = vld [vmem:[#allocation17 + $0xca4] sm:$0xf]  ;;  %v13524_v52 = vor.u32 %v14844_v42, %v13521_v8 }
 0x5b4   : > { %9948 = vmatpush.bf16.msra.mxu1 %v12788_v38  ;;  %9961 = vmatpush.bf16.msrb.mxu2 %v12916_v31  ;;  %v13249_v56 = vld [vmem:[#allocation17 + $0xcb0] sm:$0xf0]  ;;  %v13652_v43 = vor.u32 %v14876_v18, %v13649_v57  ;;  %v14808_v27 = vld [vmem:[#allocation17 + $0xda4] sm:$0xf] }
 0x5b5   : > { %9974 = vmatpush.bf16.msrb.mxu3 %v13044_v24  ;;  %v13377_v48 = vld [vmem:[#allocation17 + $0xdb0] sm:$0xf0]  ;;  %v14840_v40 = vld [vmem:[#allocation17 + $0xea4] sm:$0xf]  ;;  %9936 = vmatmul.bf16.vlgmr.msra.gmra.mxu0 %v22273_v41  ;;  %v13252_v13 = vor.u32 %v14776_v0, %v13249_v56 }
 0x5b6   : > { %9980 = vmatpush.bf16.msrb.mxu0 %v13284_v53  ;;  %v23295_v3 = vld [vmem:[#allocation48_spill] sm:$0xff]  ;;  %v13505_v47 = vld [vmem:[#allocation17 + $0xeb0] sm:$0xf0]  ;;  %v13380_v5 = vor.u32 %v14808_v27, %v13377_v48 }
 0x5b7   : > { %v9665_v20 = vadd.f32 %v23295_v3, %v22271_v63  ;;  %9949 = vmatmul.bf16.vlgmr.msra.gmra.mxu1 %v22278_v35  ;;  %v14872_v30 = vld [vmem:[#allocation17 + $0xfa4] sm:$0xf]  ;;  %v13633_v19 = vld [vmem:[#allocation17 + $0xfb0] sm:$0xf0]  ;;  %9962 = vmatmul.bf16.vlgmr.msrb.gmra.mxu2 %v22316_v54  ;;  %v13508_v33 = vor.u32 %v14840_v40, %v13505_v47 }
 0x5b8   : > { %9993 = vmatpush.bf16.msrb.mxu1 %v13412_v7  ;;  %10006 = vmatpush.bf16.msra.mxu2 %v13540_v39  ;;  %v14772_v23 = vld [vmem:[#allocation17 + $0xc84] sm:$0xf]  ;;  %v13233_v63 = vld [vmem:[#allocation17 + $0xc90] sm:$0xf0]  ;;  %v13636_v34 = vor.u32 %v14872_v30, %v13633_v19 }
 0x5b9   : > { %10019 = vmatpush.bf16.msra.mxu3 %v13668_v61  ;;  %v9678_v6 = vadd.f32 %v9677_v2, %v9665_v20  ;;  %v14804_v50 = vld [vmem:[#allocation17 + $0xd84] sm:$0xf]  ;;  %v13361_v9 = vld [vmem:[#allocation17 + $0xd90] sm:$0xf0]  ;;  %v13236_v31 = vor.u32 %v14772_v23, %v13233_v63  ;;  %v9679_v18 = vpop.f32.mrf.mxu0  ;;  %v9692_v57 = vpop.f32.mrf.mxu1 }
 0x5ba   : > { %9975 = vmatmul.bf16.vlgmr.msrb.gmra.mxu3 %v22318_v12  ;;  %9981 = vmatpush.bf16.msrb.mxu0 %v13268_v21  ;;  %v14836_v38 = vld [vmem:[#allocation17 + $0xe84] sm:$0xf]  ;;  %v13489_v59 = vld [vmem:[#allocation17 + $0xe90] sm:$0xf0]  ;;  %v13364_v24 = vor.u32 %v14804_v50, %v13361_v9  ;;  %v9703_v21 = vpop.f32.mrf.mxu2 }
 0x5bb   : > { %v9691_v29 = vadd.f32 %v9690_v4, %v9678_v6  ;;  %v14868_v58 = vld [vmem:[#allocation17 + $0xf84] sm:$0xf]  ;;  %v13617_v25 = vld [vmem:[#allocation17 + $0xf90] sm:$0xf0]  ;;  %v13492_v46 = vor.u32 %v14836_v38, %v13489_v59 }
 0x5bc   : > { %9994 = vmatpush.bf16.msrb.mxu1 %v13396_v15  ;;  %10007 = vmatpush.bf16.msra.mxu2 %v13524_v52  ;;  %v14768_v53 = vld [vmem:[#allocation17 + $0xc64] sm:$0xf]  ;;  %v13217_v7 = vld [vmem:[#allocation17 + $0xc70] sm:$0xf0]  ;;  %v13620_v14 = vor.u32 %v14868_v58, %v13617_v25  ;;  %v9716_v15 = vpop.f32.mrf.mxu3 }
 0x5bd   : > { %10020 = vmatpush.bf16.msra.mxu3 %v13652_v43  ;;  %v14800_v39 = vld [vmem:[#allocation17 + $0xd64] sm:$0xf]  ;;  %v13345_v61 = vld [vmem:[#allocation17 + $0xd70] sm:$0xf0]  ;;  %v13220_v0 = vor.u32 %v14768_v53, %v13217_v7  ;;  %v9704_v27 = vadd.f32 %v9703_v21, %v9691_v29 }
 0x5be   : > { %9982 = vmatpush.bf16.msrb.mxu0 %v13252_v13  ;;  %v14832_v28 = vld [vmem:[#allocation17 + $0xe64] sm:$0xf]  ;;  %v13473_v44 = vld [vmem:[#allocation17 + $0xe70] sm:$0xf0]  ;;  %v13348_v56 = vor.u32 %v14800_v39, %v13345_v61 }
 0x5bf   : > { %v14864_v42 = vld [vmem:[#allocation17 + $0xf64] sm:$0xf]  ;;  %v13601_v8 = vld [vmem:[#allocation17 + $0xf70] sm:$0xf0]  ;;  %v13476_v48 = vor.u32 %v14832_v28, %v13473_v44  ;;  %v9717_v6 = vadd.f32 %v9716_v15, %v9704_v27 }
 0x5c0   : > { %9995 = vmatpush.bf16.msrb.mxu1 %v13380_v5  ;;  %10008 = vmatpush.bf16.msra.mxu2 %v13508_v33  ;;  %v14764_v52 = vld [vmem:[#allocation17 + $0xc44] sm:$0xf]  ;;  %v13201_v43 = vld [vmem:[#allocation17 + $0xc50] sm:$0xf0]  ;;  %v13604_v40 = vor.u32 %v14864_v42, %v13601_v8 }
 0x5c1   : > { %10021 = vmatpush.bf16.msra.mxu3 %v13636_v34  ;;  %v14796_v3 = vld [vmem:[#allocation17 + $0xd44] sm:$0xf]  ;;  %v13329_v20 = vld [vmem:[#allocation17 + $0xd50] sm:$0xf0]  ;;  %v13204_v4 = vor.u32 %v14764_v52, %v13201_v43  ;;  %v9729_v58 = vpop.f32.mrf.mxu0 }
 0x5c2   : > { %9983 = vmatpush.bf16.msrb.mxu0 %v13236_v31  ;;  %v14828_v47 = vld [vmem:[#allocation17 + $0xe44] sm:$0xf]  ;;  %v13457_v30 = vld [vmem:[#allocation17 + $0xe50] sm:$0xf0]  ;;  %v13332_v13 = vor.u32 %v14796_v3, %v13329_v20  ;;  %v9730_v25 = vadd.f32 %v9729_v58, %v9717_v6  ;;  %v9742_v31 = vpop.f32.mrf.mxu1  ;;  %v9705_v53 = vpop.f32.mrf.mxu2 }
 0x5c3   : > { %v14860_v19 = vld [vmem:[#allocation17 + $0xf44] sm:$0xf]  ;;  %v13585_v2 = vld [vmem:[#allocation17 + $0xf50] sm:$0xf0]  ;;  %v13460_v63 = vor.u32 %v14828_v47, %v13457_v30 }
 0x5c4   : > { %9996 = vmatpush.bf16.msrb.mxu1 %v13364_v24  ;;  %10009 = vmatpush.bf16.msra.mxu2 %v13492_v46  ;;  %v14760_v5 = vld [vmem:[#allocation17 + $0xc24] sm:$0xf]  ;;  %v13185_v23 = vld [vmem:[#allocation17 + $0xc30] sm:$0xf0]  ;;  %v13588_v33 = vor.u32 %v14860_v19, %v13585_v2  ;;  %v9718_v7 = vpop.f32.mrf.mxu3  ;;  %v9743_v8 = vadd.f32 %v9742_v31, %v9730_v25 }
 0x5c5   : > { %10022 = vmatpush.bf16.msra.mxu3 %v13620_v14  ;;  %v14792_v34 = vld [vmem:[#allocation17 + $0xd24] sm:$0xf]  ;;  %v13313_v29 = vld [vmem:[#allocation17 + $0xd30] sm:$0xf0]  ;;  %v13188_v46 = vor.u32 %v14760_v5, %v13185_v23 }
 0x5c6   : > { %9984 = vmatpush.bf16.msrb.mxu0 %v13220_v0  ;;  %v14824_v50 = vld [vmem:[#allocation17 + $0xe24] sm:$0xf]  ;;  %v13441_v9 = vld [vmem:[#allocation17 + $0xe30] sm:$0xf0]  ;;  %v13316_v14 = vor.u32 %v14792_v34, %v13313_v29 }
 0x5c7   : > { %v14856_v38 = vld [vmem:[#allocation17 + $0xf24] sm:$0xf]  ;;  %v13569_v59 = vld [vmem:[#allocation17 + $0xf30] sm:$0xf0]  ;;  %v13444_v44 = vor.u32 %v14824_v50, %v13441_v9 }
 0x5c8   : > { %9997 = vmatpush.bf16.msrb.mxu1 %v13348_v56  ;;  %10010 = vmatpush.bf16.msra.mxu2 %v13476_v48  ;;  %v14756_v24 = vld [vmem:[#allocation17 + $0xc04] sm:$0xf]  ;;  %v13169_v39 = vld [vmem:[#allocation17 + $0xc10] sm:$0xf0]  ;;  %v13572_v42 = vor.u32 %v14856_v38, %v13569_v59 }
 0x5c9   : > { %10023 = vmatpush.bf16.msra.mxu3 %v13604_v40  ;;  %v14788_v61 = vld [vmem:[#allocation17 + $0xd04] sm:$0xf]  ;;  %v13297_v28 = vld [vmem:[#allocation17 + $0xd10] sm:$0xf0]  ;;  %v13172_v48 = vor.u32 %v14756_v24, %v13169_v39 }
 0x5ca   : > { %9985 = vmatpush.bf16.msrb.mxu0 %v13204_v4  ;;  %v14820_v18 = vld [vmem:[#allocation17 + $0xe04] sm:$0xf]  ;;  %v13425_v57 = vld [vmem:[#allocation17 + $0xe10] sm:$0xf0]  ;;  %v13300_v40 = vor.u32 %v14788_v61, %v13297_v28  ;;  %v9731_v4 = vpop.f32.mrf.mxu0  ;;  %v9755_v9 = vpop.f32.mrf.mxu2 }
 0x5cb   : > { %v14852_v21 = vld [vmem:[#allocation17 + $0xf04] sm:$0xf]  ;;  %v13553_v15 = vld [vmem:[#allocation17 + $0xf10] sm:$0xf0]  ;;  %v13428_v30 = vor.u32 %v14820_v18, %v13425_v57  ;;  %v9756_v31 = vadd.f32 %v9755_v9, %v9743_v8 }
 0x5cc   : > { %9998 = vmatpush.bf16.msrb.mxu1 %v13332_v13  ;;  %10011 = vmatpush.bf16.msra.mxu2 %v13460_v63  ;;  %v14912_v0 = vld [vmem:[#allocation17 + $0x10e4] sm:$0xf]  ;;  %v13793_v56 = vld [vmem:[#allocation17 + $0x10f0] sm:$0xf0]  ;;  %v13556_v19 = vor.u32 %v14852_v21, %v13553_v15  ;;  %v9768_v38 = vpop.f32.mrf.mxu3 }
 0x5cd   : > { %10024 = vmatpush.bf16.msra.mxu3 %v13588_v33  ;;  %v14944_v52 = vld [vmem:[#allocation17 + $0x11e4] sm:$0xf]  ;;  %v13921_v43 = vld [vmem:[#allocation17 + $0x11f0] sm:$0xf0]  ;;  %v13796_v2 = vor.u32 %v14912_v0, %v13793_v56  ;;  %v9744_v33 = vpop.f32.mrf.mxu1 }
 0x5ce   : > { %v14976_v27 = vld [vmem:[#allocation17 + $0x12e4] sm:$0xf]  ;;  %9986 = vmatpush.bf16.msrb.mxu0 %v13188_v46  ;;  %v14049_v3 = vld [vmem:[#allocation17 + $0x12f0] sm:$0xf0]  ;;  %v13924_v6 = vor.u32 %v14944_v52, %v13921_v43 }
 0x5cf   : > { %v15008_v20 = vld [vmem:[#allocation17 + $0x13e4] sm:$0xf]  ;;  %v14177_v47 = vld [vmem:[#allocation17 + $0x13f0] sm:$0xf0]  ;;  %v14052_v23 = vor.u32 %v14976_v27, %v14049_v3 }
 0x5d0   : > { %9999 = vmatpush.bf16.msrb.mxu1 %v13316_v14  ;;  %10012 = vmatpush.bf16.msra.mxu2 %v13444_v44  ;;  %v14908_v13 = vld [vmem:[#allocation17 + $0x10c4] sm:$0xf]  ;;  %v13777_v5 = vld [vmem:[#allocation17 + $0x10d0] sm:$0xf0]  ;;  %v14180_v63 = vor.u32 %v15008_v20, %v14177_v47  ;;  %v22417_v14 = vadd.f32 %v9768_v38, %v9756_v31 }
 0x5d1   : > { %10025 = vmatpush.bf16.msra.mxu3 %v13572_v42  ;;  %v14940_v34 = vld [vmem:[#allocation17 + $0x11c4] sm:$0xf]  ;;  %v13905_v29 = vld [vmem:[#allocation17 + $0x11d0] sm:$0xf0]  ;;  %v13780_v24 = vor.u32 %v14908_v13, %v13777_v5 }
 0x5d2   : > { %v14972_v50 = vld [vmem:[#allocation17 + $0x12c4] sm:$0xf]  ;;  %9987 = vmatpush.bf16.msrb.mxu0 %v13172_v48  ;;  %v14033_v59 = vld [vmem:[#allocation17 + $0x12d0] sm:$0xf0]  ;;  %v13908_v53 = vor.u32 %v14940_v34, %v13905_v29  ;;  %v9757_v3 = vpop.f32.mrf.mxu2 }
 0x5d3   : > { %v15004_v58 = vld [vmem:[#allocation17 + $0x13c4] sm:$0xf]  ;;  %v14161_v25 = vld [vmem:[#allocation17 + $0x13d0] sm:$0xf0]  ;;  %v14036_v39 = vor.u32 %v14972_v50, %v14033_v59 }
 0x5d4   : > { %10000 = vmatpush.bf16.msrb.mxu1 %v13300_v40  ;;  %10013 = vmatpush.bf16.msra.mxu2 %v13428_v30  ;;  %v14904_v7 = vld [vmem:[#allocation17 + $0x10a4] sm:$0xf]  ;;  %v13761_v46 = vld [vmem:[#allocation17 + $0x10b0] sm:$0xf0]  ;;  %v14164_v61 = vor.u32 %v15004_v58, %v14161_v25  ;;  %v9770_v20 = vpop.f32.mrf.mxu3 }
 0x5d5   : > { %10026 = vmatpush.bf16.msra.mxu3 %v13556_v19  ;;  %v14936_v28 = vld [vmem:[#allocation17 + $0x11a4] sm:$0xf]  ;;  %v13889_v44 = vld [vmem:[#allocation17 + $0x11b0] sm:$0xf0]  ;;  %9988 = vmatmul.bf16.vlgmr.msrb.gmra.mxu0 %v22374_v36  ;;  %v13764_v21 = vor.u32 %v14904_v7, %v13761_v46 }
 0x5d6   : > { %10032 = vmatpush.bf16.msra.mxu0 %v13796_v2  ;;  %v14968_v42 = vld [vmem:[#allocation17 + $0x12a4] sm:$0xf]  ;;  %v14017_v8 = vld [vmem:[#allocation17 + $0x12b0] sm:$0xf0]  ;;  %v13892_v15 = vor.u32 %v14936_v28, %v13889_v44 }
 0x5d7   : > { %10001 = vmatmul.bf16.vlgmr.msrb.gmra.mxu1 %v22378_v49  ;;  %v15000_v18 = vld [vmem:[#allocation17 + $0x13a4] sm:$0xf]  ;;  %v14145_v57 = vld [vmem:[#allocation17 + $0x13b0] sm:$0xf0]  ;;  %10014 = vmatmul.bf16.vlgmr.msra.gmra.mxu2 %v22382_v1  ;;  %v14020_v52 = vor.u32 %v14968_v42, %v14017_v8 }
 0x5d8   : > { %10045 = vmatpush.bf16.msra.mxu1 %v13924_v6  ;;  %10058 = vmatpush.bf16.msrb.mxu2 %v14052_v23  ;;  %v14900_v0 = vld [vmem:[#allocation17 + $0x1084] sm:$0xf]  ;;  %v13745_v56 = vld [vmem:[#allocation17 + $0x1090] sm:$0xf0]  ;;  %v14148_v43 = vor.u32 %v15000_v18, %v14145_v57 }
 0x5d9   : > { %10071 = vmatpush.bf16.msrb.mxu3 %v14180_v63  ;;  %v14932_v27 = vld [vmem:[#allocation17 + $0x1184] sm:$0xf]  ;;  %v13873_v48 = vld [vmem:[#allocation17 + $0x1190] sm:$0xf0]  ;;  %v13748_v2 = vor.u32 %v14900_v0, %v13745_v56 }
 0x5da   : > { %10027 = vmatmul.bf16.vlgmr.msra.gmra.mxu3 %v22384_v37  ;;  %10033 = vmatpush.bf16.msra.mxu0 %v13780_v24  ;;  %v14964_v40 = vld [vmem:[#allocation17 + $0x1284] sm:$0xf]  ;;  %v14001_v47 = vld [vmem:[#allocation17 + $0x1290] sm:$0xf0]  ;;  %v13876_v6 = vor.u32 %v14932_v27, %v13873_v48 }
 0x5db   : > { %v14996_v30 = vld [vmem:[#allocation17 + $0x1384] sm:$0xf]  ;;  %v14129_v19 = vld [vmem:[#allocation17 + $0x1390] sm:$0xf0]  ;;  %v14004_v5 = vor.u32 %v14964_v40, %v14001_v47 }
 0x5dc   : > { %10046 = vmatpush.bf16.msra.mxu1 %v13908_v53  ;;  %10059 = vmatpush.bf16.msrb.mxu2 %v14036_v39  ;;  %v14896_v4 = vld [vmem:[#allocation17 + $0x1064] sm:$0xf]  ;;  %v13729_v13 = vld [vmem:[#allocation17 + $0x1070] sm:$0xf0]  ;;  %v14132_v23 = vor.u32 %v14996_v30, %v14129_v19 }
 0x5dd   : > { %10072 = vmatpush.bf16.msrb.mxu3 %v14164_v61  ;;  %v14928_v63 = vld [vmem:[#allocation17 + $0x1164] sm:$0xf]  ;;  %v13857_v33 = vld [vmem:[#allocation17 + $0x1170] sm:$0xf0]  ;;  %v13732_v38 = vor.u32 %v14896_v4, %v13729_v13 }
 0x5de   : > { %10034 = vmatpush.bf16.msra.mxu0 %v13764_v21  ;;  %v14960_v34 = vld [vmem:[#allocation17 + $0x1264] sm:$0xf]  ;;  %v13985_v29 = vld [vmem:[#allocation17 + $0x1270] sm:$0xf0]  ;;  %v13860_v59 = vor.u32 %v14928_v63, %v13857_v33  ;;  %v11751_v33 = vld [vmem:[#allocation17 + $0xe8] sm:$0xf] }
 0x5df   : > { %v14992_v50 = vld [vmem:[#allocation17 + $0x1364] sm:$0xf]  ;;  %v14113_v9 = vld [vmem:[#allocation17 + $0x1370] sm:$0xf0]  ;;  %v13988_v31 = vor.u32 %v14960_v34, %v13985_v29  ;;  %v14403_v34 = vld [vmem:[#allocation17 + $0xf4] sm:$0xf0] }
 0x5e0   : > { %10047 = vmatpush.bf16.msra.mxu1 %v13892_v15  ;;  %10060 = vmatpush.bf16.msrb.mxu2 %v14020_v52  ;;  %v14892_v58 = vld [vmem:[#allocation17 + $0x1044] sm:$0xf]  ;;  %v13713_v25 = vld [vmem:[#allocation17 + $0x1050] sm:$0xf0]  ;;  %v14116_v24 = vor.u32 %v14992_v50, %v14113_v9  ;;  %v9794_v19 = vpop.f32.mrf.mxu1  ;;  %v11879_v50 = vld [vmem:[#allocation17 + $0x1e8] sm:$0xf] }
 0x5e1   : > { %10073 = vmatpush.bf16.msrb.mxu3 %v14148_v43  ;;  %v14924_v53 = vld [vmem:[#allocation17 + $0x1144] sm:$0xf]  ;;  %v13841_v7 = vld [vmem:[#allocation17 + $0x1150] sm:$0xf0]  ;;  %v13716_v44 = vor.u32 %v14892_v58, %v13713_v25  ;;  %v14435_v9 = vld [vmem:[#allocation17 + $0x1f4] sm:$0xf0] }
 0x5e2   : > { %10035 = vmatpush.bf16.msra.mxu0 %v13748_v2  ;;  %v14956_v46 = vld [vmem:[#allocation17 + $0x1244] sm:$0xf]  ;;  %v13969_v39 = vld [vmem:[#allocation17 + $0x1250] sm:$0xf0]  ;;  %v13844_v42 = vor.u32 %v14924_v53, %v13841_v7  ;;  %v14467_v25 = vld [vmem:[#allocation17 + $0x2f4] sm:$0xf0] }
 0x5e3   : > { %v14988_v61 = vld [vmem:[#allocation17 + $0x1344] sm:$0xf]  ;;  %v14097_v28 = vld [vmem:[#allocation17 + $0x1350] sm:$0xf0]  ;;  %v13972_v57 = vor.u32 %v14956_v46, %v13969_v39  ;;  %v11752_v39 = vor.u32 %v14403_v34, %v11751_v33 }
 0x5e4   : > { %10048 = vmatpush.bf16.msra.mxu1 %v13876_v6  ;;  %10061 = vmatpush.bf16.msrb.mxu2 %v14004_v5  ;;  %v14888_v8 = vld [vmem:[#allocation17 + $0x1024] sm:$0xf]  ;;  %v13697_v18 = vld [vmem:[#allocation17 + $0x1030] sm:$0xf0]  ;;  %v14100_v21 = vor.u32 %v14988_v61, %v14097_v28  ;;  %v11880_v61 = vor.u32 %v14435_v9, %v11879_v50  ;;  %v11735_v28 = vld [vmem:[#allocation17 + $0xc8] sm:$0xf] }
 0x5e5   : > { %10074 = vmatpush.bf16.msrb.mxu3 %v14132_v23  ;;  %v14920_v15 = vld [vmem:[#allocation17 + $0x1124] sm:$0xf]  ;;  %v13825_v0 = vld [vmem:[#allocation17 + $0x1130] sm:$0xf0]  ;;  %v13700_v40 = vor.u32 %v14888_v8, %v13697_v18  ;;  %v9781_v23 = vpop.f32.mrf.mxu0  ;;  %v11863_v8 = vld [vmem:[#allocation17 + $0x1c8] sm:$0xf] }
 0x5e6   : > { %10036 = vmatpush.bf16.msra.mxu0 %v13732_v38  ;;  %v14952_v56 = vld [vmem:[#allocation17 + $0x1224] sm:$0xf]  ;;  %v13953_v52 = vld [vmem:[#allocation17 + $0x1230] sm:$0xf0]  ;;  %v13828_v3 = vor.u32 %v14920_v15, %v13825_v0  ;;  %v9782_v29 = vadd.f32 %v9781_v23, %v22417_v14  ;;  %v12007_v38 = vld [vmem:[#allocation17 + $0x2e8] sm:$0xf] }
 0x5e7   : > { %v14984_v43 = vld [vmem:[#allocation17 + $0x1324] sm:$0xf]  ;;  %v14081_v27 = vld [vmem:[#allocation17 + $0x1330] sm:$0xf0]  ;;  %v13956_v2 = vor.u32 %v14952_v56, %v13953_v52  ;;  %v12008_v14 = vor.u32 %v14467_v25, %v12007_v38  ;;  %v14431_v18 = vld [vmem:[#allocation17 + $0x1d4] sm:$0xf0] }
 0x5e8   : > { %10049 = vmatpush.bf16.msra.mxu1 %v13860_v59  ;;  %10062 = vmatpush.bf16.msrb.mxu2 %v13988_v31  ;;  %v14884_v48 = vld [vmem:[#allocation17 + $0x1004] sm:$0xf]  ;;  %v13681_v20 = vld [vmem:[#allocation17 + $0x1010] sm:$0xf0]  ;;  %v14084_v6 = vor.u32 %v14984_v43, %v14081_v27  ;;  %v12135_v31 = vld [vmem:[#allocation17 + $0x3e8] sm:$0xf]  ;;  %v9795_v53 = vadd.f32 %v9794_v19, %v9782_v29  ;;  %v9796_v27 = vpop.f32.mrf.mxu1 }
 0x5e9   : > { %10075 = vmatpush.bf16.msrb.mxu3 %v14116_v24  ;;  %v14916_v47 = vld [vmem:[#allocation17 + $0x1104] sm:$0xf]  ;;  %v13809_v30 = vld [vmem:[#allocation17 + $0x1110] sm:$0xf0]  ;;  %v13684_v59 = vor.u32 %v14884_v48, %v13681_v20  ;;  %v14499_v24 = vld [vmem:[#allocation17 + $0x3f4] sm:$0xf0]  ;;  %v9820_v43 = vpop.f32.mrf.mxu3 }
 0x5ea   : > { %10037 = vmatpush.bf16.msra.mxu0 %v13716_v44  ;;  %v14948_v4 = vld [vmem:[#allocation17 + $0x1204] sm:$0xf]  ;;  %v13937_v13 = vld [vmem:[#allocation17 + $0x1210] sm:$0xf0]  ;;  %v13812_v58 = vor.u32 %v14916_v47, %v13809_v30  ;;  %v14399_v44 = vld [vmem:[#allocation17 + $0xd4] sm:$0xf0] }
 0x5eb   : > { %v14980_v5 = vld [vmem:[#allocation17 + $0x1304] sm:$0xf]  ;;  %v14065_v63 = vld [vmem:[#allocation17 + $0x1310] sm:$0xf0]  ;;  %v13940_v7 = vor.u32 %v14948_v4, %v13937_v13  ;;  %v14463_v15 = vld [vmem:[#allocation17 + $0x2d4] sm:$0xf0] }
 0x5ec   : > { %10050 = vmatpush.bf16.msra.mxu1 %v13844_v42  ;;  %10063 = vmatpush.bf16.msrb.mxu2 %v13972_v57  ;;  %v14068_v46 = vor.u32 %v14980_v5, %v14065_v63  ;;  %v12136_v42 = vor.u32 %v14499_v24, %v12135_v31  ;;  %v11991_v57 = vld [vmem:[#allocation17 + $0x2c8] sm:$0xf]  ;;  %v14495_v56 = vld [vmem:[#allocation17 + $0x3d4] sm:$0xf0]  ;;  %v15927_v24 = vld [vmem:[#allocation18] sm:$0xf] }
 0x5ed   : > { %10076 = vmatpush.bf16.msrb.mxu3 %v14100_v21  ;;  %v9807_v21 = vpop.f32.mrf.mxu2  ;;  %v12119_v0 = vld [vmem:[#allocation17 + $0x3c8] sm:$0xf]  ;;  %v9783_v48 = vpop.f32.mrf.mxu0  ;;  %v14395_v47 = vld [vmem:[#allocation17 + $0xb4] sm:$0xf0]  ;;  %v11992_v19 = vor.u32 %v14463_v15, %v11991_v57 }
 0x5ee   : > { %10038 = vmatpush.bf16.msra.mxu0 %v13700_v40  ;;  %v9808_v52 = vadd.f32 %v9807_v21, %v9795_v53  ;;  %v11736_v40 = vor.u32 %v14399_v44, %v11735_v28  ;;  %v11719_v20 = vld [vmem:[#allocation17 + $0xa8] sm:$0xf]  ;;  %v14427_v4 = vld [vmem:[#allocation17 + $0x1b4] sm:$0xf0]  ;;  %v9557_v53 = vperm.slane %v15927_v24, 1 }
 0x5ef   : > { %v11975_v13 = vld [vmem:[#allocation17 + $0x2a8] sm:$0xf]  ;;  %v14459_v5 = vld [vmem:[#allocation17 + $0x2b4] sm:$0xf0]  ;;  %v11720_v33 = vor.u32 %v14395_v47, %v11719_v20 }
 0x5f0   : > { %10051 = vmatpush.bf16.msra.mxu1 %v13828_v3  ;;  %10064 = vmatpush.bf16.msrb.mxu2 %v13956_v2  ;;  %v11864_v3 = vor.u32 %v14431_v18, %v11863_v8  ;;  %v22424_v30 = vadd.f32 %v9820_v43, %v9808_v52  ;;  %v12120_v2 = vor.u32 %v14495_v56, %v12119_v0  ;;  %v12103_v23 = vld [vmem:[#allocation17 + $0x3a8] sm:$0xf]  ;;  %v14491_v63 = vld [vmem:[#allocation17 + $0x3b4] sm:$0xf0] }
 0x5f1   : > { %10077 = vmatpush.bf16.msrb.mxu3 %v14084_v6  ;;  %v11847_v6 = vld [vmem:[#allocation17 + $0x1a8] sm:$0xf]  ;;  %v14391_v50 = vld [vmem:[#allocation17 + $0x94] sm:$0xf0]  ;;  %v11976_v38 = vor.u32 %v14459_v5, %v11975_v13 }
 0x5f2   : > { %10039 = vmatpush.bf16.msra.mxu0 %v13684_v59  ;;  %v11848_v34 = vor.u32 %v14427_v4, %v11847_v6  ;;  %v11703_v29 = vld [vmem:[#allocation17 + $0x88] sm:$0xf]  ;;  %v12104_v59 = vor.u32 %v14491_v63, %v12103_v23  ;;  %v14419_v0 = vld [vmem:[#allocation17 + $0x174] sm:$0xf0] }
 0x5f3   : > { %v11831_v9 = vld [vmem:[#allocation17 + $0x188] sm:$0xf]  ;;  %v11704_v28 = vor.u32 %v14391_v50, %v11703_v29  ;;  %v14451_v43 = vld [vmem:[#allocation17 + $0x274] sm:$0xf0] }
 0x5f4   : > { %10052 = vmatpush.bf16.msra.mxu1 %v13812_v58  ;;  %10065 = vmatpush.bf16.msrb.mxu2 %v13940_v7  ;;  %v14423_v58 = vld [vmem:[#allocation17 + $0x194] sm:$0xf0]  ;;  %v11959_v25 = vld [vmem:[#allocation17 + $0x288] sm:$0xf]  ;;  %v9846_v18 = vpop.f32.mrf.mxu1 }
 0x5f5   : > { %10078 = vmatpush.bf16.msrb.mxu3 %v14068_v46  ;;  %10040 = vmatmul.bf16.vlgmr.msra.gmra.mxu0 %v22391_v26  ;;  %v9809_v31 = vpop.f32.mrf.mxu2  ;;  %v14455_v7 = vld [vmem:[#allocation17 + $0x294] sm:$0xf0]  ;;  %v12087_v46 = vld [vmem:[#allocation17 + $0x388] sm:$0xf]  ;;  %v11832_v44 = vor.u32 %v14423_v58, %v11831_v9 }
 0x5f6   : > { %10084 = vmatpush.bf16.msrb.mxu0 %v11752_v39  ;;  %v14487_v39 = vld [vmem:[#allocation17 + $0x394] sm:$0xf0]  ;;  %v9833_v8 = vpop.f32.mrf.mxu0  ;;  %v11960_v57 = vor.u32 %v14455_v7, %v11959_v25  ;;  %v11815_v15 = vld [vmem:[#allocation17 + $0x168] sm:$0xf] }
 0x5f7   : > { %10053 = vmatmul.bf16.vlgmr.msra.gmra.mxu1 %v22393_v62  ;;  %10066 = vmatmul.bf16.vlgmr.msrb.gmra.mxu2 %v22395_v45  ;;  %v12088_v21 = vor.u32 %v14487_v39, %v12087_v46  ;;  %v11943_v56 = vld [vmem:[#allocation17 + $0x268] sm:$0xf]  ;;  %v9834_v52 = vadd.f32 %v9833_v8, %v9557_v53  ;;  %v14483_v48 = vld [vmem:[#allocation17 + $0x374] sm:$0xf0]  ;;  %v11816_v20 = vor.u32 %v14419_v0, %v11815_v15 }
 0x5f8   : > { %10097 = vmatpush.bf16.msrb.mxu1 %v11880_v61  ;;  %10110 = vmatpush.bf16.msra.mxu2 %v12008_v14  ;;  %v9822_v61 = vpop.f32.mrf.mxu3  ;;  %v11687_v14 = vld [vmem:[#allocation17 + $0x68] sm:$0xf]  ;;  %v14415_v13 = vld [vmem:[#allocation17 + $0x154] sm:$0xf0] }
 0x5f9   : > { %10123 = vmatpush.bf16.msra.mxu3 %v12136_v42  ;;  %v14387_v42 = vld [vmem:[#allocation17 + $0x74] sm:$0xf0]  ;;  %v12071_v27 = vld [vmem:[#allocation17 + $0x368] sm:$0xf] }
 0x5fa   : > { %10079 = vmatmul.bf16.vlgmr.msrb.gmra.mxu3 %v22397_v10  ;;  %10085 = vmatpush.bf16.msrb.mxu0 %v11736_v40  ;;  %v9847_v40 = vadd.f32 %v9846_v18, %v9834_v52  ;;  %v11671_v47 = vld [vmem:[#allocation17 + $0x48] sm:$0xf]  ;;  %v12072_v6 = vor.u32 %v14483_v48, %v12071_v27  ;;  %v14447_v23 = vld [vmem:[#allocation17 + $0x254] sm:$0xf0] }
 0x5fb   : > { %v11799_v4 = vld [vmem:[#allocation17 + $0x148] sm:$0xf]  ;;  %v14411_v46 = vld [vmem:[#allocation17 + $0x134] sm:$0xf0] }
 0x5fc   : > { %10098 = vmatpush.bf16.msrb.mxu1 %v11864_v3  ;;  %10111 = vmatpush.bf16.msra.mxu2 %v11992_v19  ;;  %v11688_v3 = vor.u32 %v14387_v42, %v11687_v14  ;;  %v14383_v19 = vld [vmem:[#allocation17 + $0x54] sm:$0xf0]  ;;  %v11927_v5 = vld [vmem:[#allocation17 + $0x248] sm:$0xf]  ;;  %v11800_v9 = vor.u32 %v14415_v13, %v11799_v4  ;;  %v9848_v31 = vpop.f32.mrf.mxu1 }
 0x5fd   : > { %10124 = vmatpush.bf16.msra.mxu3 %v12120_v2  ;;  %v11944_v2 = vor.u32 %v14451_v43, %v11943_v56  ;;  %v12055_v63 = vld [vmem:[#allocation17 + $0x348] sm:$0xf]  ;;  %v11672_v50 = vor.u32 %v14383_v19, %v11671_v47  ;;  %v11928_v24 = vor.u32 %v14447_v23, %v11927_v5  ;;  %v14443_v61 = vld [vmem:[#allocation17 + $0x234] sm:$0xf0] }
 0x5fe   : > { %10086 = vmatpush.bf16.msrb.mxu0 %v11720_v33  ;;  %v14479_v33 = vld [vmem:[#allocation17 + $0x354] sm:$0xf0]  ;;  %v9835_v25 = vpop.f32.mrf.mxu0  ;;  %v11783_v7 = vld [vmem:[#allocation17 + $0x128] sm:$0xf] }
 0x5ff   : > { %v12056_v53 = vor.u32 %v14479_v33, %v12055_v63  ;;  %v11911_v39 = vld [vmem:[#allocation17 + $0x228] sm:$0xf]  ;;  %v11784_v18 = vor.u32 %v14411_v46, %v11783_v7  ;;  %v14407_v15 = vld [vmem:[#allocation17 + $0x114] sm:$0xf0] }
 0x600   : > { %10099 = vmatpush.bf16.msrb.mxu1 %v11848_v34  ;;  %10112 = vmatpush.bf16.msra.mxu2 %v11976_v38  ;;  %v9859_v34 = vpop.f32.mrf.mxu2  ;;  %v9872_v29 = vpop.f32.mrf.mxu3  ;;  %v11655_v38 = vld [vmem:[#allocation17 + $0x28] sm:$0xf]  ;;  %v11912_v0 = vor.u32 %v14443_v61, %v11911_v39  ;;  %v14439_v43 = vld [vmem:[#allocation17 + $0x214] sm:$0xf0] }
 0x601   : > { %10125 = vmatpush.bf16.msra.mxu3 %v12104_v59  ;;  %v14379_v59 = vld [vmem:[#allocation17 + $0x34] sm:$0xf0]  ;;  %v9860_v58 = vadd.f32 %v9859_v34, %v9847_v40  ;;  %v11639_v42 = vld [vmem:[#allocation17 + $0x8] sm:$0xf] }
 0x602   : > { %10087 = vmatpush.bf16.msrb.mxu0 %v11704_v28  ;;  %v12039_v28 = vld [vmem:[#allocation17 + $0x328] sm:$0xf]  ;;  %v11656_v8 = vor.u32 %v14379_v59, %v11655_v38  ;;  %v14471_v48 = vld [vmem:[#allocation17 + $0x314] sm:$0xf0] }
 0x603   : > { %v22430_v14 = vadd.f32 %v9872_v29, %v9860_v58  ;;  %v11895_v52 = vld [vmem:[#allocation17 + $0x208] sm:$0xf]  ;;  %v14563_v47 = vld [vmem:[#allocation17 + $0x5f4] sm:$0xf0] }
 0x604   : > { %10100 = vmatpush.bf16.msrb.mxu1 %v11832_v44  ;;  %10113 = vmatpush.bf16.msra.mxu2 %v11960_v57  ;;  %v14475_v44 = vld [vmem:[#allocation17 + $0x334] sm:$0xf0]  ;;  %v12023_v27 = vld [vmem:[#allocation17 + $0x308] sm:$0xf]  ;;  %v11896_v33 = vor.u32 %v14439_v43, %v11895_v52 }
 0x605   : > { %10126 = vmatpush.bf16.msra.mxu3 %v12088_v21  ;;  %v14375_v57 = vld [vmem:[#allocation17 + $0x14] sm:$0xf0]  ;;  %v11767_v21 = vld [vmem:[#allocation17 + $0x108] sm:$0xf]  ;;  %v12040_v56 = vor.u32 %v14475_v44, %v12039_v28  ;;  %v12024_v34 = vor.u32 %v14471_v48, %v12023_v27 }
 0x606   : > { %10088 = vmatpush.bf16.msrb.mxu0 %v11688_v3  ;;  %v12263_v40 = vld [vmem:[#allocation17 + $0x4e8] sm:$0xf]  ;;  %v14531_v3 = vld [vmem:[#allocation17 + $0x4f4] sm:$0xf0]  ;;  %v11640_v4 = vor.u32 %v14375_v57, %v11639_v42  ;;  %v11768_v13 = vor.u32 %v14407_v15, %v11767_v21 }
 0x607   : > { %v12519_v19 = vld [vmem:[#allocation17 + $0x6e8] sm:$0xf]  ;;  %v14595_v5 = vld [vmem:[#allocation17 + $0x6f4] sm:$0xf0]  ;;  %v12264_v29 = vor.u32 %v14531_v3, %v12263_v40 }
 0x608   : > { %10101 = vmatpush.bf16.msrb.mxu1 %v11816_v20  ;;  %10114 = vmatpush.bf16.msra.mxu2 %v11944_v2  ;;  %v12391_v20 = vld [vmem:[#allocation17 + $0x5e8] sm:$0xf]  ;;  %v9861_v2 = vpop.f32.mrf.mxu2  ;;  %v14627_v63 = vld [vmem:[#allocation17 + $0x7f4] sm:$0xf0]  ;;  %v12520_v59 = vor.u32 %v14595_v5, %v12519_v19 }
 0x609   : > { %10127 = vmatpush.bf16.msra.mxu3 %v12072_v6  ;;  %v9874_v6 = vpop.f32.mrf.mxu3  ;;  %v12647_v23 = vld [vmem:[#allocation17 + $0x7e8] sm:$0xf]  ;;  %v14527_v38 = vld [vmem:[#allocation17 + $0x4d4] sm:$0xf0] }
 0x60a   : > { %10089 = vmatpush.bf16.msrb.mxu0 %v11672_v50  ;;  %v12392_v50 = vor.u32 %v14563_v47, %v12391_v20  ;;  %v12648_v58 = vor.u32 %v14627_v63, %v12647_v23  ;;  %v12375_v25 = vld [vmem:[#allocation17 + $0x5c8] sm:$0xf]  ;;  %v14559_v31 = vld [vmem:[#allocation17 + $0x5d4] sm:$0xf0] }
 0x60b   : > { %v12631_v7 = vld [vmem:[#allocation17 + $0x7c8] sm:$0xf]  ;;  %v14623_v46 = vld [vmem:[#allocation17 + $0x7d4] sm:$0xf0]  ;;  %v12376_v61 = vor.u32 %v14559_v31, %v12375_v25 }
 0x60c   : > { %10102 = vmatpush.bf16.msrb.mxu1 %v11800_v9  ;;  %10115 = vmatpush.bf16.msra.mxu2 %v11928_v24  ;;  %v12247_v9 = vld [vmem:[#allocation17 + $0x4c8] sm:$0xf]  ;;  %v14523_v44 = vld [vmem:[#allocation17 + $0x4b4] sm:$0xf0] }
 0x60d   : > { %10128 = vmatpush.bf16.msra.mxu3 %v12056_v53  ;;  %v12503_v24 = vld [vmem:[#allocation17 + $0x6c8] sm:$0xf]  ;;  %v14591_v53 = vld [vmem:[#allocation17 + $0x6d4] sm:$0xf0]  ;;  %v12248_v39 = vor.u32 %v14527_v38, %v12247_v9 }
 0x60e   : > { %10090 = vmatpush.bf16.msrb.mxu0 %v11656_v8  ;;  %v12231_v28 = vld [vmem:[#allocation17 + $0x4a8] sm:$0xf]  ;;  %v12504_v42 = vor.u32 %v14591_v53, %v12503_v24  ;;  %v12632_v8 = vor.u32 %v14623_v46, %v12631_v7  ;;  %v14555_v57 = vld [vmem:[#allocation17 + $0x5b4] sm:$0xf0] }
 0x60f   : > { %v12487_v21 = vld [vmem:[#allocation17 + $0x6a8] sm:$0xf]  ;;  %v14587_v15 = vld [vmem:[#allocation17 + $0x6b4] sm:$0xf0]  ;;  %v12232_v52 = vor.u32 %v14523_v44, %v12231_v28 }
 0x610   : > { %10103 = vmatpush.bf16.msrb.mxu1 %v11784_v18  ;;  %10116 = vmatpush.bf16.msra.mxu2 %v11912_v0  ;;  %v12359_v18 = vld [vmem:[#allocation17 + $0x5a8] sm:$0xf]  ;;  %v14519_v48 = vld [vmem:[#allocation17 + $0x494] sm:$0xf0]  ;;  %v12488_v40 = vor.u32 %v14587_v15, %v12487_v21 }
 0x611   : > { %10129 = vmatpush.bf16.msra.mxu3 %v12040_v56  ;;  %v12615_v0 = vld [vmem:[#allocation17 + $0x7a8] sm:$0xf]  ;;  %v14619_v56 = vld [vmem:[#allocation17 + $0x7b4] sm:$0xf0]  ;;  %v12360_v43 = vor.u32 %v14555_v57, %v12359_v18 }
 0x612   : > { %10091 = vmatpush.bf16.msrb.mxu0 %v11640_v4  ;;  %v12215_v27 = vld [vmem:[#allocation17 + $0x488] sm:$0xf]  ;;  %v12616_v3 = vor.u32 %v14619_v56, %v12615_v0  ;;  %v14551_v47 = vld [vmem:[#allocation17 + $0x594] sm:$0xf0] }
 0x613   : > { %v12343_v20 = vld [vmem:[#allocation17 + $0x588] sm:$0xf]  ;;  %v14583_v2 = vld [vmem:[#allocation17 + $0x694] sm:$0xf0]  ;;  %v12216_v63 = vor.u32 %v14519_v48, %v12215_v27 }
 0x614   : > { %10104 = vmatpush.bf16.msrb.mxu1 %v11768_v13  ;;  %10117 = vmatpush.bf16.msra.mxu2 %v11896_v33  ;;  %v12471_v19 = vld [vmem:[#allocation17 + $0x688] sm:$0xf]  ;;  %v14615_v4 = vld [vmem:[#allocation17 + $0x794] sm:$0xf0]  ;;  %v9885_v13 = vpop.f32.mrf.mxu0  ;;  %v9898_v5 = vpop.f32.mrf.mxu1  ;;  %v12344_v33 = vor.u32 %v14551_v47, %v12343_v20 }
 0x615   : > { %10130 = vmatpush.bf16.msra.mxu3 %v12024_v34  ;;  %10092 = vmatmul.bf16.vlgmr.msrb.gmra.mxu0 %v23287_v55  ;;  %v12599_v6 = vld [vmem:[#allocation17 + $0x788] sm:$0xf]  ;;  %v9886_v23 = vadd.f32 %v9885_v13, %v22430_v14  ;;  %v14579_v31 = vld [vmem:[#allocation17 + $0x674] sm:$0xf0] }
 0x616   : > { %10136 = vmatpush.bf16.msra.mxu0 %v12264_v29  ;;  %v12199_v34 = vld [vmem:[#allocation17 + $0x468] sm:$0xf]  ;;  %v14515_v29 = vld [vmem:[#allocation17 + $0x474] sm:$0xf0]  ;;  %v12600_v9 = vor.u32 %v14615_v4, %v12599_v6 }
 0x617   : > { %10105 = vmatmul.bf16.vlgmr.msrb.gmra.mxu1 %v23288_v16  ;;  %10118 = vmatmul.bf16.vlgmr.msra.gmra.mxu2 %v23289_v11  ;;  %v12327_v38 = vld [vmem:[#allocation17 + $0x568] sm:$0xf]  ;;  %v9899_v25 = vadd.f32 %v9898_v5, %v9886_v23  ;;  %v14611_v53 = vld [vmem:[#allocation17 + $0x774] sm:$0xf0]  ;;  %v12200_v7 = vor.u32 %v14515_v29, %v12199_v34 }
 0x618   : > { %10149 = vmatpush.bf16.msra.mxu1 %v12392_v50  ;;  %10162 = vmatpush.bf16.msrb.mxu2 %v12520_v59  ;;  %v12472_v50 = vor.u32 %v14583_v2, %v12471_v19  ;;  %v14547_v59 = vld [vmem:[#allocation17 + $0x574] sm:$0xf0]  ;;  %v12583_v24 = vld [vmem:[#allocation17 + $0x768] sm:$0xf] }
 0x619   : > { %10175 = vmatpush.bf16.msrb.mxu3 %v12648_v58  ;;  %v12455_v58 = vld [vmem:[#allocation17 + $0x668] sm:$0xf]  ;;  %v12328_v46 = vor.u32 %v14547_v59, %v12327_v38  ;;  %v12584_v28 = vor.u32 %v14611_v53, %v12583_v24  ;;  %v14575_v21 = vld [vmem:[#allocation17 + $0x654] sm:$0xf0] }
 0x61a   : > { %10131 = vmatmul.bf16.vlgmr.msra.gmra.mxu3 %v23290_v22  ;;  %10137 = vmatpush.bf16.msra.mxu0 %v12248_v39  ;;  %v12183_v14 = vld [vmem:[#allocation17 + $0x448] sm:$0xf]  ;;  %v14511_v39 = vld [vmem:[#allocation17 + $0x454] sm:$0xf0] }
 0x61b   : > { %v12311_v44 = vld [vmem:[#allocation17 + $0x548] sm:$0xf]  ;;  %v14607_v0 = vld [vmem:[#allocation17 + $0x754] sm:$0xf0]  ;;  %v12184_v27 = vor.u32 %v14511_v39, %v12183_v14 }
 0x61c   : > { %10150 = vmatpush.bf16.msra.mxu1 %v12376_v61  ;;  %10163 = vmatpush.bf16.msrb.mxu2 %v12504_v42  ;;  %v12456_v61 = vor.u32 %v14579_v31, %v12455_v58  ;;  %v14543_v42 = vld [vmem:[#allocation17 + $0x554] sm:$0xf0]  ;;  %v9911_v18 = vpop.f32.mrf.mxu2  ;;  %v12567_v15 = vld [vmem:[#allocation17 + $0x748] sm:$0xf] }
 0x61d   : > { %10176 = vmatpush.bf16.msrb.mxu3 %v12632_v8  ;;  %v12439_v8 = vld [vmem:[#allocation17 + $0x648] sm:$0xf]  ;;  %v9924_v57 = vpop.f32.mrf.mxu3  ;;  %v9912_v56 = vadd.f32 %v9911_v18, %v9899_v25  ;;  %v12312_v48 = vor.u32 %v14543_v42, %v12311_v44  ;;  %v12568_v19 = vor.u32 %v14607_v0, %v12567_v15  ;;  %v14539_v6 = vld [vmem:[#allocation17 + $0x534] sm:$0xf0] }
 0x61e   : > { %10138 = vmatpush.bf16.msra.mxu0 %v12232_v52  ;;  %v9887_v52 = vpop.f32.mrf.mxu0  ;;  %v12440_v47 = vor.u32 %v14575_v21, %v12439_v8  ;;  %v12295_v2 = vld [vmem:[#allocation17 + $0x528] sm:$0xf]  ;;  %v14571_v13 = vld [vmem:[#allocation17 + $0x634] sm:$0xf0] }
 0x61f   : > { %v22437_v20 = vadd.f32 %v9924_v57, %v9912_v56  ;;  %v12423_v4 = vld [vmem:[#allocation17 + $0x628] sm:$0xf]  ;;  %v14603_v23 = vld [vmem:[#allocation17 + $0x734] sm:$0xf0]  ;;  %v12296_v34 = vor.u32 %v14539_v6, %v12295_v2 }
 0x620   : > { %10151 = vmatpush.bf16.msra.mxu1 %v12360_v43  ;;  %10164 = vmatpush.bf16.msrb.mxu2 %v12488_v40  ;;  %v9900_v43 = vpop.f32.mrf.mxu1  ;;  %v12167_v40 = vld [vmem:[#allocation17 + $0x428] sm:$0xf]  ;;  %v14503_v29 = vld [vmem:[#allocation17 + $0x414] sm:$0xf0]  ;;  %v12424_v38 = vor.u32 %v14571_v13, %v12423_v4 }
 0x621   : > { %10177 = vmatpush.bf16.msrb.mxu3 %v12616_v3  ;;  %v14507_v3 = vld [vmem:[#allocation17 + $0x434] sm:$0xf0]  ;;  %v12551_v5 = vld [vmem:[#allocation17 + $0x728] sm:$0xf] }
 0x622   : > { %10139 = vmatpush.bf16.msra.mxu0 %v12216_v63  ;;  %v12151_v63 = vld [vmem:[#allocation17 + $0x408] sm:$0xf]  ;;  %v12552_v59 = vor.u32 %v14603_v23, %v12551_v5  ;;  %v14567_v25 = vld [vmem:[#allocation17 + $0x614] sm:$0xf0] }
 0x623   : > { %v12407_v58 = vld [vmem:[#allocation17 + $0x608] sm:$0xf]  ;;  %v14659_v14 = vld [vmem:[#allocation17 + $0x8f4] sm:$0xf0]  ;;  %v12152_v44 = vor.u32 %v14503_v29, %v12151_v63 }
 0x624   : > { %10152 = vmatpush.bf16.msra.mxu1 %v12344_v33  ;;  %10165 = vmatpush.bf16.msrb.mxu2 %v12472_v50  ;;  %v12168_v33 = vor.u32 %v14507_v3, %v12167_v40  ;;  %v12279_v50 = vld [vmem:[#allocation17 + $0x508] sm:$0xf]  ;;  %v9913_v24 = vpop.f32.mrf.mxu2  ;;  %v14723_v8 = vld [vmem:[#allocation17 + $0xaf4] sm:$0xf0]  ;;  %v12408_v21 = vor.u32 %v14567_v25, %v12407_v58 }
 0x625   : > { %10178 = vmatpush.bf16.msrb.mxu3 %v12600_v9  ;;  %v14535_v9 = vld [vmem:[#allocation17 + $0x514] sm:$0xf0]  ;;  %v12535_v31 = vld [vmem:[#allocation17 + $0x708] sm:$0xf]  ;;  %v9926_v53 = vpop.f32.mrf.mxu3 }
 0x626   : > { %10140 = vmatpush.bf16.msra.mxu0 %v12200_v7  ;;  %v14599_v7 = vld [vmem:[#allocation17 + $0x714] sm:$0xf0]  ;;  %v12903_v39 = vld [vmem:[#allocation17 + $0x9e8] sm:$0xf]  ;;  %v12280_v42 = vor.u32 %v14535_v9, %v12279_v50 }
 0x627   : > { %v13159_v18 = vld [vmem:[#allocation17 + $0xbe8] sm:$0xf]  ;;  %v14755_v57 = vld [vmem:[#allocation17 + $0xbf4] sm:$0xf0]  ;;  %v12536_v15 = vor.u32 %v14599_v7, %v12535_v31 }
 0x628   : > { %10153 = vmatpush.bf16.msra.mxu1 %v12328_v46  ;;  %10166 = vmatpush.bf16.msrb.mxu2 %v12456_v61  ;;  %v12775_v46 = vld [vmem:[#allocation17 + $0x8e8] sm:$0xf]  ;;  %v14691_v61 = vld [vmem:[#allocation17 + $0x9f4] sm:$0xf0] }
 0x629   : > { %10179 = vmatpush.bf16.msrb.mxu3 %v12584_v28  ;;  %v13031_v28 = vld [vmem:[#allocation17 + $0xae8] sm:$0xf]  ;;  %v12776_v0 = vor.u32 %v14659_v14, %v12775_v46  ;;  %v12904_v56 = vor.u32 %v14691_v61, %v12903_v39  ;;  %v14655_v43 = vld [vmem:[#allocation17 + $0x8d4] sm:$0xf0] }
 0x62a   : > { %10141 = vmatpush.bf16.msra.mxu0 %v12184_v27  ;;  %v12759_v52 = vld [vmem:[#allocation17 + $0x8c8] sm:$0xf]  ;;  %v13032_v27 = vor.u32 %v14723_v8, %v13031_v28  ;;  %v14687_v3 = vld [vmem:[#allocation17 + $0x9d4] sm:$0xf0] }
 0x62b   : > { %v12887_v40 = vld [vmem:[#allocation17 + $0x9c8] sm:$0xf]  ;;  %v14751_v6 = vld [vmem:[#allocation17 + $0xbd4] sm:$0xf0]  ;;  %v12760_v4 = vor.u32 %v14655_v43, %v12759_v52 }
 0x62c   : > { %10154 = vmatpush.bf16.msra.mxu1 %v12312_v48  ;;  %10167 = vmatpush.bf16.msrb.mxu2 %v12440_v47  ;;  %v13160_v48 = vor.u32 %v14755_v57, %v13159_v18  ;;  %v13015_v47 = vld [vmem:[#allocation17 + $0xac8] sm:$0xf]  ;;  %v12888_v13 = vor.u32 %v14687_v3, %v12887_v40  ;;  %v14651_v23 = vld [vmem:[#allocation17 + $0x8b4] sm:$0xf0] }
 0x62d   : > { %10180 = vmatpush.bf16.msrb.mxu3 %v12568_v19  ;;  %v14719_v19 = vld [vmem:[#allocation17 + $0xad4] sm:$0xf0]  ;;  %v13143_v2 = vld [vmem:[#allocation17 + $0xbc8] sm:$0xf] }
 0x62e   : > { %10142 = vmatpush.bf16.msra.mxu0 %v12168_v33  ;;  %v12743_v5 = vld [vmem:[#allocation17 + $0x8a8] sm:$0xf]  ;;  %v13016_v63 = vor.u32 %v14719_v19, %v13015_v47  ;;  %v13144_v33 = vor.u32 %v14751_v6, %v13143_v2  ;;  %v14683_v29 = vld [vmem:[#allocation17 + $0x9b4] sm:$0xf0] }
 0x62f   : > { %v12999_v50 = vld [vmem:[#allocation17 + $0xaa8] sm:$0xf]  ;;  %v14715_v9 = vld [vmem:[#allocation17 + $0xab4] sm:$0xf0]  ;;  %v12744_v58 = vor.u32 %v14651_v23, %v12743_v5 }
 0x630   : > { %10155 = vmatpush.bf16.msra.mxu1 %v12296_v34  ;;  %10168 = vmatpush.bf16.msrb.mxu2 %v12424_v38  ;;  %v12871_v34 = vld [vmem:[#allocation17 + $0x9a8] sm:$0xf]  ;;  %v14647_v24 = vld [vmem:[#allocation17 + $0x894] sm:$0xf0]  ;;  %v13000_v53 = vor.u32 %v14715_v9, %v12999_v50 }
 0x631   : > { %10181 = vmatpush.bf16.msrb.mxu3 %v12552_v59  ;;  %v13127_v38 = vld [vmem:[#allocation17 + $0xba8] sm:$0xf]  ;;  %v14747_v59 = vld [vmem:[#allocation17 + $0xbb4] sm:$0xf0]  ;;  %v12872_v25 = vor.u32 %v14683_v29, %v12871_v34 }
 0x632   : > { %10143 = vmatpush.bf16.msra.mxu0 %v12152_v44  ;;  %v12727_v31 = vld [vmem:[#allocation17 + $0x888] sm:$0xf]  ;;  %v13128_v7 = vor.u32 %v14747_v59, %v13127_v38  ;;  %v14679_v14 = vld [vmem:[#allocation17 + $0x994] sm:$0xf0] }
 0x633   : > { %v12855_v46 = vld [vmem:[#allocation17 + $0x988] sm:$0xf]  ;;  %v14711_v61 = vld [vmem:[#allocation17 + $0xa94] sm:$0xf0]  ;;  %v12728_v57 = vor.u32 %v14647_v24, %v12727_v31 }
 0x634   : > { %10156 = vmatpush.bf16.msra.mxu1 %v12280_v42  ;;  %10169 = vmatpush.bf16.msrb.mxu2 %v12408_v21  ;;  %v12983_v39 = vld [vmem:[#allocation17 + $0xa88] sm:$0xf]  ;;  %v14743_v44 = vld [vmem:[#allocation17 + $0xb94] sm:$0xf0]  ;;  %v9937_v42 = vpop.f32.mrf.mxu0  ;;  %v9950_v8 = vpop.f32.mrf.mxu1  ;;  %v12856_v21 = vor.u32 %v14679_v14, %v12855_v46 }
 0x635   : > { %10182 = vmatpush.bf16.msrb.mxu3 %v12536_v15  ;;  %10144 = vmatmul.bf16.vlgmr.msra.gmra.mxu0 %v23291_v32  ;;  %v13111_v28 = vld [vmem:[#allocation17 + $0xb88] sm:$0xf]  ;;  %v9938_v18 = vadd.f32 %v9937_v42, %v22437_v20  ;;  %v14707_v3 = vld [vmem:[#allocation17 + $0xa74] sm:$0xf0] }
 0x636   : > { %10188 = vmatpush.bf16.msrb.mxu0 %v12776_v0  ;;  %v12711_v15 = vld [vmem:[#allocation17 + $0x868] sm:$0xf]  ;;  %v14643_v0 = vld [vmem:[#allocation17 + $0x874] sm:$0xf0]  ;;  %v13112_v52 = vor.u32 %v14743_v44, %v13111_v28 }
 0x637   : > { %10157 = vmatmul.bf16.vlgmr.msra.gmra.mxu1 %v23292_v51  ;;  %10170 = vmatmul.bf16.vlgmr.msrb.gmra.mxu2 %v23293_v60  ;;  %v12839_v43 = vld [vmem:[#allocation17 + $0x968] sm:$0xf]  ;;  %v9951_v40 = vadd.f32 %v9950_v8, %v9938_v18  ;;  %v14739_v19 = vld [vmem:[#allocation17 + $0xb74] sm:$0xf0]  ;;  %v12712_v2 = vor.u32 %v14643_v0, %v12711_v15 }
 0x638   : > { %10201 = vmatpush.bf16.msrb.mxu1 %v12904_v56  ;;  %10214 = vmatpush.bf16.msra.mxu2 %v13032_v27  ;;  %v12984_v56 = vor.u32 %v14711_v61, %v12983_v39  ;;  %v14675_v27 = vld [vmem:[#allocation17 + $0x974] sm:$0xf0]  ;;  %v13095_v47 = vld [vmem:[#allocation17 + $0xb68] sm:$0xf] }
 0x639   : > { %10227 = vmatpush.bf16.msra.mxu3 %v13160_v48  ;;  %v12967_v48 = vld [vmem:[#allocation17 + $0xa68] sm:$0xf]  ;;  %v12840_v6 = vor.u32 %v14675_v27, %v12839_v43  ;;  %v13096_v5 = vor.u32 %v14739_v19, %v13095_v47  ;;  %v14703_v50 = vld [vmem:[#allocation17 + $0xa54] sm:$0xf0] }
 0x63a   : > { %10183 = vmatmul.bf16.vlgmr.msrb.gmra.mxu3 %v23294_v17  ;;  %10189 = vmatpush.bf16.msrb.mxu0 %v12760_v4  ;;  %v12695_v20 = vld [vmem:[#allocation17 + $0x848] sm:$0xf]  ;;  %v14639_v4 = vld [vmem:[#allocation17 + $0x854] sm:$0xf0]  ;;  %v9963_v34 = vpop.f32.mrf.mxu2 }
 0x63b   : > { %v12823_v23 = vld [vmem:[#allocation17 + $0x948] sm:$0xf]  ;;  %v14735_v38 = vld [vmem:[#allocation17 + $0xb54] sm:$0xf0]  ;;  %v9964_v59 = vadd.f32 %v9963_v34, %v9951_v40  ;;  %v12696_v31 = vor.u32 %v14639_v4, %v12695_v20 }
 0x63c   : > { %10202 = vmatpush.bf16.msrb.mxu1 %v12888_v13  ;;  %10215 = vmatpush.bf16.msra.mxu2 %v13016_v63  ;;  %v12968_v13 = vor.u32 %v14707_v3, %v12967_v48  ;;  %v14671_v63 = vld [vmem:[#allocation17 + $0x954] sm:$0xf0]  ;;  %v13079_v9 = vld [vmem:[#allocation17 + $0xb48] sm:$0xf] }
 0x63d   : > { %10228 = vmatpush.bf16.msra.mxu3 %v13144_v33  ;;  %v12951_v33 = vld [vmem:[#allocation17 + $0xa48] sm:$0xf]  ;;  %v9976_v29 = vpop.f32.mrf.mxu3  ;;  %v12824_v24 = vor.u32 %v14671_v63, %v12823_v23  ;;  %v13080_v39 = vor.u32 %v14735_v38, %v13079_v9  ;;  %v14667_v28 = vld [vmem:[#allocation17 + $0x934] sm:$0xf0] }
 0x63e   : > { %10190 = vmatpush.bf16.msrb.mxu0 %v12744_v58  ;;  %v9939_v58 = vpop.f32.mrf.mxu0  ;;  %v22444_v46 = vadd.f32 %v9976_v29, %v9964_v59  ;;  %v12952_v14 = vor.u32 %v14703_v50, %v12951_v33  ;;  %v12807_v61 = vld [vmem:[#allocation17 + $0x928] sm:$0xf]  ;;  %v14699_v42 = vld [vmem:[#allocation17 + $0xa34] sm:$0xf0] }
 0x63f   : > { %v12935_v44 = vld [vmem:[#allocation17 + $0xa28] sm:$0xf]  ;;  %v14731_v18 = vld [vmem:[#allocation17 + $0xb34] sm:$0xf0]  ;;  %v12808_v15 = vor.u32 %v14667_v28, %v12807_v61 }
 0x640   : > { %10203 = vmatpush.bf16.msrb.mxu1 %v12872_v25  ;;  %10216 = vmatpush.bf16.msra.mxu2 %v13000_v53  ;;  %v9952_v25 = vpop.f32.mrf.mxu1  ;;  %v12679_v53 = vld [vmem:[#allocation17 + $0x828] sm:$0xf]  ;;  %v14631_v0 = vld [vmem:[#allocation17 + $0x814] sm:$0xf0]  ;;  %v12936_v43 = vor.u32 %v14699_v42, %v12935_v44 }
 0x641   : > { %10229 = vmatpush.bf16.msra.mxu3 %v13128_v7  ;;  %v14635_v7 = vld [vmem:[#allocation17 + $0x834] sm:$0xf0]  ;;  %v13063_v8 = vld [vmem:[#allocation17 + $0xb28] sm:$0xf] }
 0x642   : > { %10191 = vmatpush.bf16.msrb.mxu0 %v12728_v57  ;;  %v12663_v57 = vld [vmem:[#allocation17 + $0x808] sm:$0xf]  ;;  %v13064_v27 = vor.u32 %v14731_v18, %v13063_v8  ;;  %v14695_v40 = vld [vmem:[#allocation17 + $0xa14] sm:$0xf0]  ;;  %v9965_v47 = vpop.f32.mrf.mxu2 }
 0x643   : > { %v12919_v48 = vld [vmem:[#allocation17 + $0xa08] sm:$0xf]  ;;  %v14787_v20 = vld [vmem:[#allocation17 + $0xcf4] sm:$0xf0]  ;;  %v12664_v23 = vor.u32 %v14631_v0, %v12663_v57 }
 0x644   : > { %10204 = vmatpush.bf16.msrb.mxu1 %v12856_v21  ;;  %10217 = vmatpush.bf16.msra.mxu2 %v12984_v56  ;;  %v12680_v21 = vor.u32 %v14635_v7, %v12679_v53  ;;  %v12791_v56 = vld [vmem:[#allocation17 + $0x908] sm:$0xf]  ;;  %v14851_v33 = vld [vmem:[#allocation17 + $0xef4] sm:$0xf0]  ;;  %v12920_v50 = vor.u32 %v14695_v40, %v12919_v48 }
 0x645   : > { %10230 = vmatpush.bf16.msra.mxu3 %v13112_v52  ;;  %v14663_v52 = vld [vmem:[#allocation17 + $0x914] sm:$0xf0]  ;;  %v13047_v3 = vld [vmem:[#allocation17 + $0xb08] sm:$0xf]  ;;  %v9978_v19 = vpop.f32.mrf.mxu3 }
 0x646   : > { %10192 = vmatpush.bf16.msrb.mxu0 %v12712_v2  ;;  %v14727_v2 = vld [vmem:[#allocation17 + $0xb14] sm:$0xf0]  ;;  %v13415_v4 = vld [vmem:[#allocation17 + $0xde8] sm:$0xf]  ;;  %v12792_v63 = vor.u32 %v14663_v52, %v12791_v56 }
 0x647   : > { %v13671_v34 = vld [vmem:[#allocation17 + $0xfe8] sm:$0xf]  ;;  %v14883_v29 = vld [vmem:[#allocation17 + $0xff4] sm:$0xf0]  ;;  %v13048_v9 = vor.u32 %v14727_v2, %v13047_v3 }
 0x648   : > { %10205 = vmatpush.bf16.msrb.mxu1 %v12840_v6  ;;  %10218 = vmatpush.bf16.msra.mxu2 %v12968_v13  ;;  %v13287_v6 = vld [vmem:[#allocation17 + $0xce8] sm:$0xf]  ;;  %v14819_v13 = vld [vmem:[#allocation17 + $0xdf4] sm:$0xf0] }
 0x649   : > { %10231 = vmatpush.bf16.msra.mxu3 %v13096_v5  ;;  %v13543_v5 = vld [vmem:[#allocation17 + $0xee8] sm:$0xf]  ;;  %v13288_v38 = vor.u32 %v14787_v20, %v13287_v6  ;;  %v13416_v59 = vor.u32 %v14819_v13, %v13415_v4  ;;  %v14783_v25 = vld [vmem:[#allocation17 + $0xcd4] sm:$0xf0] }
 0x64a   : > { %10193 = vmatpush.bf16.msrb.mxu0 %v12696_v31  ;;  %v13271_v58 = vld [vmem:[#allocation17 + $0xcc8] sm:$0xf]  ;;  %v13544_v31 = vor.u32 %v14851_v33, %v13543_v5  ;;  %v14815_v7 = vld [vmem:[#allocation17 + $0xdd4] sm:$0xf0] }
 0x64b   : > { %v13399_v53 = vld [vmem:[#allocation17 + $0xdc8] sm:$0xf]  ;;  %v14879_v28 = vld [vmem:[#allocation17 + $0xfd4] sm:$0xf0]  ;;  %v13272_v44 = vor.u32 %v14783_v25, %v13271_v58 }
 0x64c   : > { %10206 = vmatpush.bf16.msrb.mxu1 %v12824_v24  ;;  %10219 = vmatpush.bf16.msra.mxu2 %v12952_v14  ;;  %v13672_v24 = vor.u32 %v14883_v29, %v13671_v34  ;;  %v13527_v14 = vld [vmem:[#allocation17 + $0xec8] sm:$0xf]  ;;  %v13400_v42 = vor.u32 %v14815_v7, %v13399_v53  ;;  %v14779_v18 = vld [vmem:[#allocation17 + $0xcb4] sm:$0xf0] }
 0x64d   : > { %10232 = vmatpush.bf16.msra.mxu3 %v13080_v39  ;;  %v14847_v39 = vld [vmem:[#allocation17 + $0xed4] sm:$0xf0]  ;;  %v13655_v61 = vld [vmem:[#allocation17 + $0xfc8] sm:$0xf] }
 0x64e   : > { %10194 = vmatpush.bf16.msrb.mxu0 %v12680_v21  ;;  %v13255_v8 = vld [vmem:[#allocation17 + $0xca8] sm:$0xf]  ;;  %v13528_v57 = vor.u32 %v14847_v39, %v13527_v14  ;;  %v13656_v21 = vor.u32 %v14879_v28, %v13655_v61  ;;  %v14811_v0 = vld [vmem:[#allocation17 + $0xdb4] sm:$0xf0] }
 0x64f   : > { %v13511_v56 = vld [vmem:[#allocation17 + $0xea8] sm:$0xf]  ;;  %v14843_v52 = vld [vmem:[#allocation17 + $0xeb4] sm:$0xf0]  ;;  %v13256_v48 = vor.u32 %v14779_v18, %v13255_v8 }
 0x650   : > { %10207 = vmatpush.bf16.msrb.mxu1 %v12808_v15  ;;  %10220 = vmatpush.bf16.msra.mxu2 %v12936_v43  ;;  %v13383_v15 = vld [vmem:[#allocation17 + $0xda8] sm:$0xf]  ;;  %v14775_v47 = vld [vmem:[#allocation17 + $0xc94] sm:$0xf0]  ;;  %v13512_v19 = vor.u32 %v14843_v52, %v13511_v56 }
 0x651   : > { %10233 = vmatpush.bf16.msra.mxu3 %v13064_v27  ;;  %v13639_v43 = vld [vmem:[#allocation17 + $0xfa8] sm:$0xf]  ;;  %v14875_v27 = vld [vmem:[#allocation17 + $0xfb4] sm:$0xf0]  ;;  %v13384_v40 = vor.u32 %v14811_v0, %v13383_v15 }
 0x652   : > { %10195 = vmatpush.bf16.msrb.mxu0 %v12664_v23  ;;  %v13239_v3 = vld [vmem:[#allocation17 + $0xc88] sm:$0xf]  ;;  %v13640_v2 = vor.u32 %v14875_v27, %v13639_v43  ;;  %v14807_v20 = vld [vmem:[#allocation17 + $0xd94] sm:$0xf0] }
 0x653   : > { %v13367_v6 = vld [vmem:[#allocation17 + $0xd88] sm:$0xf]  ;;  %v14839_v13 = vld [vmem:[#allocation17 + $0xe94] sm:$0xf0]  ;;  %v13240_v29 = vor.u32 %v14775_v47, %v13239_v3 }
 0x654   : > { %10208 = vmatpush.bf16.msrb.mxu1 %v12792_v63  ;;  %10221 = vmatpush.bf16.msra.mxu2 %v12920_v50  ;;  %v13495_v4 = vld [vmem:[#allocation17 + $0xe88] sm:$0xf]  ;;  %v14871_v23 = vld [vmem:[#allocation17 + $0xf94] sm:$0xf0]  ;;  %v9989_v63 = vpop.f32.mrf.mxu0  ;;  %v10002_v33 = vpop.f32.mrf.mxu1  ;;  %v13368_v50 = vor.u32 %v14807_v20, %v13367_v6 }
 0x655   : > { %10234 = vmatpush.bf16.msra.mxu3 %v13048_v9  ;;  %10196 = vmatmul.bf16.vlgmr.msrb.gmra.mxu0 %v22273_v41  ;;  %v13623_v5 = vld [vmem:[#allocation17 + $0xf88] sm:$0xf]  ;;  %v9990_v34 = vadd.f32 %v9989_v63, %v22444_v46  ;;  %v14835_v7 = vld [vmem:[#allocation17 + $0xe74] sm:$0xf0] }
 0x656   : > { %10240 = vmatpush.bf16.msra.mxu0 %v13288_v38  ;;  %v13223_v9 = vld [vmem:[#allocation17 + $0xc68] sm:$0xf]  ;;  %v14771_v38 = vld [vmem:[#allocation17 + $0xc74] sm:$0xf0]  ;;  %v13624_v58 = vor.u32 %v14871_v23, %v13623_v5 }
 0x657   : > { %10209 = vmatmul.bf16.vlgmr.msrb.gmra.mxu1 %v22278_v35  ;;  %10222 = vmatmul.bf16.vlgmr.msra.gmra.mxu2 %v22316_v54  ;;  %v13351_v25 = vld [vmem:[#allocation17 + $0xd68] sm:$0xf]  ;;  %v10003_v53 = vadd.f32 %v10002_v33, %v9990_v34  ;;  %v14867_v39 = vld [vmem:[#allocation17 + $0xf74] sm:$0xf0]  ;;  %v13224_v61 = vor.u32 %v14771_v38, %v13223_v9 }
 0x658   : > { %10253 = vmatpush.bf16.msra.mxu1 %v13416_v59  ;;  %10266 = vmatpush.bf16.msrb.mxu2 %v13544_v31  ;;  %v13496_v59 = vor.u32 %v14839_v13, %v13495_v4  ;;  %v14803_v31 = vld [vmem:[#allocation17 + $0xd74] sm:$0xf0]  ;;  %v13607_v14 = vld [vmem:[#allocation17 + $0xf68] sm:$0xf] }
 0x659   : > { %10279 = vmatpush.bf16.msrb.mxu3 %v13672_v24  ;;  %v13479_v24 = vld [vmem:[#allocation17 + $0xe68] sm:$0xf]  ;;  %v13352_v28 = vor.u32 %v14803_v31, %v13351_v25  ;;  %v13608_v8 = vor.u32 %v14867_v39, %v13607_v14  ;;  %v14831_v56 = vld [vmem:[#allocation17 + $0xe54] sm:$0xf0] }
 0x65a   : > { %10235 = vmatmul.bf16.vlgmr.msra.gmra.mxu3 %v22318_v12  ;;  %10241 = vmatpush.bf16.msra.mxu0 %v13272_v44  ;;  %v13207_v46 = vld [vmem:[#allocation17 + $0xc48] sm:$0xf]  ;;  %v14767_v44 = vld [vmem:[#allocation17 + $0xc54] sm:$0xf0]  ;;  %v10015_v15 = vpop.f32.mrf.mxu2 }
 0x65b   : > { %v13335_v18 = vld [vmem:[#allocation17 + $0xd48] sm:$0xf]  ;;  %v14863_v43 = vld [vmem:[#allocation17 + $0xf54] sm:$0xf0]  ;;  %v10016_v27 = vadd.f32 %v10015_v15, %v10003_v53  ;;  %v13208_v3 = vor.u32 %v14767_v44, %v13207_v46 }
 0x65c   : > { %10254 = vmatpush.bf16.msra.mxu1 %v13400_v42  ;;  %10267 = vmatpush.bf16.msrb.mxu2 %v13528_v57  ;;  %v13480_v42 = vor.u32 %v14835_v7, %v13479_v24  ;;  %v14799_v57 = vld [vmem:[#allocation17 + $0xd54] sm:$0xf0]  ;;  %v13591_v52 = vld [vmem:[#allocation17 + $0xf48] sm:$0xf] }
 0x65d   : > { %10280 = vmatpush.bf16.msrb.mxu3 %v13656_v21  ;;  %v13463_v21 = vld [vmem:[#allocation17 + $0xe48] sm:$0xf]  ;;  %v10028_v0 = vpop.f32.mrf.mxu3  ;;  %v13336_v47 = vor.u32 %v14799_v57, %v13335_v18  ;;  %v13592_v4 = vor.u32 %v14863_v43, %v13591_v52  ;;  %v14795_v5 = vld [vmem:[#allocation17 + $0xd34] sm:$0xf0] }
 0x65e   : > { %10242 = vmatpush.bf16.msra.mxu0 %v13256_v48  ;;  %v9991_v48 = vpop.f32.mrf.mxu0  ;;  %v22451_v6 = vadd.f32 %v10028_v0, %v10016_v27  ;;  %v13464_v20 = vor.u32 %v14831_v56, %v13463_v21  ;;  %v13319_v13 = vld [vmem:[#allocation17 + $0xd28] sm:$0xf]  ;;  %v14827_v63 = vld [vmem:[#allocation17 + $0xe34] sm:$0xf0] }
 0x65f   : > { %v13447_v23 = vld [vmem:[#allocation17 + $0xe28] sm:$0xf]  ;;  %v14859_v34 = vld [vmem:[#allocation17 + $0xf34] sm:$0xf0]  ;;  %v13320_v9 = vor.u32 %v14795_v5, %v13319_v13 }
 0x660   : > { %10255 = vmatpush.bf16.msra.mxu1 %v13384_v40  ;;  %10268 = vmatpush.bf16.msrb.mxu2 %v13512_v19  ;;  %v10004_v40 = vpop.f32.mrf.mxu1  ;;  %v13191_v19 = vld [vmem:[#allocation17 + $0xc28] sm:$0xf]  ;;  %v14759_v38 = vld [vmem:[#allocation17 + $0xc14] sm:$0xf0]  ;;  %v13448_v25 = vor.u32 %v14827_v63, %v13447_v23 }
 0x661   : > { %10281 = vmatpush.bf16.msrb.mxu3 %v13640_v2  ;;  %v14763_v2 = vld [vmem:[#allocation17 + $0xc34] sm:$0xf0]  ;;  %v13575_v33 = vld [vmem:[#allocation17 + $0xf28] sm:$0xf] }
 0x662   : > { %10243 = vmatpush.bf16.msra.mxu0 %v13240_v29  ;;  %v13175_v29 = vld [vmem:[#allocation17 + $0xc08] sm:$0xf]  ;;  %v13576_v31 = vor.u32 %v14859_v34, %v13575_v33  ;;  %v14823_v53 = vld [vmem:[#allocation17 + $0xe14] sm:$0xf0]  ;;  %v10017_v14 = vpop.f32.mrf.mxu2 }
 0x663   : > { %v13431_v24 = vld [vmem:[#allocation17 + $0xe08] sm:$0xf]  ;;  %v14915_v46 = vld [vmem:[#allocation17 + $0x10f4] sm:$0xf0]  ;;  %v13176_v18 = vor.u32 %v14759_v38, %v13175_v29 }
 0x664   : > { %10256 = vmatpush.bf16.msra.mxu1 %v13368_v50  ;;  %10269 = vmatpush.bf16.msrb.mxu2 %v13496_v59  ;;  %v13192_v50 = vor.u32 %v14763_v2, %v13191_v19  ;;  %v13303_v59 = vld [vmem:[#allocation17 + $0xd08] sm:$0xf]  ;;  %v14979_v21 = vld [vmem:[#allocation17 + $0x12f4] sm:$0xf0]  ;;  %v13432_v56 = vor.u32 %v14823_v53, %v13431_v24 }
 0x665   : > { %10282 = vmatpush.bf16.msrb.mxu3 %v13624_v58  ;;  %v14791_v58 = vld [vmem:[#allocation17 + $0xd14] sm:$0xf0]  ;;  %v13559_v7 = vld [vmem:[#allocation17 + $0xf08] sm:$0xf]  ;;  %v10030_v39 = vpop.f32.mrf.mxu3 }
 0x666   : > { %10244 = vmatpush.bf16.msra.mxu0 %v13224_v61  ;;  %v14855_v61 = vld [vmem:[#allocation17 + $0xf14] sm:$0xf0]  ;;  %v13927_v44 = vld [vmem:[#allocation17 + $0x11e8] sm:$0xf]  ;;  %v13304_v57 = vor.u32 %v14791_v58, %v13303_v59 }
 0x667   : > { %v14183_v15 = vld [vmem:[#allocation17 + $0x13e8] sm:$0xf]  ;;  %v15011_v0 = vld [vmem:[#allocation17 + $0x13f4] sm:$0xf0]  ;;  %v13560_v52 = vor.u32 %v14855_v61, %v13559_v7 }
 0x668   : > { %10257 = vmatpush.bf16.msra.mxu1 %v13352_v28  ;;  %10270 = vmatpush.bf16.msrb.mxu2 %v13480_v42  ;;  %v13799_v28 = vld [vmem:[#allocation17 + $0x10e8] sm:$0xf]  ;;  %v14947_v42 = vld [vmem:[#allocation17 + $0x11f4] sm:$0xf0] }
 0x669   : > { %10283 = vmatpush.bf16.msrb.mxu3 %v13608_v8  ;;  %v14055_v8 = vld [vmem:[#allocation17 + $0x12e8] sm:$0xf]  ;;  %v13800_v43 = vor.u32 %v14915_v46, %v13799_v28  ;;  %v13928_v27 = vor.u32 %v14947_v42, %v13927_v44  ;;  %v14911_v40 = vld [vmem:[#allocation17 + $0x10d4] sm:$0xf0] }
 0x66a   : > { %10245 = vmatpush.bf16.msra.mxu0 %v13208_v3  ;;  %v13783_v48 = vld [vmem:[#allocation17 + $0x10c8] sm:$0xf]  ;;  %v14056_v3 = vor.u32 %v14979_v21, %v14055_v8  ;;  %v14943_v2 = vld [vmem:[#allocation17 + $0x11d4] sm:$0xf0] }
 0x66b   : > { %v13911_v19 = vld [vmem:[#allocation17 + $0x11c8] sm:$0xf]  ;;  %v15007_v5 = vld [vmem:[#allocation17 + $0x13d4] sm:$0xf0]  ;;  %v13784_v23 = vor.u32 %v14911_v40, %v13783_v48 }
 0x66c   : > { %10258 = vmatpush.bf16.msra.mxu1 %v13336_v47  ;;  %10271 = vmatpush.bf16.msrb.mxu2 %v13464_v20  ;;  %v14184_v47 = vor.u32 %v15011_v0, %v14183_v15  ;;  %v14039_v20 = vld [vmem:[#allocation17 + $0x12c8] sm:$0xf]  ;;  %v13912_v63 = vor.u32 %v14943_v2, %v13911_v19  ;;  %v14907_v34 = vld [vmem:[#allocation17 + $0x10b4] sm:$0xf0] }
 0x66d   : > { %10284 = vmatpush.bf16.msrb.mxu3 %v13592_v4  ;;  %v14975_v4 = vld [vmem:[#allocation17 + $0x12d4] sm:$0xf0]  ;;  %v14167_v13 = vld [vmem:[#allocation17 + $0x13c8] sm:$0xf] }
 0x66e   : > { %10246 = vmatpush.bf16.msra.mxu0 %v13192_v50  ;;  %v13767_v33 = vld [vmem:[#allocation17 + $0x10a8] sm:$0xf]  ;;  %v14040_v29 = vor.u32 %v14975_v4, %v14039_v20  ;;  %v14168_v50 = vor.u32 %v15007_v5, %v14167_v13  ;;  %v14939_v38 = vld [vmem:[#allocation17 + $0x11b4] sm:$0xf0] }
 0x66f   : > { %v14023_v59 = vld [vmem:[#allocation17 + $0x12a8] sm:$0xf]  ;;  %v14971_v58 = vld [vmem:[#allocation17 + $0x12b4] sm:$0xf0]  ;;  %v13768_v24 = vor.u32 %v14907_v34, %v13767_v33 }
 0x670   : > { %10259 = vmatpush.bf16.msra.mxu1 %v13320_v9  ;;  %10272 = vmatpush.bf16.msrb.mxu2 %v13448_v25  ;;  %v13895_v9 = vld [vmem:[#allocation17 + $0x11a8] sm:$0xf]  ;;  %v14903_v14 = vld [vmem:[#allocation17 + $0x1094] sm:$0xf0]  ;;  %v14024_v39 = vor.u32 %v14971_v58, %v14023_v59 }
 0x671   : > { %10285 = vmatpush.bf16.msrb.mxu3 %v13576_v31  ;;  %v14151_v25 = vld [vmem:[#allocation17 + $0x13a8] sm:$0xf]  ;;  %v15003_v31 = vld [vmem:[#allocation17 + $0x13b4] sm:$0xf0]  ;;  %v13896_v53 = vor.u32 %v14939_v38, %v13895_v9 }
 0x672   : > { %10247 = vmatpush.bf16.msra.mxu0 %v13176_v18  ;;  %v13751_v7 = vld [vmem:[#allocation17 + $0x1088] sm:$0xf]  ;;  %v14152_v61 = vor.u32 %v15003_v31, %v14151_v25  ;;  %v14935_v46 = vld [vmem:[#allocation17 + $0x1194] sm:$0xf0] }
 0x673   : > { %v13879_v28 = vld [vmem:[#allocation17 + $0x1188] sm:$0xf]  ;;  %v14967_v42 = vld [vmem:[#allocation17 + $0x1294] sm:$0xf0]  ;;  %v13752_v0 = vor.u32 %v14903_v14, %v13751_v7 }
 0x674   : > { %10260 = vmatpush.bf16.msra.mxu1 %v13304_v57  ;;  %10273 = vmatpush.bf16.msrb.mxu2 %v13432_v56  ;;  %v14007_v44 = vld [vmem:[#allocation17 + $0x1288] sm:$0xf]  ;;  %v14999_v18 = vld [vmem:[#allocation17 + $0x1394] sm:$0xf0]  ;;  %v10041_v57 = vpop.f32.mrf.mxu0  ;;  %v10054_v21 = vpop.f32.mrf.mxu1  ;;  %v13880_v56 = vor.u32 %v14935_v46, %v13879_v28 }
 0x675   : > { %10286 = vmatpush.bf16.msrb.mxu3 %v13560_v52  ;;  %10248 = vmatmul.bf16.vlgmr.msra.gmra.mxu0 %v22374_v36  ;;  %v14135_v8 = vld [vmem:[#allocation17 + $0x1388] sm:$0xf]  ;;  %v10042_v15 = vadd.f32 %v10041_v57, %v22451_v6  ;;  %v14963_v2 = vld [vmem:[#allocation17 + $0x1274] sm:$0xf0] }
 0x676   : > { %10292 = vmatpush.bf16.msrb.mxu0 %v13800_v43  ;;  %v13735_v52 = vld [vmem:[#allocation17 + $0x1068] sm:$0xf]  ;;  %v14899_v43 = vld [vmem:[#allocation17 + $0x1074] sm:$0xf0]  ;;  %v14136_v48 = vor.u32 %v14999_v18, %v14135_v8 }
 0x677   : > { %10261 = vmatmul.bf16.vlgmr.msra.gmra.mxu1 %v22378_v49  ;;  %10274 = vmatmul.bf16.vlgmr.msrb.gmra.mxu2 %v22382_v1  ;;  %v13863_v40 = vld [vmem:[#allocation17 + $0x1168] sm:$0xf]  ;;  %v10055_v19 = vadd.f32 %v10054_v21, %v10042_v15  ;;  %v14995_v4 = vld [vmem:[#allocation17 + $0x1374] sm:$0xf0]  ;;  %v13736_v13 = vor.u32 %v14899_v43, %v13735_v52 }
 0x678   : > { %10305 = vmatpush.bf16.msrb.mxu1 %v13928_v27  ;;  %10318 = vmatpush.bf16.msra.mxu2 %v14056_v3  ;;  %v14008_v27 = vor.u32 %v14967_v42, %v14007_v44  ;;  %v14931_v3 = vld [vmem:[#allocation17 + $0x1174] sm:$0xf0]  ;;  %v14119_v20 = vld [vmem:[#allocation17 + $0x1368] sm:$0xf] }
 0x679   : > { %10331 = vmatpush.bf16.msra.mxu3 %v14184_v47  ;;  %v13991_v47 = vld [vmem:[#allocation17 + $0x1268] sm:$0xf]  ;;  %v13864_v5 = vor.u32 %v14931_v3, %v13863_v40  ;;  %v14120_v33 = vor.u32 %v14995_v4, %v14119_v20  ;;  %v14959_v59 = vld [vmem:[#allocation17 + $0x1254] sm:$0xf0] }
 0x67a   : > { %10287 = vmatmul.bf16.vlgmr.msrb.gmra.mxu3 %v22384_v37  ;;  %10293 = vmatpush.bf16.msrb.mxu0 %v13784_v23  ;;  %v13719_v6 = vld [vmem:[#allocation17 + $0x1048] sm:$0xf]  ;;  %v14895_v23 = vld [vmem:[#allocation17 + $0x1054] sm:$0xf0]  ;;  %v10067_v9 = vpop.f32.mrf.mxu2 }
 0x67b   : > { %v13847_v34 = vld [vmem:[#allocation17 + $0x1148] sm:$0xf]  ;;  %v14991_v25 = vld [vmem:[#allocation17 + $0x1354] sm:$0xf0]  ;;  %v10068_v31 = vadd.f32 %v10067_v9, %v10055_v19  ;;  %v13720_v7 = vor.u32 %v14895_v23, %v13719_v6  ;;  %v11753_v6 = vld [vmem:[#allocation17 + $0xf8] sm:$0xf0] }
 0x67c   : > { %10306 = vmatpush.bf16.msrb.mxu1 %v13912_v63  ;;  %10319 = vmatpush.bf16.msra.mxu2 %v14040_v29  ;;  %v13992_v63 = vor.u32 %v14963_v2, %v13991_v47  ;;  %v14927_v29 = vld [vmem:[#allocation17 + $0x1154] sm:$0xf0]  ;;  %v14103_v58 = vld [vmem:[#allocation17 + $0x1348] sm:$0xf]  ;;  %v14433_v23 = vld [vmem:[#allocation17 + $0x1ec] sm:$0xf] }
 0x67d   : > { %10332 = vmatpush.bf16.msra.mxu3 %v14168_v50  ;;  %v13975_v50 = vld [vmem:[#allocation17 + $0x1248] sm:$0xf]  ;;  %v10080_v38 = vpop.f32.mrf.mxu3  ;;  %v13848_v14 = vor.u32 %v14927_v29, %v13847_v34  ;;  %v14104_v44 = vor.u32 %v14991_v25, %v14103_v58  ;;  %v14923_v8 = vld [vmem:[#allocation17 + $0x1134] sm:$0xf0]  ;;  %v14497_v9 = vld [vmem:[#allocation17 + $0x3ec] sm:$0xf] }
 0x67e   : > { %10294 = vmatpush.bf16.msrb.mxu0 %v13768_v24  ;;  %v10043_v24 = vpop.f32.mrf.mxu0  ;;  %v22458_v28 = vadd.f32 %v10080_v38, %v10068_v31  ;;  %v13976_v46 = vor.u32 %v14959_v59, %v13975_v50  ;;  %v13831_v42 = vld [vmem:[#allocation17 + $0x1128] sm:$0xf]  ;;  %v14955_v57 = vld [vmem:[#allocation17 + $0x1234] sm:$0xf0]  ;;  %v12009_v50 = vld [vmem:[#allocation17 + $0x2f8] sm:$0xf0] }
 0x67f   : > { %v13959_v18 = vld [vmem:[#allocation17 + $0x1228] sm:$0xf]  ;;  %v14987_v15 = vld [vmem:[#allocation17 + $0x1334] sm:$0xf0]  ;;  %v13832_v52 = vor.u32 %v14923_v8, %v13831_v42  ;;  %v12137_v38 = vld [vmem:[#allocation17 + $0x3f8] sm:$0xf0] }
 0x680   : > { %10307 = vmatpush.bf16.msrb.mxu1 %v13896_v53  ;;  %10320 = vmatpush.bf16.msra.mxu2 %v14024_v39  ;;  %v10056_v53 = vpop.f32.mrf.mxu1  ;;  %v13703_v39 = vld [vmem:[#allocation17 + $0x1028] sm:$0xf]  ;;  %v14887_v43 = vld [vmem:[#allocation17 + $0x1014] sm:$0xf0]  ;;  %v13960_v40 = vor.u32 %v14955_v57, %v13959_v18  ;;  %v14397_v24 = vld [vmem:[#allocation17 + $0xcc] sm:$0xf] }
 0x681   : > { %10333 = vmatpush.bf16.msra.mxu3 %v14152_v61  ;;  %v14891_v61 = vld [vmem:[#allocation17 + $0x1034] sm:$0xf0]  ;;  %v14087_v21 = vld [vmem:[#allocation17 + $0x1328] sm:$0xf]  ;;  %v11737_v53 = vld [vmem:[#allocation17 + $0xd8] sm:$0xf0] }
 0x682   : > { %10295 = vmatpush.bf16.msrb.mxu0 %v13752_v0  ;;  %v13687_v0 = vld [vmem:[#allocation17 + $0x1008] sm:$0xf]  ;;  %v14088_v3 = vor.u32 %v14987_v15, %v14087_v21  ;;  %v14951_v19 = vld [vmem:[#allocation17 + $0x1214] sm:$0xf0]  ;;  %v10069_v20 = vpop.f32.mrf.mxu2  ;;  %v14493_v42 = vld [vmem:[#allocation17 + $0x3cc] sm:$0xf]  ;;  %v11740_v18 = vor.u32 %v14397_v24, %v11737_v53 }
 0x683   : > { %v13943_v47 = vld [vmem:[#allocation17 + $0x1208] sm:$0xf]  ;;  %v13688_v34 = vor.u32 %v14887_v43, %v13687_v0  ;;  %v12121_v8 = vld [vmem:[#allocation17 + $0x3d8] sm:$0xf0]  ;;  %v14393_v21 = vld [vmem:[#allocation17 + $0xac] sm:$0xf] }
 0x684   : > { %10308 = vmatpush.bf16.msrb.mxu1 %v13880_v56  ;;  %10321 = vmatpush.bf16.msra.mxu2 %v14008_v27  ;;  %v13704_v56 = vor.u32 %v14891_v61, %v13703_v39  ;;  %v13815_v27 = vld [vmem:[#allocation17 + $0x1108] sm:$0xf]  ;;  %v13944_v59 = vor.u32 %v14951_v19, %v13943_v47  ;;  %v14429_v39 = vld [vmem:[#allocation17 + $0x1cc] sm:$0xf]  ;;  %v11865_v61 = vld [vmem:[#allocation17 + $0x1d8] sm:$0xf0] }
 0x685   : > { %10334 = vmatpush.bf16.msra.mxu3 %v14136_v48  ;;  %v14919_v48 = vld [vmem:[#allocation17 + $0x1114] sm:$0xf0]  ;;  %v14071_v2 = vld [vmem:[#allocation17 + $0x1308] sm:$0xf]  ;;  %v10082_v4 = vpop.f32.mrf.mxu3  ;;  %v11868_v57 = vor.u32 %v14429_v39, %v11865_v61  ;;  %v11721_v15 = vld [vmem:[#allocation17 + $0xb8] sm:$0xf0] }
 0x686   : > { %10296 = vmatpush.bf16.msrb.mxu0 %v13736_v13  ;;  %v14983_v13 = vld [vmem:[#allocation17 + $0x1314] sm:$0xf0]  ;;  %v13816_v29 = vor.u32 %v14919_v48, %v13815_v27  ;;  %v11849_v43 = vld [vmem:[#allocation17 + $0x1b8] sm:$0xf0]  ;;  %v14457_v27 = vld [vmem:[#allocation17 + $0x2ac] sm:$0xf]  ;;  %v11724_v47 = vor.u32 %v14393_v21, %v11721_v15 }
 0x687   : > { %v14072_v58 = vor.u32 %v14983_v13, %v14071_v2  ;;  %v11977_v48 = vld [vmem:[#allocation17 + $0x2b8] sm:$0xf0]  ;;  %v15928_v2 = vld [vmem:[#allocation18] sm:$0xf]  ;;  %v14389_v4 = vld [vmem:[#allocation17 + $0x8c] sm:$0xf] }
 0x688   : > { %10309 = vmatpush.bf16.msrb.mxu1 %v13864_v5  ;;  %10322 = vmatpush.bf16.msra.mxu2 %v13992_v63  ;;  %v14401_v5 = vld [vmem:[#allocation17 + $0xec] sm:$0xf]  ;;  %v11881_v63 = vld [vmem:[#allocation17 + $0x1f8] sm:$0xf0]  ;;  %v9558_v20 = vperm.slane %v15928_v2, 2 }
 0x689   : > { %10335 = vmatpush.bf16.msra.mxu3 %v14120_v33  ;;  %v14465_v33 = vld [vmem:[#allocation17 + $0x2ec] sm:$0xf]  ;;  %v11756_v25 = vor.u32 %v14401_v5, %v11753_v6  ;;  %v11884_v31 = vor.u32 %v14433_v23, %v11881_v63  ;;  %v11705_v13 = vld [vmem:[#allocation17 + $0x98] sm:$0xf0]  ;;  %v11980_v5 = vor.u32 %v14457_v27, %v11977_v48 }
 0x68a   : > { %10297 = vmatpush.bf16.msrb.mxu0 %v13720_v7  ;;  %v12012_v7 = vor.u32 %v14465_v33, %v12009_v50  ;;  %v14421_v23 = vld [vmem:[#allocation17 + $0x18c] sm:$0xf]  ;;  %v11833_v63 = vld [vmem:[#allocation17 + $0x198] sm:$0xf0] }
 0x68b   : > { %v14453_v33 = vld [vmem:[#allocation17 + $0x28c] sm:$0xf]  ;;  %v12089_v50 = vld [vmem:[#allocation17 + $0x398] sm:$0xf0] }
 0x68c   : > { %10310 = vmatpush.bf16.msrb.mxu1 %v13848_v14  ;;  %10323 = vmatpush.bf16.msra.mxu2 %v13976_v46  ;;  %v12140_v14 = vor.u32 %v14497_v9, %v12137_v38  ;;  %v14461_v46 = vld [vmem:[#allocation17 + $0x2cc] sm:$0xf]  ;;  %v11689_v24 = vld [vmem:[#allocation17 + $0x78] sm:$0xf0] }
 0x68d   : > { %10336 = vmatpush.bf16.msra.mxu3 %v14104_v44  ;;  %v11993_v44 = vld [vmem:[#allocation17 + $0x2d8] sm:$0xf0]  ;;  %v14449_v61 = vld [vmem:[#allocation17 + $0x26c] sm:$0xf] }
 0x68e   : > { %10298 = vmatpush.bf16.msrb.mxu0 %v13704_v56  ;;  %v11996_v0 = vor.u32 %v14461_v46, %v11993_v44  ;;  %v12124_v56 = vor.u32 %v14493_v42, %v12121_v8  ;;  %v11817_v39 = vld [vmem:[#allocation17 + $0x178] sm:$0xf0]  ;;  %v14481_v42 = vld [vmem:[#allocation17 + $0x36c] sm:$0xf] }
 0x68f   : > { %v11945_v44 = vld [vmem:[#allocation17 + $0x278] sm:$0xf0]  ;;  %v14381_v21 = vld [vmem:[#allocation17 + $0x4c] sm:$0xf] }
 0x690   : > { %10311 = vmatpush.bf16.msrb.mxu1 %v13832_v52  ;;  %10324 = vmatpush.bf16.msra.mxu2 %v13960_v40  ;;  %v14425_v52 = vld [vmem:[#allocation17 + $0x1ac] sm:$0xf]  ;;  %v12073_v8 = vld [vmem:[#allocation17 + $0x378] sm:$0xf0] }
 0x691   : > { %10337 = vmatpush.bf16.msra.mxu3 %v14088_v3  ;;  %v14489_v40 = vld [vmem:[#allocation17 + $0x3ac] sm:$0xf]  ;;  %v12105_v3 = vld [vmem:[#allocation17 + $0x3b8] sm:$0xf0]  ;;  %v11852_v19 = vor.u32 %v14425_v52, %v11849_v43 }
 0x692   : > { %10299 = vmatpush.bf16.msrb.mxu0 %v13688_v34  ;;  %v12108_v6 = vor.u32 %v14489_v40, %v12105_v3  ;;  %v11961_v34 = vld [vmem:[#allocation17 + $0x298] sm:$0xf0]  ;;  %v10093_v9 = vpop.f32.mrf.mxu0  ;;  %v14413_v52 = vld [vmem:[#allocation17 + $0x14c] sm:$0xf] }
 0x693   : > { %v11964_v53 = vor.u32 %v14453_v33, %v11961_v34  ;;  %v11673_v15 = vld [vmem:[#allocation17 + $0x58] sm:$0xf0]  ;;  %v14445_v27 = vld [vmem:[#allocation17 + $0x24c] sm:$0xf] }
 0x694   : > { %10312 = vmatpush.bf16.msrb.mxu1 %v13816_v29  ;;  %10325 = vmatpush.bf16.msra.mxu2 %v13944_v59  ;;  %v14485_v29 = vld [vmem:[#allocation17 + $0x38c] sm:$0xf]  ;;  %v10106_v38 = vpop.f32.mrf.mxu1  ;;  %v10094_v59 = vadd.f32 %v10093_v9, %v9558_v20  ;;  %v11801_v43 = vld [vmem:[#allocation17 + $0x158] sm:$0xf0] }
 0x695   : > { %10338 = vmatpush.bf16.msra.mxu3 %v14072_v58  ;;  %10300 = vmatmul.bf16.vlgmr.msrb.gmra.mxu0 %v22391_v26  ;;  %v11708_v58 = vor.u32 %v14389_v4, %v11705_v13  ;;  %v11929_v3 = vld [vmem:[#allocation17 + $0x258] sm:$0xf0]  ;;  %v11676_v13 = vor.u32 %v14381_v21, %v11673_v15  ;;  %v14441_v9 = vld [vmem:[#allocation17 + $0x22c] sm:$0xf] }
 0x696   : > { %10344 = vmatpush.bf16.msra.mxu0 %v11756_v25  ;;  %v11836_v25 = vor.u32 %v14421_v23, %v11833_v63  ;;  %v10107_v46 = vadd.f32 %v10106_v38, %v10094_v59  ;;  %v11657_v23 = vld [vmem:[#allocation17 + $0x38] sm:$0xf0]  ;;  %v11932_v33 = vor.u32 %v14445_v27, %v11929_v3  ;;  %v14473_v59 = vld [vmem:[#allocation17 + $0x32c] sm:$0xf] }
 0x697   : > { %10313 = vmatmul.bf16.vlgmr.msrb.gmra.mxu1 %v22393_v62  ;;  %10326 = vmatmul.bf16.vlgmr.msra.gmra.mxu2 %v22395_v45  ;;  %v11913_v38 = vld [vmem:[#allocation17 + $0x238] sm:$0xf0]  ;;  %v14529_v21 = vld [vmem:[#allocation17 + $0x4ec] sm:$0xf] }
 0x698   : > { %10357 = vmatpush.bf16.msra.mxu1 %v11884_v31  ;;  %10370 = vmatpush.bf16.msrb.mxu2 %v12012_v7  ;;  %v14385_v31 = vld [vmem:[#allocation17 + $0x6c] sm:$0xf]  ;;  %v12092_v7 = vor.u32 %v14485_v29, %v12089_v50  ;;  %v11785_v50 = vld [vmem:[#allocation17 + $0x138] sm:$0xf0] }
 0x699   : > { %10383 = vmatpush.bf16.msrb.mxu3 %v12140_v14  ;;  %v14417_v14 = vld [vmem:[#allocation17 + $0x16c] sm:$0xf]  ;;  %v12265_v15 = vld [vmem:[#allocation17 + $0x4f8] sm:$0xf0] }
 0x69a   : > { %10339 = vmatmul.bf16.vlgmr.msra.gmra.mxu3 %v22397_v10  ;;  %10345 = vmatpush.bf16.msra.mxu0 %v11740_v18  ;;  %v11692_v18 = vor.u32 %v14385_v31, %v11689_v24  ;;  %v10119_v48 = vpop.f32.mrf.mxu2  ;;  %v10095_v20 = vpop.f32.mrf.mxu0  ;;  %v14409_v29 = vld [vmem:[#allocation17 + $0x12c] sm:$0xf]  ;;  %v12649_v3 = vld [vmem:[#allocation17 + $0x7f8] sm:$0xf0] }
 0x69b   : > { %v10120_v2 = vadd.f32 %v10119_v48, %v10107_v46  ;;  %v11788_v24 = vor.u32 %v14409_v29, %v11785_v50  ;;  %v14437_v46 = vld [vmem:[#allocation17 + $0x20c] sm:$0xf]  ;;  %v12521_v48 = vld [vmem:[#allocation17 + $0x6f8] sm:$0xf0] }
 0x69c   : > { %10358 = vmatpush.bf16.msra.mxu1 %v11868_v57  ;;  %10371 = vmatpush.bf16.msrb.mxu2 %v11996_v0  ;;  %v11820_v57 = vor.u32 %v14417_v14, %v11817_v39  ;;  %v11948_v0 = vor.u32 %v14449_v61, %v11945_v44  ;;  %v10108_v4 = vpop.f32.mrf.mxu1  ;;  %v11769_v14 = vld [vmem:[#allocation17 + $0x118] sm:$0xf0]  ;;  %v11916_v39 = vor.u32 %v14441_v9, %v11913_v38  ;;  %v14621_v50 = vld [vmem:[#allocation17 + $0x7cc] sm:$0xf] }
 0x69d   : > { %10384 = vmatpush.bf16.msrb.mxu3 %v12124_v56  ;;  %v12076_v56 = vor.u32 %v14481_v42, %v12073_v8  ;;  %v10132_v40 = vpop.f32.mrf.mxu3  ;;  %v11897_v44 = vld [vmem:[#allocation17 + $0x218] sm:$0xf0]  ;;  %v14469_v42 = vld [vmem:[#allocation17 + $0x30c] sm:$0xf] }
 0x69e   : > { %10346 = vmatpush.bf16.msra.mxu0 %v11724_v47  ;;  %v14477_v47 = vld [vmem:[#allocation17 + $0x34c] sm:$0xf]  ;;  %v22464_v63 = vadd.f32 %v10132_v40, %v10120_v2  ;;  %v12268_v2 = vor.u32 %v14529_v21, %v12265_v15  ;;  %v12505_v29 = vld [vmem:[#allocation17 + $0x6d8] sm:$0xf0] }
 0x69f   : > { %v14625_v40 = vld [vmem:[#allocation17 + $0x7ec] sm:$0xf]  ;;  %v12633_v9 = vld [vmem:[#allocation17 + $0x7d8] sm:$0xf0] }
 0x6a0   : > { %10359 = vmatpush.bf16.msra.mxu1 %v11852_v19  ;;  %10372 = vmatpush.bf16.msrb.mxu2 %v11980_v5  ;;  %v12057_v19 = vld [vmem:[#allocation17 + $0x358] sm:$0xf0]  ;;  %v11804_v5 = vor.u32 %v14413_v52, %v11801_v43  ;;  %v14593_v52 = vld [vmem:[#allocation17 + $0x6ec] sm:$0xf] }
 0x6a1   : > { %10385 = vmatpush.bf16.msrb.mxu3 %v12108_v6  ;;  %v14377_v6 = vld [vmem:[#allocation17 + $0x2c] sm:$0xf]  ;;  %v12060_v34 = vor.u32 %v14477_v47, %v12057_v19  ;;  %v11900_v47 = vor.u32 %v14437_v46, %v11897_v44  ;;  %v12617_v46 = vld [vmem:[#allocation17 + $0x7b8] sm:$0xf0] }
 0x6a2   : > { %10347 = vmatpush.bf16.msra.mxu0 %v11708_v58  ;;  %v12041_v58 = vld [vmem:[#allocation17 + $0x338] sm:$0xf0]  ;;  %v11660_v31 = vor.u32 %v14377_v6, %v11657_v23  ;;  %v10121_v8 = vpop.f32.mrf.mxu2  ;;  %v14525_v4 = vld [vmem:[#allocation17 + $0x4cc] sm:$0xf]  ;;  %v12652_v6 = vor.u32 %v14625_v40, %v12649_v3 }
 0x6a3   : > { %v12044_v61 = vor.u32 %v14473_v59, %v12041_v58  ;;  %v14557_v23 = vld [vmem:[#allocation17 + $0x5cc] sm:$0xf]  ;;  %v12345_v15 = vld [vmem:[#allocation17 + $0x598] sm:$0xf0] }
 0x6a4   : > { %10360 = vmatpush.bf16.msra.mxu1 %v11836_v25  ;;  %10373 = vmatpush.bf16.msrb.mxu2 %v11964_v53  ;;  %v14373_v25 = vld [vmem:[#allocation17 + $0xc] sm:$0xf]  ;;  %v11641_v53 = vld [vmem:[#allocation17 + $0x18] sm:$0xf0] }
 0x6a5   : > { %10386 = vmatpush.bf16.msrb.mxu3 %v12092_v7  ;;  %v14405_v7 = vld [vmem:[#allocation17 + $0x10c] sm:$0xf]  ;;  %v11644_v43 = vor.u32 %v14373_v25, %v11641_v53  ;;  %v12233_v25 = vld [vmem:[#allocation17 + $0x4b8] sm:$0xf0] }
 0x6a6   : > { %10348 = vmatpush.bf16.msra.mxu0 %v11692_v18  ;;  %v10134_v18 = vpop.f32.mrf.mxu3  ;;  %v11772_v27 = vor.u32 %v14405_v7, %v11769_v14  ;;  %v14521_v58 = vld [vmem:[#allocation17 + $0x4ac] sm:$0xf]  ;;  %v12361_v7 = vld [vmem:[#allocation17 + $0x5b8] sm:$0xf0] }
 0x6a7   : > { %v14553_v53 = vld [vmem:[#allocation17 + $0x5ac] sm:$0xf]  ;;  %v12236_v44 = vor.u32 %v14521_v58, %v12233_v25  ;;  %v12217_v18 = vld [vmem:[#allocation17 + $0x498] sm:$0xf0] }
 0x6a8   : > { %10361 = vmatpush.bf16.msra.mxu1 %v11820_v57  ;;  %10374 = vmatpush.bf16.msrb.mxu2 %v11948_v0  ;;  %v12025_v57 = vld [vmem:[#allocation17 + $0x318] sm:$0xf0]  ;;  %v14561_v0 = vld [vmem:[#allocation17 + $0x5ec] sm:$0xf] }
 0x6a9   : > { %10387 = vmatpush.bf16.msrb.mxu3 %v12076_v56  ;;  %v12393_v56 = vld [vmem:[#allocation17 + $0x5f8] sm:$0xf0]  ;;  %v12028_v19 = vor.u32 %v14469_v42, %v12025_v57  ;;  %v14585_v14 = vld [vmem:[#allocation17 + $0x6ac] sm:$0xf]  ;;  %v12364_v42 = vor.u32 %v14553_v53, %v12361_v7 }
 0x6aa   : > { %10349 = vmatpush.bf16.msra.mxu0 %v11676_v13  ;;  %v12396_v20 = vor.u32 %v14561_v0, %v12393_v56  ;;  %v12249_v13 = vld [vmem:[#allocation17 + $0x4d8] sm:$0xf0]  ;;  %v14517_v8 = vld [vmem:[#allocation17 + $0x48c] sm:$0xf] }
 0x6ab   : > { %v12252_v38 = vor.u32 %v14525_v4, %v12249_v13  ;;  %v12473_v0 = vld [vmem:[#allocation17 + $0x698] sm:$0xf0]  ;;  %v14613_v56 = vld [vmem:[#allocation17 + $0x78c] sm:$0xf] }
 0x6ac   : > { %10362 = vmatpush.bf16.msra.mxu1 %v11804_v5  ;;  %10375 = vmatpush.bf16.msrb.mxu2 %v11932_v33  ;;  %v12524_v5 = vor.u32 %v14593_v52, %v12521_v48  ;;  %v12377_v33 = vld [vmem:[#allocation17 + $0x5d8] sm:$0xf0]  ;;  %v14513_v40 = vld [vmem:[#allocation17 + $0x46c] sm:$0xf] }
 0x6ad   : > { %10388 = vmatpush.bf16.msrb.mxu3 %v12060_v34  ;;  %v14589_v34 = vld [vmem:[#allocation17 + $0x6cc] sm:$0xf]  ;;  %v12380_v59 = vor.u32 %v14557_v23, %v12377_v33  ;;  %v12601_v52 = vld [vmem:[#allocation17 + $0x798] sm:$0xf0] }
 0x6ae   : > { %10350 = vmatpush.bf16.msra.mxu0 %v11660_v31  ;;  %v12508_v31 = vor.u32 %v14589_v34, %v12505_v29  ;;  %v12201_v3 = vld [vmem:[#allocation17 + $0x478] sm:$0xf0]  ;;  %v14577_v4 = vld [vmem:[#allocation17 + $0x66c] sm:$0xf] }
 0x6af   : > { %v12585_v23 = vld [vmem:[#allocation17 + $0x778] sm:$0xf0]  ;;  %v12204_v33 = vor.u32 %v14513_v40, %v12201_v3  ;;  %v14573_v58 = vld [vmem:[#allocation17 + $0x64c] sm:$0xf] }
 0x6b0   : > { %10363 = vmatpush.bf16.msra.mxu1 %v11788_v24  ;;  %10376 = vmatpush.bf16.msrb.mxu2 %v11916_v39  ;;  %v12636_v24 = vor.u32 %v14621_v50, %v12633_v9  ;;  %v12489_v39 = vld [vmem:[#allocation17 + $0x6b8] sm:$0xf0]  ;;  %v14605_v53 = vld [vmem:[#allocation17 + $0x74c] sm:$0xf] }
 0x6b1   : > { %10389 = vmatpush.bf16.msrb.mxu3 %v12044_v61  ;;  %v14617_v61 = vld [vmem:[#allocation17 + $0x7ac] sm:$0xf]  ;;  %v12492_v57 = vor.u32 %v14585_v14, %v12489_v39  ;;  %v12185_v29 = vld [vmem:[#allocation17 + $0x458] sm:$0xf0] }
 0x6b2   : > { %10351 = vmatpush.bf16.msra.mxu0 %v11644_v43  ;;  %v12620_v21 = vor.u32 %v14617_v61, %v12617_v46  ;;  %v10145_v43 = vpop.f32.mrf.mxu0  ;;  %v12569_v7 = vld [vmem:[#allocation17 + $0x758] sm:$0xf0] }
 0x6b3   : > { %v12281_v40 = vld [vmem:[#allocation17 + $0x518] sm:$0xf0] }
 0x6b4   : > { %10364 = vmatpush.bf16.msra.mxu1 %v11772_v27  ;;  %10377 = vmatpush.bf16.msrb.mxu2 %v11900_v47  ;;  %v12220_v27 = vor.u32 %v14517_v8, %v12217_v18  ;;  %v12169_v8 = vld [vmem:[#allocation17 + $0x438] sm:$0xf0] }
 0x6b5   : > { %10390 = vmatpush.bf16.msrb.mxu3 %v12028_v19  ;;  %10352 = vmatmul.bf16.vlgmr.msra.gmra.mxu0 %v23287_v55  ;;  %v14549_v55 = vld [vmem:[#allocation17 + $0x58c] sm:$0xf]  ;;  %v12604_v19 = vor.u32 %v14613_v56, %v12601_v52  ;;  %v12553_v52 = vld [vmem:[#allocation17 + $0x738] sm:$0xf0] }
 0x6b6   : > { %10396 = vmatpush.bf16.msrb.mxu0 %v12268_v2  ;;  %v12348_v48 = vor.u32 %v14549_v55, %v12345_v15  ;;  %v14545_v2 = vld [vmem:[#allocation17 + $0x56c] sm:$0xf]  ;;  %v12297_v15 = vld [vmem:[#allocation17 + $0x538] sm:$0xf0] }
 0x6b7   : > { %10365 = vmatmul.bf16.vlgmr.msra.gmra.mxu1 %v23288_v16  ;;  %10378 = vmatmul.bf16.vlgmr.msrb.gmra.mxu2 %v23289_v11  ;;  %v14581_v16 = vld [vmem:[#allocation17 + $0x68c] sm:$0xf]  ;;  %v10158_v11 = vpop.f32.mrf.mxu1 }
 0x6b8   : > { %10409 = vmatpush.bf16.msrb.mxu1 %v12396_v20  ;;  %10422 = vmatpush.bf16.msra.mxu2 %v12524_v5  ;;  %v12476_v47 = vor.u32 %v14581_v16, %v12473_v0  ;;  %v12329_v20 = vld [vmem:[#allocation17 + $0x578] sm:$0xf0]  ;;  %v14537_v55 = vld [vmem:[#allocation17 + $0x52c] sm:$0xf] }
 0x6b9   : > { %10435 = vmatpush.bf16.msra.mxu3 %v12652_v6  ;;  %v12457_v5 = vld [vmem:[#allocation17 + $0x678] sm:$0xf0]  ;;  %v14609_v6 = vld [vmem:[#allocation17 + $0x76c] sm:$0xf]  ;;  %v12332_v34 = vor.u32 %v14545_v2, %v12329_v20 }
 0x6ba   : > { %10391 = vmatmul.bf16.vlgmr.msrb.gmra.mxu3 %v23290_v22  ;;  %10397 = vmatpush.bf16.msrb.mxu0 %v12252_v38  ;;  %v10146_v22 = vadd.f32 %v10145_v43, %v22464_v63  ;;  %v14509_v63 = vld [vmem:[#allocation17 + $0x44c] sm:$0xf]  ;;  %v12460_v50 = vor.u32 %v14577_v4, %v12457_v5  ;;  %v12588_v9 = vor.u32 %v14609_v6, %v12585_v23  ;;  %v10171_v25 = vpop.f32.mrf.mxu2  ;;  %v10147_v39 = vpop.f32.mrf.mxu0  ;;  %v12425_v0 = vld [vmem:[#allocation17 + $0x638] sm:$0xf0] }
 0x6bb   : > { %v14541_v38 = vld [vmem:[#allocation17 + $0x54c] sm:$0xf]  ;;  %v12188_v46 = vor.u32 %v14509_v63, %v12185_v29  ;;  %v12409_v2 = vld [vmem:[#allocation17 + $0x618] sm:$0xf0] }
 0x6bc   : > { %10410 = vmatpush.bf16.msrb.mxu1 %v12380_v59  ;;  %10423 = vmatpush.bf16.msra.mxu2 %v12508_v31  ;;  %v10159_v13 = vadd.f32 %v10158_v11, %v10146_v22  ;;  %v12313_v59 = vld [vmem:[#allocation17 + $0x558] sm:$0xf0]  ;;  %v14569_v16 = vld [vmem:[#allocation17 + $0x62c] sm:$0xf]  ;;  %v12300_v22 = vor.u32 %v14537_v55, %v12297_v15 }
 0x6bd   : > { %10436 = vmatpush.bf16.msra.mxu3 %v12636_v24  ;;  %v10184_v31 = vpop.f32.mrf.mxu3  ;;  %v12441_v24 = vld [vmem:[#allocation17 + $0x658] sm:$0xf0]  ;;  %v14601_v56 = vld [vmem:[#allocation17 + $0x72c] sm:$0xf]  ;;  %v12428_v3 = vor.u32 %v14569_v16, %v12425_v0 }
 0x6be   : > { %10398 = vmatpush.bf16.msrb.mxu0 %v12236_v44  ;;  %v10172_v14 = vadd.f32 %v10171_v25, %v10159_v13  ;;  %v12316_v44 = vor.u32 %v14541_v38, %v12313_v59  ;;  %v14501_v43 = vld [vmem:[#allocation17 + $0x40c] sm:$0xf]  ;;  %v12537_v5 = vld [vmem:[#allocation17 + $0x718] sm:$0xf0] }
 0x6bf   : > { %v10160_v61 = vpop.f32.mrf.mxu1  ;;  %v14597_v20 = vld [vmem:[#allocation17 + $0x70c] sm:$0xf]  ;;  %v12777_v23 = vld [vmem:[#allocation17 + $0x8f8] sm:$0xf0] }
 0x6c0   : > { %10411 = vmatpush.bf16.msrb.mxu1 %v12364_v42  ;;  %10424 = vmatpush.bf16.msra.mxu2 %v12492_v57  ;;  %v14505_v42 = vld [vmem:[#allocation17 + $0x42c] sm:$0xf]  ;;  %v22471_v18 = vadd.f32 %v10184_v31, %v10172_v14  ;;  %v12444_v57 = vor.u32 %v14573_v58, %v12441_v24  ;;  %v13161_v59 = vld [vmem:[#allocation17 + $0xbf8] sm:$0xf0]  ;;  %v12540_v25 = vor.u32 %v14597_v20, %v12537_v5 }
 0x6c1   : > { %10437 = vmatpush.bf16.msra.mxu3 %v12620_v21  ;;  %v12572_v21 = vor.u32 %v14605_v53, %v12569_v7  ;;  %v12172_v11 = vor.u32 %v14505_v42, %v12169_v8  ;;  %v14657_v6 = vld [vmem:[#allocation17 + $0x8ec] sm:$0xf]  ;;  %v12761_v7 = vld [vmem:[#allocation17 + $0x8d8] sm:$0xf0] }
 0x6c2   : > { %10399 = vmatpush.bf16.msrb.mxu0 %v12220_v27  ;;  %v12153_v27 = vld [vmem:[#allocation17 + $0x418] sm:$0xf0]  ;;  %v10173_v4 = vpop.f32.mrf.mxu2  ;;  %v14721_v63 = vld [vmem:[#allocation17 + $0xaec] sm:$0xf]  ;;  %v12780_v31 = vor.u32 %v14657_v6, %v12777_v23 }
 0x6c3   : > { %v12156_v29 = vor.u32 %v14501_v43, %v12153_v27  ;;  %v14753_v38 = vld [vmem:[#allocation17 + $0xbec] sm:$0xf]  ;;  %v13017_v42 = vld [vmem:[#allocation17 + $0xad8] sm:$0xf0] }
 0x6c4   : > { %10412 = vmatpush.bf16.msrb.mxu1 %v12348_v48  ;;  %10425 = vmatpush.bf16.msra.mxu2 %v12476_v47  ;;  %v14533_v48 = vld [vmem:[#allocation17 + $0x50c] sm:$0xf]  ;;  %v12556_v47 = vor.u32 %v14601_v56, %v12553_v52  ;;  %v13164_v39 = vor.u32 %v14753_v38, %v13161_v59  ;;  %v12745_v16 = vld [vmem:[#allocation17 + $0x8b8] sm:$0xf0] }
 0x6c5   : > { %10438 = vmatpush.bf16.msra.mxu3 %v12604_v19  ;;  %v14565_v19 = vld [vmem:[#allocation17 + $0x60c] sm:$0xf]  ;;  %v10186_v13 = vpop.f32.mrf.mxu3  ;;  %v12873_v43 = vld [vmem:[#allocation17 + $0x9b8] sm:$0xf0] }
 0x6c6   : > { %10400 = vmatpush.bf16.msrb.mxu0 %v12204_v33  ;;  %v14689_v33 = vld [vmem:[#allocation17 + $0x9ec] sm:$0xf]  ;;  %v12412_v58 = vor.u32 %v14565_v19, %v12409_v2  ;;  %v12729_v19 = vld [vmem:[#allocation17 + $0x898] sm:$0xf0] }
 0x6c7   : > { %v14653_v53 = vld [vmem:[#allocation17 + $0x8cc] sm:$0xf]  ;;  %v12857_v4 = vld [vmem:[#allocation17 + $0x998] sm:$0xf0] }
 0x6c8   : > { %10413 = vmatpush.bf16.msrb.mxu1 %v12332_v34  ;;  %10426 = vmatpush.bf16.msra.mxu2 %v12460_v50  ;;  %v12905_v34 = vld [vmem:[#allocation17 + $0x9f8] sm:$0xf0]  ;;  %v12284_v50 = vor.u32 %v14533_v48, %v12281_v40  ;;  %v14685_v61 = vld [vmem:[#allocation17 + $0x9cc] sm:$0xf] }
 0x6c9   : > { %10439 = vmatpush.bf16.msra.mxu3 %v12588_v9  ;;  %v13033_v9 = vld [vmem:[#allocation17 + $0xaf8] sm:$0xf0]  ;;  %v12908_v24 = vor.u32 %v14689_v33, %v12905_v34  ;;  %v14749_v8 = vld [vmem:[#allocation17 + $0xbcc] sm:$0xf] }
 0x6ca   : > { %10401 = vmatpush.bf16.msrb.mxu0 %v12188_v46  ;;  %v13036_v14 = vor.u32 %v14721_v63, %v13033_v9  ;;  %v12889_v46 = vld [vmem:[#allocation17 + $0x9d8] sm:$0xf0]  ;;  %v14649_v15 = vld [vmem:[#allocation17 + $0x8ac] sm:$0xf] }
 0x6cb   : > { %v12892_v55 = vor.u32 %v14685_v61, %v12889_v46  ;;  %v14681_v52 = vld [vmem:[#allocation17 + $0x9ac] sm:$0xf]  ;;  %v13129_v48 = vld [vmem:[#allocation17 + $0xbb8] sm:$0xf0]  ;;  %v12748_v40 = vor.u32 %v14649_v15, %v12745_v16 }
 0x6cc   : > { %10414 = vmatpush.bf16.msrb.mxu1 %v12316_v44  ;;  %10427 = vmatpush.bf16.msra.mxu2 %v12444_v57  ;;  %v14717_v44 = vld [vmem:[#allocation17 + $0xacc] sm:$0xf]  ;;  %v13145_v57 = vld [vmem:[#allocation17 + $0xbd8] sm:$0xf0] }
 0x6cd   : > { %10440 = vmatpush.bf16.msra.mxu3 %v12572_v21  ;;  %v12764_v21 = vor.u32 %v14653_v53, %v12761_v7  ;;  %v13020_v0 = vor.u32 %v14717_v44, %v13017_v42  ;;  %v13148_v56 = vor.u32 %v14749_v8, %v13145_v57  ;;  %v14745_v27 = vld [vmem:[#allocation17 + $0xbac] sm:$0xf]  ;;  %v12985_v13 = vld [vmem:[#allocation17 + $0xa98] sm:$0xf0] }
 0x6ce   : > { %10402 = vmatpush.bf16.msrb.mxu0 %v12172_v11  ;;  %v14713_v11 = vld [vmem:[#allocation17 + $0xaac] sm:$0xf]  ;;  %v13132_v20 = vor.u32 %v14745_v27, %v13129_v48  ;;  %v13113_v6 = vld [vmem:[#allocation17 + $0xb98] sm:$0xf0] }
 0x6cf   : > { %v14741_v5 = vld [vmem:[#allocation17 + $0xb8c] sm:$0xf]  ;;  %v12841_v59 = vld [vmem:[#allocation17 + $0x978] sm:$0xf0] }
 0x6d0   : > { %10415 = vmatpush.bf16.msrb.mxu1 %v12300_v22  ;;  %10428 = vmatpush.bf16.msra.mxu2 %v12428_v3  ;;  %v13001_v22 = vld [vmem:[#allocation17 + $0xab8] sm:$0xf0]  ;;  %v12876_v3 = vor.u32 %v14681_v52, %v12873_v43  ;;  %v14641_v63 = vld [vmem:[#allocation17 + $0x86c] sm:$0xf]  ;;  %v13116_v9 = vor.u32 %v14741_v5, %v13113_v6 }
 0x6d1   : > { %10441 = vmatpush.bf16.msra.mxu3 %v12556_v47  ;;  %v14645_v47 = vld [vmem:[#allocation17 + $0x88c] sm:$0xf]  ;;  %v13004_v2 = vor.u32 %v14713_v11, %v13001_v22  ;;  %v13097_v53 = vld [vmem:[#allocation17 + $0xb78] sm:$0xf0] }
 0x6d2   : > { %10403 = vmatpush.bf16.msrb.mxu0 %v12156_v29  ;;  %v10197_v23 = vpop.f32.mrf.mxu0  ;;  %v12732_v33 = vor.u32 %v14645_v47, %v12729_v19  ;;  %v12713_v29 = vld [vmem:[#allocation17 + $0x878] sm:$0xf0]  ;;  %v14673_v38 = vld [vmem:[#allocation17 + $0x96c] sm:$0xf] }
 0x6d3   : > { %v12716_v7 = vor.u32 %v14641_v63, %v12713_v29  ;;  %v14669_v44 = vld [vmem:[#allocation17 + $0x94c] sm:$0xf]  ;;  %v12825_v42 = vld [vmem:[#allocation17 + $0x958] sm:$0xf0] }
 0x6d4   : > { %10416 = vmatpush.bf16.msrb.mxu1 %v12284_v50  ;;  %10429 = vmatpush.bf16.msra.mxu2 %v12412_v58  ;;  %v14705_v58 = vld [vmem:[#allocation17 + $0xa6c] sm:$0xf]  ;;  %v13081_v16 = vld [vmem:[#allocation17 + $0xb58] sm:$0xf0]  ;;  %v12828_v11 = vor.u32 %v14669_v44, %v12825_v42 }
 0x6d5   : > { %10442 = vmatpush.bf16.msra.mxu3 %v12540_v25  ;;  %10404 = vmatmul.bf16.vlgmr.msrb.gmra.mxu0 %v23291_v32  ;;  %v14677_v32 = vld [vmem:[#allocation17 + $0x98c] sm:$0xf]  ;;  %v12681_v27 = vld [vmem:[#allocation17 + $0x838] sm:$0xf0] }
 0x6d6   : > { %10448 = vmatpush.bf16.msra.mxu0 %v12780_v31  ;;  %v12860_v34 = vor.u32 %v14677_v32, %v12857_v4  ;;  %v12969_v31 = vld [vmem:[#allocation17 + $0xa78] sm:$0xf0]  ;;  %v14701_v8 = vld [vmem:[#allocation17 + $0xa4c] sm:$0xf] }
 0x6d7   : > { %10417 = vmatmul.bf16.vlgmr.msrb.gmra.mxu1 %v23292_v51  ;;  %10430 = vmatmul.bf16.vlgmr.msra.gmra.mxu2 %v23293_v60  ;;  %v14709_v51 = vld [vmem:[#allocation17 + $0xa8c] sm:$0xf]  ;;  %v10210_v60 = vpop.f32.mrf.mxu1  ;;  %v12972_v61 = vor.u32 %v14705_v58, %v12969_v31  ;;  %v12809_v19 = vld [vmem:[#allocation17 + $0x938] sm:$0xf0] }
 0x6d8   : > { %10461 = vmatpush.bf16.msra.mxu1 %v12908_v24  ;;  %10474 = vmatpush.bf16.msrb.mxu2 %v13036_v14  ;;  %v12988_v50 = vor.u32 %v14709_v51, %v12985_v13  ;;  %v14737_v24 = vld [vmem:[#allocation17 + $0xb6c] sm:$0xf]  ;;  %v12844_v14 = vor.u32 %v14673_v38, %v12841_v59  ;;  %v13065_v4 = vld [vmem:[#allocation17 + $0xb38] sm:$0xf0] }
 0x6d9   : > { %10487 = vmatpush.bf16.msrb.mxu3 %v13164_v39  ;;  %v12697_v39 = vld [vmem:[#allocation17 + $0x858] sm:$0xf0]  ;;  %v13100_v46 = vor.u32 %v14737_v24, %v13097_v53  ;;  %v14733_v15 = vld [vmem:[#allocation17 + $0xb4c] sm:$0xf] }
 0x6da   : > { %10443 = vmatmul.bf16.vlgmr.msra.gmra.mxu3 %v23294_v17  ;;  %10449 = vmatpush.bf16.msra.mxu0 %v12764_v21  ;;  %v10198_v17 = vadd.f32 %v10197_v23, %v22471_v18  ;;  %v14637_v18 = vld [vmem:[#allocation17 + $0x84c] sm:$0xf]  ;;  %v10223_v57 = vpop.f32.mrf.mxu2  ;;  %v12665_v6 = vld [vmem:[#allocation17 + $0x818] sm:$0xf0] }
 0x6db   : > { %v12700_v43 = vor.u32 %v14637_v18, %v12697_v39  ;;  %v14633_v22 = vld [vmem:[#allocation17 + $0x82c] sm:$0xf]  ;;  %v12921_v63 = vld [vmem:[#allocation17 + $0xa18] sm:$0xf0] }
 0x6dc   : > { %10462 = vmatpush.bf16.msra.mxu1 %v12892_v55  ;;  %10475 = vmatpush.bf16.msrb.mxu2 %v13020_v0  ;;  %v10211_v25 = vadd.f32 %v10210_v60, %v10198_v17  ;;  %v12953_v55 = vld [vmem:[#allocation17 + $0xa58] sm:$0xf0]  ;;  %v14665_v47 = vld [vmem:[#allocation17 + $0x92c] sm:$0xf]  ;;  %v12684_v13 = vor.u32 %v14633_v22, %v12681_v27 }
 0x6dd   : > { %10488 = vmatpush.bf16.msrb.mxu3 %v13148_v56  ;;  %v10236_v21 = vpop.f32.mrf.mxu3  ;;  %v10199_v56 = vpop.f32.mrf.mxu0  ;;  %v14729_v32 = vld [vmem:[#allocation17 + $0xb2c] sm:$0xf]  ;;  %v12812_v5 = vor.u32 %v14665_v47, %v12809_v19  ;;  %v12793_v60 = vld [vmem:[#allocation17 + $0x918] sm:$0xf0] }
 0x6de   : > { %10450 = vmatpush.bf16.msra.mxu0 %v12748_v40  ;;  %v10224_v0 = vadd.f32 %v10223_v57, %v10211_v25  ;;  %v12956_v40 = vor.u32 %v14701_v8, %v12953_v55  ;;  %v14629_v51 = vld [vmem:[#allocation17 + $0x80c] sm:$0xf]  ;;  %v13049_v38 = vld [vmem:[#allocation17 + $0xb18] sm:$0xf0] }
 0x6df   : > { %v10212_v52 = vpop.f32.mrf.mxu1  ;;  %v14661_v23 = vld [vmem:[#allocation17 + $0x90c] sm:$0xf]  ;;  %v13289_v58 = vld [vmem:[#allocation17 + $0xcf8] sm:$0xf0]  ;;  %v12668_v53 = vor.u32 %v14629_v51, %v12665_v6 }
 0x6e0   : > { %10463 = vmatpush.bf16.msra.mxu1 %v12876_v3  ;;  %10476 = vmatpush.bf16.msrb.mxu2 %v13004_v2  ;;  %v22478_v48 = vadd.f32 %v10236_v21, %v10224_v0  ;;  %v13084_v3 = vor.u32 %v14733_v15, %v13081_v16  ;;  %v14697_v2 = vld [vmem:[#allocation17 + $0xa2c] sm:$0xf]  ;;  %v13417_v31 = vld [vmem:[#allocation17 + $0xdf8] sm:$0xf0] }
 0x6e1   : > { %10489 = vmatpush.bf16.msrb.mxu3 %v13132_v20  ;;  %v12937_v20 = vld [vmem:[#allocation17 + $0xa38] sm:$0xf0]  ;;  %v14725_v29 = vld [vmem:[#allocation17 + $0xb0c] sm:$0xf] }
 0x6e2   : > { %10451 = vmatpush.bf16.msra.mxu0 %v12732_v33  ;;  %v12940_v17 = vor.u32 %v14697_v2, %v12937_v20  ;;  %v13068_v33 = vor.u32 %v14729_v32, %v13065_v4  ;;  %v14785_v59 = vld [vmem:[#allocation17 + $0xcec] sm:$0xf]  ;;  %v13673_v39 = vld [vmem:[#allocation17 + $0xff8] sm:$0xf0] }
 0x6e3   : > { %v14817_v25 = vld [vmem:[#allocation17 + $0xdec] sm:$0xf]  ;;  %v13292_v44 = vor.u32 %v14785_v59, %v13289_v58  ;;  %v13273_v57 = vld [vmem:[#allocation17 + $0xcd8] sm:$0xf0] }
 0x6e4   : > { %10464 = vmatpush.bf16.msra.mxu1 %v12860_v34  ;;  %10477 = vmatpush.bf16.msrb.mxu2 %v12988_v50  ;;  %v14693_v34 = vld [vmem:[#allocation17 + $0xa0c] sm:$0xf]  ;;  %v10225_v50 = vpop.f32.mrf.mxu2  ;;  %v13420_v42 = vor.u32 %v14817_v25, %v13417_v31  ;;  %v13401_v16 = vld [vmem:[#allocation17 + $0xdd8] sm:$0xf0] }
 0x6e5   : > { %10490 = vmatpush.bf16.msrb.mxu3 %v13116_v9  ;;  %v10238_v9 = vpop.f32.mrf.mxu3  ;;  %v14849_v24 = vld [vmem:[#allocation17 + $0xeec] sm:$0xf]  ;;  %v13529_v56 = vld [vmem:[#allocation17 + $0xed8] sm:$0xf0] }
 0x6e6   : > { %10452 = vmatpush.bf16.msra.mxu0 %v12716_v7  ;;  %v12796_v7 = vor.u32 %v14661_v23, %v12793_v60  ;;  %v14881_v18 = vld [vmem:[#allocation17 + $0xfec] sm:$0xf]  ;;  %v13385_v2 = vld [vmem:[#allocation17 + $0xdb8] sm:$0xf0] }
 0x6e7   : > { %v14781_v8 = vld [vmem:[#allocation17 + $0xccc] sm:$0xf]  ;;  %v13676_v55 = vor.u32 %v14881_v18, %v13673_v39  ;;  %v13513_v32 = vld [vmem:[#allocation17 + $0xeb8] sm:$0xf0] }
 0x6e8   : > { %10465 = vmatpush.bf16.msra.mxu1 %v12844_v14  ;;  %10478 = vmatpush.bf16.msrb.mxu2 %v12972_v61  ;;  %v13545_v14 = vld [vmem:[#allocation17 + $0xef8] sm:$0xf0]  ;;  %v12924_v61 = vor.u32 %v14693_v34, %v12921_v63  ;;  %v14813_v15 = vld [vmem:[#allocation17 + $0xdcc] sm:$0xf] }
 0x6e9   : > { %10491 = vmatpush.bf16.msrb.mxu3 %v13100_v46  ;;  %v13052_v46 = vor.u32 %v14725_v29, %v13049_v38  ;;  %v13548_v21 = vor.u32 %v14849_v24, %v13545_v14  ;;  %v14845_v0 = vld [vmem:[#allocation17 + $0xecc] sm:$0xf]  ;;  %v13404_v22 = vor.u32 %v14813_v15, %v13401_v16  ;;  %v13641_v51 = vld [vmem:[#allocation17 + $0xfb8] sm:$0xf0] }
 0x6ea   : > { %10453 = vmatpush.bf16.msra.mxu0 %v12700_v43  ;;  %v14877_v52 = vld [vmem:[#allocation17 + $0xfcc] sm:$0xf]  ;;  %v13657_v43 = vld [vmem:[#allocation17 + $0xfd8] sm:$0xf0] }
 0x6eb   : > { %v14777_v27 = vld [vmem:[#allocation17 + $0xcac] sm:$0xf]  ;;  %v13660_v47 = vor.u32 %v14877_v52, %v13657_v43  ;;  %v13241_v23 = vld [vmem:[#allocation17 + $0xc98] sm:$0xf0] }
 0x6ec   : > { %10466 = vmatpush.bf16.msra.mxu1 %v12828_v11  ;;  %10479 = vmatpush.bf16.msrb.mxu2 %v12956_v40  ;;  %v13276_v11 = vor.u32 %v14781_v8, %v13273_v57  ;;  %v13257_v40 = vld [vmem:[#allocation17 + $0xcb8] sm:$0xf0]  ;;  %v14809_v19 = vld [vmem:[#allocation17 + $0xdac] sm:$0xf] }
 0x6ed   : > { %10492 = vmatpush.bf16.msrb.mxu3 %v13084_v3  ;;  %v13532_v3 = vor.u32 %v14845_v0, %v13529_v56  ;;  %v14841_v20 = vld [vmem:[#allocation17 + $0xeac] sm:$0xf]  ;;  %v13497_v34 = vld [vmem:[#allocation17 + $0xe98] sm:$0xf0] }
 0x6ee   : > { %10454 = vmatpush.bf16.msra.mxu0 %v12684_v13  ;;  %v14873_v4 = vld [vmem:[#allocation17 + $0xfac] sm:$0xf]  ;;  %v13260_v13 = vor.u32 %v14777_v27, %v13257_v40  ;;  %v13516_v60 = vor.u32 %v14841_v20, %v13513_v32  ;;  %v13625_v29 = vld [vmem:[#allocation17 + $0xf98] sm:$0xf0] }
 0x6ef   : > { %v14773_v6 = vld [vmem:[#allocation17 + $0xc8c] sm:$0xf]  ;;  %v13225_v58 = vld [vmem:[#allocation17 + $0xc78] sm:$0xf0] }
 0x6f0   : > { %10467 = vmatpush.bf16.msra.mxu1 %v12812_v5  ;;  %10480 = vmatpush.bf16.msrb.mxu2 %v12940_v17  ;;  %v13388_v5 = vor.u32 %v14809_v19, %v13385_v2  ;;  %v13644_v17 = vor.u32 %v14873_v4, %v13641_v51  ;;  %v14869_v63 = vld [vmem:[#allocation17 + $0xf8c] sm:$0xf]  ;;  %v13244_v9 = vor.u32 %v14773_v6, %v13241_v23  ;;  %v13481_v18 = vld [vmem:[#allocation17 + $0xe78] sm:$0xf0] }
 0x6f1   : > { %10493 = vmatpush.bf16.msrb.mxu3 %v13068_v33  ;;  %v13369_v33 = vld [vmem:[#allocation17 + $0xd98] sm:$0xf0]  ;;  %v14769_v59 = vld [vmem:[#allocation17 + $0xc6c] sm:$0xf]  ;;  %v13628_v31 = vor.u32 %v14869_v63, %v13625_v29 }
 0x6f2   : > { %10455 = vmatpush.bf16.msra.mxu0 %v12668_v53  ;;  %v10249_v50 = vpop.f32.mrf.mxu0  ;;  %v14801_v24 = vld [vmem:[#allocation17 + $0xd6c] sm:$0xf]  ;;  %v13353_v53 = vld [vmem:[#allocation17 + $0xd78] sm:$0xf0] }
 0x6f3   : > { %v14865_v39 = vld [vmem:[#allocation17 + $0xf6c] sm:$0xf]  ;;  %v13465_v56 = vld [vmem:[#allocation17 + $0xe58] sm:$0xf0] }
 0x6f4   : > { %10468 = vmatpush.bf16.msra.mxu1 %v12796_v7  ;;  %10481 = vmatpush.bf16.msrb.mxu2 %v12924_v61  ;;  %v14833_v7 = vld [vmem:[#allocation17 + $0xe6c] sm:$0xf]  ;;  %v13609_v61 = vld [vmem:[#allocation17 + $0xf78] sm:$0xf0] }
 0x6f5   : > { %10494 = vmatpush.bf16.msrb.mxu3 %v13052_v46  ;;  %10456 = vmatmul.bf16.vlgmr.msra.gmra.mxu0 %v22273_v41  ;;  %v14805_v41 = vld [vmem:[#allocation17 + $0xd8c] sm:$0xf]  ;;  %v13228_v46 = vor.u32 %v14769_v59, %v13225_v58  ;;  %v13484_v8 = vor.u32 %v14833_v7, %v13481_v18  ;;  %v13612_v57 = vor.u32 %v14865_v39, %v13609_v61  ;;  %v13593_v43 = vld [vmem:[#allocation17 + $0xf58] sm:$0xf0] }
 0x6f6   : > { %10500 = vmatpush.bf16.msrb.mxu0 %v13292_v44  ;;  %v13372_v38 = vor.u32 %v14805_v41, %v13369_v33  ;;  %v14765_v44 = vld [vmem:[#allocation17 + $0xc4c] sm:$0xf]  ;;  %v13321_v32 = vld [vmem:[#allocation17 + $0xd38] sm:$0xf0] }
 0x6f7   : > { %10469 = vmatmul.bf16.vlgmr.msra.gmra.mxu1 %v22278_v35  ;;  %10482 = vmatmul.bf16.vlgmr.msrb.gmra.mxu2 %v22316_v54  ;;  %v14837_v35 = vld [vmem:[#allocation17 + $0xe8c] sm:$0xf]  ;;  %v10262_v54 = vpop.f32.mrf.mxu1  ;;  %v13449_v51 = vld [vmem:[#allocation17 + $0xe38] sm:$0xf0] }
 0x6f8   : > { %10513 = vmatpush.bf16.msrb.mxu1 %v13420_v42  ;;  %10526 = vmatpush.bf16.msra.mxu2 %v13548_v21  ;;  %v13500_v25 = vor.u32 %v14837_v35, %v13497_v34  ;;  %v13209_v42 = vld [vmem:[#allocation17 + $0xc58] sm:$0xf0]  ;;  %v14797_v21 = vld [vmem:[#allocation17 + $0xd4c] sm:$0xf] }
 0x6f9   : > { %10539 = vmatpush.bf16.msra.mxu3 %v13676_v55  ;;  %v13337_v55 = vld [vmem:[#allocation17 + $0xd58] sm:$0xf0]  ;;  %v14829_v15 = vld [vmem:[#allocation17 + $0xe4c] sm:$0xf]  ;;  %v13212_v27 = vor.u32 %v14765_v44, %v13209_v42 }
 0x6fa   : > { %10495 = vmatmul.bf16.vlgmr.msrb.gmra.mxu3 %v22318_v12  ;;  %10501 = vmatpush.bf16.msrb.mxu0 %v13276_v11  ;;  %v10250_v12 = vadd.f32 %v10249_v50, %v22478_v48  ;;  %v13356_v48 = vor.u32 %v14801_v24, %v13353_v53  ;;  %v22487_v16 = vpop.f32.mrf.mxu2  ;;  %v14861_v52 = vld [vmem:[#allocation17 + $0xf4c] sm:$0xf]  ;;  %v10251_v11 = vpop.f32.mrf.mxu0  ;;  %v13340_v40 = vor.u32 %v14797_v21, %v13337_v55  ;;  %v13305_v33 = vld [vmem:[#allocation17 + $0xd18] sm:$0xf0] }
 0x6fb   : > { %v13468_v19 = vor.u32 %v14829_v15, %v13465_v56  ;;  %v13596_v2 = vor.u32 %v14861_v52, %v13593_v43  ;;  %v14793_v20 = vld [vmem:[#allocation17 + $0xd2c] sm:$0xf]  ;;  %v13433_v29 = vld [vmem:[#allocation17 + $0xe18] sm:$0xf0] }
 0x6fc   : > { %10514 = vmatpush.bf16.msrb.mxu1 %v13404_v22  ;;  %10527 = vmatpush.bf16.msra.mxu2 %v13532_v3  ;;  %v22485_v14 = vadd.f32 %v10262_v54, %v10250_v12  ;;  %v14761_v3 = vld [vmem:[#allocation17 + $0xc2c] sm:$0xf]  ;;  %v13801_v59 = vld [vmem:[#allocation17 + $0x10f8] sm:$0xf0] }
 0x6fd   : > { %10540 = vmatpush.bf16.msra.mxu3 %v13660_v47  ;;  %v22489_v0 = vpop.f32.mrf.mxu3  ;;  %v13193_v47 = vld [vmem:[#allocation17 + $0xc38] sm:$0xf0]  ;;  %v14825_v4 = vld [vmem:[#allocation17 + $0xe2c] sm:$0xf] }
 0x6fe   : > { %10502 = vmatpush.bf16.msrb.mxu0 %v13260_v13  ;;  %v14857_v13 = vld [vmem:[#allocation17 + $0xf2c] sm:$0xf]  ;;  %v13196_v23 = vor.u32 %v14761_v3, %v13193_v47  ;;  %v13452_v35 = vor.u32 %v14825_v4, %v13449_v51  ;;  %v14057_v7 = vld [vmem:[#allocation17 + $0x12f8] sm:$0xf0] }
 0x6ff   : > { %v10264_v22 = vpop.f32.mrf.mxu1  ;;  %v14757_v6 = vld [vmem:[#allocation17 + $0xc0c] sm:$0xf]  ;;  %v14185_v39 = vld [vmem:[#allocation17 + $0x13f8] sm:$0xf0] }
 0x700   : > { %10515 = vmatpush.bf16.msrb.mxu1 %v13388_v5  ;;  %10528 = vmatpush.bf16.msra.mxu2 %v13516_v60  ;;  %v13577_v5 = vld [vmem:[#allocation17 + $0xf38] sm:$0xf0]  ;;  %v13324_v60 = vor.u32 %v14793_v20, %v13321_v32  ;;  %v14789_v41 = vld [vmem:[#allocation17 + $0xd0c] sm:$0xf] }
 0x701   : > { %10541 = vmatpush.bf16.msra.mxu3 %v13644_v17  ;;  %v13177_v17 = vld [vmem:[#allocation17 + $0xc18] sm:$0xf0]  ;;  %v13580_v34 = vor.u32 %v14857_v13, %v13577_v5  ;;  %v14821_v63 = vld [vmem:[#allocation17 + $0xe0c] sm:$0xf]  ;;  %v13308_v53 = vor.u32 %v14789_v41, %v13305_v33 }
 0x702   : > { %10503 = vmatpush.bf16.msrb.mxu0 %v13244_v9  ;;  %v14853_v50 = vld [vmem:[#allocation17 + $0xf0c] sm:$0xf]  ;;  %v10277_v54 = vpop.f32.mrf.mxu2  ;;  %v13561_v9 = vld [vmem:[#allocation17 + $0xf18] sm:$0xf0]  ;;  %v13180_v24 = vor.u32 %v14757_v6, %v13177_v17  ;;  %v13436_v61 = vor.u32 %v14821_v63, %v13433_v29 }
 0x703   : > { %v14945_v58 = vld [vmem:[#allocation17 + $0x11ec] sm:$0xf]  ;;  %v13913_v15 = vld [vmem:[#allocation17 + $0x11d8] sm:$0xf0] }
 0x704   : > { %10516 = vmatpush.bf16.msrb.mxu1 %v13372_v38  ;;  %10529 = vmatpush.bf16.msra.mxu2 %v13500_v25  ;;  %v14913_v38 = vld [vmem:[#allocation17 + $0x10ec] sm:$0xf]  ;;  %v13929_v25 = vld [vmem:[#allocation17 + $0x11f8] sm:$0xf0] }
 0x705   : > { %10542 = vmatpush.bf16.msra.mxu3 %v13628_v31  ;;  %v10290_v12 = vpop.f32.mrf.mxu3  ;;  %v14977_v31 = vld [vmem:[#allocation17 + $0x12ec] sm:$0xf]  ;;  %v13932_v44 = vor.u32 %v14945_v58, %v13929_v25  ;;  %v14041_v52 = vld [vmem:[#allocation17 + $0x12d8] sm:$0xf0] }
 0x706   : > { %10504 = vmatpush.bf16.msrb.mxu0 %v13228_v46  ;;  %v15009_v18 = vld [vmem:[#allocation17 + $0x13ec] sm:$0xf]  ;;  %v13564_v46 = vor.u32 %v14853_v50, %v13561_v9  ;;  %v14169_v11 = vld [vmem:[#allocation17 + $0x13d8] sm:$0xf0] }
 0x707   : > { %v14909_v42 = vld [vmem:[#allocation17 + $0x10cc] sm:$0xf]  ;;  %v14188_v21 = vor.u32 %v15009_v18, %v14185_v39  ;;  %v13769_v3 = vld [vmem:[#allocation17 + $0x10b8] sm:$0xf0] }
 0x708   : > { %10517 = vmatpush.bf16.msrb.mxu1 %v13356_v48  ;;  %10530 = vmatpush.bf16.msra.mxu2 %v13484_v8  ;;  %v13804_v48 = vor.u32 %v14913_v38, %v13801_v59  ;;  %v13785_v8 = vld [vmem:[#allocation17 + $0x10d8] sm:$0xf0]  ;;  %v14941_v55 = vld [vmem:[#allocation17 + $0x11cc] sm:$0xf] }
 0x709   : > { %10543 = vmatpush.bf16.msra.mxu3 %v13612_v57  ;;  %v14060_v57 = vor.u32 %v14977_v31, %v14057_v7  ;;  %v14973_v56 = vld [vmem:[#allocation17 + $0x12cc] sm:$0xf]  ;;  %v13788_v22 = vor.u32 %v14909_v42, %v13785_v8  ;;  %v13897_v20 = vld [vmem:[#allocation17 + $0x11b8] sm:$0xf0] }
 0x70a   : > { %10505 = vmatpush.bf16.msrb.mxu0 %v13212_v27  ;;  %v15005_v43 = vld [vmem:[#allocation17 + $0x13cc] sm:$0xf]  ;;  %v13916_v27 = vor.u32 %v14941_v55, %v13913_v15  ;;  %v14044_v47 = vor.u32 %v14973_v56, %v14041_v52  ;;  %v14025_v4 = vld [vmem:[#allocation17 + $0x12b8] sm:$0xf0] }
 0x70b   : > { %v14969_v32 = vld [vmem:[#allocation17 + $0x12ac] sm:$0xf]  ;;  %v14153_v13 = vld [vmem:[#allocation17 + $0x13b8] sm:$0xf0] }
 0x70c   : > { %10518 = vmatpush.bf16.msrb.mxu1 %v13340_v40  ;;  %10531 = vmatpush.bf16.msra.mxu2 %v13468_v19  ;;  %v14905_v40 = vld [vmem:[#allocation17 + $0x10ac] sm:$0xf]  ;;  %v14172_v19 = vor.u32 %v15005_v43, %v14169_v11  ;;  %v14028_v17 = vor.u32 %v14969_v32, %v14025_v4  ;;  %v13881_v33 = vld [vmem:[#allocation17 + $0x1198] sm:$0xf0] }
 0x70d   : > { %10544 = vmatpush.bf16.msra.mxu3 %v13596_v2  ;;  %v14937_v2 = vld [vmem:[#allocation17 + $0x11ac] sm:$0xf]  ;;  %v13772_v5 = vor.u32 %v14905_v40, %v13769_v3  ;;  %v14137_v63 = vld [vmem:[#allocation17 + $0x1398] sm:$0xf0] }
 0x70e   : > { %10506 = vmatpush.bf16.msrb.mxu0 %v13196_v23  ;;  %v15001_v51 = vld [vmem:[#allocation17 + $0x13ac] sm:$0xf]  ;;  %v13900_v6 = vor.u32 %v14937_v2, %v13897_v20  ;;  %v13737_v12 = vld [vmem:[#allocation17 + $0x1078] sm:$0xf0] }
 0x70f   : > { %v14901_v23 = vld [vmem:[#allocation17 + $0x108c] sm:$0xf]  ;;  %v14156_v41 = vor.u32 %v15001_v51, %v14153_v13  ;;  %v13865_v58 = vld [vmem:[#allocation17 + $0x1178] sm:$0xf0] }
 0x710   : > { %10519 = vmatpush.bf16.msrb.mxu1 %v13324_v60  ;;  %10532 = vmatpush.bf16.msra.mxu2 %v13452_v35  ;;  %v13753_v60 = vld [vmem:[#allocation17 + $0x1098] sm:$0xf0]  ;;  %v14897_v54 = vld [vmem:[#allocation17 + $0x106c] sm:$0xf] }
 0x711   : > { %10545 = vmatpush.bf16.msra.mxu3 %v13580_v34  ;;  %v14009_v35 = vld [vmem:[#allocation17 + $0x1298] sm:$0xf0]  ;;  %v14997_v34 = vld [vmem:[#allocation17 + $0x138c] sm:$0xf]  ;;  %v13740_v7 = vor.u32 %v14897_v54, %v13737_v12 }
 0x712   : > { %10507 = vmatpush.bf16.msrb.mxu0 %v13180_v24  ;;  %v22495_v29 = vpop.f32.mrf.mxu0  ;;  %v14140_v38 = vor.u32 %v14997_v34, %v14137_v63  ;;  %v14929_v59 = vld [vmem:[#allocation17 + $0x116c] sm:$0xf]  ;;  %v13993_v31 = vld [vmem:[#allocation17 + $0x1278] sm:$0xf0] }
 0x713   : > { %v14961_v25 = vld [vmem:[#allocation17 + $0x126c] sm:$0xf]  ;;  %v13868_v18 = vor.u32 %v14929_v59, %v13865_v58  ;;  %v13849_v42 = vld [vmem:[#allocation17 + $0x1158] sm:$0xf0]  ;;  %v15027_v59 = vld [vmem:[%s22661_s12 + $0x78] sm:$0xff] }
 0x714   : > { %10520 = vmatpush.bf16.msrb.mxu1 %v13308_v53  ;;  %10533 = vmatpush.bf16.msra.mxu2 %v13436_v61  ;;  %v14993_v24 = vld [vmem:[#allocation17 + $0x136c] sm:$0xf]  ;;  %v14121_v53 = vld [vmem:[#allocation17 + $0x1378] sm:$0xf0]  ;;  %v15035_v58 = vld [vmem:[%s22661_s12 + $0xb8] sm:$0xff] }
 0x715   : > { %10546 = vmatpush.bf16.msra.mxu3 %v13564_v46  ;;  %10508 = vmatmul.bf16.vlgmr.msrb.gmra.mxu0 %v22374_v36  ;;  %v14933_v36 = vld [vmem:[#allocation17 + $0x118c] sm:$0xf]  ;;  %v13721_v61 = vld [vmem:[#allocation17 + $0x1058] sm:$0xf0]  ;;  %v13996_v46 = vor.u32 %v14961_v25, %v13993_v31 }
 0x716   : > { %10552 = vmatpush.bf16.msra.mxu0 %v13804_v48  ;;  %v13884_v50 = vor.u32 %v14933_v36, %v13881_v33  ;;  %v14893_v39 = vld [vmem:[#allocation17 + $0x104c] sm:$0xf]  ;;  %v14124_v48 = vor.u32 %v14993_v24, %v14121_v53  ;;  %v13977_v55 = vld [vmem:[#allocation17 + $0x1258] sm:$0xf0]  ;;  %v15017_v53 = vld [vmem:[%s22661_s12 + $0x28] sm:$0xff] }
 0x717   : > { %10521 = vmatmul.bf16.vlgmr.msrb.gmra.mxu1 %v22378_v49  ;;  %10534 = vmatmul.bf16.vlgmr.msra.gmra.mxu2 %v22382_v1  ;;  %v14965_v49 = vld [vmem:[#allocation17 + $0x128c] sm:$0xf]  ;;  %v22497_v1 = vpop.f32.mrf.mxu1  ;;  %v14105_v56 = vld [vmem:[#allocation17 + $0x1358] sm:$0xf0]  ;;  %v13724_v11 = vor.u32 %v14893_v39, %v13721_v61 }
 0x718   : > { %10565 = vmatpush.bf16.msra.mxu1 %v13932_v44  ;;  %10578 = vmatpush.bf16.msrb.mxu2 %v14060_v57  ;;  %v14012_v9 = vor.u32 %v14965_v49, %v14009_v35  ;;  %v14925_v44 = vld [vmem:[#allocation17 + $0x114c] sm:$0xf]  ;;  %v13705_v40 = vld [vmem:[#allocation17 + $0x1038] sm:$0xf0] }
 0x719   : > { %10591 = vmatpush.bf16.msrb.mxu3 %v14188_v21  ;;  %v14957_v8 = vld [vmem:[#allocation17 + $0x124c] sm:$0xf]  ;;  %v13833_v2 = vld [vmem:[#allocation17 + $0x1138] sm:$0xf0] }
 0x71a   : > { %10547 = vmatmul.bf16.vlgmr.msra.gmra.mxu3 %v22384_v37  ;;  %10553 = vmatpush.bf16.msra.mxu0 %v13788_v22  ;;  %v13756_v37 = vor.u32 %v14901_v23, %v13753_v60  ;;  %v22499_v57 = vpop.f32.mrf.mxu2  ;;  %v14989_v15 = vld [vmem:[#allocation17 + $0x134c] sm:$0xf]  ;;  %v10303_v52 = vpop.f32.mrf.mxu0  ;;  %v13852_v22 = vor.u32 %v14925_v44, %v13849_v42  ;;  %v13980_v3 = vor.u32 %v14957_v8, %v13977_v55  ;;  %v13961_v32 = vld [vmem:[#allocation17 + $0x1238] sm:$0xf0]  ;;  %v15015_v8 = vld [vmem:[%s22661_s12 + $0x18] sm:$0xff] }
 0x71b   : > { %v14953_v20 = vld [vmem:[#allocation17 + $0x122c] sm:$0xf]  ;;  %v14089_v51 = vld [vmem:[#allocation17 + $0x1338] sm:$0xf0]  ;;  %v15023_v55 = vld [vmem:[%s22661_s12 + $0x58] sm:$0xff] }
 0x71c   : > { %10566 = vmatpush.bf16.msra.mxu1 %v13916_v27  ;;  %10579 = vmatpush.bf16.msrb.mxu2 %v14044_v47  ;;  %v14889_v27 = vld [vmem:[#allocation17 + $0x102c] sm:$0xf]  ;;  %v14108_v47 = vor.u32 %v14989_v15, %v14105_v56  ;;  %v13689_v23 = vld [vmem:[#allocation17 + $0x1018] sm:$0xf0]  ;;  %v13964_v60 = vor.u32 %v14953_v20, %v13961_v32  ;;  %v15031_v15 = vld [vmem:[%s22661_s12 + $0x98] sm:$0xff] }
 0x71d   : > { %10592 = vmatpush.bf16.msrb.mxu3 %v14172_v19  ;;  %v22501_v21 = vpop.f32.mrf.mxu3  ;;  %v14921_v19 = vld [vmem:[#allocation17 + $0x112c] sm:$0xf]  ;;  %v13708_v13 = vor.u32 %v14889_v27, %v13705_v40  ;;  %v13817_v36 = vld [vmem:[#allocation17 + $0x1118] sm:$0xf0] }
 0x71e   : > { %10554 = vmatpush.bf16.msra.mxu0 %v13772_v5  ;;  %v14985_v4 = vld [vmem:[#allocation17 + $0x132c] sm:$0xf]  ;;  %v13836_v5 = vor.u32 %v14921_v19, %v13833_v2  ;;  %v13945_v34 = vld [vmem:[#allocation17 + $0x1218] sm:$0xf0]  ;;  %v15021_v19 = vld [vmem:[%s22661_s12 + $0x48] sm:$0xff] }
 0x71f   : > { %v10316_v43 = vpop.f32.mrf.mxu1  ;;  %v14949_v33 = vld [vmem:[#allocation17 + $0x120c] sm:$0xf]  ;;  %v15032_v44 = vld [vmem:[%s22661_s12 + $0xa0] sm:$0xff]  ;;  %v15029_v2 = vld [vmem:[%s22661_s12 + $0x88] sm:$0xff] }
 0x720   : > { %10567 = vmatpush.bf16.msra.mxu1 %v13900_v6  ;;  %10580 = vmatpush.bf16.msrb.mxu2 %v14028_v17  ;;  %v14885_v6 = vld [vmem:[#allocation17 + $0x100c] sm:$0xf]  ;;  %v14092_v17 = vor.u32 %v14985_v4, %v14089_v51  ;;  %v13948_v12 = vor.u32 %v14949_v33, %v13945_v34  ;;  %v15020_v51 = vld [vmem:[%s22661_s12 + $0x40] sm:$0xff] }
 0x721   : > { %10593 = vmatpush.bf16.msrb.mxu3 %v14156_v41  ;;  %v14917_v41 = vld [vmem:[#allocation17 + $0x110c] sm:$0xf] }
 0x722   : > { %10555 = vmatpush.bf16.msra.mxu0 %v13756_v37  ;;  %v10329_v49 = vpop.f32.mrf.mxu2  ;;  %v14981_v63 = vld [vmem:[#allocation17 + $0x130c] sm:$0xf]  ;;  %v14073_v37 = vld [vmem:[#allocation17 + $0x1318] sm:$0xf0]  ;;  %v13820_v54 = vor.u32 %v14917_v41, %v13817_v36 }
 0x723   : > { %v15018_v25 = vld [vmem:[%s22661_s12 + $0x30] sm:$0xff] }
 0x724   : > { %10568 = vmatpush.bf16.msra.mxu1 %v13884_v50  ;;  %10581 = vmatpush.bf16.msrb.mxu2 %v14012_v9  ;;  %v13692_v50 = vor.u32 %v14885_v6, %v13689_v23  ;;  %v14076_v9 = vor.u32 %v14981_v63, %v14073_v37  ;;  %v15026_v31 = vld [vmem:[%s22661_s12 + $0x70] sm:$0xff] }
 0x725   : > { %10594 = vmatpush.bf16.msrb.mxu3 %v14140_v38  ;;  %v10342_v35 = vpop.f32.mrf.mxu3  ;;  %v15019_v38 = vld [vmem:[%s22661_s12 + $0x38] sm:$0xff]  ;;  %v15034_v24 = vld [vmem:[%s22661_s12 + $0xb0] sm:$0xff] }
 0x726   : > { %10556 = vmatpush.bf16.msra.mxu0 %v13740_v7  ;;  %v15929_v7 = vld [vmem:[#allocation18] sm:$0xf]  ;;  %v15022_v27 = vld [vmem:[%s22661_s12 + $0x50] sm:$0xff] }
 0x728   : > { %10569 = vmatpush.bf16.msra.mxu1 %v13868_v18  ;;  %10582 = vmatpush.bf16.msrb.mxu2 %v13996_v46  ;;  %v9559_v18 = vperm.slane %v15929_v7, 3  ;;  %v15016_v46 = vld [vmem:[%s22661_s12 + $0x20] sm:$0xff]  ;;  %v15041_v7 = vld [vmem:[%s22661_s12 + $0xe8] sm:$0xff] }
 0x729   : > { %10595 = vmatpush.bf16.msrb.mxu3 %v14124_v48  ;;  %v15024_v48 = vld [vmem:[%s22661_s12 + $0x60] sm:$0xff] }
 0x72a   : > { %10557 = vmatpush.bf16.msra.mxu0 %v13724_v11 }
 0x72c   : > { %10570 = vmatpush.bf16.msra.mxu1 %v13852_v22  ;;  %10583 = vmatpush.bf16.msrb.mxu2 %v13980_v3  ;;  %v15014_v22 = vld [vmem:[%s22661_s12 + $0x10] sm:$0xff] }
 0x72d   : > { %10596 = vmatpush.bf16.msrb.mxu3 %v14108_v47  ;;  %v15030_v3 = vld [vmem:[%s22661_s12 + $0x90] sm:$0xff] }
 0x72e   : > { %10558 = vmatpush.bf16.msra.mxu0 %v13708_v13  ;;  %v10604_v13 = vmax.f32 %v22424_v30, 0.0 }
 0x730   : > { %10571 = vmatpush.bf16.msra.mxu1 %v13836_v5  ;;  %10584 = vmatpush.bf16.msrb.mxu2 %v13964_v60  ;;  %v10605_v5 = vmax.f32 %v22458_v28, 0.0  ;;  %v10608_v23 = vpack.c.bf16 %v10604_v13, %v10604_v13 }
 0x731   : > { %10597 = vmatpush.bf16.msrb.mxu3 %v14092_v17 }
 0x732   : > { %10559 = vmatpush.bf16.msra.mxu0 %v13692_v50  ;;  %v10609_v60 = vpack.c.bf16 %v10605_v5, %v10605_v5  ;;  %v10676_v5 = vld [vmem:[#allocation20] sm:$0x1] }
 0x734   : > { %10572 = vmatpush.bf16.msra.mxu1 %v13820_v54  ;;  %10585 = vmatpush.bf16.msrb.mxu2 %v13948_v12  ;;  %v10366_v39 = vpop.f32.mrf.mxu1 }
 0x735   : > { %10598 = vmatpush.bf16.msrb.mxu3 %v14076_v9  ;;  %10560 = vmatmul.bf16.vlgmr.msra.gmra.mxu0 %v22391_v26  ;;  %v15025_v26 = vld [vmem:[%s22661_s12 + $0x68] sm:$0xff] }
 0x736   : > { %10869 = vmatpush.bf16.msrb.mxu0 %v15019_v38 }
 0x737   : > { %10573 = vmatmul.bf16.vlgmr.msra.gmra.mxu1 %v22393_v62  ;;  %10586 = vmatmul.bf16.vlgmr.msrb.gmra.mxu2 %v22395_v45  ;;  %v15033_v62 = vld [vmem:[%s22661_s12 + $0xa8] sm:$0xff]  ;;  %v10276_v45 = vadd.f32 %v22487_v16, %v22485_v14 }
 0x738   : > { %10882 = vmatpush.bf16.msrb.mxu1 %v15027_v59  ;;  %10895 = vmatpush.bf16.msra.mxu2 %v15035_v58 }
 0x739   : > { %10599 = vmatmul.bf16.vlgmr.msrb.gmra.mxu3 %v22397_v10  ;;  %v10353_v10 = vpop.f32.mrf.mxu0  ;;  %v10289_v14 = vadd.f32 %v22489_v0, %v10276_v45 }
 0x73a   : > { %10870 = vmatpush.bf16.msrb.mxu0 %v15018_v25  ;;  %v10354_v61 = vadd.f32 %v10353_v10, %v9559_v18  ;;  %v10379_v56 = vpop.f32.mrf.mxu2  ;;  %v15040_v18 = vld [vmem:[%s22661_s12 + $0xe0] sm:$0xff] }
 0x73b   : > { %v10302_v42 = vadd.f32 %v22495_v29, %v10289_v14 }
 0x73c   : > { %10883 = vmatpush.bf16.msrb.mxu1 %v15026_v31  ;;  %10896 = vmatpush.bf16.msra.mxu2 %v15034_v24  ;;  %v10367_v16 = vadd.f32 %v10366_v39, %v10354_v61  ;;  %v10368_v29 = vpop.f32.mrf.mxu1  ;;  %v15043_v31 = vld [vmem:[%s22661_s12 + $0xf8] sm:$0xff]  ;;  %v15042_v24 = vld [vmem:[%s22661_s12 + $0xf0] sm:$0xff]  ;;  %v15037_v61 = vld [vmem:[%s22661_s12 + $0xc8] sm:$0xff] }
 0x73d   : > { %v10392_v0 = vpop.f32.mrf.mxu3  ;;  %v10315_v11 = vadd.f32 %v22497_v1, %v10302_v42  ;;  %v15013_v1 = vld [vmem:[%s22661_s12 + $0x8] sm:$0xff]  ;;  %10908 = vmatpush.bf16.msra.mxu3 %v15043_v31  ;;  %v15038_v39 = vld [vmem:[%s22661_s12 + $0xd0] sm:$0xff]  ;;  %v15036_v42 = vld [vmem:[%s22661_s12 + $0xc0] sm:$0xff] }
 0x73e   : > { %10871 = vmatpush.bf16.msrb.mxu0 %v15017_v53  ;;  %v10380_v52 = vadd.f32 %v10379_v56, %v10367_v16 }
 0x73f   : > { %v10328_v47 = vadd.f32 %v22499_v57, %v10315_v11  ;;  %v15012_v57 = vld [vmem:[%s22661_s12] sm:$0xff] }
 0x740   : > { %10884 = vmatpush.bf16.msrb.mxu1 %v15025_v26  ;;  %10897 = vmatpush.bf16.msra.mxu2 %v15033_v62  ;;  %v10393_v40 = vadd.f32 %v10392_v0, %v10380_v52  ;;  %v15039_v62 = vld [vmem:[%s22661_s12 + $0xd8] sm:$0xff] }
 0x741   : > { %v10355_v43 = vpop.f32.mrf.mxu0  ;;  %v10341_v20 = vadd.f32 %v22501_v21, %v10328_v47  ;;  %v15028_v21 = vld [vmem:[%s22661_s12 + $0x80] sm:$0xff]  ;;  %10909 = vmatpush.bf16.msra.mxu3 %v15042_v24 }
 0x742   : > { %10872 = vmatpush.bf16.msrb.mxu0 %v15016_v46  ;;  %v10381_v32 = vpop.f32.mrf.mxu2 }
 0x743   : > { %v10606_v6 = vmax.f32 %v10341_v20, 0.0 }
 0x744   : > { %10885 = vmatpush.bf16.msrb.mxu1 %v15024_v48  ;;  %10898 = vmatpush.bf16.msra.mxu2 %v15032_v44 }
 0x745   : > { %v10394_v4 = vpop.f32.mrf.mxu3  ;;  %v10610_v17 = vpack.c.bf16 %v10606_v6, %v10606_v6  ;;  %10910 = vmatpush.bf16.msra.mxu3 %v15041_v7 }
 0x746   : > { %10873 = vmatpush.bf16.msrb.mxu0 %v15015_v8 }
 0x748   : > { %10886 = vmatpush.bf16.msrb.mxu1 %v15023_v55  ;;  %10899 = vmatpush.bf16.msra.mxu2 %v15031_v15 }
 0x749   : > { %10911 = vmatpush.bf16.msra.mxu3 %v15040_v18 }
 0x74a   : > { %10874 = vmatpush.bf16.msrb.mxu0 %v15014_v22 }
 0x74c   : > { %10887 = vmatpush.bf16.msrb.mxu1 %v15022_v27  ;;  %10900 = vmatpush.bf16.msra.mxu2 %v15030_v3 }
 0x74d   : > { %10912 = vmatpush.bf16.msra.mxu3 %v15039_v62 }
 0x74e   : > { %10875 = vmatpush.bf16.msrb.mxu0 %v15013_v1 }
 0x750   : > { %10888 = vmatpush.bf16.msrb.mxu1 %v15021_v19  ;;  %10901 = vmatpush.bf16.msra.mxu2 %v15029_v2 }
 0x751   : > { %10913 = vmatpush.bf16.msra.mxu3 %v15038_v39 }
 0x752   : > { %10876 = vmatpush.bf16.msrb.mxu0 %v15012_v57  ;;  %v10405_v41 = vpop.f32.mrf.mxu0 }
 0x753   : > { %v10406_v30 = vadd.f32 %v10405_v41, %v10393_v40 }
 0x754   : > { %10889 = vmatpush.bf16.msrb.mxu1 %v15020_v51  ;;  %10902 = vmatpush.bf16.msra.mxu2 %v15028_v21  ;;  %v10418_v36 = vpop.f32.mrf.mxu1 }
 0x755   : > { %10877 = vmatmul.bf16.vlgmr.msrb.gmra.mxu0 %v10608_v23  ;;  %v10419_v33 = vadd.f32 %v10418_v36, %v10406_v30  ;;  %10914 = vmatpush.bf16.msra.mxu3 %v15037_v61 }
 0x757   : > { %10890 = vmatmul.bf16.vlgmr.msrb.gmra.mxu1 %v10609_v60  ;;  %10903 = vmatmul.bf16.vlgmr.msra.gmra.mxu2 %v10610_v17 }
 0x759   : > { %10915 = vmatpush.bf16.msra.mxu3 %v15036_v42 }
 0x75a   : > { %v10431_v28 = vpop.f32.mrf.mxu2  ;;  %v10407_v34 = vpop.f32.mrf.mxu0 }
 0x75b   : > { %v10432_v35 = vadd.f32 %v10431_v28, %v10419_v33 }
 0x75c   : > { %v10420_v63 = vpop.f32.mrf.mxu1 }
 0x75d   : > { %v10444_v49 = vpop.f32.mrf.mxu3 }
 0x75e   : > { %v10445_v37 = vadd.f32 %v10444_v49, %v10432_v35 }
 0x762   : > { %v10433_v50 = vpop.f32.mrf.mxu2 }
 0x765   : > { %v10446_v54 = vpop.f32.mrf.mxu3 }
 0x772   : > { %v10457_v12 = vpop.f32.mrf.mxu0 }
 0x773   : > { %v10458_v46 = vadd.f32 %v10457_v12, %v10445_v37 }
 0x774   : > { %v10470_v9 = vpop.f32.mrf.mxu1 }
 0x775   : > { %v10471_v8 = vadd.f32 %v10470_v9, %v10458_v46 }
 0x77a   : > { %v10483_v38 = vpop.f32.mrf.mxu2  ;;  %v10459_v58 = vpop.f32.mrf.mxu0 }
 0x77b   : > { %v10484_v55 = vadd.f32 %v10483_v38, %v10471_v8 }
 0x77c   : > { %v10472_v25 = vpop.f32.mrf.mxu1 }
 0x77d   : > { %v10496_v59 = vpop.f32.mrf.mxu3 }
 0x77e   : > { %v10497_v0 = vadd.f32 %v10496_v59, %v10484_v55 }
 0x782   : > { %v10485_v53 = vpop.f32.mrf.mxu2 }
 0x785   : > { %v10498_v26 = vpop.f32.mrf.mxu3 }
 0x792   : > { %v10509_v45 = vpop.f32.mrf.mxu0 }
 0x793   : > { %v10510_v52 = vadd.f32 %v10509_v45, %v10497_v0 }
 0x794   : > { %v10522_v10 = vpop.f32.mrf.mxu1 }
 0x795   : > { %v10523_v43 = vadd.f32 %v10522_v10, %v10510_v52 }
 0x79a   : > { %v10535_v48 = vpop.f32.mrf.mxu2  ;;  %v10511_v14 = vpop.f32.mrf.mxu0 }
 0x79b   : > { %v10536_v29 = vadd.f32 %v10535_v48, %v10523_v43 }
 0x79c   : > { %v10524_v16 = vpop.f32.mrf.mxu1 }
 0x79d   : > { %v10548_v44 = vpop.f32.mrf.mxu3 }
 0x79e   : > { %v10549_v11 = vadd.f32 %v10548_v44, %v10536_v29 }
 0x7a2   : > { %v10537_v15 = vpop.f32.mrf.mxu2 }
 0x7a5   : > { %v10550_v56 = vpop.f32.mrf.mxu3 }
 0x7b2   : > { %v10561_v22 = vpop.f32.mrf.mxu0 }
 0x7b3   : > { %v10562_v40 = vadd.f32 %v10561_v22, %v10549_v11 }
 0x7b4   : > { %v10574_v27 = vpop.f32.mrf.mxu1 }
 0x7b5   : > { %v10575_v3 = vadd.f32 %v10574_v27, %v10562_v40 }
 0x7ba   : > { %v10587_v47 = vpop.f32.mrf.mxu2  ;;  %v10563_v2 = vpop.f32.mrf.mxu0 }
 0x7bb   : > { %v10588_v1 = vadd.f32 %v10587_v47, %v10575_v3 }
 0x7bc   : > { %v10600_v19 = vpop.f32.mrf.mxu3  ;;  %v10576_v20 = vpop.f32.mrf.mxu1 }
 0x7bd   : > { %v10601_v32 = vadd.f32 %v10600_v19, %v10588_v1 }
 0x7bf   : > { %v10607_v4 = vmax.f32 %v10601_v32, 0.0 }
 0x7c1   : > { %v10611_v57 = vpack.c.bf16 %v10607_v4, %v10607_v4 }
 0x7c2   : > { %v10589_v51 = vpop.f32.mrf.mxu2 }
 0x7c3   : > { %10916 = vmatmul.bf16.vlgmr.msra.gmra.mxu3 %v10611_v57 }
 0x7c4   : > { %v10602_v13 = vpop.f32.mrf.mxu3 }
 0x7d2   : > { %v10878_v21 = vpop.f32.mrf.mxu0 }
 0x7d3   : > { %v10879_v23 = vadd.f32 %v10878_v21, %v10676_v5 }
 0x7d4   : > { %v10891_v6 = vpop.f32.mrf.mxu1 }
 0x7d5   : > { %v10892_v60 = vadd.f32 %v10891_v6, %v10879_v23 }
 0x7da   : > { %v10904_v17 = vpop.f32.mrf.mxu2  ;;  %v10880_v36 = vpop.f32.mrf.mxu0 }
 0x7db   : > { %v10905_v41 = vadd.f32 %v10904_v17, %v10892_v60 }
 0x7dc   : > { %v10893_v30 = vpop.f32.mrf.mxu1 }
 0x7e2   : > { %v10906_v33 = vpop.f32.mrf.mxu2 }
 0x846   : > { %v10917_v28 = vpop.f32.mrf.mxu3 }
 0x847   : > { %v10918_v49 = vadd.f32 %v10917_v28, %v10905_v41 }
 0x849   : > { %10922 = vst.msk [vmem:[%s678_s23] sm:$0x1] %vm10921_vm0, %v10918_v49 }
 0x84a   : > { %16287 = shalt.err (!%p16284_p9)
}
 0x84b   : > { %15088 = dma.vmem_to_hbm [thread:$0]  (%p16497_p4), %s10935_s15, 16, %s10937_s9, %s10924_s27  }
 0x84e   : > { %v10919_v35 = vpop.f32.mrf.mxu3 }
 0x84f PF: > { %s23297_s26 = sld [smem:[#allocation32_spill]] }
 0x850   : > { %s23298_s21 = sld [smem:[#allocation29_spill]] }
 0x855   : > { %p15150_p10 = scmp.ge.s32.totalorder %s23297_s26, 2 }
 0x856   : > { %s10948_s17 = sand.u32 1, %s23298_s21  }
 0x857   : > { %p15125_p11 = pnand %p15150_p10, %p16504_p8  ;;  %s10949_s29 = scalar_lea.sflag [#allocation5], %s10948_s17 }
 0x859   : > { %p15126_p12 = pneg %p15125_p11 }
 0x85b   : > { %16337 = dma.done.wait (%p15126_p12), %s10949_s29, 16  }
 0x85c   : > { %16339 = vsyncadd (%p15126_p12), %s10949_s29, 4294967280  ;;  %s33_s18 = sadd.s32 1, %s23297_s26   ;;  %s23300_s2 = sld [smem:[#allocation30_spill]] }
 0x85d   : > { %p30_p13 = scmp.ge.s32.totalorder %s33_s18, 4   ;;  %s23301_s15 = sld [smem:[#allocation36_spill]] }
 0x85e   : > { %s23302_s16 = sld [smem:[#allocation31_spill]]  ;;  %s23304_s29 = smov %s16346_s30 }
 0x85f   : > { %s23303_s17 = sld [smem:[#allocation33_spill]]  ;;  %32 = sbr.rel (!%p30_p13) target bundleno = 17 (0x11), region = 167 }
 0x862   : > { %s23305_s30 = smov %s23300_s2 }
 0x864   :  { %10954 = vsyncpa [#allocation4], 1 }
 0x865   :  { %10956 = vsyncpa [#allocation4 + $0x1], 1 }
 0x866   :  { %10957 = vsyncpa [#allocation7], 1 }
 0x867   :  { %10958 = vsyncpa [#allocation10], 1 }
 0x868   :  { %10959 = vsyncpa [#allocation13], 1 }
 0x869   :  { %10960 = vsyncpa [#allocation16], 1 }
 0x86a   :  { %10961 = vsyncpa [#allocation19], 1 }
 0x86b   :  { %10962 = vsyncpa [#allocation5], 1 }
 0x86c   :  { %10964 = vsyncpa [#allocation5 + $0x1], 1 }

</bundles_post_ra>
